<compile_context>
chip_gen: v7x
topology: tpu7x:2x2x1
jax: 0.10.0
libtpu: 0.0.40
codegen_flags: <defaults>
</compile_context>

<pallas_src>
import jax
import jax.numpy as jnp
from jax.experimental import pallas as pl
from jax.experimental.pallas import tpu as pltpu

_CIN_PAD = 8   # stem input channels zero-padded 3 -> 8 (zero weight rows: exact)
_EPS = 1e-5    # BatchNorm2d / LayerNorm default eps


# ----------------------------------------------------------------------------
# Fused whole-network kernel
# ----------------------------------------------------------------------------
def _make_kernel(blocks, dims, hs, ws, cin_pad):
    n_stages = len(dims)

    def kernel(*refs):
        it = iter(refs)
        x_ref = next(it)
        stem_w, stem_sb = next(it), next(it)
        ds_w = [next(it) for _ in range(n_stages - 1)]
        ds_sb = [next(it) for _ in range(n_stages - 1)]
        blk_w = [next(it) for _ in range(n_stages)]
        blk_sb = [next(it) for _ in range(n_stages)]
        ln_sb, head_w, head_b = next(it), next(it), next(it)
        o_ref = next(it)
        pads = [next(it) for _ in range(n_stages)]

        # Zero the halo scratches every grid step.  (A pid==0-only init would
        # be wrong on megacore parts: each TensorCore owns its own scratch.)
        for p_ref in pads:
            p_ref[...] = jnp.zeros(p_ref.shape, jnp.float32)

        def conv3x3(read_tap, cin, m, w_tap, scale, bias, relu):
            """3x3 conv + folded-BN affine (+ optional ReLU) as 9 per-tap GEMMs.

            read_tap(i, j) -> (H, W, cin) f32 window of the (already padded)
            source.  No transposes / concatenates: each tap is a
            (M, cin) x (cin, cout) MXU GEMM accumulated in f32.
            """
            acc = None
            for t in range(9):
                i, j = t // 3, t % 3
                p = read_tap(i, j).reshape(m, cin)
                d = jnp.dot(p, w_tap(t), preferred_element_type=jnp.float32)
                acc = d if acc is None else acc + d
            out = acc * scale + bias
            return jnp.maximum(out, 0.0) if relu else out

        # ---- Stage-0 stem: Conv2d(3->C0, k=3, s=1, p=0) + BN (no ReLU) ------
        h0, w0 = hs[0], ws[0]
        act = conv3x3(lambda i, j: x_ref[0, i:i + h0, j:j + w0, :],
                      cin_pad, h0 * w0,
                      lambda t: stem_w[t],
                      stem_sb[0:1, :], stem_sb[1:2, :], relu=False)

        for s in range(n_stages):
            h, w, c = hs[s], ws[s], dims[s]
            m = h * w
            if s > 0:
                # Downsample: Conv2d(k=2, s=2, p=0) + BN == in-kernel
                # space-to-depth + 4 per-tap GEMMs (no transposes / strides).
                cp = dims[s - 1]
                a4 = act.reshape(h, 2, w, 2, cp)        # (h', i, w', j, c)
                acc = None
                for i in range(2):
                    for j in range(2):
                        p = a4[:, i, :, j, :].reshape(m, cp)
                        d = jnp.dot(p, ds_w[s - 1][i * 2 + j],
                                    preferred_element_type=jnp.float32)
                        acc = d if acc is None else acc + d
                act = acc * ds_sb[s - 1][0:1, :] + ds_sb[s - 1][1:2, :]

            # Residual blocks: x + ReLU(BN(Conv(ReLU(BN(Conv(x)))))).
            # DropPath == identity (eval).  Halo scratch: border zeros persist,
            # interior is fully rewritten before each conv read.
            pad_ref = pads[s]
            read = lambda i, j, pr=pad_ref, h=h, w=w: pr[i:i + h, j:j + w, :]
            bw, bsb = blk_w[s], blk_sb[s]
            for b in range(blocks[s]):
                pad_ref[1:1 + h, 1:1 + w, :] = act.reshape(h, w, c)
                hid = conv3x3(read, c, m, lambda t, k=2 * b: bw[k, t],
                              bsb[2 * b, 0:1, :], bsb[2 * b, 1:2, :], relu=True)
                pad_ref[1:1 + h, 1:1 + w, :] = hid.reshape(h, w, c)
                hid = conv3x3(read, c, m, lambda t, k=2 * b + 1: bw[k, t],
                              bsb[2 * b + 1, 0:1, :], bsb[2 * b + 1, 1:2, :],
                              relu=True)
                act = act + hid   # DropPath == identity (eval)

        # ---- Head: GAP + LayerNorm + Linear (Dropout == identity, eval) -----
        # TODO(synk): Dropout / DropPath are stochastic training-only ops;
        # eval-mode identity here.
        g = jnp.mean(act, axis=0, keepdims=True)                 # (1, C3)
        mu = jnp.mean(g, axis=-1, keepdims=True)
        var = jnp.mean(jnp.square(g - mu), axis=-1, keepdims=True)
        g = (g - mu) * jax.lax.rsqrt(var + _EPS)
        g = g * ln_sb[0:1, :] + ln_sb[1:2, :]
        logits = jnp.dot(g, head_w[...],
                         preferred_element_type=jnp.float32) + head_b[...]
        o_ref[0] = logits.astype(o_ref.dtype)

    return kernel


# ----------------------------------------------------------------------------
# Wrapper: one pallas_call for the whole network
# ----------------------------------------------------------------------------
def convnet_forward(x_nchw, params, blocks, dims, num_classes):
    # NCHW (PyTorch) -> NHWC; zero-pad input channels 3 -> 8 (exact, matching
    # zero weight rows) so the stem GEMM operand is sublane-friendly.
    x = jnp.transpose(x_nchw, (0, 2, 3, 1)).astype(jnp.float32)
    cin = x.shape[-1]
    if cin < _CIN_PAD:
        x = jnp.pad(x, ((0, 0), (0, 0), (0, 0), (0, _CIN_PAD - cin)))
    n, hin, win, cp = x.shape
    hs = [(hin - 2) // (1 << i) for i in range(4)]   # stem is k=3, s=1, p=0
    ws = [(win - 2) // (1 << i) for i in range(4)]

    args = [x, params["stem_w"], params["stem_sb"],
            *params["ds_w"], *params["ds_sb"],
            *params["blk_w"], *params["blk_sb"],
            params["ln_sb"], params["head_w"], params["head_b"]]

    def rep(a):  # weight slab: full-array block, constant index map
        return pl.BlockSpec(a.shape, lambda i, nd=a.ndim: (0,) * nd)

    in_specs = [pl.BlockSpec((1, hin, win, cp), lambda i: (i, 0, 0, 0))]
    in_specs += [rep(a) for a in args[1:]]

    kernel = _make_kernel(blocks, dims, hs, ws, cp)
    out = pl.pallas_call(
        kernel,
        out_shape=jax.ShapeDtypeStruct((n, 1, num_classes), jnp.float32),
        grid=(n,),
        in_specs=in_specs,
        out_specs=pl.BlockSpec((1, 1, num_classes), lambda i: (i, 0, 0)),
        scratch_shapes=[pltpu.VMEM((hs[i] + 2, ws[i] + 2, dims[i]), jnp.float32)
                        for i in range(4)],
        compiler_params=pltpu.CompilerParams(
            dimension_semantics=("parallel",)),
    )(*args)
    return out.reshape(n, num_classes)


# ----------------------------------------------------------------------------
# Parameter construction (deterministic, synthetic) with BN folding + packing
# ----------------------------------------------------------------------------
def _conv_bn_raw(key, kh, kw, cin, cout):
    ks = jax.random.split(key, 6)
    fan_in = float(kh * kw * cin)
    w = jax.random.normal(ks[0], (kh, kw, cin, cout), jnp.float32) / jnp.sqrt(fan_in)
    conv_b = 0.05 * jax.random.normal(ks[1], (cout,), jnp.float32)
    gamma = 1.0 + 0.1 * jax.random.normal(ks[2], (cout,), jnp.float32)
    beta = 0.05 * jax.random.normal(ks[3], (cout,), jnp.float32)
    rmean = 0.05 * jax.random.normal(ks[4], (cout,), jnp.float32)
    rvar = 1.0 + 0.1 * jax.random.uniform(ks[5], (cout,), jnp.float32)
    # Fold BN (eval-mode running stats) + conv bias into scale/bias epilogue.
    s = gamma * jax.lax.rsqrt(rvar + _EPS)
    b = (conv_b - rmean) * s + beta
    return w, jnp.stack([s, b])            # (kh,kw,cin,cout), (2, cout)


def init_params(key, blocks, dims, num_classes, in_chans=3):
    p = {}
    key, k = jax.random.split(key)
    w, sb = _conv_bn_raw(k, 3, 3, in_chans, dims[0])
    w = jnp.pad(w, ((0, 0), (0, 0), (0, _CIN_PAD - in_chans), (0, 0)))
    p["stem_w"] = w.reshape(9, _CIN_PAD, dims[0])        # tap-major (9, Cin, Cout)
    p["stem_sb"] = sb

    p["ds_w"], p["ds_sb"] = [], []
    for i in range(1, 4):
        key, k = jax.random.split(key)
        w, sb = _conv_bn_raw(k, 2, 2, dims[i - 1], dims[i])
        p["ds_w"].append(w.reshape(4, dims[i - 1], dims[i]))  # tap-major (4,Cin,Cout)
        p["ds_sb"].append(sb)

    p["blk_w"], p["blk_sb"] = [], []
    for i in range(4):
        ws_, sbs = [], []
        for _ in range(blocks[i] * 2):
            key, k = jax.random.split(key)
            w, sb = _conv_bn_raw(k, 3, 3, dims[i], dims[i])
            ws_.append(w.reshape(9, dims[i], dims[i]))
            sbs.append(sb)
        p["blk_w"].append(jnp.stack(ws_))      # (2*n_blocks, 9, C, C)
        p["blk_sb"].append(jnp.stack(sbs))     # (2*n_blocks, 2, C)

    key, k1, k2, k3 = jax.random.split(key, 4)
    c = dims[-1]
    ln_g = 1.0 + 0.1 * jax.random.normal(k1, (c,), jnp.float32)
    ln_b = 0.05 * jax.random.normal(k2, (c,), jnp.float32)
    p["ln_sb"] = jnp.stack([ln_g, ln_b])
    p["head_w"] = jax.random.normal(k3, (c, num_classes), jnp.float32) / jnp.sqrt(float(c))
    p["head_b"] = jnp.zeros((1, num_classes), jnp.float32)
    return p, key


# ----------------------------------------------------------------------------
if __name__ == "__main__":
    blocks = (1, 1, 1, 1)
    dims = (8, 16, 32, 32)
    num_classes = 10

    key = jax.random.PRNGKey(0)
    params, key = init_params(key, blocks, dims, num_classes)

    # Spatial: 18 -> stem(k3,s1,p0) 16 -> 8 -> 4 -> 2 -> GAP
    x = jax.random.normal(key, (2, 3, 18, 18), jnp.float32)

    fwd = jax.jit(lambda xx, pp: convnet_forward(xx, pp, blocks, dims, num_classes))
    out = jax.block_until_ready(fwd(x, params))
    assert out.shape == (2, num_classes), out.shape
    assert bool(jnp.all(jnp.isfinite(out)))
    print("KERNEL_OK")
</pallas_src>

<mosaic_0001>
module attributes {stable_mosaic.version = 11 : i64} {
  func.func @kernel(%arg0: i32, %arg1: memref<1x18x18x8xf32, #tpu.memory_space<vmem>>, %arg2: memref<9x8x8xf32, #tpu.memory_space<vmem>>, %arg3: memref<2x8xf32, #tpu.memory_space<vmem>>, %arg4: memref<4x8x16xf32, #tpu.memory_space<vmem>>, %arg5: memref<4x16x32xf32, #tpu.memory_space<vmem>>, %arg6: memref<4x32x32xf32, #tpu.memory_space<vmem>>, %arg7: memref<2x16xf32, #tpu.memory_space<vmem>>, %arg8: memref<2x32xf32, #tpu.memory_space<vmem>>, %arg9: memref<2x32xf32, #tpu.memory_space<vmem>>, %arg10: memref<2x9x8x8xf32, #tpu.memory_space<vmem>>, %arg11: memref<2x9x16x16xf32, #tpu.memory_space<vmem>>, %arg12: memref<2x9x32x32xf32, #tpu.memory_space<vmem>>, %arg13: memref<2x9x32x32xf32, #tpu.memory_space<vmem>>, %arg14: memref<2x2x8xf32, #tpu.memory_space<vmem>>, %arg15: memref<2x2x16xf32, #tpu.memory_space<vmem>>, %arg16: memref<2x2x32xf32, #tpu.memory_space<vmem>>, %arg17: memref<2x2x32xf32, #tpu.memory_space<vmem>>, %arg18: memref<2x32xf32, #tpu.memory_space<vmem>>, %arg19: memref<32x10xf32, #tpu.memory_space<vmem>>, %arg20: memref<1x10xf32, #tpu.memory_space<vmem>>, %arg21: memref<1x1x10xf32, #tpu.memory_space<vmem>>, %arg22: memref<18x18x8xf32, #tpu.memory_space<vmem>>, %arg23: memref<10x10x16xf32, #tpu.memory_space<vmem>>, %arg24: memref<6x6x32xf32, #tpu.memory_space<vmem>>, %arg25: memref<4x4x32xf32, #tpu.memory_space<vmem>>) attributes {dimension_semantics = [#tpu.dimension_semantics<parallel>], iteration_bounds = array<i64: 2>, scalar_prefetch = 0 : i64, scratch_operands = 4 : i64, tpu.core_type = #tpu.core_type<tc>, window_params = [{transform_indices = @transform_0, window_bounds = array<i64: 1, 18, 18, 8>}, {pipeline_mode = #tpu.pipeline_mode<synchronous>, transform_indices = @transform_1, window_bounds = array<i64: 9, 8, 8>}, {pipeline_mode = #tpu.pipeline_mode<synchronous>, transform_indices = @transform_2, window_bounds = array<i64: 2, 8>}, {pipeline_mode = #tpu.pipeline_mode<synchronous>, transform_indices = @transform_3, window_bounds = array<i64: 4, 8, 16>}, {pipeline_mode = #tpu.pipeline_mode<synchronous>, transform_indices = @transform_4, window_bounds = array<i64: 4, 16, 32>}, {pipeline_mode = #tpu.pipeline_mode<synchronous>, transform_indices = @transform_5, window_bounds = array<i64: 4, 32, 32>}, {pipeline_mode = #tpu.pipeline_mode<synchronous>, transform_indices = @transform_6, window_bounds = array<i64: 2, 16>}, {pipeline_mode = #tpu.pipeline_mode<synchronous>, transform_indices = @transform_7, window_bounds = array<i64: 2, 32>}, {pipeline_mode = #tpu.pipeline_mode<synchronous>, transform_indices = @transform_8, window_bounds = array<i64: 2, 32>}, {pipeline_mode = #tpu.pipeline_mode<synchronous>, transform_indices = @transform_9, window_bounds = array<i64: 2, 9, 8, 8>}, {pipeline_mode = #tpu.pipeline_mode<synchronous>, transform_indices = @transform_10, window_bounds = array<i64: 2, 9, 16, 16>}, {pipeline_mode = #tpu.pipeline_mode<synchronous>, transform_indices = @transform_11, window_bounds = array<i64: 2, 9, 32, 32>}, {pipeline_mode = #tpu.pipeline_mode<synchronous>, transform_indices = @transform_12, window_bounds = array<i64: 2, 9, 32, 32>}, {pipeline_mode = #tpu.pipeline_mode<synchronous>, transform_indices = @transform_13, window_bounds = array<i64: 2, 2, 8>}, {pipeline_mode = #tpu.pipeline_mode<synchronous>, transform_indices = @transform_14, window_bounds = array<i64: 2, 2, 16>}, {pipeline_mode = #tpu.pipeline_mode<synchronous>, transform_indices = @transform_15, window_bounds = array<i64: 2, 2, 32>}, {pipeline_mode = #tpu.pipeline_mode<synchronous>, transform_indices = @transform_16, window_bounds = array<i64: 2, 2, 32>}, {pipeline_mode = #tpu.pipeline_mode<synchronous>, transform_indices = @transform_17, window_bounds = array<i64: 2, 32>}, {pipeline_mode = #tpu.pipeline_mode<synchronous>, transform_indices = @transform_18, window_bounds = array<i64: 32, 10>}, {pipeline_mode = #tpu.pipeline_mode<synchronous>, transform_indices = @transform_19, window_bounds = array<i64: 1, 10>}, {transform_indices = @transform_20, window_bounds = array<i64: 1, 1, 10>}]} {
    %cst = arith.constant 0.000000e+00 : f32
    %0 = vector.broadcast %cst : f32 to vector<18x18x8xf32>
    %c0 = arith.constant 0 : index
    %c0_0 = arith.constant 0 : index
    %c0_1 = arith.constant 0 : index
    %1 = vector.load %arg22[%c0, %c0_0, %c0_1] : memref<18x18x8xf32, #tpu.memory_space<vmem>>, vector<18x18x8xf32>
    tpu.vector_store %arg22[%c0, %c0_0, %c0_1], %0 {strides = array<i32>} : memref<18x18x8xf32, #tpu.memory_space<vmem>>, vector<18x18x8xf32>,
    %cst_2 = arith.constant 0.000000e+00 : f32
    %2 = vector.broadcast %cst_2 : f32 to vector<10x10x16xf32>
    %c0_3 = arith.constant 0 : index
    %c0_4 = arith.constant 0 : index
    %c0_5 = arith.constant 0 : index
    %3 = vector.load %arg23[%c0_3, %c0_4, %c0_5] : memref<10x10x16xf32, #tpu.memory_space<vmem>>, vector<10x10x16xf32>
    tpu.vector_store %arg23[%c0_3, %c0_4, %c0_5], %2 {strides = array<i32>} : memref<10x10x16xf32, #tpu.memory_space<vmem>>, vector<10x10x16xf32>,
    %cst_6 = arith.constant 0.000000e+00 : f32
    %4 = vector.broadcast %cst_6 : f32 to vector<6x6x32xf32>
    %c0_7 = arith.constant 0 : index
    %c0_8 = arith.constant 0 : index
    %c0_9 = arith.constant 0 : index
    %5 = vector.load %arg24[%c0_7, %c0_8, %c0_9] : memref<6x6x32xf32, #tpu.memory_space<vmem>>, vector<6x6x32xf32>
    tpu.vector_store %arg24[%c0_7, %c0_8, %c0_9], %4 {strides = array<i32>} : memref<6x6x32xf32, #tpu.memory_space<vmem>>, vector<6x6x32xf32>,
    %cst_10 = arith.constant 0.000000e+00 : f32
    %6 = vector.broadcast %cst_10 : f32 to vector<4x4x32xf32>
    %c0_11 = arith.constant 0 : index
    %c0_12 = arith.constant 0 : index
    %c0_13 = arith.constant 0 : index
    %7 = vector.load %arg25[%c0_11, %c0_12, %c0_13] : memref<4x4x32xf32, #tpu.memory_space<vmem>>, vector<4x4x32xf32>
    tpu.vector_store %arg25[%c0_11, %c0_12, %c0_13], %6 {strides = array<i32>} : memref<4x4x32xf32, #tpu.memory_space<vmem>>, vector<4x4x32xf32>,
    %c0_14 = arith.constant 0 : index
    %c0_15 = arith.constant 0 : index
    %8 = vector.load %arg3[%c0_14, %c0_15] : memref<2x8xf32, #tpu.memory_space<vmem>>, vector<1x8xf32>
    %c1 = arith.constant 1 : index
    %c0_16 = arith.constant 0 : index
    %9 = vector.load %arg3[%c1, %c0_16] : memref<2x8xf32, #tpu.memory_space<vmem>>, vector<1x8xf32>
    %c0_17 = arith.constant 0 : index
    %c0_18 = arith.constant 0 : index
    %c0_19 = arith.constant 0 : index
    %c0_20 = arith.constant 0 : index
    %10 = vector.load %arg1[%c0_17, %c0_18, %c0_19, %c0_20] : memref<1x18x18x8xf32, #tpu.memory_space<vmem>>, vector<1x16x16x8xf32>
    %11 = vector.shape_cast %10 : vector<1x16x16x8xf32> to vector<16x16x8xf32>
    %12 = vector.shape_cast %11 : vector<16x16x8xf32> to vector<256x8xf32>
    %c0_21 = arith.constant 0 : index
    %c0_22 = arith.constant 0 : index
    %c0_23 = arith.constant 0 : index
    %13 = vector.load %arg2[%c0_21, %c0_22, %c0_23] : memref<9x8x8xf32, #tpu.memory_space<vmem>>, vector<1x8x8xf32>
    %14 = vector.shape_cast %13 : vector<1x8x8xf32> to vector<8x8xf32>
    %cst_24 = arith.constant dense<0.000000e+00> : vector<256x8xf32>
    %15 = tpu.matmul %12, %14, %cst_24 {dimension_numbers = #tpu.dot_dimension_numbers<[1], [0], [0], [1], [0, 0, 1, 1], [], []>} : vector<256x8xf32>, vector<8x8xf32>, vector<256x8xf32> -> vector<256x8xf32>
    %c0_25 = arith.constant 0 : index
    %c0_26 = arith.constant 0 : index
    %c1_27 = arith.constant 1 : index
    %c0_28 = arith.constant 0 : index
    %16 = vector.load %arg1[%c0_25, %c0_26, %c1_27, %c0_28] : memref<1x18x18x8xf32, #tpu.memory_space<vmem>>, vector<1x16x16x8xf32>
    %17 = vector.shape_cast %16 : vector<1x16x16x8xf32> to vector<16x16x8xf32>
    %18 = vector.shape_cast %17 : vector<16x16x8xf32> to vector<256x8xf32>
    %c1_29 = arith.constant 1 : index
    %c0_30 = arith.constant 0 : index
    %c0_31 = arith.constant 0 : index
    %19 = vector.load %arg2[%c1_29, %c0_30, %c0_31] : memref<9x8x8xf32, #tpu.memory_space<vmem>>, vector<1x8x8xf32>
    %20 = vector.shape_cast %19 : vector<1x8x8xf32> to vector<8x8xf32>
    %cst_32 = arith.constant dense<0.000000e+00> : vector<256x8xf32>
    %21 = tpu.matmul %18, %20, %cst_32 {dimension_numbers = #tpu.dot_dimension_numbers<[1], [0], [0], [1], [0, 0, 1, 1], [], []>} : vector<256x8xf32>, vector<8x8xf32>, vector<256x8xf32> -> vector<256x8xf32>
    %22 = arith.addf %15, %21 : vector<256x8xf32>
    %c0_33 = arith.constant 0 : index
    %c0_34 = arith.constant 0 : index
    %c2 = arith.constant 2 : index
    %c0_35 = arith.constant 0 : index
    %23 = vector.load %arg1[%c0_33, %c0_34, %c2, %c0_35] : memref<1x18x18x8xf32, #tpu.memory_space<vmem>>, vector<1x16x16x8xf32>
    %24 = vector.shape_cast %23 : vector<1x16x16x8xf32> to vector<16x16x8xf32>
    %25 = vector.shape_cast %24 : vector<16x16x8xf32> to vector<256x8xf32>
    %c2_36 = arith.constant 2 : index
    %c0_37 = arith.constant 0 : index
    %c0_38 = arith.constant 0 : index
    %26 = vector.load %arg2[%c2_36, %c0_37, %c0_38] : memref<9x8x8xf32, #tpu.memory_space<vmem>>, vector<1x8x8xf32>
    %27 = vector.shape_cast %26 : vector<1x8x8xf32> to vector<8x8xf32>
    %cst_39 = arith.constant dense<0.000000e+00> : vector<256x8xf32>
    %28 = tpu.matmul %25, %27, %cst_39 {dimension_numbers = #tpu.dot_dimension_numbers<[1], [0], [0], [1], [0, 0, 1, 1], [], []>} : vector<256x8xf32>, vector<8x8xf32>, vector<256x8xf32> -> vector<256x8xf32>
    %29 = arith.addf %22, %28 : vector<256x8xf32>
    %c0_40 = arith.constant 0 : index
    %c1_41 = arith.constant 1 : index
    %c0_42 = arith.constant 0 : index
    %c0_43 = arith.constant 0 : index
    %30 = vector.load %arg1[%c0_40, %c1_41, %c0_42, %c0_43] : memref<1x18x18x8xf32, #tpu.memory_space<vmem>>, vector<1x16x16x8xf32>
    %31 = vector.shape_cast %30 : vector<1x16x16x8xf32> to vector<16x16x8xf32>
    %32 = vector.shape_cast %31 : vector<16x16x8xf32> to vector<256x8xf32>
    %c3 = arith.constant 3 : index
    %c0_44 = arith.constant 0 : index
    %c0_45 = arith.constant 0 : index
    %33 = vector.load %arg2[%c3, %c0_44, %c0_45] : memref<9x8x8xf32, #tpu.memory_space<vmem>>, vector<1x8x8xf32>
    %34 = vector.shape_cast %33 : vector<1x8x8xf32> to vector<8x8xf32>
    %cst_46 = arith.constant dense<0.000000e+00> : vector<256x8xf32>
    %35 = tpu.matmul %32, %34, %cst_46 {dimension_numbers = #tpu.dot_dimension_numbers<[1], [0], [0], [1], [0, 0, 1, 1], [], []>} : vector<256x8xf32>, vector<8x8xf32>, vector<256x8xf32> -> vector<256x8xf32>
    %36 = arith.addf %29, %35 : vector<256x8xf32>
    %c0_47 = arith.constant 0 : index
    %c1_48 = arith.constant 1 : index
    %c1_49 = arith.constant 1 : index
    %c0_50 = arith.constant 0 : index
    %37 = vector.load %arg1[%c0_47, %c1_48, %c1_49, %c0_50] : memref<1x18x18x8xf32, #tpu.memory_space<vmem>>, vector<1x16x16x8xf32>
    %38 = vector.shape_cast %37 : vector<1x16x16x8xf32> to vector<16x16x8xf32>
    %39 = vector.shape_cast %38 : vector<16x16x8xf32> to vector<256x8xf32>
    %c4 = arith.constant 4 : index
    %c0_51 = arith.constant 0 : index
    %c0_52 = arith.constant 0 : index
    %40 = vector.load %arg2[%c4, %c0_51, %c0_52] : memref<9x8x8xf32, #tpu.memory_space<vmem>>, vector<1x8x8xf32>
    %41 = vector.shape_cast %40 : vector<1x8x8xf32> to vector<8x8xf32>
    %cst_53 = arith.constant dense<0.000000e+00> : vector<256x8xf32>
    %42 = tpu.matmul %39, %41, %cst_53 {dimension_numbers = #tpu.dot_dimension_numbers<[1], [0], [0], [1], [0, 0, 1, 1], [], []>} : vector<256x8xf32>, vector<8x8xf32>, vector<256x8xf32> -> vector<256x8xf32>
    %43 = arith.addf %36, %42 : vector<256x8xf32>
    %c0_54 = arith.constant 0 : index
    %c1_55 = arith.constant 1 : index
    %c2_56 = arith.constant 2 : index
    %c0_57 = arith.constant 0 : index
    %44 = vector.load %arg1[%c0_54, %c1_55, %c2_56, %c0_57] : memref<1x18x18x8xf32, #tpu.memory_space<vmem>>, vector<1x16x16x8xf32>
    %45 = vector.shape_cast %44 : vector<1x16x16x8xf32> to vector<16x16x8xf32>
    %46 = vector.shape_cast %45 : vector<16x16x8xf32> to vector<256x8xf32>
    %c5 = arith.constant 5 : index
    %c0_58 = arith.constant 0 : index
    %c0_59 = arith.constant 0 : index
    %47 = vector.load %arg2[%c5, %c0_58, %c0_59] : memref<9x8x8xf32, #tpu.memory_space<vmem>>, vector<1x8x8xf32>
    %48 = vector.shape_cast %47 : vector<1x8x8xf32> to vector<8x8xf32>
    %cst_60 = arith.constant dense<0.000000e+00> : vector<256x8xf32>
    %49 = tpu.matmul %46, %48, %cst_60 {dimension_numbers = #tpu.dot_dimension_numbers<[1], [0], [0], [1], [0, 0, 1, 1], [], []>} : vector<256x8xf32>, vector<8x8xf32>, vector<256x8xf32> -> vector<256x8xf32>
    %50 = arith.addf %43, %49 : vector<256x8xf32>
    %c0_61 = arith.constant 0 : index
    %c2_62 = arith.constant 2 : index
    %c0_63 = arith.constant 0 : index
    %c0_64 = arith.constant 0 : index
    %51 = vector.load %arg1[%c0_61, %c2_62, %c0_63, %c0_64] : memref<1x18x18x8xf32, #tpu.memory_space<vmem>>, vector<1x16x16x8xf32>
    %52 = vector.shape_cast %51 : vector<1x16x16x8xf32> to vector<16x16x8xf32>
    %53 = vector.shape_cast %52 : vector<16x16x8xf32> to vector<256x8xf32>
    %c6 = arith.constant 6 : index
    %c0_65 = arith.constant 0 : index
    %c0_66 = arith.constant 0 : index
    %54 = vector.load %arg2[%c6, %c0_65, %c0_66] : memref<9x8x8xf32, #tpu.memory_space<vmem>>, vector<1x8x8xf32>
    %55 = vector.shape_cast %54 : vector<1x8x8xf32> to vector<8x8xf32>
    %cst_67 = arith.constant dense<0.000000e+00> : vector<256x8xf32>
    %56 = tpu.matmul %53, %55, %cst_67 {dimension_numbers = #tpu.dot_dimension_numbers<[1], [0], [0], [1], [0, 0, 1, 1], [], []>} : vector<256x8xf32>, vector<8x8xf32>, vector<256x8xf32> -> vector<256x8xf32>
    %57 = arith.addf %50, %56 : vector<256x8xf32>
    %c0_68 = arith.constant 0 : index
    %c2_69 = arith.constant 2 : index
    %c1_70 = arith.constant 1 : index
    %c0_71 = arith.constant 0 : index
    %58 = vector.load %arg1[%c0_68, %c2_69, %c1_70, %c0_71] : memref<1x18x18x8xf32, #tpu.memory_space<vmem>>, vector<1x16x16x8xf32>
    %59 = vector.shape_cast %58 : vector<1x16x16x8xf32> to vector<16x16x8xf32>
    %60 = vector.shape_cast %59 : vector<16x16x8xf32> to vector<256x8xf32>
    %c7 = arith.constant 7 : index
    %c0_72 = arith.constant 0 : index
    %c0_73 = arith.constant 0 : index
    %61 = vector.load %arg2[%c7, %c0_72, %c0_73] : memref<9x8x8xf32, #tpu.memory_space<vmem>>, vector<1x8x8xf32>
    %62 = vector.shape_cast %61 : vector<1x8x8xf32> to vector<8x8xf32>
    %cst_74 = arith.constant dense<0.000000e+00> : vector<256x8xf32>
    %63 = tpu.matmul %60, %62, %cst_74 {dimension_numbers = #tpu.dot_dimension_numbers<[1], [0], [0], [1], [0, 0, 1, 1], [], []>} : vector<256x8xf32>, vector<8x8xf32>, vector<256x8xf32> -> vector<256x8xf32>
    %64 = arith.addf %57, %63 : vector<256x8xf32>
    %c0_75 = arith.constant 0 : index
    %c2_76 = arith.constant 2 : index
    %c2_77 = arith.constant 2 : index
    %c0_78 = arith.constant 0 : index
    %65 = vector.load %arg1[%c0_75, %c2_76, %c2_77, %c0_78] : memref<1x18x18x8xf32, #tpu.memory_space<vmem>>, vector<1x16x16x8xf32>
    %66 = vector.shape_cast %65 : vector<1x16x16x8xf32> to vector<16x16x8xf32>
    %67 = vector.shape_cast %66 : vector<16x16x8xf32> to vector<256x8xf32>
    %c8 = arith.constant 8 : index
    %c0_79 = arith.constant 0 : index
    %c0_80 = arith.constant 0 : index
    %68 = vector.load %arg2[%c8, %c0_79, %c0_80] : memref<9x8x8xf32, #tpu.memory_space<vmem>>, vector<1x8x8xf32>
    %69 = vector.shape_cast %68 : vector<1x8x8xf32> to vector<8x8xf32>
    %cst_81 = arith.constant dense<0.000000e+00> : vector<256x8xf32>
    %70 = tpu.matmul %67, %69, %cst_81 {dimension_numbers = #tpu.dot_dimension_numbers<[1], [0], [0], [1], [0, 0, 1, 1], [], []>} : vector<256x8xf32>, vector<8x8xf32>, vector<256x8xf32> -> vector<256x8xf32>
    %71 = arith.addf %64, %70 : vector<256x8xf32>
    %72 = vector.broadcast %8 : vector<1x8xf32> to vector<256x8xf32>
    %73 = arith.mulf %71, %72 : vector<256x8xf32>
    %74 = vector.broadcast %9 : vector<1x8xf32> to vector<256x8xf32>
    %75 = arith.addf %73, %74 : vector<256x8xf32>
    %76 = vector.shape_cast %75 : vector<256x8xf32> to vector<16x16x8xf32>
    %c1_82 = arith.constant 1 : index
    %c1_83 = arith.constant 1 : index
    %c0_84 = arith.constant 0 : index
    %77 = vector.load %arg22[%c1_82, %c1_83, %c0_84] : memref<18x18x8xf32, #tpu.memory_space<vmem>>, vector<16x16x8xf32>
    tpu.vector_store %arg22[%c1_82, %c1_83, %c0_84], %76 {strides = array<i32>} : memref<18x18x8xf32, #tpu.memory_space<vmem>>, vector<16x16x8xf32>,
    %c0_85 = arith.constant 0 : index
    %c0_86 = arith.constant 0 : index
    %c0_87 = arith.constant 0 : index
    %78 = vector.load %arg14[%c0_85, %c0_86, %c0_87] : memref<2x2x8xf32, #tpu.memory_space<vmem>>, vector<1x1x8xf32>
    %79 = vector.shape_cast %78 : vector<1x1x8xf32> to vector<1x8xf32>
    %c0_88 = arith.constant 0 : index
    %c1_89 = arith.constant 1 : index
    %c0_90 = arith.constant 0 : index
    %80 = vector.load %arg14[%c0_88, %c1_89, %c0_90] : memref<2x2x8xf32, #tpu.memory_space<vmem>>, vector<1x1x8xf32>
    %81 = vector.shape_cast %80 : vector<1x1x8xf32> to vector<1x8xf32>
    %c0_91 = arith.constant 0 : index
    %c0_92 = arith.constant 0 : index
    %c0_93 = arith.constant 0 : index
    %82 = vector.load %arg22[%c0_91, %c0_92, %c0_93] : memref<18x18x8xf32, #tpu.memory_space<vmem>>, vector<16x16x8xf32>
    %83 = vector.shape_cast %82 : vector<16x16x8xf32> to vector<256x8xf32>
    %c0_94 = arith.constant 0 : index
    %c0_95 = arith.constant 0 : index
    %c0_96 = arith.constant 0 : index
    %c0_97 = arith.constant 0 : index
    %84 = vector.load %arg10[%c0_94, %c0_95, %c0_96, %c0_97] : memref<2x9x8x8xf32, #tpu.memory_space<vmem>>, vector<1x1x8x8xf32>
    %85 = vector.shape_cast %84 : vector<1x1x8x8xf32> to vector<8x8xf32>
    %cst_98 = arith.constant dense<0.000000e+00> : vector<256x8xf32>
    %86 = tpu.matmul %83, %85, %cst_98 {dimension_numbers = #tpu.dot_dimension_numbers<[1], [0], [0], [1], [0, 0, 1, 1], [], []>} : vector<256x8xf32>, vector<8x8xf32>, vector<256x8xf32> -> vector<256x8xf32>
    %c0_99 = arith.constant 0 : index
    %c1_100 = arith.constant 1 : index
    %c0_101 = arith.constant 0 : index
    %87 = vector.load %arg22[%c0_99, %c1_100, %c0_101] : memref<18x18x8xf32, #tpu.memory_space<vmem>>, vector<16x16x8xf32>
    %88 = vector.shape_cast %87 : vector<16x16x8xf32> to vector<256x8xf32>
    %c0_102 = arith.constant 0 : index
    %c1_103 = arith.constant 1 : index
    %c0_104 = arith.constant 0 : index
    %c0_105 = arith.constant 0 : index
    %89 = vector.load %arg10[%c0_102, %c1_103, %c0_104, %c0_105] : memref<2x9x8x8xf32, #tpu.memory_space<vmem>>, vector<1x1x8x8xf32>
    %90 = vector.shape_cast %89 : vector<1x1x8x8xf32> to vector<8x8xf32>
    %cst_106 = arith.constant dense<0.000000e+00> : vector<256x8xf32>
    %91 = tpu.matmul %88, %90, %cst_106 {dimension_numbers = #tpu.dot_dimension_numbers<[1], [0], [0], [1], [0, 0, 1, 1], [], []>} : vector<256x8xf32>, vector<8x8xf32>, vector<256x8xf32> -> vector<256x8xf32>
    %92 = arith.addf %86, %91 : vector<256x8xf32>
    %c0_107 = arith.constant 0 : index
    %c2_108 = arith.constant 2 : index
    %c0_109 = arith.constant 0 : index
    %93 = vector.load %arg22[%c0_107, %c2_108, %c0_109] : memref<18x18x8xf32, #tpu.memory_space<vmem>>, vector<16x16x8xf32>
    %94 = vector.shape_cast %93 : vector<16x16x8xf32> to vector<256x8xf32>
    %c0_110 = arith.constant 0 : index
    %c2_111 = arith.constant 2 : index
    %c0_112 = arith.constant 0 : index
    %c0_113 = arith.constant 0 : index
    %95 = vector.load %arg10[%c0_110, %c2_111, %c0_112, %c0_113] : memref<2x9x8x8xf32, #tpu.memory_space<vmem>>, vector<1x1x8x8xf32>
    %96 = vector.shape_cast %95 : vector<1x1x8x8xf32> to vector<8x8xf32>
    %cst_114 = arith.constant dense<0.000000e+00> : vector<256x8xf32>
    %97 = tpu.matmul %94, %96, %cst_114 {dimension_numbers = #tpu.dot_dimension_numbers<[1], [0], [0], [1], [0, 0, 1, 1], [], []>} : vector<256x8xf32>, vector<8x8xf32>, vector<256x8xf32> -> vector<256x8xf32>
    %98 = arith.addf %92, %97 : vector<256x8xf32>
    %c1_115 = arith.constant 1 : index
    %c0_116 = arith.constant 0 : index
    %c0_117 = arith.constant 0 : index
    %99 = vector.load %arg22[%c1_115, %c0_116, %c0_117] : memref<18x18x8xf32, #tpu.memory_space<vmem>>, vector<16x16x8xf32>
    %100 = vector.shape_cast %99 : vector<16x16x8xf32> to vector<256x8xf32>
    %c0_118 = arith.constant 0 : index
    %c3_119 = arith.constant 3 : index
    %c0_120 = arith.constant 0 : index
    %c0_121 = arith.constant 0 : index
    %101 = vector.load %arg10[%c0_118, %c3_119, %c0_120, %c0_121] : memref<2x9x8x8xf32, #tpu.memory_space<vmem>>, vector<1x1x8x8xf32>
    %102 = vector.shape_cast %101 : vector<1x1x8x8xf32> to vector<8x8xf32>
    %cst_122 = arith.constant dense<0.000000e+00> : vector<256x8xf32>
    %103 = tpu.matmul %100, %102, %cst_122 {dimension_numbers = #tpu.dot_dimension_numbers<[1], [0], [0], [1], [0, 0, 1, 1], [], []>} : vector<256x8xf32>, vector<8x8xf32>, vector<256x8xf32> -> vector<256x8xf32>
    %104 = arith.addf %98, %103 : vector<256x8xf32>
    %c1_123 = arith.constant 1 : index
    %c1_124 = arith.constant 1 : index
    %c0_125 = arith.constant 0 : index
    %105 = vector.load %arg22[%c1_123, %c1_124, %c0_125] : memref<18x18x8xf32, #tpu.memory_space<vmem>>, vector<16x16x8xf32>
    %106 = vector.shape_cast %105 : vector<16x16x8xf32> to vector<256x8xf32>
    %c0_126 = arith.constant 0 : index
    %c4_127 = arith.constant 4 : index
    %c0_128 = arith.constant 0 : index
    %c0_129 = arith.constant 0 : index
    %107 = vector.load %arg10[%c0_126, %c4_127, %c0_128, %c0_129] : memref<2x9x8x8xf32, #tpu.memory_space<vmem>>, vector<1x1x8x8xf32>
    %108 = vector.shape_cast %107 : vector<1x1x8x8xf32> to vector<8x8xf32>
    %cst_130 = arith.constant dense<0.000000e+00> : vector<256x8xf32>
    %109 = tpu.matmul %106, %108, %cst_130 {dimension_numbers = #tpu.dot_dimension_numbers<[1], [0], [0], [1], [0, 0, 1, 1], [], []>} : vector<256x8xf32>, vector<8x8xf32>, vector<256x8xf32> -> vector<256x8xf32>
    %110 = arith.addf %104, %109 : vector<256x8xf32>
    %c1_131 = arith.constant 1 : index
    %c2_132 = arith.constant 2 : index
    %c0_133 = arith.constant 0 : index
    %111 = vector.load %arg22[%c1_131, %c2_132, %c0_133] : memref<18x18x8xf32, #tpu.memory_space<vmem>>, vector<16x16x8xf32>
    %112 = vector.shape_cast %111 : vector<16x16x8xf32> to vector<256x8xf32>
    %c0_134 = arith.constant 0 : index
    %c5_135 = arith.constant 5 : index
    %c0_136 = arith.constant 0 : index
    %c0_137 = arith.constant 0 : index
    %113 = vector.load %arg10[%c0_134, %c5_135, %c0_136, %c0_137] : memref<2x9x8x8xf32, #tpu.memory_space<vmem>>, vector<1x1x8x8xf32>
    %114 = vector.shape_cast %113 : vector<1x1x8x8xf32> to vector<8x8xf32>
    %cst_138 = arith.constant dense<0.000000e+00> : vector<256x8xf32>
    %115 = tpu.matmul %112, %114, %cst_138 {dimension_numbers = #tpu.dot_dimension_numbers<[1], [0], [0], [1], [0, 0, 1, 1], [], []>} : vector<256x8xf32>, vector<8x8xf32>, vector<256x8xf32> -> vector<256x8xf32>
    %116 = arith.addf %110, %115 : vector<256x8xf32>
    %c2_139 = arith.constant 2 : index
    %c0_140 = arith.constant 0 : index
    %c0_141 = arith.constant 0 : index
    %117 = vector.load %arg22[%c2_139, %c0_140, %c0_141] : memref<18x18x8xf32, #tpu.memory_space<vmem>>, vector<16x16x8xf32>
    %118 = vector.shape_cast %117 : vector<16x16x8xf32> to vector<256x8xf32>
    %c0_142 = arith.constant 0 : index
    %c6_143 = arith.constant 6 : index
    %c0_144 = arith.constant 0 : index
    %c0_145 = arith.constant 0 : index
    %119 = vector.load %arg10[%c0_142, %c6_143, %c0_144, %c0_145] : memref<2x9x8x8xf32, #tpu.memory_space<vmem>>, vector<1x1x8x8xf32>
    %120 = vector.shape_cast %119 : vector<1x1x8x8xf32> to vector<8x8xf32>
    %cst_146 = arith.constant dense<0.000000e+00> : vector<256x8xf32>
    %121 = tpu.matmul %118, %120, %cst_146 {dimension_numbers = #tpu.dot_dimension_numbers<[1], [0], [0], [1], [0, 0, 1, 1], [], []>} : vector<256x8xf32>, vector<8x8xf32>, vector<256x8xf32> -> vector<256x8xf32>
    %122 = arith.addf %116, %121 : vector<256x8xf32>
    %c2_147 = arith.constant 2 : index
    %c1_148 = arith.constant 1 : index
    %c0_149 = arith.constant 0 : index
    %123 = vector.load %arg22[%c2_147, %c1_148, %c0_149] : memref<18x18x8xf32, #tpu.memory_space<vmem>>, vector<16x16x8xf32>
    %124 = vector.shape_cast %123 : vector<16x16x8xf32> to vector<256x8xf32>
    %c0_150 = arith.constant 0 : index
    %c7_151 = arith.constant 7 : index
    %c0_152 = arith.constant 0 : index
    %c0_153 = arith.constant 0 : index
    %125 = vector.load %arg10[%c0_150, %c7_151, %c0_152, %c0_153] : memref<2x9x8x8xf32, #tpu.memory_space<vmem>>, vector<1x1x8x8xf32>
    %126 = vector.shape_cast %125 : vector<1x1x8x8xf32> to vector<8x8xf32>
    %cst_154 = arith.constant dense<0.000000e+00> : vector<256x8xf32>
    %127 = tpu.matmul %124, %126, %cst_154 {dimension_numbers = #tpu.dot_dimension_numbers<[1], [0], [0], [1], [0, 0, 1, 1], [], []>} : vector<256x8xf32>, vector<8x8xf32>, vector<256x8xf32> -> vector<256x8xf32>
    %128 = arith.addf %122, %127 : vector<256x8xf32>
    %c2_155 = arith.constant 2 : index
    %c2_156 = arith.constant 2 : index
    %c0_157 = arith.constant 0 : index
    %129 = vector.load %arg22[%c2_155, %c2_156, %c0_157] : memref<18x18x8xf32, #tpu.memory_space<vmem>>, vector<16x16x8xf32>
    %130 = vector.shape_cast %129 : vector<16x16x8xf32> to vector<256x8xf32>
    %c0_158 = arith.constant 0 : index
    %c8_159 = arith.constant 8 : index
    %c0_160 = arith.constant 0 : index
    %c0_161 = arith.constant 0 : index
    %131 = vector.load %arg10[%c0_158, %c8_159, %c0_160, %c0_161] : memref<2x9x8x8xf32, #tpu.memory_space<vmem>>, vector<1x1x8x8xf32>
    %132 = vector.shape_cast %131 : vector<1x1x8x8xf32> to vector<8x8xf32>
    %cst_162 = arith.constant dense<0.000000e+00> : vector<256x8xf32>
    %133 = tpu.matmul %130, %132, %cst_162 {dimension_numbers = #tpu.dot_dimension_numbers<[1], [0], [0], [1], [0, 0, 1, 1], [], []>} : vector<256x8xf32>, vector<8x8xf32>, vector<256x8xf32> -> vector<256x8xf32>
    %134 = arith.addf %128, %133 : vector<256x8xf32>
    %135 = vector.broadcast %79 : vector<1x8xf32> to vector<256x8xf32>
    %136 = arith.mulf %134, %135 : vector<256x8xf32>
    %137 = vector.broadcast %81 : vector<1x8xf32> to vector<256x8xf32>
    %138 = arith.addf %136, %137 : vector<256x8xf32>
    %cst_163 = arith.constant 0.000000e+00 : f32
    %139 = vector.broadcast %cst_163 : f32 to vector<256x8xf32>
    %140 = arith.maximumf %138, %139 : vector<256x8xf32>
    %141 = vector.shape_cast %140 : vector<256x8xf32> to vector<16x16x8xf32>
    %c1_164 = arith.constant 1 : index
    %c1_165 = arith.constant 1 : index
    %c0_166 = arith.constant 0 : index
    %142 = vector.load %arg22[%c1_164, %c1_165, %c0_166] : memref<18x18x8xf32, #tpu.memory_space<vmem>>, vector<16x16x8xf32>
    tpu.vector_store %arg22[%c1_164, %c1_165, %c0_166], %141 {strides = array<i32>} : memref<18x18x8xf32, #tpu.memory_space<vmem>>, vector<16x16x8xf32>,
    %c1_167 = arith.constant 1 : index
    %c0_168 = arith.constant 0 : index
    %c0_169 = arith.constant 0 : index
    %143 = vector.load %arg14[%c1_167, %c0_168, %c0_169] : memref<2x2x8xf32, #tpu.memory_space<vmem>>, vector<1x1x8xf32>
    %144 = vector.shape_cast %143 : vector<1x1x8xf32> to vector<1x8xf32>
    %c1_170 = arith.constant 1 : index
    %c1_171 = arith.constant 1 : index
    %c0_172 = arith.constant 0 : index
    %145 = vector.load %arg14[%c1_170, %c1_171, %c0_172] : memref<2x2x8xf32, #tpu.memory_space<vmem>>, vector<1x1x8xf32>
    %146 = vector.shape_cast %145 : vector<1x1x8xf32> to vector<1x8xf32>
    %c0_173 = arith.constant 0 : index
    %c0_174 = arith.constant 0 : index
    %c0_175 = arith.constant 0 : index
    %147 = vector.load %arg22[%c0_173, %c0_174, %c0_175] : memref<18x18x8xf32, #tpu.memory_space<vmem>>, vector<16x16x8xf32>
    %148 = vector.shape_cast %147 : vector<16x16x8xf32> to vector<256x8xf32>
    %c1_176 = arith.constant 1 : index
    %c0_177 = arith.constant 0 : index
    %c0_178 = arith.constant 0 : index
    %c0_179 = arith.constant 0 : index
    %149 = vector.load %arg10[%c1_176, %c0_177, %c0_178, %c0_179] : memref<2x9x8x8xf32, #tpu.memory_space<vmem>>, vector<1x1x8x8xf32>
    %150 = vector.shape_cast %149 : vector<1x1x8x8xf32> to vector<8x8xf32>
    %cst_180 = arith.constant dense<0.000000e+00> : vector<256x8xf32>
    %151 = tpu.matmul %148, %150, %cst_180 {dimension_numbers = #tpu.dot_dimension_numbers<[1], [0], [0], [1], [0, 0, 1, 1], [], []>} : vector<256x8xf32>, vector<8x8xf32>, vector<256x8xf32> -> vector<256x8xf32>
    %c0_181 = arith.constant 0 : index
    %c1_182 = arith.constant 1 : index
    %c0_183 = arith.constant 0 : index
    %152 = vector.load %arg22[%c0_181, %c1_182, %c0_183] : memref<18x18x8xf32, #tpu.memory_space<vmem>>, vector<16x16x8xf32>
    %153 = vector.shape_cast %152 : vector<16x16x8xf32> to vector<256x8xf32>
    %c1_184 = arith.constant 1 : index
    %c1_185 = arith.constant 1 : index
    %c0_186 = arith.constant 0 : index
    %c0_187 = arith.constant 0 : index
    %154 = vector.load %arg10[%c1_184, %c1_185, %c0_186, %c0_187] : memref<2x9x8x8xf32, #tpu.memory_space<vmem>>, vector<1x1x8x8xf32>
    %155 = vector.shape_cast %154 : vector<1x1x8x8xf32> to vector<8x8xf32>
    %cst_188 = arith.constant dense<0.000000e+00> : vector<256x8xf32>
    %156 = tpu.matmul %153, %155, %cst_188 {dimension_numbers = #tpu.dot_dimension_numbers<[1], [0], [0], [1], [0, 0, 1, 1], [], []>} : vector<256x8xf32>, vector<8x8xf32>, vector<256x8xf32> -> vector<256x8xf32>
    %157 = arith.addf %151, %156 : vector<256x8xf32>
    %c0_189 = arith.constant 0 : index
    %c2_190 = arith.constant 2 : index
    %c0_191 = arith.constant 0 : index
    %158 = vector.load %arg22[%c0_189, %c2_190, %c0_191] : memref<18x18x8xf32, #tpu.memory_space<vmem>>, vector<16x16x8xf32>
    %159 = vector.shape_cast %158 : vector<16x16x8xf32> to vector<256x8xf32>
    %c1_192 = arith.constant 1 : index
    %c2_193 = arith.constant 2 : index
    %c0_194 = arith.constant 0 : index
    %c0_195 = arith.constant 0 : index
    %160 = vector.load %arg10[%c1_192, %c2_193, %c0_194, %c0_195] : memref<2x9x8x8xf32, #tpu.memory_space<vmem>>, vector<1x1x8x8xf32>
    %161 = vector.shape_cast %160 : vector<1x1x8x8xf32> to vector<8x8xf32>
    %cst_196 = arith.constant dense<0.000000e+00> : vector<256x8xf32>
    %162 = tpu.matmul %159, %161, %cst_196 {dimension_numbers = #tpu.dot_dimension_numbers<[1], [0], [0], [1], [0, 0, 1, 1], [], []>} : vector<256x8xf32>, vector<8x8xf32>, vector<256x8xf32> -> vector<256x8xf32>
    %163 = arith.addf %157, %162 : vector<256x8xf32>
    %c1_197 = arith.constant 1 : index
    %c0_198 = arith.constant 0 : index
    %c0_199 = arith.constant 0 : index
    %164 = vector.load %arg22[%c1_197, %c0_198, %c0_199] : memref<18x18x8xf32, #tpu.memory_space<vmem>>, vector<16x16x8xf32>
    %165 = vector.shape_cast %164 : vector<16x16x8xf32> to vector<256x8xf32>
    %c1_200 = arith.constant 1 : index
    %c3_201 = arith.constant 3 : index
    %c0_202 = arith.constant 0 : index
    %c0_203 = arith.constant 0 : index
    %166 = vector.load %arg10[%c1_200, %c3_201, %c0_202, %c0_203] : memref<2x9x8x8xf32, #tpu.memory_space<vmem>>, vector<1x1x8x8xf32>
    %167 = vector.shape_cast %166 : vector<1x1x8x8xf32> to vector<8x8xf32>
    %cst_204 = arith.constant dense<0.000000e+00> : vector<256x8xf32>
    %168 = tpu.matmul %165, %167, %cst_204 {dimension_numbers = #tpu.dot_dimension_numbers<[1], [0], [0], [1], [0, 0, 1, 1], [], []>} : vector<256x8xf32>, vector<8x8xf32>, vector<256x8xf32> -> vector<256x8xf32>
    %169 = arith.addf %163, %168 : vector<256x8xf32>
    %c1_205 = arith.constant 1 : index
    %c1_206 = arith.constant 1 : index
    %c0_207 = arith.constant 0 : index
    %170 = vector.load %arg22[%c1_205, %c1_206, %c0_207] : memref<18x18x8xf32, #tpu.memory_space<vmem>>, vector<16x16x8xf32>
    %171 = vector.shape_cast %170 : vector<16x16x8xf32> to vector<256x8xf32>
    %c1_208 = arith.constant 1 : index
    %c4_209 = arith.constant 4 : index
    %c0_210 = arith.constant 0 : index
    %c0_211 = arith.constant 0 : index
    %172 = vector.load %arg10[%c1_208, %c4_209, %c0_210, %c0_211] : memref<2x9x8x8xf32, #tpu.memory_space<vmem>>, vector<1x1x8x8xf32>
    %173 = vector.shape_cast %172 : vector<1x1x8x8xf32> to vector<8x8xf32>
    %cst_212 = arith.constant dense<0.000000e+00> : vector<256x8xf32>
    %174 = tpu.matmul %171, %173, %cst_212 {dimension_numbers = #tpu.dot_dimension_numbers<[1], [0], [0], [1], [0, 0, 1, 1], [], []>} : vector<256x8xf32>, vector<8x8xf32>, vector<256x8xf32> -> vector<256x8xf32>
    %175 = arith.addf %169, %174 : vector<256x8xf32>
    %c1_213 = arith.constant 1 : index
    %c2_214 = arith.constant 2 : index
    %c0_215 = arith.constant 0 : index
    %176 = vector.load %arg22[%c1_213, %c2_214, %c0_215] : memref<18x18x8xf32, #tpu.memory_space<vmem>>, vector<16x16x8xf32>
    %177 = vector.shape_cast %176 : vector<16x16x8xf32> to vector<256x8xf32>
    %c1_216 = arith.constant 1 : index
    %c5_217 = arith.constant 5 : index
    %c0_218 = arith.constant 0 : index
    %c0_219 = arith.constant 0 : index
    %178 = vector.load %arg10[%c1_216, %c5_217, %c0_218, %c0_219] : memref<2x9x8x8xf32, #tpu.memory_space<vmem>>, vector<1x1x8x8xf32>
    %179 = vector.shape_cast %178 : vector<1x1x8x8xf32> to vector<8x8xf32>
    %cst_220 = arith.constant dense<0.000000e+00> : vector<256x8xf32>
    %180 = tpu.matmul %177, %179, %cst_220 {dimension_numbers = #tpu.dot_dimension_numbers<[1], [0], [0], [1], [0, 0, 1, 1], [], []>} : vector<256x8xf32>, vector<8x8xf32>, vector<256x8xf32> -> vector<256x8xf32>
    %181 = arith.addf %175, %180 : vector<256x8xf32>
    %c2_221 = arith.constant 2 : index
    %c0_222 = arith.constant 0 : index
    %c0_223 = arith.constant 0 : index
    %182 = vector.load %arg22[%c2_221, %c0_222, %c0_223] : memref<18x18x8xf32, #tpu.memory_space<vmem>>, vector<16x16x8xf32>
    %183 = vector.shape_cast %182 : vector<16x16x8xf32> to vector<256x8xf32>
    %c1_224 = arith.constant 1 : index
    %c6_225 = arith.constant 6 : index
    %c0_226 = arith.constant 0 : index
    %c0_227 = arith.constant 0 : index
    %184 = vector.load %arg10[%c1_224, %c6_225, %c0_226, %c0_227] : memref<2x9x8x8xf32, #tpu.memory_space<vmem>>, vector<1x1x8x8xf32>
    %185 = vector.shape_cast %184 : vector<1x1x8x8xf32> to vector<8x8xf32>
    %cst_228 = arith.constant dense<0.000000e+00> : vector<256x8xf32>
    %186 = tpu.matmul %183, %185, %cst_228 {dimension_numbers = #tpu.dot_dimension_numbers<[1], [0], [0], [1], [0, 0, 1, 1], [], []>} : vector<256x8xf32>, vector<8x8xf32>, vector<256x8xf32> -> vector<256x8xf32>
    %187 = arith.addf %181, %186 : vector<256x8xf32>
    %c2_229 = arith.constant 2 : index
    %c1_230 = arith.constant 1 : index
    %c0_231 = arith.constant 0 : index
    %188 = vector.load %arg22[%c2_229, %c1_230, %c0_231] : memref<18x18x8xf32, #tpu.memory_space<vmem>>, vector<16x16x8xf32>
    %189 = vector.shape_cast %188 : vector<16x16x8xf32> to vector<256x8xf32>
    %c1_232 = arith.constant 1 : index
    %c7_233 = arith.constant 7 : index
    %c0_234 = arith.constant 0 : index
    %c0_235 = arith.constant 0 : index
    %190 = vector.load %arg10[%c1_232, %c7_233, %c0_234, %c0_235] : memref<2x9x8x8xf32, #tpu.memory_space<vmem>>, vector<1x1x8x8xf32>
    %191 = vector.shape_cast %190 : vector<1x1x8x8xf32> to vector<8x8xf32>
    %cst_236 = arith.constant dense<0.000000e+00> : vector<256x8xf32>
    %192 = tpu.matmul %189, %191, %cst_236 {dimension_numbers = #tpu.dot_dimension_numbers<[1], [0], [0], [1], [0, 0, 1, 1], [], []>} : vector<256x8xf32>, vector<8x8xf32>, vector<256x8xf32> -> vector<256x8xf32>
    %193 = arith.addf %187, %192 : vector<256x8xf32>
    %c2_237 = arith.constant 2 : index
    %c2_238 = arith.constant 2 : index
    %c0_239 = arith.constant 0 : index
    %194 = vector.load %arg22[%c2_237, %c2_238, %c0_239] : memref<18x18x8xf32, #tpu.memory_space<vmem>>, vector<16x16x8xf32>
    %195 = vector.shape_cast %194 : vector<16x16x8xf32> to vector<256x8xf32>
    %c1_240 = arith.constant 1 : index
    %c8_241 = arith.constant 8 : index
    %c0_242 = arith.constant 0 : index
    %c0_243 = arith.constant 0 : index
    %196 = vector.load %arg10[%c1_240, %c8_241, %c0_242, %c0_243] : memref<2x9x8x8xf32, #tpu.memory_space<vmem>>, vector<1x1x8x8xf32>
    %197 = vector.shape_cast %196 : vector<1x1x8x8xf32> to vector<8x8xf32>
    %cst_244 = arith.constant dense<0.000000e+00> : vector<256x8xf32>
    %198 = tpu.matmul %195, %197, %cst_244 {dimension_numbers = #tpu.dot_dimension_numbers<[1], [0], [0], [1], [0, 0, 1, 1], [], []>} : vector<256x8xf32>, vector<8x8xf32>, vector<256x8xf32> -> vector<256x8xf32>
    %199 = arith.addf %193, %198 : vector<256x8xf32>
    %200 = vector.broadcast %144 : vector<1x8xf32> to vector<256x8xf32>
    %201 = arith.mulf %199, %200 : vector<256x8xf32>
    %202 = vector.broadcast %146 : vector<1x8xf32> to vector<256x8xf32>
    %203 = arith.addf %201, %202 : vector<256x8xf32>
    %cst_245 = arith.constant 0.000000e+00 : f32
    %204 = vector.broadcast %cst_245 : f32 to vector<256x8xf32>
    %205 = arith.maximumf %203, %204 : vector<256x8xf32>
    %206 = arith.addf %75, %205 : vector<256x8xf32>
    %207 = vector.shape_cast %206 : vector<256x8xf32> to vector<8x2x8x2x8xf32>
    %208 = vector.extract_strided_slice %207 {offsets = [0, 0, 0, 0, 0], sizes = [8, 1, 8, 1, 8], strides = [1, 1, 1, 1, 1]} : vector<8x2x8x2x8xf32> to vector<8x1x8x1x8xf32>
    %209 = vector.shape_cast %208 : vector<8x1x8x1x8xf32> to vector<8x8x8xf32>
    %210 = vector.shape_cast %209 : vector<8x8x8xf32> to vector<64x8xf32>
    %c0_246 = arith.constant 0 : index
    %c0_247 = arith.constant 0 : index
    %c0_248 = arith.constant 0 : index
    %211 = vector.load %arg4[%c0_246, %c0_247, %c0_248] : memref<4x8x16xf32, #tpu.memory_space<vmem>>, vector<1x8x16xf32>
    %212 = vector.shape_cast %211 : vector<1x8x16xf32> to vector<8x16xf32>
    %cst_249 = arith.constant dense<0.000000e+00> : vector<64x16xf32>
    %213 = tpu.matmul %210, %212, %cst_249 {dimension_numbers = #tpu.dot_dimension_numbers<[1], [0], [0], [1], [0, 0, 1, 1], [], []>} : vector<64x8xf32>, vector<8x16xf32>, vector<64x16xf32> -> vector<64x16xf32>
    %214 = vector.extract_strided_slice %207 {offsets = [0, 0, 0, 1, 0], sizes = [8, 1, 8, 1, 8], strides = [1, 1, 1, 1, 1]} : vector<8x2x8x2x8xf32> to vector<8x1x8x1x8xf32>
    %215 = vector.shape_cast %214 : vector<8x1x8x1x8xf32> to vector<8x8x8xf32>
    %216 = vector.shape_cast %215 : vector<8x8x8xf32> to vector<64x8xf32>
    %c1_250 = arith.constant 1 : index
    %c0_251 = arith.constant 0 : index
    %c0_252 = arith.constant 0 : index
    %217 = vector.load %arg4[%c1_250, %c0_251, %c0_252] : memref<4x8x16xf32, #tpu.memory_space<vmem>>, vector<1x8x16xf32>
    %218 = vector.shape_cast %217 : vector<1x8x16xf32> to vector<8x16xf32>
    %cst_253 = arith.constant dense<0.000000e+00> : vector<64x16xf32>
    %219 = tpu.matmul %216, %218, %cst_253 {dimension_numbers = #tpu.dot_dimension_numbers<[1], [0], [0], [1], [0, 0, 1, 1], [], []>} : vector<64x8xf32>, vector<8x16xf32>, vector<64x16xf32> -> vector<64x16xf32>
    %220 = arith.addf %213, %219 : vector<64x16xf32>
    %221 = vector.extract_strided_slice %207 {offsets = [0, 1, 0, 0, 0], sizes = [8, 1, 8, 1, 8], strides = [1, 1, 1, 1, 1]} : vector<8x2x8x2x8xf32> to vector<8x1x8x1x8xf32>
    %222 = vector.shape_cast %221 : vector<8x1x8x1x8xf32> to vector<8x8x8xf32>
    %223 = vector.shape_cast %222 : vector<8x8x8xf32> to vector<64x8xf32>
    %c2_254 = arith.constant 2 : index
    %c0_255 = arith.constant 0 : index
    %c0_256 = arith.constant 0 : index
    %224 = vector.load %arg4[%c2_254, %c0_255, %c0_256] : memref<4x8x16xf32, #tpu.memory_space<vmem>>, vector<1x8x16xf32>
    %225 = vector.shape_cast %224 : vector<1x8x16xf32> to vector<8x16xf32>
    %cst_257 = arith.constant dense<0.000000e+00> : vector<64x16xf32>
    %226 = tpu.matmul %223, %225, %cst_257 {dimension_numbers = #tpu.dot_dimension_numbers<[1], [0], [0], [1], [0, 0, 1, 1], [], []>} : vector<64x8xf32>, vector<8x16xf32>, vector<64x16xf32> -> vector<64x16xf32>
    %227 = arith.addf %220, %226 : vector<64x16xf32>
    %228 = vector.extract_strided_slice %207 {offsets = [0, 1, 0, 1, 0], sizes = [8, 1, 8, 1, 8], strides = [1, 1, 1, 1, 1]} : vector<8x2x8x2x8xf32> to vector<8x1x8x1x8xf32>
    %229 = vector.shape_cast %228 : vector<8x1x8x1x8xf32> to vector<8x8x8xf32>
    %230 = vector.shape_cast %229 : vector<8x8x8xf32> to vector<64x8xf32>
    %c3_258 = arith.constant 3 : index
    %c0_259 = arith.constant 0 : index
    %c0_260 = arith.constant 0 : index
    %231 = vector.load %arg4[%c3_258, %c0_259, %c0_260] : memref<4x8x16xf32, #tpu.memory_space<vmem>>, vector<1x8x16xf32>
    %232 = vector.shape_cast %231 : vector<1x8x16xf32> to vector<8x16xf32>
    %cst_261 = arith.constant dense<0.000000e+00> : vector<64x16xf32>
    %233 = tpu.matmul %230, %232, %cst_261 {dimension_numbers = #tpu.dot_dimension_numbers<[1], [0], [0], [1], [0, 0, 1, 1], [], []>} : vector<64x8xf32>, vector<8x16xf32>, vector<64x16xf32> -> vector<64x16xf32>
    %234 = arith.addf %227, %233 : vector<64x16xf32>
    %c0_262 = arith.constant 0 : index
    %c0_263 = arith.constant 0 : index
    %235 = vector.load %arg7[%c0_262, %c0_263] : memref<2x16xf32, #tpu.memory_space<vmem>>, vector<1x16xf32>
    %236 = vector.broadcast %235 : vector<1x16xf32> to vector<64x16xf32>
    %237 = arith.mulf %234, %236 : vector<64x16xf32>
    %c1_264 = arith.constant 1 : index
    %c0_265 = arith.constant 0 : index
    %238 = vector.load %arg7[%c1_264, %c0_265] : memref<2x16xf32, #tpu.memory_space<vmem>>, vector<1x16xf32>
    %239 = vector.broadcast %238 : vector<1x16xf32> to vector<64x16xf32>
    %240 = arith.addf %237, %239 : vector<64x16xf32>
    %241 = vector.shape_cast %240 : vector<64x16xf32> to vector<8x8x16xf32>
    %c1_266 = arith.constant 1 : index
    %c1_267 = arith.constant 1 : index
    %c0_268 = arith.constant 0 : index
    %242 = vector.load %arg23[%c1_266, %c1_267, %c0_268] : memref<10x10x16xf32, #tpu.memory_space<vmem>>, vector<8x8x16xf32>
    tpu.vector_store %arg23[%c1_266, %c1_267, %c0_268], %241 {strides = array<i32>} : memref<10x10x16xf32, #tpu.memory_space<vmem>>, vector<8x8x16xf32>,
    %c0_269 = arith.constant 0 : index
    %c0_270 = arith.constant 0 : index
    %c0_271 = arith.constant 0 : index
    %243 = vector.load %arg15[%c0_269, %c0_270, %c0_271] : memref<2x2x16xf32, #tpu.memory_space<vmem>>, vector<1x1x16xf32>
    %244 = vector.shape_cast %243 : vector<1x1x16xf32> to vector<1x16xf32>
    %c0_272 = arith.constant 0 : index
    %c1_273 = arith.constant 1 : index
    %c0_274 = arith.constant 0 : index
    %245 = vector.load %arg15[%c0_272, %c1_273, %c0_274] : memref<2x2x16xf32, #tpu.memory_space<vmem>>, vector<1x1x16xf32>
    %246 = vector.shape_cast %245 : vector<1x1x16xf32> to vector<1x16xf32>
    %c0_275 = arith.constant 0 : index
    %c0_276 = arith.constant 0 : index
    %c0_277 = arith.constant 0 : index
    %247 = vector.load %arg23[%c0_275, %c0_276, %c0_277] : memref<10x10x16xf32, #tpu.memory_space<vmem>>, vector<8x8x16xf32>
    %248 = vector.shape_cast %247 : vector<8x8x16xf32> to vector<64x16xf32>
    %c0_278 = arith.constant 0 : index
    %c0_279 = arith.constant 0 : index
    %c0_280 = arith.constant 0 : index
    %c0_281 = arith.constant 0 : index
    %249 = vector.load %arg11[%c0_278, %c0_279, %c0_280, %c0_281] : memref<2x9x16x16xf32, #tpu.memory_space<vmem>>, vector<1x1x16x16xf32>
    %250 = vector.shape_cast %249 : vector<1x1x16x16xf32> to vector<16x16xf32>
    %cst_282 = arith.constant dense<0.000000e+00> : vector<64x16xf32>
    %251 = tpu.matmul %248, %250, %cst_282 {dimension_numbers = #tpu.dot_dimension_numbers<[1], [0], [0], [1], [0, 0, 1, 1], [], []>} : vector<64x16xf32>, vector<16x16xf32>, vector<64x16xf32> -> vector<64x16xf32>
    %c0_283 = arith.constant 0 : index
    %c1_284 = arith.constant 1 : index
    %c0_285 = arith.constant 0 : index
    %252 = vector.load %arg23[%c0_283, %c1_284, %c0_285] : memref<10x10x16xf32, #tpu.memory_space<vmem>>, vector<8x8x16xf32>
    %253 = vector.shape_cast %252 : vector<8x8x16xf32> to vector<64x16xf32>
    %c0_286 = arith.constant 0 : index
    %c1_287 = arith.constant 1 : index
    %c0_288 = arith.constant 0 : index
    %c0_289 = arith.constant 0 : index
    %254 = vector.load %arg11[%c0_286, %c1_287, %c0_288, %c0_289] : memref<2x9x16x16xf32, #tpu.memory_space<vmem>>, vector<1x1x16x16xf32>
    %255 = vector.shape_cast %254 : vector<1x1x16x16xf32> to vector<16x16xf32>
    %cst_290 = arith.constant dense<0.000000e+00> : vector<64x16xf32>
    %256 = tpu.matmul %253, %255, %cst_290 {dimension_numbers = #tpu.dot_dimension_numbers<[1], [0], [0], [1], [0, 0, 1, 1], [], []>} : vector<64x16xf32>, vector<16x16xf32>, vector<64x16xf32> -> vector<64x16xf32>
    %257 = arith.addf %251, %256 : vector<64x16xf32>
    %c0_291 = arith.constant 0 : index
    %c2_292 = arith.constant 2 : index
    %c0_293 = arith.constant 0 : index
    %258 = vector.load %arg23[%c0_291, %c2_292, %c0_293] : memref<10x10x16xf32, #tpu.memory_space<vmem>>, vector<8x8x16xf32>
    %259 = vector.shape_cast %258 : vector<8x8x16xf32> to vector<64x16xf32>
    %c0_294 = arith.constant 0 : index
    %c2_295 = arith.constant 2 : index
    %c0_296 = arith.constant 0 : index
    %c0_297 = arith.constant 0 : index
    %260 = vector.load %arg11[%c0_294, %c2_295, %c0_296, %c0_297] : memref<2x9x16x16xf32, #tpu.memory_space<vmem>>, vector<1x1x16x16xf32>
    %261 = vector.shape_cast %260 : vector<1x1x16x16xf32> to vector<16x16xf32>
    %cst_298 = arith.constant dense<0.000000e+00> : vector<64x16xf32>
    %262 = tpu.matmul %259, %261, %cst_298 {dimension_numbers = #tpu.dot_dimension_numbers<[1], [0], [0], [1], [0, 0, 1, 1], [], []>} : vector<64x16xf32>, vector<16x16xf32>, vector<64x16xf32> -> vector<64x16xf32>
    %263 = arith.addf %257, %262 : vector<64x16xf32>
    %c1_299 = arith.constant 1 : index
    %c0_300 = arith.constant 0 : index
    %c0_301 = arith.constant 0 : index
    %264 = vector.load %arg23[%c1_299, %c0_300, %c0_301] : memref<10x10x16xf32, #tpu.memory_space<vmem>>, vector<8x8x16xf32>
    %265 = vector.shape_cast %264 : vector<8x8x16xf32> to vector<64x16xf32>
    %c0_302 = arith.constant 0 : index
    %c3_303 = arith.constant 3 : index
    %c0_304 = arith.constant 0 : index
    %c0_305 = arith.constant 0 : index
    %266 = vector.load %arg11[%c0_302, %c3_303, %c0_304, %c0_305] : memref<2x9x16x16xf32, #tpu.memory_space<vmem>>, vector<1x1x16x16xf32>
    %267 = vector.shape_cast %266 : vector<1x1x16x16xf32> to vector<16x16xf32>
    %cst_306 = arith.constant dense<0.000000e+00> : vector<64x16xf32>
    %268 = tpu.matmul %265, %267, %cst_306 {dimension_numbers = #tpu.dot_dimension_numbers<[1], [0], [0], [1], [0, 0, 1, 1], [], []>} : vector<64x16xf32>, vector<16x16xf32>, vector<64x16xf32> -> vector<64x16xf32>
    %269 = arith.addf %263, %268 : vector<64x16xf32>
    %c1_307 = arith.constant 1 : index
    %c1_308 = arith.constant 1 : index
    %c0_309 = arith.constant 0 : index
    %270 = vector.load %arg23[%c1_307, %c1_308, %c0_309] : memref<10x10x16xf32, #tpu.memory_space<vmem>>, vector<8x8x16xf32>
    %271 = vector.shape_cast %270 : vector<8x8x16xf32> to vector<64x16xf32>
    %c0_310 = arith.constant 0 : index
    %c4_311 = arith.constant 4 : index
    %c0_312 = arith.constant 0 : index
    %c0_313 = arith.constant 0 : index
    %272 = vector.load %arg11[%c0_310, %c4_311, %c0_312, %c0_313] : memref<2x9x16x16xf32, #tpu.memory_space<vmem>>, vector<1x1x16x16xf32>
    %273 = vector.shape_cast %272 : vector<1x1x16x16xf32> to vector<16x16xf32>
    %cst_314 = arith.constant dense<0.000000e+00> : vector<64x16xf32>
    %274 = tpu.matmul %271, %273, %cst_314 {dimension_numbers = #tpu.dot_dimension_numbers<[1], [0], [0], [1], [0, 0, 1, 1], [], []>} : vector<64x16xf32>, vector<16x16xf32>, vector<64x16xf32> -> vector<64x16xf32>
    %275 = arith.addf %269, %274 : vector<64x16xf32>
    %c1_315 = arith.constant 1 : index
    %c2_316 = arith.constant 2 : index
    %c0_317 = arith.constant 0 : index
    %276 = vector.load %arg23[%c1_315, %c2_316, %c0_317] : memref<10x10x16xf32, #tpu.memory_space<vmem>>, vector<8x8x16xf32>
    %277 = vector.shape_cast %276 : vector<8x8x16xf32> to vector<64x16xf32>
    %c0_318 = arith.constant 0 : index
    %c5_319 = arith.constant 5 : index
    %c0_320 = arith.constant 0 : index
    %c0_321 = arith.constant 0 : index
    %278 = vector.load %arg11[%c0_318, %c5_319, %c0_320, %c0_321] : memref<2x9x16x16xf32, #tpu.memory_space<vmem>>, vector<1x1x16x16xf32>
    %279 = vector.shape_cast %278 : vector<1x1x16x16xf32> to vector<16x16xf32>
    %cst_322 = arith.constant dense<0.000000e+00> : vector<64x16xf32>
    %280 = tpu.matmul %277, %279, %cst_322 {dimension_numbers = #tpu.dot_dimension_numbers<[1], [0], [0], [1], [0, 0, 1, 1], [], []>} : vector<64x16xf32>, vector<16x16xf32>, vector<64x16xf32> -> vector<64x16xf32>
    %281 = arith.addf %275, %280 : vector<64x16xf32>
    %c2_323 = arith.constant 2 : index
    %c0_324 = arith.constant 0 : index
    %c0_325 = arith.constant 0 : index
    %282 = vector.load %arg23[%c2_323, %c0_324, %c0_325] : memref<10x10x16xf32, #tpu.memory_space<vmem>>, vector<8x8x16xf32>
    %283 = vector.shape_cast %282 : vector<8x8x16xf32> to vector<64x16xf32>
    %c0_326 = arith.constant 0 : index
    %c6_327 = arith.constant 6 : index
    %c0_328 = arith.constant 0 : index
    %c0_329 = arith.constant 0 : index
    %284 = vector.load %arg11[%c0_326, %c6_327, %c0_328, %c0_329] : memref<2x9x16x16xf32, #tpu.memory_space<vmem>>, vector<1x1x16x16xf32>
    %285 = vector.shape_cast %284 : vector<1x1x16x16xf32> to vector<16x16xf32>
    %cst_330 = arith.constant dense<0.000000e+00> : vector<64x16xf32>
    %286 = tpu.matmul %283, %285, %cst_330 {dimension_numbers = #tpu.dot_dimension_numbers<[1], [0], [0], [1], [0, 0, 1, 1], [], []>} : vector<64x16xf32>, vector<16x16xf32>, vector<64x16xf32> -> vector<64x16xf32>
    %287 = arith.addf %281, %286 : vector<64x16xf32>
    %c2_331 = arith.constant 2 : index
    %c1_332 = arith.constant 1 : index
    %c0_333 = arith.constant 0 : index
    %288 = vector.load %arg23[%c2_331, %c1_332, %c0_333] : memref<10x10x16xf32, #tpu.memory_space<vmem>>, vector<8x8x16xf32>
    %289 = vector.shape_cast %288 : vector<8x8x16xf32> to vector<64x16xf32>
    %c0_334 = arith.constant 0 : index
    %c7_335 = arith.constant 7 : index
    %c0_336 = arith.constant 0 : index
    %c0_337 = arith.constant 0 : index
    %290 = vector.load %arg11[%c0_334, %c7_335, %c0_336, %c0_337] : memref<2x9x16x16xf32, #tpu.memory_space<vmem>>, vector<1x1x16x16xf32>
    %291 = vector.shape_cast %290 : vector<1x1x16x16xf32> to vector<16x16xf32>
    %cst_338 = arith.constant dense<0.000000e+00> : vector<64x16xf32>
    %292 = tpu.matmul %289, %291, %cst_338 {dimension_numbers = #tpu.dot_dimension_numbers<[1], [0], [0], [1], [0, 0, 1, 1], [], []>} : vector<64x16xf32>, vector<16x16xf32>, vector<64x16xf32> -> vector<64x16xf32>
    %293 = arith.addf %287, %292 : vector<64x16xf32>
    %c2_339 = arith.constant 2 : index
    %c2_340 = arith.constant 2 : index
    %c0_341 = arith.constant 0 : index
    %294 = vector.load %arg23[%c2_339, %c2_340, %c0_341] : memref<10x10x16xf32, #tpu.memory_space<vmem>>, vector<8x8x16xf32>
    %295 = vector.shape_cast %294 : vector<8x8x16xf32> to vector<64x16xf32>
    %c0_342 = arith.constant 0 : index
    %c8_343 = arith.constant 8 : index
    %c0_344 = arith.constant 0 : index
    %c0_345 = arith.constant 0 : index
    %296 = vector.load %arg11[%c0_342, %c8_343, %c0_344, %c0_345] : memref<2x9x16x16xf32, #tpu.memory_space<vmem>>, vector<1x1x16x16xf32>
    %297 = vector.shape_cast %296 : vector<1x1x16x16xf32> to vector<16x16xf32>
    %cst_346 = arith.constant dense<0.000000e+00> : vector<64x16xf32>
    %298 = tpu.matmul %295, %297, %cst_346 {dimension_numbers = #tpu.dot_dimension_numbers<[1], [0], [0], [1], [0, 0, 1, 1], [], []>} : vector<64x16xf32>, vector<16x16xf32>, vector<64x16xf32> -> vector<64x16xf32>
    %299 = arith.addf %293, %298 : vector<64x16xf32>
    %300 = vector.broadcast %244 : vector<1x16xf32> to vector<64x16xf32>
    %301 = arith.mulf %299, %300 : vector<64x16xf32>
    %302 = vector.broadcast %246 : vector<1x16xf32> to vector<64x16xf32>
    %303 = arith.addf %301, %302 : vector<64x16xf32>
    %cst_347 = arith.constant 0.000000e+00 : f32
    %304 = vector.broadcast %cst_347 : f32 to vector<64x16xf32>
    %305 = arith.maximumf %303, %304 : vector<64x16xf32>
    %306 = vector.shape_cast %305 : vector<64x16xf32> to vector<8x8x16xf32>
    %c1_348 = arith.constant 1 : index
    %c1_349 = arith.constant 1 : index
    %c0_350 = arith.constant 0 : index
    %307 = vector.load %arg23[%c1_348, %c1_349, %c0_350] : memref<10x10x16xf32, #tpu.memory_space<vmem>>, vector<8x8x16xf32>
    tpu.vector_store %arg23[%c1_348, %c1_349, %c0_350], %306 {strides = array<i32>} : memref<10x10x16xf32, #tpu.memory_space<vmem>>, vector<8x8x16xf32>,
    %c1_351 = arith.constant 1 : index
    %c0_352 = arith.constant 0 : index
    %c0_353 = arith.constant 0 : index
    %308 = vector.load %arg15[%c1_351, %c0_352, %c0_353] : memref<2x2x16xf32, #tpu.memory_space<vmem>>, vector<1x1x16xf32>
    %309 = vector.shape_cast %308 : vector<1x1x16xf32> to vector<1x16xf32>
    %c1_354 = arith.constant 1 : index
    %c1_355 = arith.constant 1 : index
    %c0_356 = arith.constant 0 : index
    %310 = vector.load %arg15[%c1_354, %c1_355, %c0_356] : memref<2x2x16xf32, #tpu.memory_space<vmem>>, vector<1x1x16xf32>
    %311 = vector.shape_cast %310 : vector<1x1x16xf32> to vector<1x16xf32>
    %c0_357 = arith.constant 0 : index
    %c0_358 = arith.constant 0 : index
    %c0_359 = arith.constant 0 : index
    %312 = vector.load %arg23[%c0_357, %c0_358, %c0_359] : memref<10x10x16xf32, #tpu.memory_space<vmem>>, vector<8x8x16xf32>
    %313 = vector.shape_cast %312 : vector<8x8x16xf32> to vector<64x16xf32>
    %c1_360 = arith.constant 1 : index
    %c0_361 = arith.constant 0 : index
    %c0_362 = arith.constant 0 : index
    %c0_363 = arith.constant 0 : index
    %314 = vector.load %arg11[%c1_360, %c0_361, %c0_362, %c0_363] : memref<2x9x16x16xf32, #tpu.memory_space<vmem>>, vector<1x1x16x16xf32>
    %315 = vector.shape_cast %314 : vector<1x1x16x16xf32> to vector<16x16xf32>
    %cst_364 = arith.constant dense<0.000000e+00> : vector<64x16xf32>
    %316 = tpu.matmul %313, %315, %cst_364 {dimension_numbers = #tpu.dot_dimension_numbers<[1], [0], [0], [1], [0, 0, 1, 1], [], []>} : vector<64x16xf32>, vector<16x16xf32>, vector<64x16xf32> -> vector<64x16xf32>
    %c0_365 = arith.constant 0 : index
    %c1_366 = arith.constant 1 : index
    %c0_367 = arith.constant 0 : index
    %317 = vector.load %arg23[%c0_365, %c1_366, %c0_367] : memref<10x10x16xf32, #tpu.memory_space<vmem>>, vector<8x8x16xf32>
    %318 = vector.shape_cast %317 : vector<8x8x16xf32> to vector<64x16xf32>
    %c1_368 = arith.constant 1 : index
    %c1_369 = arith.constant 1 : index
    %c0_370 = arith.constant 0 : index
    %c0_371 = arith.constant 0 : index
    %319 = vector.load %arg11[%c1_368, %c1_369, %c0_370, %c0_371] : memref<2x9x16x16xf32, #tpu.memory_space<vmem>>, vector<1x1x16x16xf32>
    %320 = vector.shape_cast %319 : vector<1x1x16x16xf32> to vector<16x16xf32>
    %cst_372 = arith.constant dense<0.000000e+00> : vector<64x16xf32>
    %321 = tpu.matmul %318, %320, %cst_372 {dimension_numbers = #tpu.dot_dimension_numbers<[1], [0], [0], [1], [0, 0, 1, 1], [], []>} : vector<64x16xf32>, vector<16x16xf32>, vector<64x16xf32> -> vector<64x16xf32>
    %322 = arith.addf %316, %321 : vector<64x16xf32>
    %c0_373 = arith.constant 0 : index
    %c2_374 = arith.constant 2 : index
    %c0_375 = arith.constant 0 : index
    %323 = vector.load %arg23[%c0_373, %c2_374, %c0_375] : memref<10x10x16xf32, #tpu.memory_space<vmem>>, vector<8x8x16xf32>
    %324 = vector.shape_cast %323 : vector<8x8x16xf32> to vector<64x16xf32>
    %c1_376 = arith.constant 1 : index
    %c2_377 = arith.constant 2 : index
    %c0_378 = arith.constant 0 : index
    %c0_379 = arith.constant 0 : index
    %325 = vector.load %arg11[%c1_376, %c2_377, %c0_378, %c0_379] : memref<2x9x16x16xf32, #tpu.memory_space<vmem>>, vector<1x1x16x16xf32>
    %326 = vector.shape_cast %325 : vector<1x1x16x16xf32> to vector<16x16xf32>
    %cst_380 = arith.constant dense<0.000000e+00> : vector<64x16xf32>
    %327 = tpu.matmul %324, %326, %cst_380 {dimension_numbers = #tpu.dot_dimension_numbers<[1], [0], [0], [1], [0, 0, 1, 1], [], []>} : vector<64x16xf32>, vector<16x16xf32>, vector<64x16xf32> -> vector<64x16xf32>
    %328 = arith.addf %322, %327 : vector<64x16xf32>
    %c1_381 = arith.constant 1 : index
    %c0_382 = arith.constant 0 : index
    %c0_383 = arith.constant 0 : index
    %329 = vector.load %arg23[%c1_381, %c0_382, %c0_383] : memref<10x10x16xf32, #tpu.memory_space<vmem>>, vector<8x8x16xf32>
    %330 = vector.shape_cast %329 : vector<8x8x16xf32> to vector<64x16xf32>
    %c1_384 = arith.constant 1 : index
    %c3_385 = arith.constant 3 : index
    %c0_386 = arith.constant 0 : index
    %c0_387 = arith.constant 0 : index
    %331 = vector.load %arg11[%c1_384, %c3_385, %c0_386, %c0_387] : memref<2x9x16x16xf32, #tpu.memory_space<vmem>>, vector<1x1x16x16xf32>
    %332 = vector.shape_cast %331 : vector<1x1x16x16xf32> to vector<16x16xf32>
    %cst_388 = arith.constant dense<0.000000e+00> : vector<64x16xf32>
    %333 = tpu.matmul %330, %332, %cst_388 {dimension_numbers = #tpu.dot_dimension_numbers<[1], [0], [0], [1], [0, 0, 1, 1], [], []>} : vector<64x16xf32>, vector<16x16xf32>, vector<64x16xf32> -> vector<64x16xf32>
    %334 = arith.addf %328, %333 : vector<64x16xf32>
    %c1_389 = arith.constant 1 : index
    %c1_390 = arith.constant 1 : index
    %c0_391 = arith.constant 0 : index
    %335 = vector.load %arg23[%c1_389, %c1_390, %c0_391] : memref<10x10x16xf32, #tpu.memory_space<vmem>>, vector<8x8x16xf32>
    %336 = vector.shape_cast %335 : vector<8x8x16xf32> to vector<64x16xf32>
    %c1_392 = arith.constant 1 : index
    %c4_393 = arith.constant 4 : index
    %c0_394 = arith.constant 0 : index
    %c0_395 = arith.constant 0 : index
    %337 = vector.load %arg11[%c1_392, %c4_393, %c0_394, %c0_395] : memref<2x9x16x16xf32, #tpu.memory_space<vmem>>, vector<1x1x16x16xf32>
    %338 = vector.shape_cast %337 : vector<1x1x16x16xf32> to vector<16x16xf32>
    %cst_396 = arith.constant dense<0.000000e+00> : vector<64x16xf32>
    %339 = tpu.matmul %336, %338, %cst_396 {dimension_numbers = #tpu.dot_dimension_numbers<[1], [0], [0], [1], [0, 0, 1, 1], [], []>} : vector<64x16xf32>, vector<16x16xf32>, vector<64x16xf32> -> vector<64x16xf32>
    %340 = arith.addf %334, %339 : vector<64x16xf32>
    %c1_397 = arith.constant 1 : index
    %c2_398 = arith.constant 2 : index
    %c0_399 = arith.constant 0 : index
    %341 = vector.load %arg23[%c1_397, %c2_398, %c0_399] : memref<10x10x16xf32, #tpu.memory_space<vmem>>, vector<8x8x16xf32>
    %342 = vector.shape_cast %341 : vector<8x8x16xf32> to vector<64x16xf32>
    %c1_400 = arith.constant 1 : index
    %c5_401 = arith.constant 5 : index
    %c0_402 = arith.constant 0 : index
    %c0_403 = arith.constant 0 : index
    %343 = vector.load %arg11[%c1_400, %c5_401, %c0_402, %c0_403] : memref<2x9x16x16xf32, #tpu.memory_space<vmem>>, vector<1x1x16x16xf32>
    %344 = vector.shape_cast %343 : vector<1x1x16x16xf32> to vector<16x16xf32>
    %cst_404 = arith.constant dense<0.000000e+00> : vector<64x16xf32>
    %345 = tpu.matmul %342, %344, %cst_404 {dimension_numbers = #tpu.dot_dimension_numbers<[1], [0], [0], [1], [0, 0, 1, 1], [], []>} : vector<64x16xf32>, vector<16x16xf32>, vector<64x16xf32> -> vector<64x16xf32>
    %346 = arith.addf %340, %345 : vector<64x16xf32>
    %c2_405 = arith.constant 2 : index
    %c0_406 = arith.constant 0 : index
    %c0_407 = arith.constant 0 : index
    %347 = vector.load %arg23[%c2_405, %c0_406, %c0_407] : memref<10x10x16xf32, #tpu.memory_space<vmem>>, vector<8x8x16xf32>
    %348 = vector.shape_cast %347 : vector<8x8x16xf32> to vector<64x16xf32>
    %c1_408 = arith.constant 1 : index
    %c6_409 = arith.constant 6 : index
    %c0_410 = arith.constant 0 : index
    %c0_411 = arith.constant 0 : index
    %349 = vector.load %arg11[%c1_408, %c6_409, %c0_410, %c0_411] : memref<2x9x16x16xf32, #tpu.memory_space<vmem>>, vector<1x1x16x16xf32>
    %350 = vector.shape_cast %349 : vector<1x1x16x16xf32> to vector<16x16xf32>
    %cst_412 = arith.constant dense<0.000000e+00> : vector<64x16xf32>
    %351 = tpu.matmul %348, %350, %cst_412 {dimension_numbers = #tpu.dot_dimension_numbers<[1], [0], [0], [1], [0, 0, 1, 1], [], []>} : vector<64x16xf32>, vector<16x16xf32>, vector<64x16xf32> -> vector<64x16xf32>
    %352 = arith.addf %346, %351 : vector<64x16xf32>
    %c2_413 = arith.constant 2 : index
    %c1_414 = arith.constant 1 : index
    %c0_415 = arith.constant 0 : index
    %353 = vector.load %arg23[%c2_413, %c1_414, %c0_415] : memref<10x10x16xf32, #tpu.memory_space<vmem>>, vector<8x8x16xf32>
    %354 = vector.shape_cast %353 : vector<8x8x16xf32> to vector<64x16xf32>
    %c1_416 = arith.constant 1 : index
    %c7_417 = arith.constant 7 : index
    %c0_418 = arith.constant 0 : index
    %c0_419 = arith.constant 0 : index
    %355 = vector.load %arg11[%c1_416, %c7_417, %c0_418, %c0_419] : memref<2x9x16x16xf32, #tpu.memory_space<vmem>>, vector<1x1x16x16xf32>
    %356 = vector.shape_cast %355 : vector<1x1x16x16xf32> to vector<16x16xf32>
    %cst_420 = arith.constant dense<0.000000e+00> : vector<64x16xf32>
    %357 = tpu.matmul %354, %356, %cst_420 {dimension_numbers = #tpu.dot_dimension_numbers<[1], [0], [0], [1], [0, 0, 1, 1], [], []>} : vector<64x16xf32>, vector<16x16xf32>, vector<64x16xf32> -> vector<64x16xf32>
    %358 = arith.addf %352, %357 : vector<64x16xf32>
    %c2_421 = arith.constant 2 : index
    %c2_422 = arith.constant 2 : index
    %c0_423 = arith.constant 0 : index
    %359 = vector.load %arg23[%c2_421, %c2_422, %c0_423] : memref<10x10x16xf32, #tpu.memory_space<vmem>>, vector<8x8x16xf32>
    %360 = vector.shape_cast %359 : vector<8x8x16xf32> to vector<64x16xf32>
    %c1_424 = arith.constant 1 : index
    %c8_425 = arith.constant 8 : index
    %c0_426 = arith.constant 0 : index
    %c0_427 = arith.constant 0 : index
    %361 = vector.load %arg11[%c1_424, %c8_425, %c0_426, %c0_427] : memref<2x9x16x16xf32, #tpu.memory_space<vmem>>, vector<1x1x16x16xf32>
    %362 = vector.shape_cast %361 : vector<1x1x16x16xf32> to vector<16x16xf32>
    %cst_428 = arith.constant dense<0.000000e+00> : vector<64x16xf32>
    %363 = tpu.matmul %360, %362, %cst_428 {dimension_numbers = #tpu.dot_dimension_numbers<[1], [0], [0], [1], [0, 0, 1, 1], [], []>} : vector<64x16xf32>, vector<16x16xf32>, vector<64x16xf32> -> vector<64x16xf32>
    %364 = arith.addf %358, %363 : vector<64x16xf32>
    %365 = vector.broadcast %309 : vector<1x16xf32> to vector<64x16xf32>
    %366 = arith.mulf %364, %365 : vector<64x16xf32>
    %367 = vector.broadcast %311 : vector<1x16xf32> to vector<64x16xf32>
    %368 = arith.addf %366, %367 : vector<64x16xf32>
    %cst_429 = arith.constant 0.000000e+00 : f32
    %369 = vector.broadcast %cst_429 : f32 to vector<64x16xf32>
    %370 = arith.maximumf %368, %369 : vector<64x16xf32>
    %371 = arith.addf %240, %370 : vector<64x16xf32>
    %372 = vector.shape_cast %371 : vector<64x16xf32> to vector<4x2x4x2x16xf32>
    %373 = vector.extract_strided_slice %372 {offsets = [0, 0, 0, 0, 0], sizes = [4, 1, 4, 1, 16], strides = [1, 1, 1, 1, 1]} : vector<4x2x4x2x16xf32> to vector<4x1x4x1x16xf32>
    %374 = vector.shape_cast %373 : vector<4x1x4x1x16xf32> to vector<4x4x16xf32>
    %375 = vector.shape_cast %374 : vector<4x4x16xf32> to vector<16x16xf32>
    %c0_430 = arith.constant 0 : index
    %c0_431 = arith.constant 0 : index
    %c0_432 = arith.constant 0 : index
    %376 = vector.load %arg5[%c0_430, %c0_431, %c0_432] : memref<4x16x32xf32, #tpu.memory_space<vmem>>, vector<1x16x32xf32>
    %377 = vector.shape_cast %376 : vector<1x16x32xf32> to vector<16x32xf32>
    %cst_433 = arith.constant dense<0.000000e+00> : vector<16x32xf32>
    %378 = tpu.matmul %375, %377, %cst_433 {dimension_numbers = #tpu.dot_dimension_numbers<[1], [0], [0], [1], [0, 0, 1, 1], [], []>} : vector<16x16xf32>, vector<16x32xf32>, vector<16x32xf32> -> vector<16x32xf32>
    %379 = vector.extract_strided_slice %372 {offsets = [0, 0, 0, 1, 0], sizes = [4, 1, 4, 1, 16], strides = [1, 1, 1, 1, 1]} : vector<4x2x4x2x16xf32> to vector<4x1x4x1x16xf32>
    %380 = vector.shape_cast %379 : vector<4x1x4x1x16xf32> to vector<4x4x16xf32>
    %381 = vector.shape_cast %380 : vector<4x4x16xf32> to vector<16x16xf32>
    %c1_434 = arith.constant 1 : index
    %c0_435 = arith.constant 0 : index
    %c0_436 = arith.constant 0 : index
    %382 = vector.load %arg5[%c1_434, %c0_435, %c0_436] : memref<4x16x32xf32, #tpu.memory_space<vmem>>, vector<1x16x32xf32>
    %383 = vector.shape_cast %382 : vector<1x16x32xf32> to vector<16x32xf32>
    %cst_437 = arith.constant dense<0.000000e+00> : vector<16x32xf32>
    %384 = tpu.matmul %381, %383, %cst_437 {dimension_numbers = #tpu.dot_dimension_numbers<[1], [0], [0], [1], [0, 0, 1, 1], [], []>} : vector<16x16xf32>, vector<16x32xf32>, vector<16x32xf32> -> vector<16x32xf32>
    %385 = arith.addf %378, %384 : vector<16x32xf32>
    %386 = vector.extract_strided_slice %372 {offsets = [0, 1, 0, 0, 0], sizes = [4, 1, 4, 1, 16], strides = [1, 1, 1, 1, 1]} : vector<4x2x4x2x16xf32> to vector<4x1x4x1x16xf32>
    %387 = vector.shape_cast %386 : vector<4x1x4x1x16xf32> to vector<4x4x16xf32>
    %388 = vector.shape_cast %387 : vector<4x4x16xf32> to vector<16x16xf32>
    %c2_438 = arith.constant 2 : index
    %c0_439 = arith.constant 0 : index
    %c0_440 = arith.constant 0 : index
    %389 = vector.load %arg5[%c2_438, %c0_439, %c0_440] : memref<4x16x32xf32, #tpu.memory_space<vmem>>, vector<1x16x32xf32>
    %390 = vector.shape_cast %389 : vector<1x16x32xf32> to vector<16x32xf32>
    %cst_441 = arith.constant dense<0.000000e+00> : vector<16x32xf32>
    %391 = tpu.matmul %388, %390, %cst_441 {dimension_numbers = #tpu.dot_dimension_numbers<[1], [0], [0], [1], [0, 0, 1, 1], [], []>} : vector<16x16xf32>, vector<16x32xf32>, vector<16x32xf32> -> vector<16x32xf32>
    %392 = arith.addf %385, %391 : vector<16x32xf32>
    %393 = vector.extract_strided_slice %372 {offsets = [0, 1, 0, 1, 0], sizes = [4, 1, 4, 1, 16], strides = [1, 1, 1, 1, 1]} : vector<4x2x4x2x16xf32> to vector<4x1x4x1x16xf32>
    %394 = vector.shape_cast %393 : vector<4x1x4x1x16xf32> to vector<4x4x16xf32>
    %395 = vector.shape_cast %394 : vector<4x4x16xf32> to vector<16x16xf32>
    %c3_442 = arith.constant 3 : index
    %c0_443 = arith.constant 0 : index
    %c0_444 = arith.constant 0 : index
    %396 = vector.load %arg5[%c3_442, %c0_443, %c0_444] : memref<4x16x32xf32, #tpu.memory_space<vmem>>, vector<1x16x32xf32>
    %397 = vector.shape_cast %396 : vector<1x16x32xf32> to vector<16x32xf32>
    %cst_445 = arith.constant dense<0.000000e+00> : vector<16x32xf32>
    %398 = tpu.matmul %395, %397, %cst_445 {dimension_numbers = #tpu.dot_dimension_numbers<[1], [0], [0], [1], [0, 0, 1, 1], [], []>} : vector<16x16xf32>, vector<16x32xf32>, vector<16x32xf32> -> vector<16x32xf32>
    %399 = arith.addf %392, %398 : vector<16x32xf32>
    %c0_446 = arith.constant 0 : index
    %c0_447 = arith.constant 0 : index
    %400 = vector.load %arg8[%c0_446, %c0_447] : memref<2x32xf32, #tpu.memory_space<vmem>>, vector<1x32xf32>
    %401 = vector.broadcast %400 : vector<1x32xf32> to vector<16x32xf32>
    %402 = arith.mulf %399, %401 : vector<16x32xf32>
    %c1_448 = arith.constant 1 : index
    %c0_449 = arith.constant 0 : index
    %403 = vector.load %arg8[%c1_448, %c0_449] : memref<2x32xf32, #tpu.memory_space<vmem>>, vector<1x32xf32>
    %404 = vector.broadcast %403 : vector<1x32xf32> to vector<16x32xf32>
    %405 = arith.addf %402, %404 : vector<16x32xf32>
    %406 = vector.shape_cast %405 : vector<16x32xf32> to vector<4x4x32xf32>
    %c1_450 = arith.constant 1 : index
    %c1_451 = arith.constant 1 : index
    %c0_452 = arith.constant 0 : index
    %407 = vector.load %arg24[%c1_450, %c1_451, %c0_452] : memref<6x6x32xf32, #tpu.memory_space<vmem>>, vector<4x4x32xf32>
    tpu.vector_store %arg24[%c1_450, %c1_451, %c0_452], %406 {strides = array<i32>} : memref<6x6x32xf32, #tpu.memory_space<vmem>>, vector<4x4x32xf32>,
    %c0_453 = arith.constant 0 : index
    %c0_454 = arith.constant 0 : index
    %c0_455 = arith.constant 0 : index
    %408 = vector.load %arg16[%c0_453, %c0_454, %c0_455] : memref<2x2x32xf32, #tpu.memory_space<vmem>>, vector<1x1x32xf32>
    %409 = vector.shape_cast %408 : vector<1x1x32xf32> to vector<1x32xf32>
    %c0_456 = arith.constant 0 : index
    %c1_457 = arith.constant 1 : index
    %c0_458 = arith.constant 0 : index
    %410 = vector.load %arg16[%c0_456, %c1_457, %c0_458] : memref<2x2x32xf32, #tpu.memory_space<vmem>>, vector<1x1x32xf32>
    %411 = vector.shape_cast %410 : vector<1x1x32xf32> to vector<1x32xf32>
    %c0_459 = arith.constant 0 : index
    %c0_460 = arith.constant 0 : index
    %c0_461 = arith.constant 0 : index
    %412 = vector.load %arg24[%c0_459, %c0_460, %c0_461] : memref<6x6x32xf32, #tpu.memory_space<vmem>>, vector<4x4x32xf32>
    %413 = vector.shape_cast %412 : vector<4x4x32xf32> to vector<16x32xf32>
    %c0_462 = arith.constant 0 : index
    %c0_463 = arith.constant 0 : index
    %c0_464 = arith.constant 0 : index
    %c0_465 = arith.constant 0 : index
    %414 = vector.load %arg12[%c0_462, %c0_463, %c0_464, %c0_465] : memref<2x9x32x32xf32, #tpu.memory_space<vmem>>, vector<1x1x32x32xf32>
    %415 = vector.shape_cast %414 : vector<1x1x32x32xf32> to vector<32x32xf32>
    %cst_466 = arith.constant dense<0.000000e+00> : vector<16x32xf32>
    %416 = tpu.matmul %413, %415, %cst_466 {dimension_numbers = #tpu.dot_dimension_numbers<[1], [0], [0], [1], [0, 0, 1, 1], [], []>} : vector<16x32xf32>, vector<32x32xf32>, vector<16x32xf32> -> vector<16x32xf32>
    %c0_467 = arith.constant 0 : index
    %c1_468 = arith.constant 1 : index
    %c0_469 = arith.constant 0 : index
    %417 = vector.load %arg24[%c0_467, %c1_468, %c0_469] : memref<6x6x32xf32, #tpu.memory_space<vmem>>, vector<4x4x32xf32>
    %418 = vector.shape_cast %417 : vector<4x4x32xf32> to vector<16x32xf32>
    %c0_470 = arith.constant 0 : index
    %c1_471 = arith.constant 1 : index
    %c0_472 = arith.constant 0 : index
    %c0_473 = arith.constant 0 : index
    %419 = vector.load %arg12[%c0_470, %c1_471, %c0_472, %c0_473] : memref<2x9x32x32xf32, #tpu.memory_space<vmem>>, vector<1x1x32x32xf32>
    %420 = vector.shape_cast %419 : vector<1x1x32x32xf32> to vector<32x32xf32>
    %cst_474 = arith.constant dense<0.000000e+00> : vector<16x32xf32>
    %421 = tpu.matmul %418, %420, %cst_474 {dimension_numbers = #tpu.dot_dimension_numbers<[1], [0], [0], [1], [0, 0, 1, 1], [], []>} : vector<16x32xf32>, vector<32x32xf32>, vector<16x32xf32> -> vector<16x32xf32>
    %422 = arith.addf %416, %421 : vector<16x32xf32>
    %c0_475 = arith.constant 0 : index
    %c2_476 = arith.constant 2 : index
    %c0_477 = arith.constant 0 : index
    %423 = vector.load %arg24[%c0_475, %c2_476, %c0_477] : memref<6x6x32xf32, #tpu.memory_space<vmem>>, vector<4x4x32xf32>
    %424 = vector.shape_cast %423 : vector<4x4x32xf32> to vector<16x32xf32>
    %c0_478 = arith.constant 0 : index
    %c2_479 = arith.constant 2 : index
    %c0_480 = arith.constant 0 : index
    %c0_481 = arith.constant 0 : index
    %425 = vector.load %arg12[%c0_478, %c2_479, %c0_480, %c0_481] : memref<2x9x32x32xf32, #tpu.memory_space<vmem>>, vector<1x1x32x32xf32>
    %426 = vector.shape_cast %425 : vector<1x1x32x32xf32> to vector<32x32xf32>
    %cst_482 = arith.constant dense<0.000000e+00> : vector<16x32xf32>
    %427 = tpu.matmul %424, %426, %cst_482 {dimension_numbers = #tpu.dot_dimension_numbers<[1], [0], [0], [1], [0, 0, 1, 1], [], []>} : vector<16x32xf32>, vector<32x32xf32>, vector<16x32xf32> -> vector<16x32xf32>
    %428 = arith.addf %422, %427 : vector<16x32xf32>
    %c1_483 = arith.constant 1 : index
    %c0_484 = arith.constant 0 : index
    %c0_485 = arith.constant 0 : index
    %429 = vector.load %arg24[%c1_483, %c0_484, %c0_485] : memref<6x6x32xf32, #tpu.memory_space<vmem>>, vector<4x4x32xf32>
    %430 = vector.shape_cast %429 : vector<4x4x32xf32> to vector<16x32xf32>
    %c0_486 = arith.constant 0 : index
    %c3_487 = arith.constant 3 : index
    %c0_488 = arith.constant 0 : index
    %c0_489 = arith.constant 0 : index
    %431 = vector.load %arg12[%c0_486, %c3_487, %c0_488, %c0_489] : memref<2x9x32x32xf32, #tpu.memory_space<vmem>>, vector<1x1x32x32xf32>
    %432 = vector.shape_cast %431 : vector<1x1x32x32xf32> to vector<32x32xf32>
    %cst_490 = arith.constant dense<0.000000e+00> : vector<16x32xf32>
    %433 = tpu.matmul %430, %432, %cst_490 {dimension_numbers = #tpu.dot_dimension_numbers<[1], [0], [0], [1], [0, 0, 1, 1], [], []>} : vector<16x32xf32>, vector<32x32xf32>, vector<16x32xf32> -> vector<16x32xf32>
    %434 = arith.addf %428, %433 : vector<16x32xf32>
    %c1_491 = arith.constant 1 : index
    %c1_492 = arith.constant 1 : index
    %c0_493 = arith.constant 0 : index
    %435 = vector.load %arg24[%c1_491, %c1_492, %c0_493] : memref<6x6x32xf32, #tpu.memory_space<vmem>>, vector<4x4x32xf32>
    %436 = vector.shape_cast %435 : vector<4x4x32xf32> to vector<16x32xf32>
    %c0_494 = arith.constant 0 : index
    %c4_495 = arith.constant 4 : index
    %c0_496 = arith.constant 0 : index
    %c0_497 = arith.constant 0 : index
    %437 = vector.load %arg12[%c0_494, %c4_495, %c0_496, %c0_497] : memref<2x9x32x32xf32, #tpu.memory_space<vmem>>, vector<1x1x32x32xf32>
    %438 = vector.shape_cast %437 : vector<1x1x32x32xf32> to vector<32x32xf32>
    %cst_498 = arith.constant dense<0.000000e+00> : vector<16x32xf32>
    %439 = tpu.matmul %436, %438, %cst_498 {dimension_numbers = #tpu.dot_dimension_numbers<[1], [0], [0], [1], [0, 0, 1, 1], [], []>} : vector<16x32xf32>, vector<32x32xf32>, vector<16x32xf32> -> vector<16x32xf32>
    %440 = arith.addf %434, %439 : vector<16x32xf32>
    %c1_499 = arith.constant 1 : index
    %c2_500 = arith.constant 2 : index
    %c0_501 = arith.constant 0 : index
    %441 = vector.load %arg24[%c1_499, %c2_500, %c0_501] : memref<6x6x32xf32, #tpu.memory_space<vmem>>, vector<4x4x32xf32>
    %442 = vector.shape_cast %441 : vector<4x4x32xf32> to vector<16x32xf32>
    %c0_502 = arith.constant 0 : index
    %c5_503 = arith.constant 5 : index
    %c0_504 = arith.constant 0 : index
    %c0_505 = arith.constant 0 : index
    %443 = vector.load %arg12[%c0_502, %c5_503, %c0_504, %c0_505] : memref<2x9x32x32xf32, #tpu.memory_space<vmem>>, vector<1x1x32x32xf32>
    %444 = vector.shape_cast %443 : vector<1x1x32x32xf32> to vector<32x32xf32>
    %cst_506 = arith.constant dense<0.000000e+00> : vector<16x32xf32>
    %445 = tpu.matmul %442, %444, %cst_506 {dimension_numbers = #tpu.dot_dimension_numbers<[1], [0], [0], [1], [0, 0, 1, 1], [], []>} : vector<16x32xf32>, vector<32x32xf32>, vector<16x32xf32> -> vector<16x32xf32>
    %446 = arith.addf %440, %445 : vector<16x32xf32>
    %c2_507 = arith.constant 2 : index
    %c0_508 = arith.constant 0 : index
    %c0_509 = arith.constant 0 : index
    %447 = vector.load %arg24[%c2_507, %c0_508, %c0_509] : memref<6x6x32xf32, #tpu.memory_space<vmem>>, vector<4x4x32xf32>
    %448 = vector.shape_cast %447 : vector<4x4x32xf32> to vector<16x32xf32>
    %c0_510 = arith.constant 0 : index
    %c6_511 = arith.constant 6 : index
    %c0_512 = arith.constant 0 : index
    %c0_513 = arith.constant 0 : index
    %449 = vector.load %arg12[%c0_510, %c6_511, %c0_512, %c0_513] : memref<2x9x32x32xf32, #tpu.memory_space<vmem>>, vector<1x1x32x32xf32>
    %450 = vector.shape_cast %449 : vector<1x1x32x32xf32> to vector<32x32xf32>
    %cst_514 = arith.constant dense<0.000000e+00> : vector<16x32xf32>
    %451 = tpu.matmul %448, %450, %cst_514 {dimension_numbers = #tpu.dot_dimension_numbers<[1], [0], [0], [1], [0, 0, 1, 1], [], []>} : vector<16x32xf32>, vector<32x32xf32>, vector<16x32xf32> -> vector<16x32xf32>
    %452 = arith.addf %446, %451 : vector<16x32xf32>
    %c2_515 = arith.constant 2 : index
    %c1_516 = arith.constant 1 : index
    %c0_517 = arith.constant 0 : index
    %453 = vector.load %arg24[%c2_515, %c1_516, %c0_517] : memref<6x6x32xf32, #tpu.memory_space<vmem>>, vector<4x4x32xf32>
    %454 = vector.shape_cast %453 : vector<4x4x32xf32> to vector<16x32xf32>
    %c0_518 = arith.constant 0 : index
    %c7_519 = arith.constant 7 : index
    %c0_520 = arith.constant 0 : index
    %c0_521 = arith.constant 0 : index
    %455 = vector.load %arg12[%c0_518, %c7_519, %c0_520, %c0_521] : memref<2x9x32x32xf32, #tpu.memory_space<vmem>>, vector<1x1x32x32xf32>
    %456 = vector.shape_cast %455 : vector<1x1x32x32xf32> to vector<32x32xf32>
    %cst_522 = arith.constant dense<0.000000e+00> : vector<16x32xf32>
    %457 = tpu.matmul %454, %456, %cst_522 {dimension_numbers = #tpu.dot_dimension_numbers<[1], [0], [0], [1], [0, 0, 1, 1], [], []>} : vector<16x32xf32>, vector<32x32xf32>, vector<16x32xf32> -> vector<16x32xf32>
    %458 = arith.addf %452, %457 : vector<16x32xf32>
    %c2_523 = arith.constant 2 : index
    %c2_524 = arith.constant 2 : index
    %c0_525 = arith.constant 0 : index
    %459 = vector.load %arg24[%c2_523, %c2_524, %c0_525] : memref<6x6x32xf32, #tpu.memory_space<vmem>>, vector<4x4x32xf32>
    %460 = vector.shape_cast %459 : vector<4x4x32xf32> to vector<16x32xf32>
    %c0_526 = arith.constant 0 : index
    %c8_527 = arith.constant 8 : index
    %c0_528 = arith.constant 0 : index
    %c0_529 = arith.constant 0 : index
    %461 = vector.load %arg12[%c0_526, %c8_527, %c0_528, %c0_529] : memref<2x9x32x32xf32, #tpu.memory_space<vmem>>, vector<1x1x32x32xf32>
    %462 = vector.shape_cast %461 : vector<1x1x32x32xf32> to vector<32x32xf32>
    %cst_530 = arith.constant dense<0.000000e+00> : vector<16x32xf32>
    %463 = tpu.matmul %460, %462, %cst_530 {dimension_numbers = #tpu.dot_dimension_numbers<[1], [0], [0], [1], [0, 0, 1, 1], [], []>} : vector<16x32xf32>, vector<32x32xf32>, vector<16x32xf32> -> vector<16x32xf32>
    %464 = arith.addf %458, %463 : vector<16x32xf32>
    %465 = vector.broadcast %409 : vector<1x32xf32> to vector<16x32xf32>
    %466 = arith.mulf %464, %465 : vector<16x32xf32>
    %467 = vector.broadcast %411 : vector<1x32xf32> to vector<16x32xf32>
    %468 = arith.addf %466, %467 : vector<16x32xf32>
    %cst_531 = arith.constant 0.000000e+00 : f32
    %469 = vector.broadcast %cst_531 : f32 to vector<16x32xf32>
    %470 = arith.maximumf %468, %469 : vector<16x32xf32>
    %471 = vector.shape_cast %470 : vector<16x32xf32> to vector<4x4x32xf32>
    %c1_532 = arith.constant 1 : index
    %c1_533 = arith.constant 1 : index
    %c0_534 = arith.constant 0 : index
    %472 = vector.load %arg24[%c1_532, %c1_533, %c0_534] : memref<6x6x32xf32, #tpu.memory_space<vmem>>, vector<4x4x32xf32>
    tpu.vector_store %arg24[%c1_532, %c1_533, %c0_534], %471 {strides = array<i32>} : memref<6x6x32xf32, #tpu.memory_space<vmem>>, vector<4x4x32xf32>,
    %c1_535 = arith.constant 1 : index
    %c0_536 = arith.constant 0 : index
    %c0_537 = arith.constant 0 : index
    %473 = vector.load %arg16[%c1_535, %c0_536, %c0_537] : memref<2x2x32xf32, #tpu.memory_space<vmem>>, vector<1x1x32xf32>
    %474 = vector.shape_cast %473 : vector<1x1x32xf32> to vector<1x32xf32>
    %c1_538 = arith.constant 1 : index
    %c1_539 = arith.constant 1 : index
    %c0_540 = arith.constant 0 : index
    %475 = vector.load %arg16[%c1_538, %c1_539, %c0_540] : memref<2x2x32xf32, #tpu.memory_space<vmem>>, vector<1x1x32xf32>
    %476 = vector.shape_cast %475 : vector<1x1x32xf32> to vector<1x32xf32>
    %c0_541 = arith.constant 0 : index
    %c0_542 = arith.constant 0 : index
    %c0_543 = arith.constant 0 : index
    %477 = vector.load %arg24[%c0_541, %c0_542, %c0_543] : memref<6x6x32xf32, #tpu.memory_space<vmem>>, vector<4x4x32xf32>
    %478 = vector.shape_cast %477 : vector<4x4x32xf32> to vector<16x32xf32>
    %c1_544 = arith.constant 1 : index
    %c0_545 = arith.constant 0 : index
    %c0_546 = arith.constant 0 : index
    %c0_547 = arith.constant 0 : index
    %479 = vector.load %arg12[%c1_544, %c0_545, %c0_546, %c0_547] : memref<2x9x32x32xf32, #tpu.memory_space<vmem>>, vector<1x1x32x32xf32>
    %480 = vector.shape_cast %479 : vector<1x1x32x32xf32> to vector<32x32xf32>
    %cst_548 = arith.constant dense<0.000000e+00> : vector<16x32xf32>
    %481 = tpu.matmul %478, %480, %cst_548 {dimension_numbers = #tpu.dot_dimension_numbers<[1], [0], [0], [1], [0, 0, 1, 1], [], []>} : vector<16x32xf32>, vector<32x32xf32>, vector<16x32xf32> -> vector<16x32xf32>
    %c0_549 = arith.constant 0 : index
    %c1_550 = arith.constant 1 : index
    %c0_551 = arith.constant 0 : index
    %482 = vector.load %arg24[%c0_549, %c1_550, %c0_551] : memref<6x6x32xf32, #tpu.memory_space<vmem>>, vector<4x4x32xf32>
    %483 = vector.shape_cast %482 : vector<4x4x32xf32> to vector<16x32xf32>
    %c1_552 = arith.constant 1 : index
    %c1_553 = arith.constant 1 : index
    %c0_554 = arith.constant 0 : index
    %c0_555 = arith.constant 0 : index
    %484 = vector.load %arg12[%c1_552, %c1_553, %c0_554, %c0_555] : memref<2x9x32x32xf32, #tpu.memory_space<vmem>>, vector<1x1x32x32xf32>
    %485 = vector.shape_cast %484 : vector<1x1x32x32xf32> to vector<32x32xf32>
    %cst_556 = arith.constant dense<0.000000e+00> : vector<16x32xf32>
    %486 = tpu.matmul %483, %485, %cst_556 {dimension_numbers = #tpu.dot_dimension_numbers<[1], [0], [0], [1], [0, 0, 1, 1], [], []>} : vector<16x32xf32>, vector<32x32xf32>, vector<16x32xf32> -> vector<16x32xf32>
    %487 = arith.addf %481, %486 : vector<16x32xf32>
    %c0_557 = arith.constant 0 : index
    %c2_558 = arith.constant 2 : index
    %c0_559 = arith.constant 0 : index
    %488 = vector.load %arg24[%c0_557, %c2_558, %c0_559] : memref<6x6x32xf32, #tpu.memory_space<vmem>>, vector<4x4x32xf32>
    %489 = vector.shape_cast %488 : vector<4x4x32xf32> to vector<16x32xf32>
    %c1_560 = arith.constant 1 : index
    %c2_561 = arith.constant 2 : index
    %c0_562 = arith.constant 0 : index
    %c0_563 = arith.constant 0 : index
    %490 = vector.load %arg12[%c1_560, %c2_561, %c0_562, %c0_563] : memref<2x9x32x32xf32, #tpu.memory_space<vmem>>, vector<1x1x32x32xf32>
    %491 = vector.shape_cast %490 : vector<1x1x32x32xf32> to vector<32x32xf32>
    %cst_564 = arith.constant dense<0.000000e+00> : vector<16x32xf32>
    %492 = tpu.matmul %489, %491, %cst_564 {dimension_numbers = #tpu.dot_dimension_numbers<[1], [0], [0], [1], [0, 0, 1, 1], [], []>} : vector<16x32xf32>, vector<32x32xf32>, vector<16x32xf32> -> vector<16x32xf32>
    %493 = arith.addf %487, %492 : vector<16x32xf32>
    %c1_565 = arith.constant 1 : index
    %c0_566 = arith.constant 0 : index
    %c0_567 = arith.constant 0 : index
    %494 = vector.load %arg24[%c1_565, %c0_566, %c0_567] : memref<6x6x32xf32, #tpu.memory_space<vmem>>, vector<4x4x32xf32>
    %495 = vector.shape_cast %494 : vector<4x4x32xf32> to vector<16x32xf32>
    %c1_568 = arith.constant 1 : index
    %c3_569 = arith.constant 3 : index
    %c0_570 = arith.constant 0 : index
    %c0_571 = arith.constant 0 : index
    %496 = vector.load %arg12[%c1_568, %c3_569, %c0_570, %c0_571] : memref<2x9x32x32xf32, #tpu.memory_space<vmem>>, vector<1x1x32x32xf32>
    %497 = vector.shape_cast %496 : vector<1x1x32x32xf32> to vector<32x32xf32>
    %cst_572 = arith.constant dense<0.000000e+00> : vector<16x32xf32>
    %498 = tpu.matmul %495, %497, %cst_572 {dimension_numbers = #tpu.dot_dimension_numbers<[1], [0], [0], [1], [0, 0, 1, 1], [], []>} : vector<16x32xf32>, vector<32x32xf32>, vector<16x32xf32> -> vector<16x32xf32>
    %499 = arith.addf %493, %498 : vector<16x32xf32>
    %c1_573 = arith.constant 1 : index
    %c1_574 = arith.constant 1 : index
    %c0_575 = arith.constant 0 : index
    %500 = vector.load %arg24[%c1_573, %c1_574, %c0_575] : memref<6x6x32xf32, #tpu.memory_space<vmem>>, vector<4x4x32xf32>
    %501 = vector.shape_cast %500 : vector<4x4x32xf32> to vector<16x32xf32>
    %c1_576 = arith.constant 1 : index
    %c4_577 = arith.constant 4 : index
    %c0_578 = arith.constant 0 : index
    %c0_579 = arith.constant 0 : index
    %502 = vector.load %arg12[%c1_576, %c4_577, %c0_578, %c0_579] : memref<2x9x32x32xf32, #tpu.memory_space<vmem>>, vector<1x1x32x32xf32>
    %503 = vector.shape_cast %502 : vector<1x1x32x32xf32> to vector<32x32xf32>
    %cst_580 = arith.constant dense<0.000000e+00> : vector<16x32xf32>
    %504 = tpu.matmul %501, %503, %cst_580 {dimension_numbers = #tpu.dot_dimension_numbers<[1], [0], [0], [1], [0, 0, 1, 1], [], []>} : vector<16x32xf32>, vector<32x32xf32>, vector<16x32xf32> -> vector<16x32xf32>
    %505 = arith.addf %499, %504 : vector<16x32xf32>
    %c1_581 = arith.constant 1 : index
    %c2_582 = arith.constant 2 : index
    %c0_583 = arith.constant 0 : index
    %506 = vector.load %arg24[%c1_581, %c2_582, %c0_583] : memref<6x6x32xf32, #tpu.memory_space<vmem>>, vector<4x4x32xf32>
    %507 = vector.shape_cast %506 : vector<4x4x32xf32> to vector<16x32xf32>
    %c1_584 = arith.constant 1 : index
    %c5_585 = arith.constant 5 : index
    %c0_586 = arith.constant 0 : index
    %c0_587 = arith.constant 0 : index
    %508 = vector.load %arg12[%c1_584, %c5_585, %c0_586, %c0_587] : memref<2x9x32x32xf32, #tpu.memory_space<vmem>>, vector<1x1x32x32xf32>
    %509 = vector.shape_cast %508 : vector<1x1x32x32xf32> to vector<32x32xf32>
    %cst_588 = arith.constant dense<0.000000e+00> : vector<16x32xf32>
    %510 = tpu.matmul %507, %509, %cst_588 {dimension_numbers = #tpu.dot_dimension_numbers<[1], [0], [0], [1], [0, 0, 1, 1], [], []>} : vector<16x32xf32>, vector<32x32xf32>, vector<16x32xf32> -> vector<16x32xf32>
    %511 = arith.addf %505, %510 : vector<16x32xf32>
    %c2_589 = arith.constant 2 : index
    %c0_590 = arith.constant 0 : index
    %c0_591 = arith.constant 0 : index
    %512 = vector.load %arg24[%c2_589, %c0_590, %c0_591] : memref<6x6x32xf32, #tpu.memory_space<vmem>>, vector<4x4x32xf32>
    %513 = vector.shape_cast %512 : vector<4x4x32xf32> to vector<16x32xf32>
    %c1_592 = arith.constant 1 : index
    %c6_593 = arith.constant 6 : index
    %c0_594 = arith.constant 0 : index
    %c0_595 = arith.constant 0 : index
    %514 = vector.load %arg12[%c1_592, %c6_593, %c0_594, %c0_595] : memref<2x9x32x32xf32, #tpu.memory_space<vmem>>, vector<1x1x32x32xf32>
    %515 = vector.shape_cast %514 : vector<1x1x32x32xf32> to vector<32x32xf32>
    %cst_596 = arith.constant dense<0.000000e+00> : vector<16x32xf32>
    %516 = tpu.matmul %513, %515, %cst_596 {dimension_numbers = #tpu.dot_dimension_numbers<[1], [0], [0], [1], [0, 0, 1, 1], [], []>} : vector<16x32xf32>, vector<32x32xf32>, vector<16x32xf32> -> vector<16x32xf32>
    %517 = arith.addf %511, %516 : vector<16x32xf32>
    %c2_597 = arith.constant 2 : index
    %c1_598 = arith.constant 1 : index
    %c0_599 = arith.constant 0 : index
    %518 = vector.load %arg24[%c2_597, %c1_598, %c0_599] : memref<6x6x32xf32, #tpu.memory_space<vmem>>, vector<4x4x32xf32>
    %519 = vector.shape_cast %518 : vector<4x4x32xf32> to vector<16x32xf32>
    %c1_600 = arith.constant 1 : index
    %c7_601 = arith.constant 7 : index
    %c0_602 = arith.constant 0 : index
    %c0_603 = arith.constant 0 : index
    %520 = vector.load %arg12[%c1_600, %c7_601, %c0_602, %c0_603] : memref<2x9x32x32xf32, #tpu.memory_space<vmem>>, vector<1x1x32x32xf32>
    %521 = vector.shape_cast %520 : vector<1x1x32x32xf32> to vector<32x32xf32>
    %cst_604 = arith.constant dense<0.000000e+00> : vector<16x32xf32>
    %522 = tpu.matmul %519, %521, %cst_604 {dimension_numbers = #tpu.dot_dimension_numbers<[1], [0], [0], [1], [0, 0, 1, 1], [], []>} : vector<16x32xf32>, vector<32x32xf32>, vector<16x32xf32> -> vector<16x32xf32>
    %523 = arith.addf %517, %522 : vector<16x32xf32>
    %c2_605 = arith.constant 2 : index
    %c2_606 = arith.constant 2 : index
    %c0_607 = arith.constant 0 : index
    %524 = vector.load %arg24[%c2_605, %c2_606, %c0_607] : memref<6x6x32xf32, #tpu.memory_space<vmem>>, vector<4x4x32xf32>
    %525 = vector.shape_cast %524 : vector<4x4x32xf32> to vector<16x32xf32>
    %c1_608 = arith.constant 1 : index
    %c8_609 = arith.constant 8 : index
    %c0_610 = arith.constant 0 : index
    %c0_611 = arith.constant 0 : index
    %526 = vector.load %arg12[%c1_608, %c8_609, %c0_610, %c0_611] : memref<2x9x32x32xf32, #tpu.memory_space<vmem>>, vector<1x1x32x32xf32>
    %527 = vector.shape_cast %526 : vector<1x1x32x32xf32> to vector<32x32xf32>
    %cst_612 = arith.constant dense<0.000000e+00> : vector<16x32xf32>
    %528 = tpu.matmul %525, %527, %cst_612 {dimension_numbers = #tpu.dot_dimension_numbers<[1], [0], [0], [1], [0, 0, 1, 1], [], []>} : vector<16x32xf32>, vector<32x32xf32>, vector<16x32xf32> -> vector<16x32xf32>
    %529 = arith.addf %523, %528 : vector<16x32xf32>
    %530 = vector.broadcast %474 : vector<1x32xf32> to vector<16x32xf32>
    %531 = arith.mulf %529, %530 : vector<16x32xf32>
    %532 = vector.broadcast %476 : vector<1x32xf32> to vector<16x32xf32>
    %533 = arith.addf %531, %532 : vector<16x32xf32>
    %cst_613 = arith.constant 0.000000e+00 : f32
    %534 = vector.broadcast %cst_613 : f32 to vector<16x32xf32>
    %535 = arith.maximumf %533, %534 : vector<16x32xf32>
    %536 = arith.addf %405, %535 : vector<16x32xf32>
    %537 = vector.shape_cast %536 : vector<16x32xf32> to vector<2x2x2x2x32xf32>
    %538 = vector.extract_strided_slice %537 {offsets = [0, 0, 0, 0, 0], sizes = [2, 1, 2, 1, 32], strides = [1, 1, 1, 1, 1]} : vector<2x2x2x2x32xf32> to vector<2x1x2x1x32xf32>
    %539 = vector.shape_cast %538 : vector<2x1x2x1x32xf32> to vector<2x2x32xf32>
    %540 = vector.shape_cast %539 : vector<2x2x32xf32> to vector<4x32xf32>
    %c0_614 = arith.constant 0 : index
    %c0_615 = arith.constant 0 : index
    %c0_616 = arith.constant 0 : index
    %541 = vector.load %arg6[%c0_614, %c0_615, %c0_616] : memref<4x32x32xf32, #tpu.memory_space<vmem>>, vector<1x32x32xf32>
    %542 = vector.shape_cast %541 : vector<1x32x32xf32> to vector<32x32xf32>
    %cst_617 = arith.constant dense<0.000000e+00> : vector<4x32xf32>
    %543 = tpu.matmul %540, %542, %cst_617 {dimension_numbers = #tpu.dot_dimension_numbers<[1], [0], [0], [1], [0, 0, 1, 1], [], []>} : vector<4x32xf32>, vector<32x32xf32>, vector<4x32xf32> -> vector<4x32xf32>
    %544 = vector.extract_strided_slice %537 {offsets = [0, 0, 0, 1, 0], sizes = [2, 1, 2, 1, 32], strides = [1, 1, 1, 1, 1]} : vector<2x2x2x2x32xf32> to vector<2x1x2x1x32xf32>
    %545 = vector.shape_cast %544 : vector<2x1x2x1x32xf32> to vector<2x2x32xf32>
    %546 = vector.shape_cast %545 : vector<2x2x32xf32> to vector<4x32xf32>
    %c1_618 = arith.constant 1 : index
    %c0_619 = arith.constant 0 : index
    %c0_620 = arith.constant 0 : index
    %547 = vector.load %arg6[%c1_618, %c0_619, %c0_620] : memref<4x32x32xf32, #tpu.memory_space<vmem>>, vector<1x32x32xf32>
    %548 = vector.shape_cast %547 : vector<1x32x32xf32> to vector<32x32xf32>
    %cst_621 = arith.constant dense<0.000000e+00> : vector<4x32xf32>
    %549 = tpu.matmul %546, %548, %cst_621 {dimension_numbers = #tpu.dot_dimension_numbers<[1], [0], [0], [1], [0, 0, 1, 1], [], []>} : vector<4x32xf32>, vector<32x32xf32>, vector<4x32xf32> -> vector<4x32xf32>
    %550 = arith.addf %543, %549 : vector<4x32xf32>
    %551 = vector.extract_strided_slice %537 {offsets = [0, 1, 0, 0, 0], sizes = [2, 1, 2, 1, 32], strides = [1, 1, 1, 1, 1]} : vector<2x2x2x2x32xf32> to vector<2x1x2x1x32xf32>
    %552 = vector.shape_cast %551 : vector<2x1x2x1x32xf32> to vector<2x2x32xf32>
    %553 = vector.shape_cast %552 : vector<2x2x32xf32> to vector<4x32xf32>
    %c2_622 = arith.constant 2 : index
    %c0_623 = arith.constant 0 : index
    %c0_624 = arith.constant 0 : index
    %554 = vector.load %arg6[%c2_622, %c0_623, %c0_624] : memref<4x32x32xf32, #tpu.memory_space<vmem>>, vector<1x32x32xf32>
    %555 = vector.shape_cast %554 : vector<1x32x32xf32> to vector<32x32xf32>
    %cst_625 = arith.constant dense<0.000000e+00> : vector<4x32xf32>
    %556 = tpu.matmul %553, %555, %cst_625 {dimension_numbers = #tpu.dot_dimension_numbers<[1], [0], [0], [1], [0, 0, 1, 1], [], []>} : vector<4x32xf32>, vector<32x32xf32>, vector<4x32xf32> -> vector<4x32xf32>
    %557 = arith.addf %550, %556 : vector<4x32xf32>
    %558 = vector.extract_strided_slice %537 {offsets = [0, 1, 0, 1, 0], sizes = [2, 1, 2, 1, 32], strides = [1, 1, 1, 1, 1]} : vector<2x2x2x2x32xf32> to vector<2x1x2x1x32xf32>
    %559 = vector.shape_cast %558 : vector<2x1x2x1x32xf32> to vector<2x2x32xf32>
    %560 = vector.shape_cast %559 : vector<2x2x32xf32> to vector<4x32xf32>
    %c3_626 = arith.constant 3 : index
    %c0_627 = arith.constant 0 : index
    %c0_628 = arith.constant 0 : index
    %561 = vector.load %arg6[%c3_626, %c0_627, %c0_628] : memref<4x32x32xf32, #tpu.memory_space<vmem>>, vector<1x32x32xf32>
    %562 = vector.shape_cast %561 : vector<1x32x32xf32> to vector<32x32xf32>
    %cst_629 = arith.constant dense<0.000000e+00> : vector<4x32xf32>
    %563 = tpu.matmul %560, %562, %cst_629 {dimension_numbers = #tpu.dot_dimension_numbers<[1], [0], [0], [1], [0, 0, 1, 1], [], []>} : vector<4x32xf32>, vector<32x32xf32>, vector<4x32xf32> -> vector<4x32xf32>
    %564 = arith.addf %557, %563 : vector<4x32xf32>
    %c0_630 = arith.constant 0 : index
    %c0_631 = arith.constant 0 : index
    %565 = vector.load %arg9[%c0_630, %c0_631] : memref<2x32xf32, #tpu.memory_space<vmem>>, vector<1x32xf32>
    %566 = vector.broadcast %565 : vector<1x32xf32> to vector<4x32xf32>
    %567 = arith.mulf %564, %566 : vector<4x32xf32>
    %c1_632 = arith.constant 1 : index
    %c0_633 = arith.constant 0 : index
    %568 = vector.load %arg9[%c1_632, %c0_633] : memref<2x32xf32, #tpu.memory_space<vmem>>, vector<1x32xf32>
    %569 = vector.broadcast %568 : vector<1x32xf32> to vector<4x32xf32>
    %570 = arith.addf %567, %569 : vector<4x32xf32>
    %571 = vector.shape_cast %570 : vector<4x32xf32> to vector<2x2x32xf32>
    %c1_634 = arith.constant 1 : index
    %c1_635 = arith.constant 1 : index
    %c0_636 = arith.constant 0 : index
    %572 = vector.load %arg25[%c1_634, %c1_635, %c0_636] : memref<4x4x32xf32, #tpu.memory_space<vmem>>, vector<2x2x32xf32>
    tpu.vector_store %arg25[%c1_634, %c1_635, %c0_636], %571 {strides = array<i32>} : memref<4x4x32xf32, #tpu.memory_space<vmem>>, vector<2x2x32xf32>,
    %c0_637 = arith.constant 0 : index
    %c0_638 = arith.constant 0 : index
    %c0_639 = arith.constant 0 : index
    %573 = vector.load %arg17[%c0_637, %c0_638, %c0_639] : memref<2x2x32xf32, #tpu.memory_space<vmem>>, vector<1x1x32xf32>
    %574 = vector.shape_cast %573 : vector<1x1x32xf32> to vector<1x32xf32>
    %c0_640 = arith.constant 0 : index
    %c1_641 = arith.constant 1 : index
    %c0_642 = arith.constant 0 : index
    %575 = vector.load %arg17[%c0_640, %c1_641, %c0_642] : memref<2x2x32xf32, #tpu.memory_space<vmem>>, vector<1x1x32xf32>
    %576 = vector.shape_cast %575 : vector<1x1x32xf32> to vector<1x32xf32>
    %c0_643 = arith.constant 0 : index
    %c0_644 = arith.constant 0 : index
    %c0_645 = arith.constant 0 : index
    %577 = vector.load %arg25[%c0_643, %c0_644, %c0_645] : memref<4x4x32xf32, #tpu.memory_space<vmem>>, vector<2x2x32xf32>
    %578 = vector.shape_cast %577 : vector<2x2x32xf32> to vector<4x32xf32>
    %c0_646 = arith.constant 0 : index
    %c0_647 = arith.constant 0 : index
    %c0_648 = arith.constant 0 : index
    %c0_649 = arith.constant 0 : index
    %579 = vector.load %arg13[%c0_646, %c0_647, %c0_648, %c0_649] : memref<2x9x32x32xf32, #tpu.memory_space<vmem>>, vector<1x1x32x32xf32>
    %580 = vector.shape_cast %579 : vector<1x1x32x32xf32> to vector<32x32xf32>
    %cst_650 = arith.constant dense<0.000000e+00> : vector<4x32xf32>
    %581 = tpu.matmul %578, %580, %cst_650 {dimension_numbers = #tpu.dot_dimension_numbers<[1], [0], [0], [1], [0, 0, 1, 1], [], []>} : vector<4x32xf32>, vector<32x32xf32>, vector<4x32xf32> -> vector<4x32xf32>
    %c0_651 = arith.constant 0 : index
    %c1_652 = arith.constant 1 : index
    %c0_653 = arith.constant 0 : index
    %582 = vector.load %arg25[%c0_651, %c1_652, %c0_653] : memref<4x4x32xf32, #tpu.memory_space<vmem>>, vector<2x2x32xf32>
    %583 = vector.shape_cast %582 : vector<2x2x32xf32> to vector<4x32xf32>
    %c0_654 = arith.constant 0 : index
    %c1_655 = arith.constant 1 : index
    %c0_656 = arith.constant 0 : index
    %c0_657 = arith.constant 0 : index
    %584 = vector.load %arg13[%c0_654, %c1_655, %c0_656, %c0_657] : memref<2x9x32x32xf32, #tpu.memory_space<vmem>>, vector<1x1x32x32xf32>
    %585 = vector.shape_cast %584 : vector<1x1x32x32xf32> to vector<32x32xf32>
    %cst_658 = arith.constant dense<0.000000e+00> : vector<4x32xf32>
    %586 = tpu.matmul %583, %585, %cst_658 {dimension_numbers = #tpu.dot_dimension_numbers<[1], [0], [0], [1], [0, 0, 1, 1], [], []>} : vector<4x32xf32>, vector<32x32xf32>, vector<4x32xf32> -> vector<4x32xf32>
    %587 = arith.addf %581, %586 : vector<4x32xf32>
    %c0_659 = arith.constant 0 : index
    %c2_660 = arith.constant 2 : index
    %c0_661 = arith.constant 0 : index
    %588 = vector.load %arg25[%c0_659, %c2_660, %c0_661] : memref<4x4x32xf32, #tpu.memory_space<vmem>>, vector<2x2x32xf32>
    %589 = vector.shape_cast %588 : vector<2x2x32xf32> to vector<4x32xf32>
    %c0_662 = arith.constant 0 : index
    %c2_663 = arith.constant 2 : index
    %c0_664 = arith.constant 0 : index
    %c0_665 = arith.constant 0 : index
    %590 = vector.load %arg13[%c0_662, %c2_663, %c0_664, %c0_665] : memref<2x9x32x32xf32, #tpu.memory_space<vmem>>, vector<1x1x32x32xf32>
    %591 = vector.shape_cast %590 : vector<1x1x32x32xf32> to vector<32x32xf32>
    %cst_666 = arith.constant dense<0.000000e+00> : vector<4x32xf32>
    %592 = tpu.matmul %589, %591, %cst_666 {dimension_numbers = #tpu.dot_dimension_numbers<[1], [0], [0], [1], [0, 0, 1, 1], [], []>} : vector<4x32xf32>, vector<32x32xf32>, vector<4x32xf32> -> vector<4x32xf32>
    %593 = arith.addf %587, %592 : vector<4x32xf32>
    %c1_667 = arith.constant 1 : index
    %c0_668 = arith.constant 0 : index
    %c0_669 = arith.constant 0 : index
    %594 = vector.load %arg25[%c1_667, %c0_668, %c0_669] : memref<4x4x32xf32, #tpu.memory_space<vmem>>, vector<2x2x32xf32>
    %595 = vector.shape_cast %594 : vector<2x2x32xf32> to vector<4x32xf32>
    %c0_670 = arith.constant 0 : index
    %c3_671 = arith.constant 3 : index
    %c0_672 = arith.constant 0 : index
    %c0_673 = arith.constant 0 : index
    %596 = vector.load %arg13[%c0_670, %c3_671, %c0_672, %c0_673] : memref<2x9x32x32xf32, #tpu.memory_space<vmem>>, vector<1x1x32x32xf32>
    %597 = vector.shape_cast %596 : vector<1x1x32x32xf32> to vector<32x32xf32>
    %cst_674 = arith.constant dense<0.000000e+00> : vector<4x32xf32>
    %598 = tpu.matmul %595, %597, %cst_674 {dimension_numbers = #tpu.dot_dimension_numbers<[1], [0], [0], [1], [0, 0, 1, 1], [], []>} : vector<4x32xf32>, vector<32x32xf32>, vector<4x32xf32> -> vector<4x32xf32>
    %599 = arith.addf %593, %598 : vector<4x32xf32>
    %c1_675 = arith.constant 1 : index
    %c1_676 = arith.constant 1 : index
    %c0_677 = arith.constant 0 : index
    %600 = vector.load %arg25[%c1_675, %c1_676, %c0_677] : memref<4x4x32xf32, #tpu.memory_space<vmem>>, vector<2x2x32xf32>
    %601 = vector.shape_cast %600 : vector<2x2x32xf32> to vector<4x32xf32>
    %c0_678 = arith.constant 0 : index
    %c4_679 = arith.constant 4 : index
    %c0_680 = arith.constant 0 : index
    %c0_681 = arith.constant 0 : index
    %602 = vector.load %arg13[%c0_678, %c4_679, %c0_680, %c0_681] : memref<2x9x32x32xf32, #tpu.memory_space<vmem>>, vector<1x1x32x32xf32>
    %603 = vector.shape_cast %602 : vector<1x1x32x32xf32> to vector<32x32xf32>
    %cst_682 = arith.constant dense<0.000000e+00> : vector<4x32xf32>
    %604 = tpu.matmul %601, %603, %cst_682 {dimension_numbers = #tpu.dot_dimension_numbers<[1], [0], [0], [1], [0, 0, 1, 1], [], []>} : vector<4x32xf32>, vector<32x32xf32>, vector<4x32xf32> -> vector<4x32xf32>
    %605 = arith.addf %599, %604 : vector<4x32xf32>
    %c1_683 = arith.constant 1 : index
    %c2_684 = arith.constant 2 : index
    %c0_685 = arith.constant 0 : index
    %606 = vector.load %arg25[%c1_683, %c2_684, %c0_685] : memref<4x4x32xf32, #tpu.memory_space<vmem>>, vector<2x2x32xf32>
    %607 = vector.shape_cast %606 : vector<2x2x32xf32> to vector<4x32xf32>
    %c0_686 = arith.constant 0 : index
    %c5_687 = arith.constant 5 : index
    %c0_688 = arith.constant 0 : index
    %c0_689 = arith.constant 0 : index
    %608 = vector.load %arg13[%c0_686, %c5_687, %c0_688, %c0_689] : memref<2x9x32x32xf32, #tpu.memory_space<vmem>>, vector<1x1x32x32xf32>
    %609 = vector.shape_cast %608 : vector<1x1x32x32xf32> to vector<32x32xf32>
    %cst_690 = arith.constant dense<0.000000e+00> : vector<4x32xf32>
    %610 = tpu.matmul %607, %609, %cst_690 {dimension_numbers = #tpu.dot_dimension_numbers<[1], [0], [0], [1], [0, 0, 1, 1], [], []>} : vector<4x32xf32>, vector<32x32xf32>, vector<4x32xf32> -> vector<4x32xf32>
    %611 = arith.addf %605, %610 : vector<4x32xf32>
    %c2_691 = arith.constant 2 : index
    %c0_692 = arith.constant 0 : index
    %c0_693 = arith.constant 0 : index
    %612 = vector.load %arg25[%c2_691, %c0_692, %c0_693] : memref<4x4x32xf32, #tpu.memory_space<vmem>>, vector<2x2x32xf32>
    %613 = vector.shape_cast %612 : vector<2x2x32xf32> to vector<4x32xf32>
    %c0_694 = arith.constant 0 : index
    %c6_695 = arith.constant 6 : index
    %c0_696 = arith.constant 0 : index
    %c0_697 = arith.constant 0 : index
    %614 = vector.load %arg13[%c0_694, %c6_695, %c0_696, %c0_697] : memref<2x9x32x32xf32, #tpu.memory_space<vmem>>, vector<1x1x32x32xf32>
    %615 = vector.shape_cast %614 : vector<1x1x32x32xf32> to vector<32x32xf32>
    %cst_698 = arith.constant dense<0.000000e+00> : vector<4x32xf32>
    %616 = tpu.matmul %613, %615, %cst_698 {dimension_numbers = #tpu.dot_dimension_numbers<[1], [0], [0], [1], [0, 0, 1, 1], [], []>} : vector<4x32xf32>, vector<32x32xf32>, vector<4x32xf32> -> vector<4x32xf32>
    %617 = arith.addf %611, %616 : vector<4x32xf32>
    %c2_699 = arith.constant 2 : index
    %c1_700 = arith.constant 1 : index
    %c0_701 = arith.constant 0 : index
    %618 = vector.load %arg25[%c2_699, %c1_700, %c0_701] : memref<4x4x32xf32, #tpu.memory_space<vmem>>, vector<2x2x32xf32>
    %619 = vector.shape_cast %618 : vector<2x2x32xf32> to vector<4x32xf32>
    %c0_702 = arith.constant 0 : index
    %c7_703 = arith.constant 7 : index
    %c0_704 = arith.constant 0 : index
    %c0_705 = arith.constant 0 : index
    %620 = vector.load %arg13[%c0_702, %c7_703, %c0_704, %c0_705] : memref<2x9x32x32xf32, #tpu.memory_space<vmem>>, vector<1x1x32x32xf32>
    %621 = vector.shape_cast %620 : vector<1x1x32x32xf32> to vector<32x32xf32>
    %cst_706 = arith.constant dense<0.000000e+00> : vector<4x32xf32>
    %622 = tpu.matmul %619, %621, %cst_706 {dimension_numbers = #tpu.dot_dimension_numbers<[1], [0], [0], [1], [0, 0, 1, 1], [], []>} : vector<4x32xf32>, vector<32x32xf32>, vector<4x32xf32> -> vector<4x32xf32>
    %623 = arith.addf %617, %622 : vector<4x32xf32>
    %c2_707 = arith.constant 2 : index
    %c2_708 = arith.constant 2 : index
    %c0_709 = arith.constant 0 : index
    %624 = vector.load %arg25[%c2_707, %c2_708, %c0_709] : memref<4x4x32xf32, #tpu.memory_space<vmem>>, vector<2x2x32xf32>
    %625 = vector.shape_cast %624 : vector<2x2x32xf32> to vector<4x32xf32>
    %c0_710 = arith.constant 0 : index
    %c8_711 = arith.constant 8 : index
    %c0_712 = arith.constant 0 : index
    %c0_713 = arith.constant 0 : index
    %626 = vector.load %arg13[%c0_710, %c8_711, %c0_712, %c0_713] : memref<2x9x32x32xf32, #tpu.memory_space<vmem>>, vector<1x1x32x32xf32>
    %627 = vector.shape_cast %626 : vector<1x1x32x32xf32> to vector<32x32xf32>
    %cst_714 = arith.constant dense<0.000000e+00> : vector<4x32xf32>
    %628 = tpu.matmul %625, %627, %cst_714 {dimension_numbers = #tpu.dot_dimension_numbers<[1], [0], [0], [1], [0, 0, 1, 1], [], []>} : vector<4x32xf32>, vector<32x32xf32>, vector<4x32xf32> -> vector<4x32xf32>
    %629 = arith.addf %623, %628 : vector<4x32xf32>
    %630 = vector.broadcast %574 : vector<1x32xf32> to vector<4x32xf32>
    %631 = arith.mulf %629, %630 : vector<4x32xf32>
    %632 = vector.broadcast %576 : vector<1x32xf32> to vector<4x32xf32>
    %633 = arith.addf %631, %632 : vector<4x32xf32>
    %cst_715 = arith.constant 0.000000e+00 : f32
    %634 = vector.broadcast %cst_715 : f32 to vector<4x32xf32>
    %635 = arith.maximumf %633, %634 : vector<4x32xf32>
    %636 = vector.shape_cast %635 : vector<4x32xf32> to vector<2x2x32xf32>
    %c1_716 = arith.constant 1 : index
    %c1_717 = arith.constant 1 : index
    %c0_718 = arith.constant 0 : index
    %637 = vector.load %arg25[%c1_716, %c1_717, %c0_718] : memref<4x4x32xf32, #tpu.memory_space<vmem>>, vector<2x2x32xf32>
    tpu.vector_store %arg25[%c1_716, %c1_717, %c0_718], %636 {strides = array<i32>} : memref<4x4x32xf32, #tpu.memory_space<vmem>>, vector<2x2x32xf32>,
    %c1_719 = arith.constant 1 : index
    %c0_720 = arith.constant 0 : index
    %c0_721 = arith.constant 0 : index
    %638 = vector.load %arg17[%c1_719, %c0_720, %c0_721] : memref<2x2x32xf32, #tpu.memory_space<vmem>>, vector<1x1x32xf32>
    %639 = vector.shape_cast %638 : vector<1x1x32xf32> to vector<1x32xf32>
    %c1_722 = arith.constant 1 : index
    %c1_723 = arith.constant 1 : index
    %c0_724 = arith.constant 0 : index
    %640 = vector.load %arg17[%c1_722, %c1_723, %c0_724] : memref<2x2x32xf32, #tpu.memory_space<vmem>>, vector<1x1x32xf32>
    %641 = vector.shape_cast %640 : vector<1x1x32xf32> to vector<1x32xf32>
    %c0_725 = arith.constant 0 : index
    %c0_726 = arith.constant 0 : index
    %c0_727 = arith.constant 0 : index
    %642 = vector.load %arg25[%c0_725, %c0_726, %c0_727] : memref<4x4x32xf32, #tpu.memory_space<vmem>>, vector<2x2x32xf32>
    %643 = vector.shape_cast %642 : vector<2x2x32xf32> to vector<4x32xf32>
    %c1_728 = arith.constant 1 : index
    %c0_729 = arith.constant 0 : index
    %c0_730 = arith.constant 0 : index
    %c0_731 = arith.constant 0 : index
    %644 = vector.load %arg13[%c1_728, %c0_729, %c0_730, %c0_731] : memref<2x9x32x32xf32, #tpu.memory_space<vmem>>, vector<1x1x32x32xf32>
    %645 = vector.shape_cast %644 : vector<1x1x32x32xf32> to vector<32x32xf32>
    %cst_732 = arith.constant dense<0.000000e+00> : vector<4x32xf32>
    %646 = tpu.matmul %643, %645, %cst_732 {dimension_numbers = #tpu.dot_dimension_numbers<[1], [0], [0], [1], [0, 0, 1, 1], [], []>} : vector<4x32xf32>, vector<32x32xf32>, vector<4x32xf32> -> vector<4x32xf32>
    %c0_733 = arith.constant 0 : index
    %c1_734 = arith.constant 1 : index
    %c0_735 = arith.constant 0 : index
    %647 = vector.load %arg25[%c0_733, %c1_734, %c0_735] : memref<4x4x32xf32, #tpu.memory_space<vmem>>, vector<2x2x32xf32>
    %648 = vector.shape_cast %647 : vector<2x2x32xf32> to vector<4x32xf32>
    %c1_736 = arith.constant 1 : index
    %c1_737 = arith.constant 1 : index
    %c0_738 = arith.constant 0 : index
    %c0_739 = arith.constant 0 : index
    %649 = vector.load %arg13[%c1_736, %c1_737, %c0_738, %c0_739] : memref<2x9x32x32xf32, #tpu.memory_space<vmem>>, vector<1x1x32x32xf32>
    %650 = vector.shape_cast %649 : vector<1x1x32x32xf32> to vector<32x32xf32>
    %cst_740 = arith.constant dense<0.000000e+00> : vector<4x32xf32>
    %651 = tpu.matmul %648, %650, %cst_740 {dimension_numbers = #tpu.dot_dimension_numbers<[1], [0], [0], [1], [0, 0, 1, 1], [], []>} : vector<4x32xf32>, vector<32x32xf32>, vector<4x32xf32> -> vector<4x32xf32>
    %652 = arith.addf %646, %651 : vector<4x32xf32>
    %c0_741 = arith.constant 0 : index
    %c2_742 = arith.constant 2 : index
    %c0_743 = arith.constant 0 : index
    %653 = vector.load %arg25[%c0_741, %c2_742, %c0_743] : memref<4x4x32xf32, #tpu.memory_space<vmem>>, vector<2x2x32xf32>
    %654 = vector.shape_cast %653 : vector<2x2x32xf32> to vector<4x32xf32>
    %c1_744 = arith.constant 1 : index
    %c2_745 = arith.constant 2 : index
    %c0_746 = arith.constant 0 : index
    %c0_747 = arith.constant 0 : index
    %655 = vector.load %arg13[%c1_744, %c2_745, %c0_746, %c0_747] : memref<2x9x32x32xf32, #tpu.memory_space<vmem>>, vector<1x1x32x32xf32>
    %656 = vector.shape_cast %655 : vector<1x1x32x32xf32> to vector<32x32xf32>
    %cst_748 = arith.constant dense<0.000000e+00> : vector<4x32xf32>
    %657 = tpu.matmul %654, %656, %cst_748 {dimension_numbers = #tpu.dot_dimension_numbers<[1], [0], [0], [1], [0, 0, 1, 1], [], []>} : vector<4x32xf32>, vector<32x32xf32>, vector<4x32xf32> -> vector<4x32xf32>
    %658 = arith.addf %652, %657 : vector<4x32xf32>
    %c1_749 = arith.constant 1 : index
    %c0_750 = arith.constant 0 : index
    %c0_751 = arith.constant 0 : index
    %659 = vector.load %arg25[%c1_749, %c0_750, %c0_751] : memref<4x4x32xf32, #tpu.memory_space<vmem>>, vector<2x2x32xf32>
    %660 = vector.shape_cast %659 : vector<2x2x32xf32> to vector<4x32xf32>
    %c1_752 = arith.constant 1 : index
    %c3_753 = arith.constant 3 : index
    %c0_754 = arith.constant 0 : index
    %c0_755 = arith.constant 0 : index
    %661 = vector.load %arg13[%c1_752, %c3_753, %c0_754, %c0_755] : memref<2x9x32x32xf32, #tpu.memory_space<vmem>>, vector<1x1x32x32xf32>
    %662 = vector.shape_cast %661 : vector<1x1x32x32xf32> to vector<32x32xf32>
    %cst_756 = arith.constant dense<0.000000e+00> : vector<4x32xf32>
    %663 = tpu.matmul %660, %662, %cst_756 {dimension_numbers = #tpu.dot_dimension_numbers<[1], [0], [0], [1], [0, 0, 1, 1], [], []>} : vector<4x32xf32>, vector<32x32xf32>, vector<4x32xf32> -> vector<4x32xf32>
    %664 = arith.addf %658, %663 : vector<4x32xf32>
    %c1_757 = arith.constant 1 : index
    %c1_758 = arith.constant 1 : index
    %c0_759 = arith.constant 0 : index
    %665 = vector.load %arg25[%c1_757, %c1_758, %c0_759] : memref<4x4x32xf32, #tpu.memory_space<vmem>>, vector<2x2x32xf32>
    %666 = vector.shape_cast %665 : vector<2x2x32xf32> to vector<4x32xf32>
    %c1_760 = arith.constant 1 : index
    %c4_761 = arith.constant 4 : index
    %c0_762 = arith.constant 0 : index
    %c0_763 = arith.constant 0 : index
    %667 = vector.load %arg13[%c1_760, %c4_761, %c0_762, %c0_763] : memref<2x9x32x32xf32, #tpu.memory_space<vmem>>, vector<1x1x32x32xf32>
    %668 = vector.shape_cast %667 : vector<1x1x32x32xf32> to vector<32x32xf32>
    %cst_764 = arith.constant dense<0.000000e+00> : vector<4x32xf32>
    %669 = tpu.matmul %666, %668, %cst_764 {dimension_numbers = #tpu.dot_dimension_numbers<[1], [0], [0], [1], [0, 0, 1, 1], [], []>} : vector<4x32xf32>, vector<32x32xf32>, vector<4x32xf32> -> vector<4x32xf32>
    %670 = arith.addf %664, %669 : vector<4x32xf32>
    %c1_765 = arith.constant 1 : index
    %c2_766 = arith.constant 2 : index
    %c0_767 = arith.constant 0 : index
    %671 = vector.load %arg25[%c1_765, %c2_766, %c0_767] : memref<4x4x32xf32, #tpu.memory_space<vmem>>, vector<2x2x32xf32>
    %672 = vector.shape_cast %671 : vector<2x2x32xf32> to vector<4x32xf32>
    %c1_768 = arith.constant 1 : index
    %c5_769 = arith.constant 5 : index
    %c0_770 = arith.constant 0 : index
    %c0_771 = arith.constant 0 : index
    %673 = vector.load %arg13[%c1_768, %c5_769, %c0_770, %c0_771] : memref<2x9x32x32xf32, #tpu.memory_space<vmem>>, vector<1x1x32x32xf32>
    %674 = vector.shape_cast %673 : vector<1x1x32x32xf32> to vector<32x32xf32>
    %cst_772 = arith.constant dense<0.000000e+00> : vector<4x32xf32>
    %675 = tpu.matmul %672, %674, %cst_772 {dimension_numbers = #tpu.dot_dimension_numbers<[1], [0], [0], [1], [0, 0, 1, 1], [], []>} : vector<4x32xf32>, vector<32x32xf32>, vector<4x32xf32> -> vector<4x32xf32>
    %676 = arith.addf %670, %675 : vector<4x32xf32>
    %c2_773 = arith.constant 2 : index
    %c0_774 = arith.constant 0 : index
    %c0_775 = arith.constant 0 : index
    %677 = vector.load %arg25[%c2_773, %c0_774, %c0_775] : memref<4x4x32xf32, #tpu.memory_space<vmem>>, vector<2x2x32xf32>
    %678 = vector.shape_cast %677 : vector<2x2x32xf32> to vector<4x32xf32>
    %c1_776 = arith.constant 1 : index
    %c6_777 = arith.constant 6 : index
    %c0_778 = arith.constant 0 : index
    %c0_779 = arith.constant 0 : index
    %679 = vector.load %arg13[%c1_776, %c6_777, %c0_778, %c0_779] : memref<2x9x32x32xf32, #tpu.memory_space<vmem>>, vector<1x1x32x32xf32>
    %680 = vector.shape_cast %679 : vector<1x1x32x32xf32> to vector<32x32xf32>
    %cst_780 = arith.constant dense<0.000000e+00> : vector<4x32xf32>
    %681 = tpu.matmul %678, %680, %cst_780 {dimension_numbers = #tpu.dot_dimension_numbers<[1], [0], [0], [1], [0, 0, 1, 1], [], []>} : vector<4x32xf32>, vector<32x32xf32>, vector<4x32xf32> -> vector<4x32xf32>
    %682 = arith.addf %676, %681 : vector<4x32xf32>
    %c2_781 = arith.constant 2 : index
    %c1_782 = arith.constant 1 : index
    %c0_783 = arith.constant 0 : index
    %683 = vector.load %arg25[%c2_781, %c1_782, %c0_783] : memref<4x4x32xf32, #tpu.memory_space<vmem>>, vector<2x2x32xf32>
    %684 = vector.shape_cast %683 : vector<2x2x32xf32> to vector<4x32xf32>
    %c1_784 = arith.constant 1 : index
    %c7_785 = arith.constant 7 : index
    %c0_786 = arith.constant 0 : index
    %c0_787 = arith.constant 0 : index
    %685 = vector.load %arg13[%c1_784, %c7_785, %c0_786, %c0_787] : memref<2x9x32x32xf32, #tpu.memory_space<vmem>>, vector<1x1x32x32xf32>
    %686 = vector.shape_cast %685 : vector<1x1x32x32xf32> to vector<32x32xf32>
    %cst_788 = arith.constant dense<0.000000e+00> : vector<4x32xf32>
    %687 = tpu.matmul %684, %686, %cst_788 {dimension_numbers = #tpu.dot_dimension_numbers<[1], [0], [0], [1], [0, 0, 1, 1], [], []>} : vector<4x32xf32>, vector<32x32xf32>, vector<4x32xf32> -> vector<4x32xf32>
    %688 = arith.addf %682, %687 : vector<4x32xf32>
    %c2_789 = arith.constant 2 : index
    %c2_790 = arith.constant 2 : index
    %c0_791 = arith.constant 0 : index
    %689 = vector.load %arg25[%c2_789, %c2_790, %c0_791] : memref<4x4x32xf32, #tpu.memory_space<vmem>>, vector<2x2x32xf32>
    %690 = vector.shape_cast %689 : vector<2x2x32xf32> to vector<4x32xf32>
    %c1_792 = arith.constant 1 : index
    %c8_793 = arith.constant 8 : index
    %c0_794 = arith.constant 0 : index
    %c0_795 = arith.constant 0 : index
    %691 = vector.load %arg13[%c1_792, %c8_793, %c0_794, %c0_795] : memref<2x9x32x32xf32, #tpu.memory_space<vmem>>, vector<1x1x32x32xf32>
    %692 = vector.shape_cast %691 : vector<1x1x32x32xf32> to vector<32x32xf32>
    %cst_796 = arith.constant dense<0.000000e+00> : vector<4x32xf32>
    %693 = tpu.matmul %690, %692, %cst_796 {dimension_numbers = #tpu.dot_dimension_numbers<[1], [0], [0], [1], [0, 0, 1, 1], [], []>} : vector<4x32xf32>, vector<32x32xf32>, vector<4x32xf32> -> vector<4x32xf32>
    %694 = arith.addf %688, %693 : vector<4x32xf32>
    %695 = vector.broadcast %639 : vector<1x32xf32> to vector<4x32xf32>
    %696 = arith.mulf %694, %695 : vector<4x32xf32>
    %697 = vector.broadcast %641 : vector<1x32xf32> to vector<4x32xf32>
    %698 = arith.addf %696, %697 : vector<4x32xf32>
    %cst_797 = arith.constant 0.000000e+00 : f32
    %699 = vector.broadcast %cst_797 : f32 to vector<4x32xf32>
    %700 = arith.maximumf %698, %699 : vector<4x32xf32>
    %701 = arith.addf %570, %700 : vector<4x32xf32>
    %cst_798 = arith.constant dense<0.000000e+00> : vector<32xf32>
    %702 = vector.multi_reduction <add>, %701, %cst_798 [0] : vector<4x32xf32> to vector<32xf32>
    %703 = vector.shape_cast %702 : vector<32xf32> to vector<1x32xf32>
    %cst_799 = arith.constant 4.000000e+00 : f32
    %704 = vector.broadcast %cst_799 : f32 to vector<1x32xf32>
    %705 = arith.divf %703, %704 : vector<1x32xf32>
    %cst_800 = arith.constant dense<0.000000e+00> : vector<1xf32>
    %706 = vector.multi_reduction <add>, %705, %cst_800 [1] : vector<1x32xf32> to vector<1xf32>
    %707 = vector.shape_cast %706 : vector<1xf32> to vector<1x1xf32>
    %cst_801 = arith.constant 3.200000e+01 : f32
    %708 = vector.broadcast %cst_801 : f32 to vector<1x1xf32>
    %709 = arith.divf %707, %708 : vector<1x1xf32>
    %710 = vector.broadcast %709 : vector<1x1xf32> to vector<1x32xf32>
    %711 = arith.subf %705, %710 : vector<1x32xf32>
    %712 = arith.mulf %711, %711 : vector<1x32xf32>
    %cst_802 = arith.constant dense<0.000000e+00> : vector<1xf32>
    %713 = vector.multi_reduction <add>, %712, %cst_802 [1] : vector<1x32xf32> to vector<1xf32>
    %714 = vector.shape_cast %713 : vector<1xf32> to vector<1x1xf32>
    %cst_803 = arith.constant 3.200000e+01 : f32
    %715 = vector.broadcast %cst_803 : f32 to vector<1x1xf32>
    %716 = arith.divf %714, %715 : vector<1x1xf32>
    %717 = vector.broadcast %709 : vector<1x1xf32> to vector<1x32xf32>
    %718 = arith.subf %705, %717 : vector<1x32xf32>
    %cst_804 = arith.constant 9.99999974E-6 : f32
    %719 = vector.broadcast %cst_804 : f32 to vector<1x1xf32>
    %720 = arith.addf %716, %719 : vector<1x1xf32>
    %721 = math.rsqrt %720 : vector<1x1xf32>
    %722 = vector.broadcast %721 : vector<1x1xf32> to vector<1x32xf32>
    %723 = arith.mulf %718, %722 : vector<1x32xf32>
    %c0_805 = arith.constant 0 : index
    %c0_806 = arith.constant 0 : index
    %724 = vector.load %arg18[%c0_805, %c0_806] : memref<2x32xf32, #tpu.memory_space<vmem>>, vector<1x32xf32>
    %725 = arith.mulf %723, %724 : vector<1x32xf32>
    %c1_807 = arith.constant 1 : index
    %c0_808 = arith.constant 0 : index
    %726 = vector.load %arg18[%c1_807, %c0_808] : memref<2x32xf32, #tpu.memory_space<vmem>>, vector<1x32xf32>
    %727 = arith.addf %725, %726 : vector<1x32xf32>
    %c0_809 = arith.constant 0 : index
    %c0_810 = arith.constant 0 : index
    %728 = vector.load %arg19[%c0_809, %c0_810] : memref<32x10xf32, #tpu.memory_space<vmem>>, vector<32x10xf32>
    %cst_811 = arith.constant dense<0.000000e+00> : vector<1x10xf32>
    %729 = tpu.matmul %727, %728, %cst_811 {dimension_numbers = #tpu.dot_dimension_numbers<[1], [0], [0], [1], [0, 0, 1, 1], [], []>} : vector<1x32xf32>, vector<32x10xf32>, vector<1x10xf32> -> vector<1x10xf32>
    %c0_812 = arith.constant 0 : index
    %c0_813 = arith.constant 0 : index
    %730 = vector.load %arg20[%c0_812, %c0_813] : memref<1x10xf32, #tpu.memory_space<vmem>>, vector<1x10xf32>
    %731 = arith.addf %729, %730 : vector<1x10xf32>
    %c0_814 = arith.constant 0 : index
    %c0_815 = arith.constant 0 : index
    %c0_816 = arith.constant 0 : index
    %732 = vector.load %arg21[%c0_814, %c0_815, %c0_816] : memref<1x1x10xf32, #tpu.memory_space<vmem>>, vector<1x1x10xf32>
    %733 = vector.shape_cast %732 : vector<1x1x10xf32> to vector<1x10xf32>
    %734 = vector.shape_cast %731 : vector<1x10xf32> to vector<1x1x10xf32>
    tpu.vector_store %arg21[%c0_814, %c0_815, %c0_816], %734 {strides = array<i32>} : memref<1x1x10xf32, #tpu.memory_space<vmem>>, vector<1x1x10xf32>,
    return
  }
  func.func @transform_0(%arg0: i32) -> (i32, i32, i32, i32) {
    %c0_i32 = arith.constant 0 : i32
    %c0_i32_0 = arith.constant 0 : i32
    %c0_i32_1 = arith.constant 0 : i32
    %c0_i32_2 = arith.constant 0 : i32
    return %arg0, %c0_i32, %c0_i32_0, %c0_i32_1 : i32, i32, i32, i32
  }
  func.func @transform_1(%arg0: i32) -> (i32, i32, i32) {
    %c0_i32 = arith.constant 0 : i32
    %c0_i32_0 = arith.constant 0 : i32
    %c0_i32_1 = arith.constant 0 : i32
    %c0_i32_2 = arith.constant 0 : i32
    return %c0_i32, %c0_i32_0, %c0_i32_1 : i32, i32, i32
  }
  func.func @transform_2(%arg0: i32) -> (i32, i32) {
    %c0_i32 = arith.constant 0 : i32
    %c0_i32_0 = arith.constant 0 : i32
    %c0_i32_1 = arith.constant 0 : i32
    return %c0_i32, %c0_i32_0 : i32, i32
  }
  func.func @transform_3(%arg0: i32) -> (i32, i32, i32) {
    %c0_i32 = arith.constant 0 : i32
    %c0_i32_0 = arith.constant 0 : i32
    %c0_i32_1 = arith.constant 0 : i32
    %c0_i32_2 = arith.constant 0 : i32
    return %c0_i32, %c0_i32_0, %c0_i32_1 : i32, i32, i32
  }
  func.func @transform_4(%arg0: i32) -> (i32, i32, i32) {
    %c0_i32 = arith.constant 0 : i32
    %c0_i32_0 = arith.constant 0 : i32
    %c0_i32_1 = arith.constant 0 : i32
    %c0_i32_2 = arith.constant 0 : i32
    return %c0_i32, %c0_i32_0, %c0_i32_1 : i32, i32, i32
  }
  func.func @transform_5(%arg0: i32) -> (i32, i32, i32) {
    %c0_i32 = arith.constant 0 : i32
    %c0_i32_0 = arith.constant 0 : i32
    %c0_i32_1 = arith.constant 0 : i32
    %c0_i32_2 = arith.constant 0 : i32
    return %c0_i32, %c0_i32_0, %c0_i32_1 : i32, i32, i32
  }
  func.func @transform_6(%arg0: i32) -> (i32, i32) {
    %c0_i32 = arith.constant 0 : i32
    %c0_i32_0 = arith.constant 0 : i32
    %c0_i32_1 = arith.constant 0 : i32
    return %c0_i32, %c0_i32_0 : i32, i32
  }
  func.func @transform_7(%arg0: i32) -> (i32, i32) {
    %c0_i32 = arith.constant 0 : i32
    %c0_i32_0 = arith.constant 0 : i32
    %c0_i32_1 = arith.constant 0 : i32
    return %c0_i32, %c0_i32_0 : i32, i32
  }
  func.func @transform_8(%arg0: i32) -> (i32, i32) {
    %c0_i32 = arith.constant 0 : i32
    %c0_i32_0 = arith.constant 0 : i32
    %c0_i32_1 = arith.constant 0 : i32
    return %c0_i32, %c0_i32_0 : i32, i32
  }
  func.func @transform_9(%arg0: i32) -> (i32, i32, i32, i32) {
    %c0_i32 = arith.constant 0 : i32
    %c0_i32_0 = arith.constant 0 : i32
    %c0_i32_1 = arith.constant 0 : i32
    %c0_i32_2 = arith.constant 0 : i32
    %c0_i32_3 = arith.constant 0 : i32
    return %c0_i32, %c0_i32_0, %c0_i32_1, %c0_i32_2 : i32, i32, i32, i32
  }
  func.func @transform_10(%arg0: i32) -> (i32, i32, i32, i32) {
    %c0_i32 = arith.constant 0 : i32
    %c0_i32_0 = arith.constant 0 : i32
    %c0_i32_1 = arith.constant 0 : i32
    %c0_i32_2 = arith.constant 0 : i32
    %c0_i32_3 = arith.constant 0 : i32
    return %c0_i32, %c0_i32_0, %c0_i32_1, %c0_i32_2 : i32, i32, i32, i32
  }
  func.func @transform_11(%arg0: i32) -> (i32, i32, i32, i32) {
    %c0_i32 = arith.constant 0 : i32
    %c0_i32_0 = arith.constant 0 : i32
    %c0_i32_1 = arith.constant 0 : i32
    %c0_i32_2 = arith.constant 0 : i32
    %c0_i32_3 = arith.constant 0 : i32
    return %c0_i32, %c0_i32_0, %c0_i32_1, %c0_i32_2 : i32, i32, i32, i32
  }
  func.func @transform_12(%arg0: i32) -> (i32, i32, i32, i32) {
    %c0_i32 = arith.constant 0 : i32
    %c0_i32_0 = arith.constant 0 : i32
    %c0_i32_1 = arith.constant 0 : i32
    %c0_i32_2 = arith.constant 0 : i32
    %c0_i32_3 = arith.constant 0 : i32
    return %c0_i32, %c0_i32_0, %c0_i32_1, %c0_i32_2 : i32, i32, i32, i32
  }
  func.func @transform_13(%arg0: i32) -> (i32, i32, i32) {
    %c0_i32 = arith.constant 0 : i32
    %c0_i32_0 = arith.constant 0 : i32
    %c0_i32_1 = arith.constant 0 : i32
    %c0_i32_2 = arith.constant 0 : i32
    return %c0_i32, %c0_i32_0, %c0_i32_1 : i32, i32, i32
  }
  func.func @transform_14(%arg0: i32) -> (i32, i32, i32) {
    %c0_i32 = arith.constant 0 : i32
    %c0_i32_0 = arith.constant 0 : i32
    %c0_i32_1 = arith.constant 0 : i32
    %c0_i32_2 = arith.constant 0 : i32
    return %c0_i32, %c0_i32_0, %c0_i32_1 : i32, i32, i32
  }
  func.func @transform_15(%arg0: i32) -> (i32, i32, i32) {
    %c0_i32 = arith.constant 0 : i32
    %c0_i32_0 = arith.constant 0 : i32
    %c0_i32_1 = arith.constant 0 : i32
    %c0_i32_2 = arith.constant 0 : i32
    return %c0_i32, %c0_i32_0, %c0_i32_1 : i32, i32, i32
  }
  func.func @transform_16(%arg0: i32) -> (i32, i32, i32) {
    %c0_i32 = arith.constant 0 : i32
    %c0_i32_0 = arith.constant 0 : i32
    %c0_i32_1 = arith.constant 0 : i32
    %c0_i32_2 = arith.constant 0 : i32
    return %c0_i32, %c0_i32_0, %c0_i32_1 : i32, i32, i32
  }
  func.func @transform_17(%arg0: i32) -> (i32, i32) {
    %c0_i32 = arith.constant 0 : i32
    %c0_i32_0 = arith.constant 0 : i32
    %c0_i32_1 = arith.constant 0 : i32
    return %c0_i32, %c0_i32_0 : i32, i32
  }
  func.func @transform_18(%arg0: i32) -> (i32, i32) {
    %c0_i32 = arith.constant 0 : i32
    %c0_i32_0 = arith.constant 0 : i32
    %c0_i32_1 = arith.constant 0 : i32
    return %c0_i32, %c0_i32_0 : i32, i32
  }
  func.func @transform_19(%arg0: i32) -> (i32, i32) {
    %c0_i32 = arith.constant 0 : i32
    %c0_i32_0 = arith.constant 0 : i32
    %c0_i32_1 = arith.constant 0 : i32
    return %c0_i32, %c0_i32_0 : i32, i32
  }
  func.func @transform_20(%arg0: i32) -> (i32, i32, i32) {
    %c0_i32 = arith.constant 0 : i32
    %c0_i32_0 = arith.constant 0 : i32
    %c0_i32_1 = arith.constant 0 : i32
    return %arg0, %c0_i32, %c0_i32_0 : i32, i32, i32
  }
}

</mosaic_0001>

<bundles_post_ra>
// kernel: _lambda_.1
= control target key start
LH: loop header
LB: loop body
LE: loop exit
PB: predicated region body
PF: predicated region fallthrough
CT: control target
= control target key end

     0   :  { %s34346_s0 = inlined_call_operand.vmem [shape: f32[2,18,18,8], index: 0, kind: input, shape index: {}]   ;;  %s34347_s1 = inlined_call_operand.vmem [shape: f32[9,8,8], index: 1, kind: input, shape index: {}]   ;;  %s34348_s2 = inlined_call_operand.vmem [shape: f32[2,8], index: 2, kind: input, shape index: {}]   ;;  %s34349_s3 = inlined_call_operand.vmem [shape: f32[4,8,16], index: 3, kind: input, shape index: {}]   ;;  %s34350_s4 = inlined_call_operand.vmem [shape: f32[4,16,32], index: 4, kind: input, shape index: {}]   ;;  %s34351_s5 = inlined_call_operand.vmem [shape: f32[4,32,32], index: 5, kind: input, shape index: {}]   ;;  %s34352_s6 = inlined_call_operand.vmem [shape: f32[2,16], index: 6, kind: input, shape index: {}]   ;;  %s34353_s7 = inlined_call_operand.vmem [shape: f32[2,32], index: 7, kind: input, shape index: {}]   ;;  %s34354_s8 = inlined_call_operand.vmem [shape: f32[2,32], index: 8, kind: input, shape index: {}]   ;;  %s34355_s9 = inlined_call_operand.vmem [shape: f32[2,9,8,8], index: 9, kind: input, shape index: {}]   ;;  %s34356_s10 = inlined_call_operand.vmem [shape: f32[2,9,16,16], index: 10, kind: input, shape index: {}]   ;;  %s34357_s11 = inlined_call_operand.vmem [shape: f32[2,9,32,32], index: 11, kind: input, shape index: {}]   ;;  %s34358_s12 = inlined_call_operand.vmem [shape: f32[2,9,32,32], index: 12, kind: input, shape index: {}]   ;;  %s34359_s13 = inlined_call_operand.vmem [shape: f32[2,2,8], index: 13, kind: input, shape index: {}]   ;;  %s34360_s14 = inlined_call_operand.vmem [shape: f32[2,2,16], index: 14, kind: input, shape index: {}]   ;;  %s34361_s15 = inlined_call_operand.vmem [shape: f32[2,2,32], index: 15, kind: input, shape index: {}]   ;;  %s34362_s16 = inlined_call_operand.vmem [shape: f32[2,2,32], index: 16, kind: input, shape index: {}]   ;;  %s34363_s17 = inlined_call_operand.vmem [shape: f32[2,32], index: 17, kind: input, shape index: {}]   ;;  %s34364_s18 = inlined_call_operand.vmem [shape: f32[32,10], index: 18, kind: input, shape index: {}]   ;;  %s34365_s19 = inlined_call_operand.vmem [shape: f32[1,10], index: 19, kind: input, shape index: {}]   ;;  %s34366_s20 = inlined_call_operand.hbm [shape: f32[2,1,10], index: 20, kind: output, shape index: {}]  }
   0x1   :  { %34658 = sst [smem:[#allocation83_spill]] %s34346_s0 }
   0x2   :  { %34659 = sst [smem:[#allocation84_spill]] %s34347_s1 }
   0x3   :  { %34660 = sst [smem:[#allocation85_spill]] %s34348_s2 }
   0x4   :  { %34661 = sst [smem:[#allocation86_spill]] %s34349_s3 }
   0x5   :  { %34662 = sst [smem:[#allocation87_spill]] %s34350_s4 }
   0x6   :  { %34663 = sst [smem:[#allocation88_spill]] %s34351_s5 }
   0x7   :  { %34664 = sst [smem:[#allocation89_spill]] %s34352_s6 }
   0x8   :  { %34665 = sst [smem:[#allocation90_spill]] %s34353_s7 }
   0x9   :  { %34666 = sst [smem:[#allocation91_spill]] %s34355_s9 }
   0xa   :  { %25 = vsyncpa [#allocation7], 0 }
   0xb   :  { %27 = vsyncpa [#allocation7 + $0x1], 0  ;;  %s28043_s1 = smov 0   ;;  %s28045_s22 = smov 0  }
   0xc   :  { %s28047_s23 = smov 0   ;;  %s28049_s24 = smov 0  }
   0xd LB: > { %34667 = sst [smem:[#allocation9_spill]] %s27927_s23  ;;  %s28064_s2 = sadd.s32 4294967295, %s27931_s24   ;;  %s27931_s24 = sphi %s28049_s24, %s35228_s24   ;;  %s27927_s23 = sphi %s28047_s23, %s35230_s23   ;;  %s27923_s22 = sphi %s28045_s22, %s35232_s22   ;;  %s27919_s1 = sphi %s28043_s1, %s35231_s1  }
   0xe   : > { %s21307_s25 = sadd.s32 4294967294, %s27931_s24   ;;  %s28068_s3 = sadd.s32 1, %s27931_s24  }
   0xf   : > { %34668 = sst [smem:[#allocation10_spill]] %s28068_s3  ;;  %s465_s26 = sadd.s32 1, %s27927_s23 }
  0x10   : > { %s462_s27 = ssub.s32 %s27931_s24, %s28068_s3  ;;  %p475_p0 = scmp.ne.s32.totalorder %s27927_s23, %s27923_s22 }
  0x11   : > { %p463_p1 = scmp.eq.s32.totalorder %s462_s27, 0  ;;  %p476_p2 = scmp.eq.s32.totalorder %s28064_s2, 1 }
  0x12   : > { %p481_p3 = scmp.ne.s32.totalorder %s27923_s22, %s27919_s1  ;;  %p482_p4 = scmp.eq.s32.totalorder %s21307_s25, 1 }
  0x13   : > { %s28079_s28 = scalar_select %p463_p1, %s27927_s23, %s465_s26  }
  0x14   : > { %p28081_p5 = por %p476_p2, %p475_p0  ;;  %p28085_p6 = por %p482_p4, %p481_p3 }
  0x15   : > { %34669 = sst [smem:[#allocation11_spill]] %s28079_s28  ;;  %p21310_p7 = scmp.ge.s32.totalorder %s27931_s24, 1 }
  0x16   : > { %s34671_s29 = scalar_select %p28085_p6, 1, 0 }
  0x17   : > { %p565_p8 = scmp.lt.s32.totalorder %s27931_s24, 3 }
  0x18   : > { %34672 = sst [smem:[#allocation12_spill]] %s34671_s29 }
  0x19   : > { %p566_p9 = pnand %p21310_p7, %p565_p8 }
  0x1b   : > { %569 = sbr.rel (%p566_p9) target bundleno = 5607 (0x15e7), region = 100 }
  0x22   : > { %s34673_s21 = sld [smem:[#allocation84_spill]]  ;;  %p622_p10 = scmp.lt.s32.totalorder %s28064_s2, 1  ;;  %vm627_vm0 = vcmask 64512   ;;  %vm630_vm1 = vcmask 58368   ;;  %vm12194_vm2 = vcmask 1041409   ;;  %vm12196_vm3 = vcmask 1042434  }
  0x23   : > { %s34674_s29 = sld [smem:[#allocation83_spill]]  ;;  %s34948_s3 = sld [smem:[#allocation86_spill]]  ;;  %vm12198_vm4 = vcmask 1043459   ;;  %vm12200_vm5 = vcmask 1044484   ;;  %vm12202_vm6 = vcmask 1045509   ;;  %vm12204_vm7 = vcmask 1046534  }
  0x24   : > { %s623_s27 = scalar_select %p622_p10, %s28064_s2, 1  ;;  %vm12206_vm8 = vcmask 1047559   ;;  %vm683_vm9 = vcmask 130048   ;;  %vm685_vm10 = vcmask 123904   ;;  %vm705_vm11 = vcmask 259072  }
  0x25   : > { %s34767_s9 = sld [smem:[#allocation91_spill]]  ;;  %s35219_s6 = sld [smem:[#allocation89_spill]]  ;;  %vm712_vm12 = vcmask 257024   ;;  %vm17286_vm13 = vcmask 261120   ;;  %vm27936_vm14 = vmmov 0   ;;  %vm19472_vm15 = vcmask 254976  }
  0x26   : > { %s27749_s28 = smul.u32 432, %s623_s27  ;;  %s35220_s27 = sld [smem:[#allocation87_spill]] }
  0x27   : > { %s35225_s7 = sld [smem:[#allocation90_spill]]  ;;  %s35226_s5 = sld [smem:[#allocation88_spill]] }
  0x28   : > { %v21312_v0 = vld [vmem:[%s34673_s21 + $0x8] sm:$0xff]  ;;  %v751_v1 = vld [vmem:[%s34673_s21] sm:$0xff]  ;;  %v21377_v5 = vld [vmem:[%s34673_s21 + $0x10] sm:$0xff]  ;;  %s22859_s0 = sshll.u32 %s28064_s2, 4  ;;  %s27937_s2 = smov [#allocation6]  }
  0x29   : > { %24208 = vmatprep.subr.mxu0 %v21312_v0  ;;  %26751 = vmatprep.subr.mxu1 %v21312_v0  ;;  %s28102_s30 = scalar_lea.vmem %s34674_s29, %s27749_s28  ;;  %v28250_v34 = vld [vmem:[%s34673_s21 + $0x18] sm:$0xff]  ;;  %s34768_s29 = sld [smem:[#allocation85_spill]] }
  0x2a   : > { %24209 = vmatpush3.msra.mxu0 %v21312_v0  ;;  %26752 = vmatpush3.msra.mxu1 %v21312_v0  ;;  %v752_v2 = vld [vmem:[%s28102_s30 + $0x1] sm:$0xff]  ;;  %v753_v3 = vld [vmem:[%s28102_s30 + $0x9] sm:$0xff]  ;;  %v28107_v4 = vld [vmem:[%s28102_s30 + $0x19] sm:$0xff]  ;;  %s620_s28 = sand.u32 1, %s27923_s22   ;;  %s34304_s23 = scalar_lea.hbm %s34366_s20, %s22859_s0 }
  0x2b   : > { %24258 = vmatprep.subr.mxu0 %v751_v1  ;;  %24210 = vmatprep.mubr.msk.f32.mxu0 %vm627_vm0, %v752_v2  ;;  %v28117_v6 = vld [vmem:[%s28102_s30 + $0x21] sm:$0xff]  ;;  %v28120_v7 = vld [vmem:[%s28102_s30 + $0x31] sm:$0xff]  ;;  %v28127_v8 = vld [vmem:[%s28102_s30 + $0x39] sm:$0xff] }
  0x2c   : > { %24211 = vmatmul.mubr.msk.f32.vlgmr.msra.gmra.mrb[0].mxu0 %vm627_vm0, %v753_v3  ;;  %v28130_v9 = vld [vmem:[%s28102_s30 + $0x49] sm:$0xff]  ;;  %v28137_v10 = vld [vmem:[%s28102_s30 + $0x51] sm:$0xff]  ;;  %v28140_v11 = vld [vmem:[%s28102_s30 + $0x61] sm:$0xff] }
  0x2d   : > { %24259 = vmatpush3.msra.mxu0 %v751_v1  ;;  %24213 = vmatprep.mubr.msk.f32.mxu0 %vm627_vm0, %v28107_v4  ;;  %v28147_v12 = vld [vmem:[%s28102_s30 + $0x69] sm:$0xff]  ;;  %v28150_v13 = vld [vmem:[%s28102_s30 + $0x79] sm:$0xff]  ;;  %v28157_v14 = vld [vmem:[%s28102_s30 + $0x81] sm:$0xff] }
  0x2e   : > { %24308 = vmatprep.subr.mxu0 %v21377_v5  ;;  %v28160_v15 = vld [vmem:[%s28102_s30 + $0x91] sm:$0xff]  ;;  %v28167_v16 = vld [vmem:[%s28102_s30 + $0x99] sm:$0xff]  ;;  %v28170_v17 = vld [vmem:[%s28102_s30 + $0xa9] sm:$0xff] }
  0x2f   : > { %v28177_v18 = vld [vmem:[%s28102_s30 + $0xb1] sm:$0xff]  ;;  %v28180_v19 = vld [vmem:[%s28102_s30 + $0xc1] sm:$0xff]  ;;  %v28187_v20 = vld [vmem:[%s28102_s30 + $0xc9] sm:$0xff] }
  0x30   : > { %24214 = vmatmul.mubr.msk.f32.gmra.mrb[2].mxu0 %vm627_vm0, %v28117_v6  ;;  %v28190_v21 = vld [vmem:[%s28102_s30 + $0xd9] sm:$0xff]  ;;  %v28197_v22 = vld [vmem:[%s28102_s30 + $0xe1] sm:$0xff]  ;;  %v28200_v23 = vld [vmem:[%s28102_s30 + $0xf1] sm:$0xff] }
  0x31   : > { %24216 = vmatprep.mubr.msk.f32.mxu0 %vm627_vm0, %v28120_v7  ;;  %v28207_v24 = vld [vmem:[%s28102_s30 + $0xf9] sm:$0xff]  ;;  %v28210_v25 = vld [vmem:[%s28102_s30 + $0x109] sm:$0xff]  ;;  %v28217_v26 = vld [vmem:[%s28102_s30 + $0x111] sm:$0xff] }
  0x32   : > { %v28220_v27 = vld [vmem:[%s28102_s30 + $0x121] sm:$0xff]  ;;  %v28227_v28 = vld [vmem:[%s28102_s30 + $0x129] sm:$0xff]  ;;  %v28230_v29 = vld [vmem:[%s28102_s30 + $0x139] sm:$0xff] }
  0x33   : > { %34675 = vst [vmem:[#allocation13_spill] sm:$0xff] %v28230_v29  ;;  %v28237_v30 = vld [vmem:[%s28102_s30 + $0x141] sm:$0xff]  ;;  %v28245_v33 = vld [vmem:[%s28102_s30 + $0x18] sm:$0xff]  ;;  %v28259_v36 = vld [vmem:[%s28102_s30 + $0x30] sm:$0xff] }
  0x34   : > { %24217 = vmatmul.mubr.msk.f32.gmra.mrb[4].mxu0 %vm627_vm0, %v28127_v8  ;;  %34676 = vst [vmem:[#allocation14_spill] sm:$0xff] %v28237_v30  ;;  %v719_v31 = vld [vmem:[%s28102_s30] sm:$0xff]  ;;  %v720_v32 = vld [vmem:[%s28102_s30 + $0x8] sm:$0xff]  ;;  %v28267_v37 = vld [vmem:[%s28102_s30 + $0x38] sm:$0xff] }
  0x35   : > { %24219 = vmatprep.mubr.msk.f32.mxu0 %vm627_vm0, %v28130_v9  ;;  %v28256_v35 = vld [vmem:[%s28102_s30 + $0x20] sm:$0xff]  ;;  %v28270_v38 = vld [vmem:[%s28102_s30 + $0x48] sm:$0xff]  ;;  %v28277_v39 = vld [vmem:[%s28102_s30 + $0x50] sm:$0xff] }
  0x36   : > { %v28280_v40 = vld [vmem:[%s28102_s30 + $0x60] sm:$0xff]  ;;  %v28287_v41 = vld [vmem:[%s28102_s30 + $0x68] sm:$0xff]  ;;  %v28290_v42 = vld [vmem:[%s28102_s30 + $0x78] sm:$0xff] }
  0x37   : > { %v28297_v43 = vld [vmem:[%s28102_s30 + $0x80] sm:$0xff]  ;;  %v28300_v44 = vld [vmem:[%s28102_s30 + $0x90] sm:$0xff]  ;;  %v28307_v45 = vld [vmem:[%s28102_s30 + $0x98] sm:$0xff] }
  0x38   : > { %24220 = vmatmul.mubr.msk.f32.gmra.mrb[6].mxu0 %vm627_vm0, %v28137_v10  ;;  %v28310_v46 = vld [vmem:[%s28102_s30 + $0xa8] sm:$0xff]  ;;  %v28317_v47 = vld [vmem:[%s28102_s30 + $0xb0] sm:$0xff]  ;;  %v28320_v48 = vld [vmem:[%s28102_s30 + $0xc0] sm:$0xff] }
  0x39   : > { %24222 = vmatprep.mubr.msk.f32.mxu0 %vm627_vm0, %v28140_v11  ;;  %v28327_v49 = vld [vmem:[%s28102_s30 + $0xc8] sm:$0xff]  ;;  %v28330_v50 = vld [vmem:[%s28102_s30 + $0xd8] sm:$0xff]  ;;  %v28337_v51 = vld [vmem:[%s28102_s30 + $0xe0] sm:$0xff] }
  0x3a   : > { %v28340_v52 = vld [vmem:[%s28102_s30 + $0xf0] sm:$0xff]  ;;  %v28347_v53 = vld [vmem:[%s28102_s30 + $0xf8] sm:$0xff]  ;;  %v28350_v54 = vld [vmem:[%s28102_s30 + $0x108] sm:$0xff] }
  0x3b   : > { %v28357_v55 = vld [vmem:[%s28102_s30 + $0x110] sm:$0xff]  ;;  %v28360_v56 = vld [vmem:[%s28102_s30 + $0x120] sm:$0xff]  ;;  %v28367_v57 = vld [vmem:[%s28102_s30 + $0x128] sm:$0xff] }
  0x3c   : > { %24223 = vmatmul.mubr.msk.f32.gmra.mrb[8].mxu0 %vm627_vm0, %v28147_v12  ;;  %v28370_v58 = vld [vmem:[%s28102_s30 + $0x138] sm:$0xff]  ;;  %v28377_v59 = vld [vmem:[%s28102_s30 + $0x140] sm:$0xff]  ;;  %v28380_v60 = vld [vmem:[%s28102_s30 + $0x150] sm:$0xff] }
  0x3d   : > { %24225 = vmatprep.mubr.msk.f32.mxu0 %vm627_vm0, %v28150_v13  ;;  %v28387_v61 = vld [vmem:[%s28102_s30 + $0x158] sm:$0xff]  ;;  %v28390_v62 = vld [vmem:[%s28102_s30 + $0x168] sm:$0xff]  ;;  %v28397_v63 = vld [vmem:[%s28102_s30 + $0x170] sm:$0xff] }
  0x3e   : > { %v1428_v0 = vld [vmem:[%s28102_s30 + $0x2] sm:$0xff]  ;;  %v1429_v1 = vld [vmem:[%s28102_s30 + $0xa] sm:$0xff]  ;;  %v28405_v2 = vld [vmem:[%s28102_s30 + $0x1a] sm:$0xff] }
  0x3f   : > { %34677 = vst [vmem:[#allocation15_spill] sm:$0xff] %v28405_v2  ;;  %v28410_v3 = vld [vmem:[%s34673_s21 + $0x20] sm:$0xff] }
  0x40   : > { %24226 = vmatmul.mubr.msk.f32.gmra.mrb[10].mxu0 %vm627_vm0, %v28157_v14 }
  0x41   : > { %24228 = vmatprep.mubr.msk.f32.mxu0 %vm627_vm0, %v28160_v15 }
  0x44   : > { %24229 = vmatmul.mubr.msk.f32.gmra.mrb[12].mxu0 %vm627_vm0, %v28167_v16 }
  0x45   : > { %24231 = vmatprep.mubr.msk.f32.mxu0 %vm627_vm0, %v28170_v17 }
  0x48   : > { %24232 = vmatmul.mubr.msk.f32.gmra.mrb[14].mxu0 %vm627_vm0, %v28177_v18 }
  0x49   : > { %24234 = vmatprep.mubr.msk.f32.mxu0 %vm627_vm0, %v28180_v19 }
  0x4c   : > { %24235 = vmatmul.mubr.msk.f32.gmra.mrb[16].mxu0 %vm627_vm0, %v28187_v20 }
  0x4d   : > { %24237 = vmatprep.mubr.msk.f32.mxu0 %vm627_vm0, %v28190_v21 }
  0x50   : > { %24238 = vmatmul.mubr.msk.f32.gmra.mrb[18].mxu0 %vm627_vm0, %v28197_v22 }
  0x51   : > { %24240 = vmatprep.mubr.msk.f32.mxu0 %vm627_vm0, %v28200_v23 }
  0x54   : > { %24241 = vmatmul.mubr.msk.f32.gmra.mrb[20].mxu0 %vm627_vm0, %v28207_v24 }
  0x55   : > { %24243 = vmatprep.mubr.msk.f32.mxu0 %vm627_vm0, %v28210_v25 }
  0x58   : > { %24244 = vmatmul.mubr.msk.f32.gmra.mrb[22].mxu0 %vm627_vm0, %v28217_v26 }
  0x59   : > { %24246 = vmatprep.mubr.msk.f32.mxu0 %vm627_vm0, %v28220_v27 }
  0x5c   : > { %24247 = vmatmul.mubr.msk.f32.gmra.mrb[24].mxu0 %vm627_vm0, %v28227_v28 }
  0x5d   : > { %24249 = vmatprep.mubr.msk.f32.mxu0 %vm627_vm0, %v28230_v29 }
  0x60   : > { %24250 = vmatmul.mubr.msk.f32.gmra.mrb[26].mxu0 %vm627_vm0, %v28237_v30 }
  0x61   : > { %24260 = vmatprep.mubr.msk.f32.mxu0 %vm627_vm0, %v719_v31  ;;  %v28420_v31 = vld [vmem:[%s28102_s30 + $0x32] sm:$0xff] }
  0x62   : > { %34679 = vst [vmem:[#allocation17_spill] sm:$0xff] %v28420_v31 }
  0x64   : > { %24261 = vmatmul.mubr.msk.f32.vlgmr.msra.gmra.mrb[0].mxu0 %vm627_vm0, %v720_v32  ;;  %v28428_v32 = vld [vmem:[%s28102_s30 + $0x3a] sm:$0xff] }
  0x65   : > { %24309 = vmatpush3.msra.mxu0 %v21377_v5  ;;  %24263 = vmatprep.mubr.msk.f32.mxu0 %vm627_vm0, %v28245_v33  ;;  %v28417_v5 = vld [vmem:[%s28102_s30 + $0x22] sm:$0xff]  ;;  %34680 = vst [vmem:[#allocation18_spill] sm:$0xff] %v28428_v32 }
  0x66   : > { %24358 = vmatprep.subr.mxu0 %v28250_v34  ;;  %34678 = vst [vmem:[#allocation16_spill] sm:$0xff] %v28417_v5 }
  0x68   : > { %24264 = vmatmul.mubr.msk.f32.gmra.mrb[2].mxu0 %vm627_vm0, %v28256_v35 }
  0x69   : > { %24266 = vmatprep.mubr.msk.f32.mxu0 %vm627_vm0, %v28259_v36 }
  0x6c   : > { %24267 = vmatmul.mubr.msk.f32.gmra.mrb[4].mxu0 %vm627_vm0, %v28267_v37 }
  0x6d   : > { %24269 = vmatprep.mubr.msk.f32.mxu0 %vm627_vm0, %v28270_v38 }
  0x70   : > { %24270 = vmatmul.mubr.msk.f32.gmra.mrb[6].mxu0 %vm627_vm0, %v28277_v39 }
  0x71   : > { %24272 = vmatprep.mubr.msk.f32.mxu0 %vm627_vm0, %v28280_v40 }
  0x74   : > { %24273 = vmatmul.mubr.msk.f32.gmra.mrb[8].mxu0 %vm627_vm0, %v28287_v41 }
  0x75   : > { %24275 = vmatprep.mubr.msk.f32.mxu0 %vm627_vm0, %v28290_v42 }
  0x78   : > { %24276 = vmatmul.mubr.msk.f32.gmra.mrb[10].mxu0 %vm627_vm0, %v28297_v43 }
  0x79   : > { %24278 = vmatprep.mubr.msk.f32.mxu0 %vm627_vm0, %v28300_v44 }
  0x7c   : > { %24279 = vmatmul.mubr.msk.f32.gmra.mrb[12].mxu0 %vm627_vm0, %v28307_v45 }
  0x7d   : > { %24281 = vmatprep.mubr.msk.f32.mxu0 %vm627_vm0, %v28310_v46 }
  0x80   : > { %24282 = vmatmul.mubr.msk.f32.gmra.mrb[14].mxu0 %vm627_vm0, %v28317_v47 }
  0x81   : > { %24284 = vmatprep.mubr.msk.f32.mxu0 %vm627_vm0, %v28320_v48 }
  0x84   : > { %24285 = vmatmul.mubr.msk.f32.gmra.mrb[16].mxu0 %vm627_vm0, %v28327_v49 }
  0x85   : > { %24287 = vmatprep.mubr.msk.f32.mxu0 %vm627_vm0, %v28330_v50 }
  0x88   : > { %24288 = vmatmul.mubr.msk.f32.gmra.mrb[18].mxu0 %vm627_vm0, %v28337_v51 }
  0x89   : > { %24290 = vmatprep.mubr.msk.f32.mxu0 %vm627_vm0, %v28340_v52 }
  0x8c   : > { %24291 = vmatmul.mubr.msk.f32.gmra.mrb[20].mxu0 %vm627_vm0, %v28347_v53 }
  0x8d   : > { %24293 = vmatprep.mubr.msk.f32.mxu0 %vm627_vm0, %v28350_v54 }
  0x90   : > { %24294 = vmatmul.mubr.msk.f32.gmra.mrb[22].mxu0 %vm627_vm0, %v28357_v55 }
  0x91   : > { %24296 = vmatprep.mubr.msk.f32.mxu0 %vm627_vm0, %v28360_v56 }
  0x94   : > { %24297 = vmatmul.mubr.msk.f32.gmra.mrb[24].mxu0 %vm627_vm0, %v28367_v57 }
  0x95   : > { %24299 = vmatprep.mubr.msk.f32.mxu0 %vm627_vm0, %v28370_v58 }
  0x98   : > { %24300 = vmatmul.mubr.msk.f32.gmra.mrb[26].mxu0 %vm627_vm0, %v28377_v59 }
  0x99   : > { %24302 = vmatprep.mubr.msk.f32.mxu0 %vm627_vm0, %v28380_v60 }
  0x9c   : > { %24303 = vmatmul.mubr.msk.f32.gmra.mrb[28].mxu0 %vm627_vm0, %v28387_v61 }
  0x9d   : > { %24305 = vmatprep.mubr.msk.f32.mxu0 %vm627_vm0, %v28390_v62 }
  0xa0   : > { %24306 = vmatmul.mubr.msk.f32.gmra.mrb[30].mxu0 %vm627_vm0, %v28397_v63 }
  0xa1   : > { %24310 = vmatprep.mubr.msk.f32.mxu0 %vm627_vm0, %v1428_v0  ;;  %v28438_v0 = vld [vmem:[%s28102_s30 + $0x52] sm:$0xff] }
  0xa2   : > { %34682 = vst [vmem:[#allocation20_spill] sm:$0xff] %v28438_v0 }
  0xa4   : > { %24311 = vmatmul.mubr.msk.f32.vlgmr.msra.gmra.mrb[0].mxu0 %vm627_vm0, %v1429_v1  ;;  %v28441_v1 = vld [vmem:[%s28102_s30 + $0x62] sm:$0xff] }
  0xa5   : > { %24359 = vmatpush3.msra.mxu0 %v28250_v34  ;;  %24313 = vmatprep.mubr.msk.f32.mxu0 %vm627_vm0, %v28405_v2  ;;  %v28431_v34 = vld [vmem:[%s28102_s30 + $0x4a] sm:$0xff]  ;;  %34683 = vst [vmem:[#allocation21_spill] sm:$0xff] %v28441_v1 }
  0xa6   : > { %24408 = vmatprep.subr.mxu0 %v28410_v3  ;;  %34681 = vst [vmem:[#allocation19_spill] sm:$0xff] %v28431_v34  ;;  %v28564_v2 = vld [vmem:[%s28102_s30 + $0x171] sm:$0xff] }
  0xa7   : > { %34707 = vst [vmem:[#allocation45_spill] sm:$0xff] %v28564_v2 }
  0xa8   : > { %24314 = vmatmul.mubr.msk.f32.gmra.mrb[2].mxu0 %vm627_vm0, %v28417_v5  ;;  %v28451_v5 = vld [vmem:[%s28102_s30 + $0x7a] sm:$0xff] }
  0xa9   : > { %24316 = vmatprep.mubr.msk.f32.mxu0 %vm627_vm0, %v28420_v31  ;;  %v28448_v31 = vld [vmem:[%s28102_s30 + $0x6a] sm:$0xff]  ;;  %34685 = vst [vmem:[#allocation23_spill] sm:$0xff] %v28451_v5 }
  0xaa   : > { %34684 = vst [vmem:[#allocation22_spill] sm:$0xff] %v28448_v31 }
  0xac   : > { %24317 = vmatmul.mubr.msk.f32.gmra.mrb[4].mxu0 %vm627_vm0, %v28428_v32  ;;  %v28461_v32 = vld [vmem:[%s28102_s30 + $0x92] sm:$0xff] }
  0xad   : > { %24319 = vmatprep.mubr.msk.f32.mxu0 %vm627_vm0, %v28431_v34  ;;  %v28458_v34 = vld [vmem:[%s28102_s30 + $0x82] sm:$0xff]  ;;  %34687 = vst [vmem:[#allocation25_spill] sm:$0xff] %v28461_v32 }
  0xae   : > { %34686 = vst [vmem:[#allocation24_spill] sm:$0xff] %v28458_v34 }
  0xb0   : > { %24320 = vmatmul.mubr.msk.f32.gmra.mrb[6].mxu0 %vm627_vm0, %v28438_v0  ;;  %v28471_v0 = vld [vmem:[%s28102_s30 + $0xaa] sm:$0xff] }
  0xb1   : > { %24322 = vmatprep.mubr.msk.f32.mxu0 %vm627_vm0, %v28441_v1  ;;  %v28468_v1 = vld [vmem:[%s28102_s30 + $0x9a] sm:$0xff]  ;;  %34689 = vst [vmem:[#allocation27_spill] sm:$0xff] %v28471_v0 }
  0xb2   : > { %34688 = vst [vmem:[#allocation26_spill] sm:$0xff] %v28468_v1 }
  0xb4   : > { %24323 = vmatmul.mubr.msk.f32.gmra.mrb[8].mxu0 %vm627_vm0, %v28448_v31  ;;  %v28481_v31 = vld [vmem:[%s28102_s30 + $0xc2] sm:$0xff] }
  0xb5   : > { %24325 = vmatprep.mubr.msk.f32.mxu0 %vm627_vm0, %v28451_v5  ;;  %v28478_v5 = vld [vmem:[%s28102_s30 + $0xb2] sm:$0xff]  ;;  %34691 = vst [vmem:[#allocation29_spill] sm:$0xff] %v28481_v31 }
  0xb6   : > { %34690 = vst [vmem:[#allocation28_spill] sm:$0xff] %v28478_v5 }
  0xb8   : > { %24326 = vmatmul.mubr.msk.f32.gmra.mrb[10].mxu0 %vm627_vm0, %v28458_v34  ;;  %v28491_v34 = vld [vmem:[%s28102_s30 + $0xda] sm:$0xff] }
  0xb9   : > { %24328 = vmatprep.mubr.msk.f32.mxu0 %vm627_vm0, %v28461_v32  ;;  %v28488_v32 = vld [vmem:[%s28102_s30 + $0xca] sm:$0xff]  ;;  %34693 = vst [vmem:[#allocation31_spill] sm:$0xff] %v28491_v34 }
  0xba   : > { %34692 = vst [vmem:[#allocation30_spill] sm:$0xff] %v28488_v32 }
  0xbc   : > { %24329 = vmatmul.mubr.msk.f32.gmra.mrb[12].mxu0 %vm627_vm0, %v28468_v1  ;;  %v28501_v1 = vld [vmem:[%s28102_s30 + $0xf2] sm:$0xff] }
  0xbd   : > { %24331 = vmatprep.mubr.msk.f32.mxu0 %vm627_vm0, %v28471_v0  ;;  %v28498_v0 = vld [vmem:[%s28102_s30 + $0xe2] sm:$0xff]  ;;  %34695 = vst [vmem:[#allocation33_spill] sm:$0xff] %v28501_v1 }
  0xbe   : > { %34694 = vst [vmem:[#allocation32_spill] sm:$0xff] %v28498_v0 }
  0xc0   : > { %24332 = vmatmul.mubr.msk.f32.gmra.mrb[14].mxu0 %vm627_vm0, %v28478_v5  ;;  %v28521_v5 = vld [vmem:[%s28102_s30 + $0x122] sm:$0xff] }
  0xc1   : > { %24334 = vmatprep.mubr.msk.f32.mxu0 %vm627_vm0, %v28481_v31  ;;  %v28508_v31 = vld [vmem:[%s28102_s30 + $0xfa] sm:$0xff]  ;;  %34699 = vst [vmem:[#allocation37_spill] sm:$0xff] %v28521_v5 }
  0xc2   : > { %34696 = vst [vmem:[#allocation34_spill] sm:$0xff] %v28508_v31 }
  0xc4   : > { %24335 = vmatmul.mubr.msk.f32.gmra.mrb[16].mxu0 %vm627_vm0, %v28488_v32  ;;  %v28511_v32 = vld [vmem:[%s28102_s30 + $0x10a] sm:$0xff] }
  0xc5   : > { %24337 = vmatprep.mubr.msk.f32.mxu0 %vm627_vm0, %v28491_v34  ;;  %34697 = vst [vmem:[#allocation35_spill] sm:$0xff] %v28511_v32  ;;  %v28518_v34 = vld [vmem:[%s28102_s30 + $0x112] sm:$0xff] }
  0xc6   : > { %34698 = vst [vmem:[#allocation36_spill] sm:$0xff] %v28518_v34 }
  0xc8   : > { %24338 = vmatmul.mubr.msk.f32.gmra.mrb[18].mxu0 %vm627_vm0, %v28498_v0  ;;  %v28541_v0 = vld [vmem:[%s28102_s30 + $0x142] sm:$0xff] }
  0xc9   : > { %24340 = vmatprep.mubr.msk.f32.mxu0 %vm627_vm0, %v28501_v1  ;;  %v28528_v1 = vld [vmem:[%s28102_s30 + $0x12a] sm:$0xff]  ;;  %34703 = vst [vmem:[#allocation41_spill] sm:$0xff] %v28541_v0 }
  0xca   : > { %34700 = vst [vmem:[#allocation38_spill] sm:$0xff] %v28528_v1 }
  0xcc   : > { %24341 = vmatmul.mubr.msk.f32.gmra.mrb[20].mxu0 %vm627_vm0, %v28508_v31  ;;  %v28531_v31 = vld [vmem:[%s28102_s30 + $0x13a] sm:$0xff] }
  0xcd   : > { %24343 = vmatprep.mubr.msk.f32.mxu0 %vm627_vm0, %v28511_v32  ;;  %34701 = vst [vmem:[#allocation39_spill] sm:$0xff] %v28531_v31  ;;  %v28536_v32 = vld [vmem:[%s28102_s30 + $0x151] sm:$0xff] }
  0xce   : > { %34702 = vst [vmem:[#allocation40_spill] sm:$0xff] %v28536_v32  ;;  %24252 = vmatprep.mubr.msk.f32.mxu1 %vm627_vm0, %v28536_v32  ;;  %v28569_v32 = vld [vmem:[%s28102_s30 + $0x16a] sm:$0xff] }
  0xcf   : > { %34708 = vst [vmem:[#allocation46_spill] sm:$0xff] %v28569_v32 }
  0xd0   : > { %24344 = vmatmul.mubr.msk.f32.gmra.mrb[22].mxu0 %vm627_vm0, %v28518_v34  ;;  %v28544_v34 = vld [vmem:[%s28102_s30 + $0x159] sm:$0xff] }
  0xd1   : > { %24346 = vmatprep.mubr.msk.f32.mxu0 %vm627_vm0, %v28521_v5  ;;  %34704 = vst [vmem:[#allocation42_spill] sm:$0xff] %v28544_v34  ;;  %v28549_v5 = vld [vmem:[%s28102_s30 + $0x152] sm:$0xff]  ;;  %24253 = vmatmul.mubr.msk.f32.vlgmr.msra.gmra.mrb[0].mxu1 %vm627_vm0, %v28544_v34 }
  0xd2   : > { %34705 = vst [vmem:[#allocation43_spill] sm:$0xff] %v28549_v5 }
  0xd4   : > { %24347 = vmatmul.mubr.msk.f32.gmra.mrb[24].mxu0 %vm627_vm0, %v28528_v1  ;;  %v28556_v1 = vld [vmem:[%s28102_s30 + $0x169] sm:$0xff] }
  0xd5   : > { %24349 = vmatprep.mubr.msk.f32.mxu0 %vm627_vm0, %v28531_v31  ;;  %34706 = vst [vmem:[#allocation44_spill] sm:$0xff] %v28556_v1  ;;  %v28561_v31 = vld [vmem:[%s28102_s30 + $0x15a] sm:$0xff]  ;;  %24255 = vmatprep.mubr.msk.f32.mxu1 %vm627_vm0, %v28556_v1 }
  0xd6   : > { %24256 = vmatmul.mubr.msk.f32.gmra.mrb[2].mxu1 %vm627_vm0, %v28564_v2 }
  0xd8   : > { %24350 = vmatmul.mubr.msk.f32.gmra.mrb[26].mxu0 %vm627_vm0, %v28541_v0  ;;  %v28578_v0 = vld [vmem:[%s28102_s30 + $0x172] sm:$0xff] }
  0xd9   : > { %24352 = vmatprep.mubr.msk.f32.mxu0 %vm627_vm0, %v28549_v5  ;;  %v21572_v5 = vld [vmem:[%s34673_s21 + $0x28] sm:$0xff] }
  0xdc   : > { %24353 = vmatmul.mubr.msk.f32.gmra.mrb[28].mxu0 %vm627_vm0, %v28561_v31 }
  0xdd   : > { %24355 = vmatprep.mubr.msk.f32.mxu0 %vm627_vm0, %v28569_v32 }
  0xe0   : > { %24356 = vmatmul.mubr.msk.f32.gmra.mrb[30].mxu0 %vm627_vm0, %v28578_v0 }
  0xe1   : > { %24360 = vmatprep.mubr.msk.f32.mxu0 %vm627_vm0, %v28245_v33  ;;  %v28645_v33 = vld [vmem:[%s28102_s30 + $0x180] sm:$0xff] }
  0xe4   : > { %24361 = vmatmul.mubr.msk.f32.vlgmr.msra.gmra.mrb[0].mxu0 %vm627_vm0, %v28256_v35  ;;  %v28652_v35 = vld [vmem:[%s28102_s30 + $0x188] sm:$0xff] }
  0xe5   : > { %24409 = vmatpush3.msra.mxu0 %v28410_v3  ;;  %24363 = vmatprep.mubr.msk.f32.mxu0 %vm627_vm0, %v28259_v36  ;;  %v21637_v3 = vld [vmem:[%s34673_s21 + $0x30] sm:$0xff] }
  0xe6   : > { %24458 = vmatprep.subr.mxu0 %v21572_v5 }
  0xe8   : > { %24364 = vmatmul.mubr.msk.f32.gmra.mrb[2].mxu0 %vm627_vm0, %v28267_v37 }
  0xe9   : > { %24366 = vmatprep.mubr.msk.f32.mxu0 %vm627_vm0, %v28270_v38 }
  0xec   : > { %24367 = vmatmul.mubr.msk.f32.gmra.mrb[4].mxu0 %vm627_vm0, %v28277_v39 }
  0xed   : > { %24369 = vmatprep.mubr.msk.f32.mxu0 %vm627_vm0, %v28280_v40 }
  0xf0   : > { %24370 = vmatmul.mubr.msk.f32.gmra.mrb[6].mxu0 %vm627_vm0, %v28287_v41 }
  0xf1   : > { %24372 = vmatprep.mubr.msk.f32.mxu0 %vm627_vm0, %v28290_v42 }
  0xf4   : > { %24373 = vmatmul.mubr.msk.f32.gmra.mrb[8].mxu0 %vm627_vm0, %v28297_v43 }
  0xf5   : > { %24375 = vmatprep.mubr.msk.f32.mxu0 %vm627_vm0, %v28300_v44 }
  0xf8   : > { %24376 = vmatmul.mubr.msk.f32.gmra.mrb[10].mxu0 %vm627_vm0, %v28307_v45 }
  0xf9   : > { %24378 = vmatprep.mubr.msk.f32.mxu0 %vm627_vm0, %v28310_v46 }
  0xfc   : > { %24379 = vmatmul.mubr.msk.f32.gmra.mrb[12].mxu0 %vm627_vm0, %v28317_v47 }
  0xfd   : > { %24381 = vmatprep.mubr.msk.f32.mxu0 %vm627_vm0, %v28320_v48 }
 0x100   : > { %24382 = vmatmul.mubr.msk.f32.gmra.mrb[14].mxu0 %vm627_vm0, %v28327_v49 }
 0x101   : > { %24384 = vmatprep.mubr.msk.f32.mxu0 %vm627_vm0, %v28330_v50 }
 0x104   : > { %24385 = vmatmul.mubr.msk.f32.gmra.mrb[16].mxu0 %vm627_vm0, %v28337_v51 }
 0x105   : > { %24387 = vmatprep.mubr.msk.f32.mxu0 %vm627_vm0, %v28340_v52 }
 0x108   : > { %24388 = vmatmul.mubr.msk.f32.gmra.mrb[18].mxu0 %vm627_vm0, %v28347_v53 }
 0x109   : > { %24390 = vmatprep.mubr.msk.f32.mxu0 %vm627_vm0, %v28350_v54 }
 0x10c   : > { %24391 = vmatmul.mubr.msk.f32.gmra.mrb[20].mxu0 %vm627_vm0, %v28357_v55 }
 0x10d   : > { %24393 = vmatprep.mubr.msk.f32.mxu0 %vm627_vm0, %v28360_v56 }
 0x110   : > { %24394 = vmatmul.mubr.msk.f32.gmra.mrb[22].mxu0 %vm627_vm0, %v28367_v57 }
 0x111   : > { %24396 = vmatprep.mubr.msk.f32.mxu0 %vm627_vm0, %v28370_v58 }
 0x114   : > { %24397 = vmatmul.mubr.msk.f32.gmra.mrb[24].mxu0 %vm627_vm0, %v28377_v59 }
 0x115   : > { %24399 = vmatprep.mubr.msk.f32.mxu0 %vm627_vm0, %v28380_v60 }
 0x118   : > { %24400 = vmatmul.mubr.msk.f32.gmra.mrb[26].mxu0 %vm627_vm0, %v28387_v61 }
 0x119   : > { %24402 = vmatprep.mubr.msk.f32.mxu0 %vm627_vm0, %v28390_v62 }
 0x11c   : > { %24403 = vmatmul.mubr.msk.f32.gmra.mrb[28].mxu0 %vm627_vm0, %v28397_v63 }
 0x11d   : > { %24405 = vmatprep.mubr.msk.f32.mxu0 %vm627_vm0, %v28645_v33 }
 0x120   : > { %24406 = vmatmul.mubr.msk.f32.gmra.mrb[30].mxu0 %vm627_vm0, %v28652_v35 }
 0x121   : > { %24410 = vmatprep.mubr.msk.f32.mxu0 %vm627_vm0, %v28107_v4  ;;  %v34709_v4 = vld [vmem:[#allocation40_spill] sm:$0xff] }
 0x124   : > { %24411 = vmatmul.mubr.msk.f32.vlgmr.msra.gmra.mrb[0].mxu0 %vm627_vm0, %v28117_v6  ;;  %v28718_v6 = vld [vmem:[%s28102_s30 + $0x181] sm:$0xff] }
 0x125   : > { %24459 = vmatpush3.msra.mxu0 %v21572_v5  ;;  %24413 = vmatprep.mubr.msk.f32.mxu0 %vm627_vm0, %v28120_v7  ;;  %34710 = vst [vmem:[#allocation47_spill] sm:$0xff] %v28718_v6  ;;  %v28725_v5 = vld [vmem:[%s28102_s30 + $0x189] sm:$0xff] }
 0x126   : > { %24508 = vmatprep.subr.mxu0 %v21637_v3  ;;  %34711 = vst [vmem:[#allocation48_spill] sm:$0xff] %v28725_v5 }
 0x128   : > { %24414 = vmatmul.mubr.msk.f32.gmra.mrb[2].mxu0 %vm627_vm0, %v28127_v8 }
 0x129   : > { %24416 = vmatprep.mubr.msk.f32.mxu0 %vm627_vm0, %v28130_v9 }
 0x12c   : > { %24417 = vmatmul.mubr.msk.f32.gmra.mrb[4].mxu0 %vm627_vm0, %v28137_v10 }
 0x12d   : > { %24419 = vmatprep.mubr.msk.f32.mxu0 %vm627_vm0, %v28140_v11 }
 0x130   : > { %24420 = vmatmul.mubr.msk.f32.gmra.mrb[6].mxu0 %vm627_vm0, %v28147_v12 }
 0x131   : > { %24422 = vmatprep.mubr.msk.f32.mxu0 %vm627_vm0, %v28150_v13 }
 0x134   : > { %24423 = vmatmul.mubr.msk.f32.gmra.mrb[8].mxu0 %vm627_vm0, %v28157_v14 }
 0x135   : > { %24425 = vmatprep.mubr.msk.f32.mxu0 %vm627_vm0, %v28160_v15 }
 0x138   : > { %24426 = vmatmul.mubr.msk.f32.gmra.mrb[10].mxu0 %vm627_vm0, %v28167_v16 }
 0x139   : > { %24428 = vmatprep.mubr.msk.f32.mxu0 %vm627_vm0, %v28170_v17 }
 0x13c   : > { %24429 = vmatmul.mubr.msk.f32.gmra.mrb[12].mxu0 %vm627_vm0, %v28177_v18 }
 0x13d   : > { %24431 = vmatprep.mubr.msk.f32.mxu0 %vm627_vm0, %v28180_v19 }
 0x140   : > { %24432 = vmatmul.mubr.msk.f32.gmra.mrb[14].mxu0 %vm627_vm0, %v28187_v20 }
 0x141   : > { %24434 = vmatprep.mubr.msk.f32.mxu0 %vm627_vm0, %v28190_v21 }
 0x144   : > { %24435 = vmatmul.mubr.msk.f32.gmra.mrb[16].mxu0 %vm627_vm0, %v28197_v22 }
 0x145   : > { %24437 = vmatprep.mubr.msk.f32.mxu0 %vm627_vm0, %v28200_v23 }
 0x148   : > { %24438 = vmatmul.mubr.msk.f32.gmra.mrb[18].mxu0 %vm627_vm0, %v28207_v24 }
 0x149   : > { %24440 = vmatprep.mubr.msk.f32.mxu0 %vm627_vm0, %v28210_v25 }
 0x14c   : > { %24441 = vmatmul.mubr.msk.f32.gmra.mrb[20].mxu0 %vm627_vm0, %v28217_v26 }
 0x14d   : > { %24443 = vmatprep.mubr.msk.f32.mxu0 %vm627_vm0, %v28220_v27 }
 0x150   : > { %24444 = vmatmul.mubr.msk.f32.gmra.mrb[22].mxu0 %vm627_vm0, %v28227_v28 }
 0x151   : > { %24446 = vmatprep.mubr.msk.f32.mxu0 %vm627_vm0, %v28230_v29  ;;  %v34719_v29 = vld [vmem:[#allocation22_spill] sm:$0xff] }
 0x154   : > { %24447 = vmatmul.mubr.msk.f32.gmra.mrb[24].mxu0 %vm627_vm0, %v28237_v30  ;;  %v34716_v30 = vld [vmem:[#allocation19_spill] sm:$0xff] }
 0x155   : > { %24449 = vmatprep.mubr.msk.f32.mxu0 %vm627_vm0, %v34709_v4  ;;  %v34712_v4 = vld [vmem:[#allocation15_spill] sm:$0xff] }
 0x158   : > { %24450 = vmatmul.mubr.msk.f32.gmra.mrb[26].mxu0 %vm627_vm0, %v28544_v34  ;;  %v34713_v34 = vld [vmem:[#allocation16_spill] sm:$0xff] }
 0x159   : > { %24452 = vmatprep.mubr.msk.f32.mxu0 %vm627_vm0, %v28556_v1  ;;  %v21702_v1 = vld [vmem:[%s34673_s21 + $0x38] sm:$0xff] }
 0x15c   : > { %24453 = vmatmul.mubr.msk.f32.gmra.mrb[28].mxu0 %vm627_vm0, %v28564_v2  ;;  %v34714_v2 = vld [vmem:[#allocation17_spill] sm:$0xff] }
 0x15d   : > { %24455 = vmatprep.mubr.msk.f32.mxu0 %vm627_vm0, %v28718_v6  ;;  %v34715_v6 = vld [vmem:[#allocation18_spill] sm:$0xff] }
 0x160   : > { %24456 = vmatmul.mubr.msk.f32.gmra.mrb[30].mxu0 %vm627_vm0, %v28725_v5  ;;  %v34717_v5 = vld [vmem:[#allocation20_spill] sm:$0xff] }
 0x161   : > { %24460 = vmatprep.mubr.msk.f32.mxu0 %vm627_vm0, %v34712_v4  ;;  %v34718_v4 = vld [vmem:[#allocation21_spill] sm:$0xff] }
 0x164   : > { %24461 = vmatmul.mubr.msk.f32.vlgmr.msra.gmra.mrb[0].mxu0 %vm627_vm0, %v34713_v34  ;;  %v34720_v34 = vld [vmem:[#allocation23_spill] sm:$0xff] }
 0x165   : > { %24509 = vmatpush3.msra.mxu0 %v21637_v3  ;;  %24463 = vmatprep.mubr.msk.f32.mxu0 %vm627_vm0, %v34714_v2  ;;  %v34721_v3 = vld [vmem:[#allocation24_spill] sm:$0xff]  ;;  %v34722_v2 = vld [vmem:[#allocation25_spill] sm:$0xff] }
 0x166   : > { %24558 = vmatprep.subr.mxu0 %v21702_v1 }
 0x168   : > { %24464 = vmatmul.mubr.msk.f32.gmra.mrb[2].mxu0 %vm627_vm0, %v34715_v6  ;;  %v34723_v6 = vld [vmem:[#allocation26_spill] sm:$0xff] }
 0x169   : > { %24466 = vmatprep.mubr.msk.f32.mxu0 %vm627_vm0, %v34716_v30  ;;  %v34724_v30 = vld [vmem:[#allocation27_spill] sm:$0xff] }
 0x16c   : > { %24467 = vmatmul.mubr.msk.f32.gmra.mrb[4].mxu0 %vm627_vm0, %v34717_v5  ;;  %v34725_v5 = vld [vmem:[#allocation28_spill] sm:$0xff] }
 0x16d   : > { %24469 = vmatprep.mubr.msk.f32.mxu0 %vm627_vm0, %v34718_v4  ;;  %v34726_v4 = vld [vmem:[#allocation29_spill] sm:$0xff] }
 0x170   : > { %24470 = vmatmul.mubr.msk.f32.gmra.mrb[6].mxu0 %vm627_vm0, %v34719_v29  ;;  %v34736_v29 = vld [vmem:[#allocation39_spill] sm:$0xff] }
 0x171   : > { %24472 = vmatprep.mubr.msk.f32.mxu0 %vm627_vm0, %v34720_v34  ;;  %v34727_v34 = vld [vmem:[#allocation30_spill] sm:$0xff] }
 0x174   : > { %24473 = vmatmul.mubr.msk.f32.gmra.mrb[8].mxu0 %vm627_vm0, %v34721_v3  ;;  %v34728_v3 = vld [vmem:[#allocation31_spill] sm:$0xff] }
 0x175   : > { %24475 = vmatprep.mubr.msk.f32.mxu0 %vm627_vm0, %v34722_v2  ;;  %v34729_v2 = vld [vmem:[#allocation32_spill] sm:$0xff] }
 0x178   : > { %24476 = vmatmul.mubr.msk.f32.gmra.mrb[10].mxu0 %vm627_vm0, %v34723_v6  ;;  %v34730_v6 = vld [vmem:[#allocation33_spill] sm:$0xff] }
 0x179   : > { %24478 = vmatprep.mubr.msk.f32.mxu0 %vm627_vm0, %v34724_v30  ;;  %v34731_v30 = vld [vmem:[#allocation34_spill] sm:$0xff] }
 0x17c   : > { %24479 = vmatmul.mubr.msk.f32.gmra.mrb[12].mxu0 %vm627_vm0, %v34725_v5  ;;  %v34732_v5 = vld [vmem:[#allocation35_spill] sm:$0xff] }
 0x17d   : > { %24481 = vmatprep.mubr.msk.f32.mxu0 %vm627_vm0, %v34726_v4  ;;  %v34733_v4 = vld [vmem:[#allocation36_spill] sm:$0xff] }
 0x180   : > { %24482 = vmatmul.mubr.msk.f32.gmra.mrb[14].mxu0 %vm627_vm0, %v34727_v34  ;;  %v34734_v34 = vld [vmem:[#allocation37_spill] sm:$0xff] }
 0x181   : > { %24484 = vmatprep.mubr.msk.f32.mxu0 %vm627_vm0, %v34728_v3  ;;  %v34735_v3 = vld [vmem:[#allocation38_spill] sm:$0xff] }
 0x184   : > { %24485 = vmatmul.mubr.msk.f32.gmra.mrb[16].mxu0 %vm627_vm0, %v34729_v2  ;;  %v34737_v2 = vld [vmem:[#allocation41_spill] sm:$0xff] }
 0x185   : > { %24487 = vmatprep.mubr.msk.f32.mxu0 %vm627_vm0, %v34730_v6  ;;  %v34738_v6 = vld [vmem:[#allocation43_spill] sm:$0xff] }
 0x188   : > { %24488 = vmatmul.mubr.msk.f32.gmra.mrb[18].mxu0 %vm627_vm0, %v34731_v30 }
 0x189   : > { %24490 = vmatprep.mubr.msk.f32.mxu0 %vm627_vm0, %v34732_v5 }
 0x18c   : > { %24491 = vmatmul.mubr.msk.f32.gmra.mrb[20].mxu0 %vm627_vm0, %v34733_v4  ;;  %v28791_v4 = vld [vmem:[%s28102_s30 + $0x182] sm:$0xff] }
 0x18d   : > { %24493 = vmatprep.mubr.msk.f32.mxu0 %vm627_vm0, %v34734_v34 }
 0x190   : > { %24494 = vmatmul.mubr.msk.f32.gmra.mrb[22].mxu0 %vm627_vm0, %v34735_v3 }
 0x191   : > { %24496 = vmatprep.mubr.msk.f32.mxu0 %vm627_vm0, %v34736_v29  ;;  %v28798_v29 = vld [vmem:[%s28102_s30 + $0x18a] sm:$0xff] }
 0x194   : > { %24497 = vmatmul.mubr.msk.f32.gmra.mrb[24].mxu0 %vm627_vm0, %v34737_v2 }
 0x195   : > { %24499 = vmatprep.mubr.msk.f32.mxu0 %vm627_vm0, %v34738_v6 }
 0x198   : > { %24500 = vmatmul.mubr.msk.f32.gmra.mrb[26].mxu0 %vm627_vm0, %v28561_v31 }
 0x199   : > { %24502 = vmatprep.mubr.msk.f32.mxu0 %vm627_vm0, %v28569_v32  ;;  %v28807_v32 = vld [vmem:[%s34673_s21 + $0x40] sm:$0xff] }
 0x19c   : > { %24503 = vmatmul.mubr.msk.f32.gmra.mrb[28].mxu0 %vm627_vm0, %v28578_v0 }
 0x19d   : > { %24505 = vmatprep.mubr.msk.f32.mxu0 %vm627_vm0, %v28791_v4 }
 0x1a0   : > { %24506 = vmatmul.mubr.msk.f32.gmra.mrb[30].mxu0 %vm627_vm0, %v28798_v29 }
 0x1a1   : > { %24510 = vmatprep.mubr.msk.f32.mxu0 %vm627_vm0, %v28259_v36  ;;  %v21635_v36 = vld [vmem:[%s28102_s30 + $0x198] sm:$0xff] }
 0x1a4   : > { %24511 = vmatmul.mubr.msk.f32.vlgmr.msra.gmra.mrb[0].mxu0 %vm627_vm0, %v28267_v37  ;;  %v21636_v37 = vld [vmem:[%s28102_s30 + $0x1a0] sm:$0xff] }
 0x1a5   : > { %24559 = vmatpush3.msra.mxu0 %v21702_v1  ;;  %24513 = vmatprep.mubr.msk.f32.mxu0 %vm627_vm0, %v28270_v38  ;;  %v34437_v38 = vmov 0.0  }
 0x1a6   : > { %24608 = vmatprep.subr.mxu0 %v28807_v32  ;;  %633 = vst.msk [vmem:[#allocation2 + $0x20] sm:$0xff] %vm627_vm0, %v34437_v38  ;;  %628 = vst.msk [vmem:[#allocation2] sm:$0xff] %vm627_vm0, %v34437_v38 }
 0x1a7   : > { %634 = vst.msk [vmem:[#allocation2 + $0x28] sm:$0x3] %vm630_vm1, %v34437_v38  ;;  %631 = vst.msk [vmem:[#allocation2 + $0x10] sm:$0x3] %vm630_vm1, %v34437_v38 }
 0x1a8   : > { %24514 = vmatmul.mubr.msk.f32.gmra.mrb[2].mxu0 %vm627_vm0, %v28277_v39  ;;  %629 = vst.msk [vmem:[#allocation2 + $0x8] sm:$0xff] %vm627_vm0, %v34437_v38  ;;  %632 = vst.msk [vmem:[#allocation2 + $0x18] sm:$0xff] %vm627_vm0, %v34437_v38  ;;  %v34759_v39 = vld [vmem:[#allocation29_spill] sm:$0xff] }
 0x1a9   : > { %24516 = vmatprep.mubr.msk.f32.mxu0 %vm627_vm0, %v28280_v40  ;;  %635 = vst.msk [vmem:[#allocation2 + $0x30] sm:$0xff] %vm627_vm0, %v34437_v38  ;;  %636 = vst.msk [vmem:[#allocation2 + $0x38] sm:$0xff] %vm627_vm0, %v34437_v38  ;;  %v34760_v40 = vld [vmem:[#allocation30_spill] sm:$0xff] }
 0x1aa   : > { %637 = vst.msk [vmem:[#allocation2 + $0x40] sm:$0x3] %vm630_vm1, %v34437_v38  ;;  %640 = vst.msk [vmem:[#allocation2 + $0x58] sm:$0x3] %vm630_vm1, %v34437_v38 }
 0x1ab   : > { %638 = vst.msk [vmem:[#allocation2 + $0x48] sm:$0xff] %vm627_vm0, %v34437_v38  ;;  %639 = vst.msk [vmem:[#allocation2 + $0x50] sm:$0xff] %vm627_vm0, %v34437_v38 }
 0x1ac   : > { %24517 = vmatmul.mubr.msk.f32.gmra.mrb[4].mxu0 %vm627_vm0, %v28287_v41  ;;  %641 = vst.msk [vmem:[#allocation2 + $0x60] sm:$0xff] %vm627_vm0, %v34437_v38  ;;  %642 = vst.msk [vmem:[#allocation2 + $0x68] sm:$0xff] %vm627_vm0, %v34437_v38  ;;  %v34761_v41 = vld [vmem:[#allocation31_spill] sm:$0xff] }
 0x1ad   : > { %24519 = vmatprep.mubr.msk.f32.mxu0 %vm627_vm0, %v28290_v42  ;;  %643 = vst.msk [vmem:[#allocation2 + $0x70] sm:$0x3] %vm630_vm1, %v34437_v38  ;;  %646 = vst.msk [vmem:[#allocation2 + $0x88] sm:$0x3] %vm630_vm1, %v34437_v38  ;;  %v34762_v42 = vld [vmem:[#allocation32_spill] sm:$0xff] }
 0x1ae   : > { %644 = vst.msk [vmem:[#allocation2 + $0x78] sm:$0xff] %vm627_vm0, %v34437_v38  ;;  %645 = vst.msk [vmem:[#allocation2 + $0x80] sm:$0xff] %vm627_vm0, %v34437_v38 }
 0x1af   : > { %647 = vst.msk [vmem:[#allocation2 + $0x90] sm:$0xff] %vm627_vm0, %v34437_v38  ;;  %648 = vst.msk [vmem:[#allocation2 + $0x98] sm:$0xff] %vm627_vm0, %v34437_v38 }
 0x1b0   : > { %24520 = vmatmul.mubr.msk.f32.gmra.mrb[6].mxu0 %vm627_vm0, %v28297_v43  ;;  %649 = vst.msk [vmem:[#allocation2 + $0xa0] sm:$0x3] %vm630_vm1, %v34437_v38  ;;  %652 = vst.msk [vmem:[#allocation2 + $0xb8] sm:$0x3] %vm630_vm1, %v34437_v38  ;;  %v34763_v43 = vld [vmem:[#allocation33_spill] sm:$0xff] }
 0x1b1   : > { %24522 = vmatprep.mubr.msk.f32.mxu0 %vm627_vm0, %v28300_v44  ;;  %650 = vst.msk [vmem:[#allocation2 + $0xa8] sm:$0xff] %vm627_vm0, %v34437_v38  ;;  %651 = vst.msk [vmem:[#allocation2 + $0xb0] sm:$0xff] %vm627_vm0, %v34437_v38  ;;  %v34764_v44 = vld [vmem:[#allocation36_spill] sm:$0xff] }
 0x1b2   : > { %653 = vst.msk [vmem:[#allocation2 + $0xc0] sm:$0xff] %vm627_vm0, %v34437_v38  ;;  %654 = vst.msk [vmem:[#allocation2 + $0xc8] sm:$0xff] %vm627_vm0, %v34437_v38 }
 0x1b3   : > { %655 = vst.msk [vmem:[#allocation2 + $0xd0] sm:$0x3] %vm630_vm1, %v34437_v38  ;;  %658 = vst.msk [vmem:[#allocation2 + $0xe8] sm:$0x3] %vm630_vm1, %v34437_v38 }
 0x1b4   : > { %24523 = vmatmul.mubr.msk.f32.gmra.mrb[8].mxu0 %vm627_vm0, %v28307_v45  ;;  %656 = vst.msk [vmem:[#allocation2 + $0xd8] sm:$0xff] %vm627_vm0, %v34437_v38  ;;  %657 = vst.msk [vmem:[#allocation2 + $0xe0] sm:$0xff] %vm627_vm0, %v34437_v38  ;;  %v34765_v45 = vld [vmem:[#allocation39_spill] sm:$0xff] }
 0x1b5   : > { %24525 = vmatprep.mubr.msk.f32.mxu0 %vm627_vm0, %v28310_v46  ;;  %659 = vst.msk [vmem:[#allocation2 + $0xf0] sm:$0xff] %vm627_vm0, %v34437_v38  ;;  %660 = vst.msk [vmem:[#allocation2 + $0xf8] sm:$0xff] %vm627_vm0, %v34437_v38  ;;  %v21765_v46 = vld [vmem:[%s28102_s30 + $0x19a] sm:$0xff] }
 0x1b6   : > { %661 = vst.msk [vmem:[#allocation2 + $0x100] sm:$0x3] %vm630_vm1, %v34437_v38  ;;  %664 = vst.msk [vmem:[#allocation2 + $0x118] sm:$0x3] %vm630_vm1, %v34437_v38 }
 0x1b7   : > { %662 = vst.msk [vmem:[#allocation2 + $0x108] sm:$0xff] %vm627_vm0, %v34437_v38  ;;  %663 = vst.msk [vmem:[#allocation2 + $0x110] sm:$0xff] %vm627_vm0, %v34437_v38 }
 0x1b8   : > { %24526 = vmatmul.mubr.msk.f32.gmra.mrb[10].mxu0 %vm627_vm0, %v28317_v47  ;;  %665 = vst.msk [vmem:[#allocation2 + $0x120] sm:$0xff] %vm627_vm0, %v34437_v38  ;;  %666 = vst.msk [vmem:[#allocation2 + $0x128] sm:$0xff] %vm627_vm0, %v34437_v38  ;;  %v21766_v47 = vld [vmem:[%s28102_s30 + $0x1a2] sm:$0xff] }
 0x1b9   : > { %24528 = vmatprep.mubr.msk.f32.mxu0 %vm627_vm0, %v28320_v48  ;;  %667 = vst.msk [vmem:[#allocation2 + $0x130] sm:$0x3] %vm630_vm1, %v34437_v38  ;;  %670 = vst.msk [vmem:[#allocation2 + $0x148] sm:$0x3] %vm630_vm1, %v34437_v38  ;;  %v21802_v48 = vld [vmem:[%s34767_s9 + $0x8] sm:$0xff] }
 0x1ba   : > { %668 = vst.msk [vmem:[#allocation2 + $0x138] sm:$0xff] %vm627_vm0, %v34437_v38  ;;  %669 = vst.msk [vmem:[#allocation2 + $0x140] sm:$0xff] %vm627_vm0, %v34437_v38  ;;  %24658 = vmatprep.subr.mxu1 %v21802_v48 }
 0x1bb   : > { %671 = vst.msk [vmem:[#allocation2 + $0x150] sm:$0xff] %vm627_vm0, %v34437_v38  ;;  %672 = vst.msk [vmem:[#allocation2 + $0x158] sm:$0xff] %vm627_vm0, %v34437_v38  ;;  %24659 = vmatpush3.msra.mxu1 %v21802_v48 }
 0x1bc   : > { %24529 = vmatmul.mubr.msk.f32.gmra.mrb[12].mxu0 %vm627_vm0, %v28327_v49  ;;  %673 = vst.msk [vmem:[#allocation2 + $0x160] sm:$0x3] %vm630_vm1, %v34437_v38  ;;  %676 = vst.msk [vmem:[#allocation2 + $0x178] sm:$0x3] %vm630_vm1, %v34437_v38  ;;  %v4279_v49 = vld [vmem:[#allocation2 + $0x1] sm:$0xff] }
 0x1bd   : > { %24531 = vmatprep.mubr.msk.f32.mxu0 %vm627_vm0, %v28330_v50  ;;  %674 = vst.msk [vmem:[#allocation2 + $0x168] sm:$0xff] %vm627_vm0, %v34437_v38  ;;  %675 = vst.msk [vmem:[#allocation2 + $0x170] sm:$0xff] %vm627_vm0, %v34437_v38  ;;  %24660 = vmatprep.mubr.msk.f32.mxu1 %vm627_vm0, %v4279_v49  ;;  %v4280_v50 = vld [vmem:[#allocation2 + $0x9] sm:$0xff] }
 0x1be   : > { %677 = vst.msk [vmem:[#allocation2 + $0x180] sm:$0xff] %vm627_vm0, %v34437_v38  ;;  %678 = vst.msk [vmem:[#allocation2 + $0x188] sm:$0xff] %vm627_vm0, %v34437_v38  ;;  %24661 = vmatmul.mubr.msk.f32.vlgmr.msra.gmra.mrb[4].mxu1 %vm627_vm0, %v4280_v50 }
 0x1bf   : > { %679 = vst.msk [vmem:[#allocation2 + $0x190] sm:$0x3] %vm630_vm1, %v34437_v38  ;;  %682 = vst.msk [vmem:[#allocation2 + $0x1a8] sm:$0x3] %vm630_vm1, %v34437_v38 }
 0x1c0   : > { %24532 = vmatmul.mubr.msk.f32.gmra.mrb[14].mxu0 %vm627_vm0, %v28337_v51  ;;  %680 = vst.msk [vmem:[#allocation2 + $0x198] sm:$0xff] %vm627_vm0, %v34437_v38  ;;  %681 = vst.msk [vmem:[#allocation2 + $0x1a0] sm:$0xff] %vm627_vm0, %v34437_v38  ;;  %v29117_v51 = vpop.f32.mrb[0].mxu1 }
 0x1c1   : > { %24534 = vmatprep.mubr.msk.f32.mxu0 %vm627_vm0, %v28340_v52  ;;  %v29119_v52 = vpop.f32.mrb[1].mxu1 }
 0x1c4   : > { %24535 = vmatmul.mubr.msk.f32.gmra.mrb[16].mxu0 %vm627_vm0, %v28347_v53  ;;  %v29121_v53 = vpop.f32.mrb[2].mxu1 }
 0x1c5   : > { %24537 = vmatprep.mubr.msk.f32.mxu0 %vm627_vm0, %v28350_v54  ;;  %v29123_v54 = vpop.f32.mrb[3].mxu1 }
 0x1c8   : > { %24538 = vmatmul.mubr.msk.f32.gmra.mrb[18].mxu0 %vm627_vm0, %v28357_v55  ;;  %v29128_v55 = vld [vmem:[%s34767_s9 + $0x10] sm:$0xff] }
 0x1c9   : > { %24540 = vmatprep.mubr.msk.f32.mxu0 %vm627_vm0, %v28360_v56  ;;  %v29134_v56 = vld [vmem:[%s34768_s29] ss:$0 sm:$0xff] }
 0x1cc   : > { %24541 = vmatmul.mubr.msk.f32.gmra.mrb[20].mxu0 %vm627_vm0, %v28367_v57  ;;  %v29139_v57 = vld [vmem:[%s34768_s29 + $0x1] ss:$0 sm:$0xff] }
 0x1cd   : > { %24543 = vmatprep.mubr.msk.f32.mxu0 %vm627_vm0, %v28370_v58 }
 0x1d0   : > { %24544 = vmatmul.mubr.msk.f32.gmra.mrb[22].mxu0 %vm627_vm0, %v28377_v59 }
 0x1d1   : > { %24546 = vmatprep.mubr.msk.f32.mxu0 %vm627_vm0, %v28380_v60 }
 0x1d4   : > { %24547 = vmatmul.mubr.msk.f32.gmra.mrb[24].mxu0 %vm627_vm0, %v28387_v61 }
 0x1d5   : > { %24549 = vmatprep.mubr.msk.f32.mxu0 %vm627_vm0, %v28390_v62 }
 0x1d8   : > { %24550 = vmatmul.mubr.msk.f32.gmra.mrb[26].mxu0 %vm627_vm0, %v28397_v63 }
 0x1d9   : > { %24552 = vmatprep.mubr.msk.f32.mxu0 %vm627_vm0, %v28645_v33 }
 0x1dc   : > { %24553 = vmatmul.mubr.msk.f32.gmra.mrb[28].mxu0 %vm627_vm0, %v28652_v35 }
 0x1dd   : > { %24555 = vmatprep.mubr.msk.f32.mxu0 %vm627_vm0, %v21635_v36 }
 0x1e0   : > { %24556 = vmatmul.mubr.msk.f32.gmra.mrb[30].mxu0 %vm627_vm0, %v21636_v37 }
 0x1e1   : > { %24560 = vmatprep.mubr.msk.f32.mxu0 %vm627_vm0, %v28120_v7  ;;  %v34739_v7 = vld [vmem:[#allocation13_spill] sm:$0xff] }
 0x1e4   : > { %24561 = vmatmul.mubr.msk.f32.vlgmr.msra.gmra.mrb[0].mxu0 %vm627_vm0, %v28127_v8  ;;  %v34740_v8 = vld [vmem:[#allocation14_spill] sm:$0xff] }
 0x1e5   : > { %24609 = vmatpush3.msra.mxu0 %v28807_v32  ;;  %24563 = vmatprep.mubr.msk.f32.mxu0 %vm627_vm0, %v28130_v9  ;;  %v34741_v9 = vld [vmem:[#allocation40_spill] sm:$0xff] }
 0x1e8   : > { %24564 = vmatmul.mubr.msk.f32.gmra.mrb[2].mxu0 %vm627_vm0, %v28137_v10  ;;  %v34742_v10 = vld [vmem:[#allocation42_spill] sm:$0xff] }
 0x1e9   : > { %24566 = vmatprep.mubr.msk.f32.mxu0 %vm627_vm0, %v28140_v11  ;;  %v34743_v11 = vld [vmem:[#allocation44_spill] sm:$0xff] }
 0x1ec   : > { %24567 = vmatmul.mubr.msk.f32.gmra.mrb[4].mxu0 %vm627_vm0, %v28147_v12  ;;  %v34744_v12 = vld [vmem:[#allocation45_spill] sm:$0xff] }
 0x1ed   : > { %24569 = vmatprep.mubr.msk.f32.mxu0 %vm627_vm0, %v28150_v13  ;;  %v34745_v13 = vld [vmem:[#allocation47_spill] sm:$0xff] }
 0x1f0   : > { %24570 = vmatmul.mubr.msk.f32.gmra.mrb[6].mxu0 %vm627_vm0, %v28157_v14  ;;  %v21700_v14 = vld [vmem:[%s28102_s30 + $0x199] sm:$0xff] }
 0x1f1   : > { %24572 = vmatprep.mubr.msk.f32.mxu0 %vm627_vm0, %v28160_v15  ;;  %v34746_v15 = vld [vmem:[#allocation48_spill] sm:$0xff] }
 0x1f4   : > { %24573 = vmatmul.mubr.msk.f32.gmra.mrb[8].mxu0 %vm627_vm0, %v28167_v16  ;;  %v21701_v16 = vld [vmem:[%s28102_s30 + $0x1a1] sm:$0xff] }
 0x1f5   : > { %24575 = vmatprep.mubr.msk.f32.mxu0 %vm627_vm0, %v28170_v17  ;;  %v34747_v17 = vld [vmem:[#allocation17_spill] sm:$0xff] }
 0x1f8   : > { %24576 = vmatmul.mubr.msk.f32.gmra.mrb[10].mxu0 %vm627_vm0, %v28177_v18  ;;  %v34748_v18 = vld [vmem:[#allocation18_spill] sm:$0xff] }
 0x1f9   : > { %24578 = vmatprep.mubr.msk.f32.mxu0 %vm627_vm0, %v28180_v19  ;;  %v34749_v19 = vld [vmem:[#allocation19_spill] sm:$0xff] }
 0x1fc   : > { %24579 = vmatmul.mubr.msk.f32.gmra.mrb[12].mxu0 %vm627_vm0, %v28187_v20  ;;  %v34750_v20 = vld [vmem:[#allocation20_spill] sm:$0xff] }
 0x1fd   : > { %24581 = vmatprep.mubr.msk.f32.mxu0 %vm627_vm0, %v28190_v21  ;;  %v34751_v21 = vld [vmem:[#allocation21_spill] sm:$0xff] }
 0x200   : > { %24582 = vmatmul.mubr.msk.f32.gmra.mrb[14].mxu0 %vm627_vm0, %v28197_v22  ;;  %v34752_v22 = vld [vmem:[#allocation22_spill] sm:$0xff] }
 0x201   : > { %24584 = vmatprep.mubr.msk.f32.mxu0 %vm627_vm0, %v28200_v23  ;;  %v34753_v23 = vld [vmem:[#allocation23_spill] sm:$0xff] }
 0x204   : > { %24585 = vmatmul.mubr.msk.f32.gmra.mrb[16].mxu0 %vm627_vm0, %v28207_v24  ;;  %v34754_v24 = vld [vmem:[#allocation24_spill] sm:$0xff] }
 0x205   : > { %24587 = vmatprep.mubr.msk.f32.mxu0 %vm627_vm0, %v28210_v25  ;;  %v34755_v25 = vld [vmem:[#allocation25_spill] sm:$0xff] }
 0x208   : > { %24588 = vmatmul.mubr.msk.f32.gmra.mrb[18].mxu0 %vm627_vm0, %v28217_v26  ;;  %v34756_v26 = vld [vmem:[#allocation26_spill] sm:$0xff] }
 0x209   : > { %24590 = vmatprep.mubr.msk.f32.mxu0 %vm627_vm0, %v28220_v27  ;;  %v34757_v27 = vld [vmem:[#allocation27_spill] sm:$0xff] }
 0x20c   : > { %24591 = vmatmul.mubr.msk.f32.gmra.mrb[20].mxu0 %vm627_vm0, %v28227_v28  ;;  %v34758_v28 = vld [vmem:[#allocation28_spill] sm:$0xff] }
 0x20d   : > { %24593 = vmatprep.mubr.msk.f32.mxu0 %vm627_vm0, %v34739_v7 }
 0x210   : > { %24594 = vmatmul.mubr.msk.f32.gmra.mrb[22].mxu0 %vm627_vm0, %v34740_v8 }
 0x211   : > { %24596 = vmatprep.mubr.msk.f32.mxu0 %vm627_vm0, %v34741_v9 }
 0x214   : > { %24597 = vmatmul.mubr.msk.f32.gmra.mrb[24].mxu0 %vm627_vm0, %v34742_v10 }
 0x215   : > { %24599 = vmatprep.mubr.msk.f32.mxu0 %vm627_vm0, %v34743_v11 }
 0x218   : > { %24600 = vmatmul.mubr.msk.f32.gmra.mrb[26].mxu0 %vm627_vm0, %v34744_v12 }
 0x219   : > { %24602 = vmatprep.mubr.msk.f32.mxu0 %vm627_vm0, %v34745_v13 }
 0x21c   : > { %24603 = vmatmul.mubr.msk.f32.gmra.mrb[28].mxu0 %vm627_vm0, %v34746_v15 }
 0x21d   : > { %24605 = vmatprep.mubr.msk.f32.mxu0 %vm627_vm0, %v21700_v14 }
 0x220   : > { %24606 = vmatmul.mubr.msk.f32.gmra.mrb[30].mxu0 %vm627_vm0, %v21701_v16 }
 0x221   : > { %24610 = vmatprep.mubr.msk.f32.mxu0 %vm627_vm0, %v34747_v17 }
 0x224   : > { %24611 = vmatmul.mubr.msk.f32.vlgmr.msra.gmra.mrb[0].mxu0 %vm627_vm0, %v34748_v18 }
 0x225   : > { %24613 = vmatprep.mubr.msk.f32.mxu0 %vm627_vm0, %v34749_v19 }
 0x228   : > { %24614 = vmatmul.mubr.msk.f32.gmra.mrb[2].mxu0 %vm627_vm0, %v34750_v20 }
 0x229   : > { %24616 = vmatprep.mubr.msk.f32.mxu0 %vm627_vm0, %v34751_v21 }
 0x22c   : > { %24617 = vmatmul.mubr.msk.f32.gmra.mrb[4].mxu0 %vm627_vm0, %v34752_v22 }
 0x22d   : > { %24619 = vmatprep.mubr.msk.f32.mxu0 %vm627_vm0, %v34753_v23 }
 0x230   : > { %24620 = vmatmul.mubr.msk.f32.gmra.mrb[6].mxu0 %vm627_vm0, %v34754_v24 }
 0x231   : > { %24622 = vmatprep.mubr.msk.f32.mxu0 %vm627_vm0, %v34755_v25 }
 0x234   : > { %24623 = vmatmul.mubr.msk.f32.gmra.mrb[8].mxu0 %vm627_vm0, %v34756_v26 }
 0x235   : > { %24625 = vmatprep.mubr.msk.f32.mxu0 %vm627_vm0, %v34757_v27 }
 0x238   : > { %24626 = vmatmul.mubr.msk.f32.gmra.mrb[10].mxu0 %vm627_vm0, %v34758_v28 }
 0x239   : > { %24628 = vmatprep.mubr.msk.f32.mxu0 %vm627_vm0, %v34759_v39 }
 0x23c   : > { %24629 = vmatmul.mubr.msk.f32.gmra.mrb[12].mxu0 %vm627_vm0, %v34760_v40 }
 0x23d   : > { %24631 = vmatprep.mubr.msk.f32.mxu0 %vm627_vm0, %v34761_v41 }
 0x240   : > { %24632 = vmatmul.mubr.msk.f32.gmra.mrb[14].mxu0 %vm627_vm0, %v34762_v42 }
 0x241   : > { %24634 = vmatprep.mubr.msk.f32.mxu0 %vm627_vm0, %v34763_v43 }
 0x244   : > { %24635 = vmatmul.mubr.msk.f32.gmra.mrb[16].mxu0 %vm627_vm0, %v34731_v30  ;;  %v34766_v30 = vld [vmem:[#allocation46_spill] sm:$0xff] }
 0x245   : > { %24637 = vmatprep.mubr.msk.f32.mxu0 %vm627_vm0, %v34732_v5 }
 0x248   : > { %24638 = vmatmul.mubr.msk.f32.gmra.mrb[18].mxu0 %vm627_vm0, %v34764_v44 }
 0x249   : > { %24640 = vmatprep.mubr.msk.f32.mxu0 %vm627_vm0, %v34734_v34 }
 0x24c   : > { %24641 = vmatmul.mubr.msk.f32.gmra.mrb[20].mxu0 %vm627_vm0, %v34735_v3 }
 0x24d   : > { %24643 = vmatprep.mubr.msk.f32.mxu0 %vm627_vm0, %v34765_v45 }
 0x250   : > { %24644 = vmatmul.mubr.msk.f32.gmra.mrb[22].mxu0 %vm627_vm0, %v34737_v2 }
 0x251   : > { %24646 = vmatprep.mubr.msk.f32.mxu0 %vm627_vm0, %v34738_v6 }
 0x254   : > { %24647 = vmatmul.mubr.msk.f32.gmra.mrb[24].mxu0 %vm627_vm0, %v28561_v31 }
 0x255   : > { %24649 = vmatprep.mubr.msk.f32.mxu0 %vm627_vm0, %v34766_v30 }
 0x258   : > { %24650 = vmatmul.mubr.msk.f32.gmra.mrb[26].mxu0 %vm627_vm0, %v28578_v0 }
 0x259   : > { %24652 = vmatprep.mubr.msk.f32.mxu0 %vm627_vm0, %v28791_v4 }
 0x25c   : > { %24653 = vmatmul.mubr.msk.f32.gmra.mrb[28].mxu0 %vm627_vm0, %v28798_v29  ;;  %v4278_v29 = vld [vmem:[%s34767_s9] sm:$0xff] }
 0x25d   : > { %24655 = vmatprep.mubr.msk.f32.mxu0 %vm627_vm0, %v21765_v46  ;;  %24708 = vmatprep.subr.mxu1 %v4278_v29 }
 0x25e   : > { %24709 = vmatpush3.msra.mxu1 %v4278_v29 }
 0x25f   : > { %24758 = vmatprep.subr.mxu1 %v29128_v55 }
 0x260   : > { %24656 = vmatmul.mubr.msk.f32.gmra.mrb[30].mxu0 %vm627_vm0, %v21766_v47 }
 0x2f7   : > { %v24612_v58 = vpop.f32.mrb[0].mxu0 }
 0x2f8   : > { %v4144_v59 = vmul.f32 %v24612_v58, %v29134_v56  ;;  %v3948_v60 = vpop.f32.mrb[1].mxu0 }
 0x2f9   : > { %v4143_v61 = vmul.f32 %v29134_v56, %v3948_v60 }
 0x2fa   : > { %v29144_v62 = vadd.f32 %v29139_v57, %v4144_v59 }
 0x2fb   : > { %v29147_v63 = vadd.f32 %v29139_v57, %v4143_v61  ;;  %v24615_v2 = vpop.f32.mrb[2].mxu0 }
 0x2fc   : > { %34769 = vst [vmem:[#allocation15_spill] sm:$0xff] %v29144_v62  ;;  %4213 = vst.msk [vmem:[#allocation2 + $0x21] sm:$0xff] %vm627_vm0, %v29144_v62  ;;  %v4146_v31 = vmul.f32 %v24615_v2, %v29134_v56  ;;  %v3958_v32 = vpop.f32.mrb[3].mxu0  ;;  %v29590_v62 = vld [vmem:[%s34767_s9 + $0x20] sm:$0xff] }
 0x2fd   : > { %34770 = vst [vmem:[#allocation16_spill] sm:$0xff] %v29147_v63  ;;  %4212 = vst.msk [vmem:[#allocation2 + $0x19] sm:$0xff] %vm627_vm0, %v29147_v63  ;;  %v4145_v0 = vmul.f32 %v29134_v56, %v3958_v32  ;;  %v4956_v63 = vld [vmem:[#allocation2 + $0xa] sm:$0xff] }
 0x2fe   : > { %v29156_v1 = vadd.f32 %v29139_v57, %v4146_v31 }
 0x2ff   : > { %v29159_v33 = vadd.f32 %v29139_v57, %v4145_v0  ;;  %v24618_v35 = vpop.f32.mrb[4].mxu0 }
 0x300   : > { %34771 = vst [vmem:[#allocation34_spill] sm:$0xff] %v29156_v1  ;;  %4215 = vst.msk [vmem:[#allocation2 + $0x39] sm:$0xff] %vm627_vm0, %v29156_v1  ;;  %v4148_v6 = vmul.f32 %v24618_v35, %v29134_v56  ;;  %v3968_v5 = vpop.f32.mrb[5].mxu0 }
 0x301   : > { %34772 = vst [vmem:[#allocation35_spill] sm:$0xff] %v29159_v33  ;;  %4214 = vst.msk [vmem:[#allocation2 + $0x31] sm:$0xff] %vm627_vm0, %v29159_v33  ;;  %v4147_v4 = vmul.f32 %v29134_v56, %v3968_v5  ;;  %v4955_v33 = vld [vmem:[#allocation2 + $0x2] sm:$0xff] }
 0x302   : > { %v29168_v34 = vadd.f32 %v29139_v57, %v4148_v6 }
 0x303   : > { %v29171_v3 = vadd.f32 %v29139_v57, %v4147_v4  ;;  %v24621_v36 = vpop.f32.mrb[6].mxu0  ;;  %v29183_v10 = vld [vmem:[#allocation2 + $0x21] sm:$0xff] }
 0x304   : > { %34773 = vst [vmem:[#allocation37_spill] sm:$0xff] %v29168_v34  ;;  %4217 = vst.msk [vmem:[#allocation2 + $0x51] sm:$0xff] %vm627_vm0, %v29168_v34  ;;  %v4150_v37 = vmul.f32 %v24621_v36, %v29134_v56  ;;  %v3978_v7 = vpop.f32.mrb[7].mxu0  ;;  %v29176_v8 = vld [vmem:[#allocation2 + $0x19] sm:$0xff] }
 0x305   : > { %34774 = vst [vmem:[#allocation38_spill] sm:$0xff] %v29171_v3  ;;  %4216 = vst.msk [vmem:[#allocation2 + $0x49] sm:$0xff] %vm627_vm0, %v29171_v3  ;;  %v4149_v9 = vmul.f32 %v29134_v56, %v3978_v7  ;;  %24663 = vmatprep.mubr.msk.f32.mxu1 %vm627_vm0, %v29176_v8 }
 0x306   : > { %v29186_v11 = vadd.f32 %v29139_v57, %v4150_v37  ;;  %24664 = vmatmul.mubr.msk.f32.gmra.mrb[6].mxu1 %vm627_vm0, %v29183_v10 }
 0x307   : > { %v29191_v12 = vadd.f32 %v29139_v57, %v4149_v9  ;;  %v24624_v13 = vpop.f32.mrb[8].mxu0  ;;  %v29203_v18 = vld [vmem:[#allocation2 + $0x39] sm:$0xff] }
 0x308   : > { %34775 = vst [vmem:[#allocation41_spill] sm:$0xff] %v29186_v11  ;;  %4219 = vst.msk [vmem:[#allocation2 + $0x69] sm:$0xff] %vm627_vm0, %v29186_v11  ;;  %v4152_v14 = vmul.f32 %v24624_v13, %v29134_v56  ;;  %v3988_v15 = vpop.f32.mrb[9].mxu0  ;;  %v29196_v16 = vld [vmem:[#allocation2 + $0x31] sm:$0xff] }
 0x309   : > { %34776 = vst [vmem:[#allocation43_spill] sm:$0xff] %v29191_v12  ;;  %4218 = vst.msk [vmem:[#allocation2 + $0x61] sm:$0xff] %vm627_vm0, %v29191_v12  ;;  %v4151_v17 = vmul.f32 %v29134_v56, %v3988_v15  ;;  %24666 = vmatprep.mubr.msk.f32.mxu1 %vm627_vm0, %v29196_v16 }
 0x30a   : > { %v29206_v19 = vadd.f32 %v29139_v57, %v4152_v14  ;;  %24667 = vmatmul.mubr.msk.f32.gmra.mrb[8].mxu1 %vm627_vm0, %v29203_v18 }
 0x30b   : > { %v29211_v20 = vadd.f32 %v29139_v57, %v4151_v17  ;;  %v24627_v21 = vpop.f32.mrb[10].mxu0  ;;  %v29223_v26 = vld [vmem:[#allocation2 + $0x51] sm:$0xff] }
 0x30c   : > { %34777 = vst [vmem:[#allocation13_spill] sm:$0xff] %v29206_v19  ;;  %4221 = vst.msk [vmem:[#allocation2 + $0x81] sm:$0xff] %vm627_vm0, %v29206_v19  ;;  %v4154_v22 = vmul.f32 %v24627_v21, %v29134_v56  ;;  %v3998_v23 = vpop.f32.mrb[11].mxu0  ;;  %v29216_v24 = vld [vmem:[#allocation2 + $0x49] sm:$0xff] }
 0x30d   : > { %34778 = vst [vmem:[#allocation14_spill] sm:$0xff] %v29211_v20  ;;  %4220 = vst.msk [vmem:[#allocation2 + $0x79] sm:$0xff] %vm627_vm0, %v29211_v20  ;;  %v4153_v25 = vmul.f32 %v29134_v56, %v3998_v23  ;;  %24669 = vmatprep.mubr.msk.f32.mxu1 %vm627_vm0, %v29216_v24 }
 0x30e   : > { %v29226_v27 = vadd.f32 %v29139_v57, %v4154_v22  ;;  %24670 = vmatmul.mubr.msk.f32.gmra.mrb[10].mxu1 %vm627_vm0, %v29223_v26 }
 0x30f   : > { %v29231_v28 = vadd.f32 %v29139_v57, %v4153_v25  ;;  %v24630_v39 = vpop.f32.mrb[12].mxu0  ;;  %v29243_v44 = vld [vmem:[#allocation2 + $0x69] sm:$0xff] }
 0x310   : > { %34779 = vst [vmem:[#allocation40_spill] sm:$0xff] %v29226_v27  ;;  %4223 = vst.msk [vmem:[#allocation2 + $0x99] sm:$0xff] %vm627_vm0, %v29226_v27  ;;  %v4156_v40 = vmul.f32 %v24630_v39, %v29134_v56  ;;  %v4008_v41 = vpop.f32.mrb[13].mxu0  ;;  %v29236_v42 = vld [vmem:[#allocation2 + $0x61] sm:$0xff] }
 0x311   : > { %34780 = vst [vmem:[#allocation42_spill] sm:$0xff] %v29231_v28  ;;  %4222 = vst.msk [vmem:[#allocation2 + $0x91] sm:$0xff] %vm627_vm0, %v29231_v28  ;;  %v4155_v43 = vmul.f32 %v29134_v56, %v4008_v41  ;;  %24672 = vmatprep.mubr.msk.f32.mxu1 %vm627_vm0, %v29236_v42 }
 0x312   : > { %v29246_v45 = vadd.f32 %v29139_v57, %v4156_v40  ;;  %24673 = vmatmul.mubr.msk.f32.gmra.mrb[12].mxu1 %vm627_vm0, %v29243_v44 }
 0x313   : > { %v29251_v30 = vadd.f32 %v29139_v57, %v4155_v43  ;;  %v24633_v46 = vpop.f32.mrb[14].mxu0  ;;  %v29263_v29 = vld [vmem:[#allocation2 + $0x81] sm:$0xff] }
 0x314   : > { %34781 = vst [vmem:[#allocation44_spill] sm:$0xff] %v29246_v45  ;;  %4225 = vst.msk [vmem:[#allocation2 + $0xb1] sm:$0xff] %vm627_vm0, %v29246_v45  ;;  %v4158_v47 = vmul.f32 %v24633_v46, %v29134_v56  ;;  %v4018_v48 = vpop.f32.mrb[15].mxu0  ;;  %v29256_v49 = vld [vmem:[#allocation2 + $0x79] sm:$0xff] }
 0x315   : > { %34782 = vst [vmem:[#allocation45_spill] sm:$0xff] %v29251_v30  ;;  %4224 = vst.msk [vmem:[#allocation2 + $0xa9] sm:$0xff] %vm627_vm0, %v29251_v30  ;;  %v4157_v50 = vmul.f32 %v29134_v56, %v4018_v48  ;;  %24675 = vmatprep.mubr.msk.f32.mxu1 %vm627_vm0, %v29256_v49 }
 0x316   : > { %v29266_v58 = vadd.f32 %v29139_v57, %v4158_v47  ;;  %24676 = vmatmul.mubr.msk.f32.gmra.mrb[14].mxu1 %vm627_vm0, %v29263_v29 }
 0x317   : > { %v29271_v59 = vadd.f32 %v29139_v57, %v4157_v50  ;;  %v24636_v60 = vpop.f32.mrb[16].mxu0  ;;  %v29283_v0 = vld [vmem:[#allocation2 + $0x99] sm:$0xff] }
 0x318   : > { %34783 = vst [vmem:[#allocation47_spill] sm:$0xff] %v29266_v58  ;;  %4227 = vst.msk [vmem:[#allocation2 + $0xc9] sm:$0xff] %vm627_vm0, %v29266_v58  ;;  %v4160_v61 = vmul.f32 %v24636_v60, %v29134_v56  ;;  %v4028_v2 = vpop.f32.mrb[17].mxu0  ;;  %v29276_v31 = vld [vmem:[#allocation2 + $0x91] sm:$0xff] }
 0x319   : > { %34784 = vst [vmem:[#allocation48_spill] sm:$0xff] %v29271_v59  ;;  %4226 = vst.msk [vmem:[#allocation2 + $0xc1] sm:$0xff] %vm627_vm0, %v29271_v59  ;;  %v4159_v32 = vmul.f32 %v29134_v56, %v4028_v2  ;;  %24678 = vmatprep.mubr.msk.f32.mxu1 %vm627_vm0, %v29276_v31 }
 0x31a   : > { %v29286_v35 = vadd.f32 %v29139_v57, %v4160_v61  ;;  %24679 = vmatmul.mubr.msk.f32.gmra.mrb[16].mxu1 %vm627_vm0, %v29283_v0 }
 0x31b   : > { %v29291_v6 = vadd.f32 %v29139_v57, %v4159_v32  ;;  %v24639_v5 = vpop.f32.mrb[18].mxu0  ;;  %v29303_v9 = vld [vmem:[#allocation2 + $0xb1] sm:$0xff] }
 0x31c   : > { %34785 = vst [vmem:[#allocation17_spill] sm:$0xff] %v29286_v35  ;;  %4229 = vst.msk [vmem:[#allocation2 + $0xe1] sm:$0xff] %vm627_vm0, %v29286_v35  ;;  %v4162_v4 = vmul.f32 %v24639_v5, %v29134_v56  ;;  %v4038_v36 = vpop.f32.mrb[19].mxu0  ;;  %v29296_v37 = vld [vmem:[#allocation2 + $0xa9] sm:$0xff] }
 0x31d   : > { %34786 = vst [vmem:[#allocation18_spill] sm:$0xff] %v29291_v6  ;;  %4228 = vst.msk [vmem:[#allocation2 + $0xd9] sm:$0xff] %vm627_vm0, %v29291_v6  ;;  %v4161_v7 = vmul.f32 %v29134_v56, %v4038_v36  ;;  %24681 = vmatprep.mubr.msk.f32.mxu1 %vm627_vm0, %v29296_v37 }
 0x31e   : > { %v29306_v13 = vadd.f32 %v29139_v57, %v4162_v4  ;;  %24682 = vmatmul.mubr.msk.f32.gmra.mrb[18].mxu1 %vm627_vm0, %v29303_v9 }
 0x31f   : > { %v29311_v14 = vadd.f32 %v29139_v57, %v4161_v7  ;;  %v24642_v15 = vpop.f32.mrb[20].mxu0  ;;  %v29323_v25 = vld [vmem:[#allocation2 + $0xc9] sm:$0xff] }
 0x320   : > { %34787 = vst [vmem:[#allocation19_spill] sm:$0xff] %v29306_v13  ;;  %4231 = vst.msk [vmem:[#allocation2 + $0xf9] sm:$0xff] %vm627_vm0, %v29306_v13  ;;  %v4164_v17 = vmul.f32 %v24642_v15, %v29134_v56  ;;  %v4048_v21 = vpop.f32.mrb[21].mxu0  ;;  %v29316_v22 = vld [vmem:[#allocation2 + $0xc1] sm:$0xff] }
 0x321   : > { %34788 = vst [vmem:[#allocation20_spill] sm:$0xff] %v29311_v14  ;;  %4230 = vst.msk [vmem:[#allocation2 + $0xf1] sm:$0xff] %vm627_vm0, %v29311_v14  ;;  %v4163_v23 = vmul.f32 %v29134_v56, %v4048_v21  ;;  %24684 = vmatprep.mubr.msk.f32.mxu1 %vm627_vm0, %v29316_v22  ;;  %v29518_v14 = vld [vmem:[#allocation2 + $0xb0] sm:$0xff]  ;;  %v29522_v13 = vld [vmem:[#allocation2 + $0xc0] sm:$0xff] }
 0x322   : > { %v29326_v39 = vadd.f32 %v29139_v57, %v4164_v17  ;;  %24685 = vmatmul.mubr.msk.f32.gmra.mrb[20].mxu1 %vm627_vm0, %v29323_v25  ;;  %v29526_v6 = vld [vmem:[#allocation2 + $0xc8] sm:$0xff] }
 0x323   : > { %v29331_v40 = vadd.f32 %v29139_v57, %v4163_v23  ;;  %v24645_v41 = vpop.f32.mrb[22].mxu0  ;;  %v29343_v50 = vld [vmem:[#allocation2 + $0xe1] sm:$0xff] }
 0x324   : > { %34789 = vst [vmem:[#allocation21_spill] sm:$0xff] %v29326_v39  ;;  %4233 = vst.msk [vmem:[#allocation2 + $0x111] sm:$0xff] %vm627_vm0, %v29326_v39  ;;  %v4166_v43 = vmul.f32 %v24645_v41, %v29134_v56  ;;  %v4058_v46 = vpop.f32.mrb[23].mxu0  ;;  %v29336_v47 = vld [vmem:[#allocation2 + $0xd9] sm:$0xff]  ;;  %v29514_v39 = vld [vmem:[#allocation2 + $0xa8] sm:$0xff] }
 0x325   : > { %34790 = vst [vmem:[#allocation22_spill] sm:$0xff] %v29331_v40  ;;  %4232 = vst.msk [vmem:[#allocation2 + $0x109] sm:$0xff] %vm627_vm0, %v29331_v40  ;;  %v4165_v48 = vmul.f32 %v29134_v56, %v4058_v46  ;;  %24687 = vmatprep.mubr.msk.f32.mxu1 %vm627_vm0, %v29336_v47  ;;  %v29510_v40 = vld [vmem:[#allocation2 + $0x98] sm:$0xff]  ;;  %v29534_v59 = vld [vmem:[#allocation2 + $0xe0] sm:$0xff] }
 0x326   : > { %v29346_v60 = vadd.f32 %v29139_v57, %v4166_v43  ;;  %24688 = vmatmul.mubr.msk.f32.gmra.mrb[22].mxu1 %vm627_vm0, %v29343_v50  ;;  %v29530_v35 = vld [vmem:[#allocation2 + $0xd8] sm:$0xff] }
 0x327   : > { %v29351_v61 = vadd.f32 %v29139_v57, %v4165_v48  ;;  %v24648_v2 = vpop.f32.mrb[24].mxu0  ;;  %v29363_v7 = vld [vmem:[#allocation2 + $0xf9] sm:$0xff] }
 0x328   : > { %34791 = vst [vmem:[#allocation23_spill] sm:$0xff] %v29346_v60  ;;  %4235 = vst.msk [vmem:[#allocation2 + $0x129] sm:$0xff] %vm627_vm0, %v29346_v60  ;;  %v4168_v32 = vmul.f32 %v24648_v2, %v29134_v56  ;;  %v4068_v5 = vpop.f32.mrb[25].mxu0  ;;  %v29356_v4 = vld [vmem:[#allocation2 + $0xf1] sm:$0xff] }
 0x329   : > { %34792 = vst [vmem:[#allocation24_spill] sm:$0xff] %v29351_v61  ;;  %4234 = vst.msk [vmem:[#allocation2 + $0x121] sm:$0xff] %vm627_vm0, %v29351_v61  ;;  %v4167_v36 = vmul.f32 %v29134_v56, %v4068_v5  ;;  %24690 = vmatprep.mubr.msk.f32.mxu1 %vm627_vm0, %v29356_v4  ;;  %v29502_v61 = vld [vmem:[#allocation2 + $0x80] sm:$0xff]  ;;  %v29506_v60 = vld [vmem:[#allocation2 + $0x90] sm:$0xff] }
 0x32a   : > { %v29366_v15 = vadd.f32 %v29139_v57, %v4168_v32  ;;  %24691 = vmatmul.mubr.msk.f32.gmra.mrb[24].mxu1 %vm627_vm0, %v29363_v7  ;;  %v29538_v58 = vld [vmem:[#allocation2 + $0xf0] sm:$0xff]  ;;  %v29542_v30 = vld [vmem:[#allocation2 + $0xf8] sm:$0xff] }
 0x32b   : > { %v29371_v17 = vadd.f32 %v29139_v57, %v4167_v36  ;;  %v24651_v21 = vpop.f32.mrb[26].mxu0  ;;  %v29383_v48 = vld [vmem:[#allocation2 + $0x111] sm:$0xff] }
 0x32c   : > { %34793 = vst [vmem:[#allocation25_spill] sm:$0xff] %v29366_v15  ;;  %4237 = vst.msk [vmem:[#allocation2 + $0x141] sm:$0xff] %vm627_vm0, %v29366_v15  ;;  %v4170_v23 = vmul.f32 %v24651_v21, %v29134_v56  ;;  %v4078_v41 = vpop.f32.mrb[27].mxu0  ;;  %v29376_v43 = vld [vmem:[#allocation2 + $0x109] sm:$0xff] }
 0x32d   : > { %34794 = vst [vmem:[#allocation26_spill] sm:$0xff] %v29371_v17  ;;  %4236 = vst.msk [vmem:[#allocation2 + $0x139] sm:$0xff] %vm627_vm0, %v29371_v17  ;;  %v4169_v46 = vmul.f32 %v29134_v56, %v4078_v41  ;;  %24693 = vmatprep.mubr.msk.f32.mxu1 %vm627_vm0, %v29376_v43  ;;  %v29546_v45 = vld [vmem:[#allocation2 + $0x108] sm:$0xff]  ;;  %v29550_v28 = vld [vmem:[#allocation2 + $0x110] sm:$0xff] }
 0x32e   : > { %v29386_v2 = vadd.f32 %v29139_v57, %v4170_v23  ;;  %24694 = vmatmul.mubr.msk.f32.gmra.mrb[26].mxu1 %vm627_vm0, %v29383_v48 }
 0x32f   : > { %v29391_v32 = vadd.f32 %v29139_v57, %v4169_v46  ;;  %v24654_v5 = vpop.f32.mrb[28].mxu0  ;;  %v29403_v38 = vld [vmem:[#allocation2 + $0x129] sm:$0xff] }
 0x330   : > { %34795 = vst [vmem:[#allocation27_spill] sm:$0xff] %v29386_v2  ;;  %4239 = vst.msk [vmem:[#allocation2 + $0x159] sm:$0xff] %vm627_vm0, %v29386_v2  ;;  %v26753_v36 = vadd.f32 %v24654_v5, %v29117_v51  ;;  %v4088_v21 = vpop.f32.mrb[29].mxu0  ;;  %v29396_v41 = vld [vmem:[#allocation2 + $0x121] sm:$0xff] }
 0x331   : > { %34796 = vst [vmem:[#allocation28_spill] sm:$0xff] %v29391_v32  ;;  %4238 = vst.msk [vmem:[#allocation2 + $0x151] sm:$0xff] %vm627_vm0, %v29391_v32  ;;  %v26754_v23 = vadd.f32 %v4088_v21, %v29119_v52  ;;  %24696 = vmatprep.mubr.msk.f32.mxu1 %vm627_vm0, %v29396_v41  ;;  %v29554_v27 = vld [vmem:[#allocation2 + $0x120] sm:$0xff]  ;;  %v29558_v20 = vld [vmem:[#allocation2 + $0x128] sm:$0xff] }
 0x332   : > { %v4172_v46 = vmul.f32 %v26753_v36, %v29134_v56  ;;  %24697 = vmatmul.mubr.msk.f32.gmra.mrb[28].mxu1 %vm627_vm0, %v29403_v38 }
 0x333   : > { %v4171_v51 = vmul.f32 %v26754_v23, %v29134_v56  ;;  %v24657_v5 = vpop.f32.mrb[30].mxu0  ;;  %v29421_v36 = vld [vmem:[#allocation2 + $0x141] sm:$0xff] }
 0x334   : > { %v29410_v2 = vadd.f32 %v29139_v57, %v4172_v46  ;;  %v26755_v32 = vadd.f32 %v24657_v5, %v29121_v53  ;;  %v4098_v17 = vpop.f32.mrb[31].mxu0  ;;  %v29413_v52 = vld [vmem:[#allocation2 + $0x139] sm:$0xff] }
 0x335   : > { %v29416_v21 = vadd.f32 %v29139_v57, %v4171_v51  ;;  %v26756_v15 = vadd.f32 %v4098_v17, %v29123_v54  ;;  %24699 = vmatprep.mubr.msk.f32.mxu1 %vm627_vm0, %v29413_v52  ;;  %v4247_v51 = vld [vmem:[#allocation2 + $0x8] sm:$0xff]  ;;  %v29461_v5 = vld [vmem:[%s34767_s9 + $0x18] sm:$0xff]  ;;  %v29566_v12 = vld [vmem:[#allocation2 + $0x140] sm:$0xff] }
 0x336   : > { %34797 = vst [vmem:[#allocation29_spill] sm:$0xff] %v29410_v2  ;;  %4241 = vst.msk [vmem:[#allocation2 + $0x171] sm:$0xff] %vm627_vm0, %v29410_v2  ;;  %v4174_v23 = vmul.f32 %v26755_v32, %v29134_v56  ;;  %24700 = vmatmul.mubr.msk.f32.gmra.mrb[30].mxu1 %vm627_vm0, %v29421_v36  ;;  %v29498_v2 = vld [vmem:[#allocation2 + $0x78] sm:$0xff] }
 0x337   : > { %34798 = vst [vmem:[#allocation30_spill] sm:$0xff] %v29416_v21  ;;  %4240 = vst.msk [vmem:[#allocation2 + $0x169] sm:$0xff] %vm627_vm0, %v29416_v21  ;;  %v4173_v53 = vmul.f32 %v26756_v15, %v29134_v56  ;;  %v29441_v32 = vld [vmem:[#allocation2 + $0x159] sm:$0xff]  ;;  %v29494_v21 = vld [vmem:[#allocation2 + $0x68] sm:$0xff] }
 0x338   : > { %v29432_v54 = vadd.f32 %v29139_v57, %v4174_v23  ;;  %v29434_v17 = vld [vmem:[#allocation2 + $0x151] sm:$0xff]  ;;  %v4246_v15 = vld [vmem:[#allocation2] sm:$0xff] }
 0x339   : > { %v29437_v46 = vadd.f32 %v29139_v57, %v4173_v53  ;;  %24702 = vmatprep.mubr.msk.f32.mxu1 %vm627_vm0, %v29434_v17  ;;  %v29464_v23 = vld [vmem:[#allocation2 + $0x18] sm:$0xff]  ;;  %v29470_v53 = vld [vmem:[#allocation2 + $0x20] sm:$0xff]  ;;  %v29570_v11 = vld [vmem:[#allocation2 + $0x150] sm:$0xff] }
 0x33a   : > { %34799 = vst [vmem:[#allocation31_spill] sm:$0xff] %v29432_v54  ;;  %4243 = vst.msk [vmem:[#allocation2 + $0x189] sm:$0xff] %vm627_vm0, %v29432_v54  ;;  %24703 = vmatmul.mubr.msk.f32.gmra.mrb[32].mxu1 %vm627_vm0, %v29441_v32  ;;  %v29490_v54 = vld [vmem:[#allocation2 + $0x60] sm:$0xff]  ;;  %v29562_v19 = vld [vmem:[#allocation2 + $0x138] sm:$0xff] }
 0x33b   : > { %34800 = vst [vmem:[#allocation32_spill] sm:$0xff] %v29437_v46  ;;  %4242 = vst.msk [vmem:[#allocation2 + $0x181] sm:$0xff] %vm627_vm0, %v29437_v46  ;;  %v29486_v46 = vld [vmem:[#allocation2 + $0x50] sm:$0xff]  ;;  %v29574_v3 = vld [vmem:[#allocation2 + $0x158] sm:$0xff] }
 0x33d   : > { %v29453_v57 = vld [vmem:[#allocation2 + $0x171] sm:$0xff] }
 0x33e   : > { %v29449_v56 = vld [vmem:[#allocation2 + $0x169] sm:$0xff]  ;;  %34802 = vst [vmem:[#allocation36_spill] sm:$0xff] %v29453_v57 }
 0x33f   : > { %34801 = vst [vmem:[#allocation33_spill] sm:$0xff] %v29449_v56  ;;  %24705 = vmatprep.mubr.msk.f32.mxu1 %vm627_vm0, %v29449_v56  ;;  %v29578_v34 = vld [vmem:[#allocation2 + $0x168] sm:$0xff]  ;;  %v29582_v1 = vld [vmem:[#allocation2 + $0x170] sm:$0xff] }
 0x340   : > { %24706 = vmatmul.mubr.msk.f32.gmra.mrb[34].mxu1 %vm627_vm0, %v29453_v57  ;;  %v29593_v57 = vld [vmem:[#allocation2 + $0x1a] sm:$0xff]  ;;  %v29599_v56 = vld [vmem:[#allocation2 + $0x22] sm:$0xff] }
 0x341   : > { %24710 = vmatprep.mubr.msk.f32.mxu1 %vm627_vm0, %v4246_v15  ;;  %v29474_v15 = vld [vmem:[#allocation2 + $0x30] sm:$0xff]  ;;  %34803 = vst [vmem:[#allocation39_spill] sm:$0xff] %v29593_v57  ;;  %34804 = vst [vmem:[#allocation46_spill] sm:$0xff] %v29599_v56 }
 0x344   : > { %24711 = vmatmul.mubr.msk.f32.vlgmr.msra.gmra.mrb[4].mxu1 %vm627_vm0, %v4247_v51  ;;  %v29478_v51 = vld [vmem:[#allocation2 + $0x38] sm:$0xff] }
 0x345   : > { %24759 = vmatpush3.msra.mxu1 %v29128_v55  ;;  %24713 = vmatprep.mubr.msk.f32.mxu1 %vm627_vm0, %v29464_v23  ;;  %v29482_v55 = vld [vmem:[#allocation2 + $0x48] sm:$0xff] }
 0x346   : > { %24808 = vmatprep.subr.mxu1 %v29461_v5 }
 0x348   : > { %24714 = vmatmul.mubr.msk.f32.gmra.mrb[6].mxu1 %vm627_vm0, %v29470_v53 }
 0x349   : > { %24716 = vmatprep.mubr.msk.f32.mxu1 %vm627_vm0, %v29474_v15 }
 0x34c   : > { %24717 = vmatmul.mubr.msk.f32.gmra.mrb[8].mxu1 %vm627_vm0, %v29478_v51 }
 0x34d   : > { %24719 = vmatprep.mubr.msk.f32.mxu1 %vm627_vm0, %v29482_v55 }
 0x350   : > { %24720 = vmatmul.mubr.msk.f32.gmra.mrb[10].mxu1 %vm627_vm0, %v29486_v46 }
 0x351   : > { %24722 = vmatprep.mubr.msk.f32.mxu1 %vm627_vm0, %v29490_v54 }
 0x354   : > { %24723 = vmatmul.mubr.msk.f32.gmra.mrb[12].mxu1 %vm627_vm0, %v29494_v21 }
 0x355   : > { %24725 = vmatprep.mubr.msk.f32.mxu1 %vm627_vm0, %v29498_v2 }
 0x358   : > { %24726 = vmatmul.mubr.msk.f32.gmra.mrb[14].mxu1 %vm627_vm0, %v29502_v61 }
 0x359   : > { %24728 = vmatprep.mubr.msk.f32.mxu1 %vm627_vm0, %v29506_v60 }
 0x35c   : > { %24729 = vmatmul.mubr.msk.f32.gmra.mrb[16].mxu1 %vm627_vm0, %v29510_v40 }
 0x35d   : > { %24731 = vmatprep.mubr.msk.f32.mxu1 %vm627_vm0, %v29514_v39 }
 0x360   : > { %24732 = vmatmul.mubr.msk.f32.gmra.mrb[18].mxu1 %vm627_vm0, %v29518_v14 }
 0x361   : > { %24734 = vmatprep.mubr.msk.f32.mxu1 %vm627_vm0, %v29522_v13 }
 0x364   : > { %24735 = vmatmul.mubr.msk.f32.gmra.mrb[20].mxu1 %vm627_vm0, %v29526_v6 }
 0x365   : > { %24737 = vmatprep.mubr.msk.f32.mxu1 %vm627_vm0, %v29530_v35 }
 0x368   : > { %24738 = vmatmul.mubr.msk.f32.gmra.mrb[22].mxu1 %vm627_vm0, %v29534_v59 }
 0x369   : > { %24740 = vmatprep.mubr.msk.f32.mxu1 %vm627_vm0, %v29538_v58 }
 0x36c   : > { %24741 = vmatmul.mubr.msk.f32.gmra.mrb[24].mxu1 %vm627_vm0, %v29542_v30 }
 0x36d   : > { %24743 = vmatprep.mubr.msk.f32.mxu1 %vm627_vm0, %v29546_v45 }
 0x370   : > { %24744 = vmatmul.mubr.msk.f32.gmra.mrb[26].mxu1 %vm627_vm0, %v29550_v28 }
 0x371   : > { %24746 = vmatprep.mubr.msk.f32.mxu1 %vm627_vm0, %v29554_v27 }
 0x374   : > { %24747 = vmatmul.mubr.msk.f32.gmra.mrb[28].mxu1 %vm627_vm0, %v29558_v20 }
 0x375   : > { %24749 = vmatprep.mubr.msk.f32.mxu1 %vm627_vm0, %v29562_v19 }
 0x378   : > { %24750 = vmatmul.mubr.msk.f32.gmra.mrb[30].mxu1 %vm627_vm0, %v29566_v12 }
 0x379   : > { %24752 = vmatprep.mubr.msk.f32.mxu1 %vm627_vm0, %v29570_v11 }
 0x37c   : > { %24753 = vmatmul.mubr.msk.f32.gmra.mrb[32].mxu1 %vm627_vm0, %v29574_v3 }
 0x37d   : > { %24755 = vmatprep.mubr.msk.f32.mxu1 %vm627_vm0, %v29578_v34 }
 0x380   : > { %24756 = vmatmul.mubr.msk.f32.gmra.mrb[34].mxu1 %vm627_vm0, %v29582_v1 }
 0x381   : > { %24760 = vmatprep.mubr.msk.f32.mxu1 %vm627_vm0, %v4955_v33  ;;  %v29603_v33 = vld [vmem:[#allocation2 + $0x32] sm:$0xff] }
 0x382   : > { %34805 = vst [vmem:[#allocation49_spill] sm:$0xff] %v29603_v33 }
 0x384   : > { %24761 = vmatmul.mubr.msk.f32.vlgmr.msra.gmra.mrb[4].mxu1 %vm627_vm0, %v4956_v63  ;;  %v29607_v63 = vld [vmem:[#allocation2 + $0x3a] sm:$0xff] }
 0x385   : > { %24809 = vmatpush3.msra.mxu1 %v29461_v5  ;;  %24763 = vmatprep.mubr.msk.f32.mxu1 %vm627_vm0, %v29593_v57  ;;  %34806 = vst [vmem:[#allocation50_spill] sm:$0xff] %v29607_v63  ;;  %v29611_v5 = vld [vmem:[#allocation2 + $0x4a] sm:$0xff]  ;;  %v29615_v57 = vld [vmem:[#allocation2 + $0x52] sm:$0xff] }
 0x386   : > { %24858 = vmatprep.subr.mxu1 %v29590_v62  ;;  %34807 = vst [vmem:[#allocation51_spill] sm:$0xff] %v29611_v5  ;;  %34808 = vst [vmem:[#allocation52_spill] sm:$0xff] %v29615_v57 }
 0x388   : > { %24764 = vmatmul.mubr.msk.f32.gmra.mrb[6].mxu1 %vm627_vm0, %v29599_v56  ;;  %v29619_v56 = vld [vmem:[#allocation2 + $0x62] sm:$0xff] }
 0x389   : > { %24766 = vmatprep.mubr.msk.f32.mxu1 %vm627_vm0, %v29603_v33  ;;  %34809 = vst [vmem:[#allocation53_spill] sm:$0xff] %v29619_v56  ;;  %v29623_v33 = vld [vmem:[#allocation2 + $0x6a] sm:$0xff] }
 0x38a   : > { %34810 = vst [vmem:[#allocation54_spill] sm:$0xff] %v29623_v33 }
 0x38c   : > { %24767 = vmatmul.mubr.msk.f32.gmra.mrb[8].mxu1 %vm627_vm0, %v29607_v63  ;;  %v29627_v63 = vld [vmem:[#allocation2 + $0x7a] sm:$0xff] }
 0x38d   : > { %24769 = vmatprep.mubr.msk.f32.mxu1 %vm627_vm0, %v29611_v5  ;;  %34811 = vst [vmem:[#allocation55_spill] sm:$0xff] %v29627_v63  ;;  %v29631_v5 = vld [vmem:[#allocation2 + $0x82] sm:$0xff] }
 0x38e   : > { %34812 = vst [vmem:[#allocation56_spill] sm:$0xff] %v29631_v5 }
 0x390   : > { %24770 = vmatmul.mubr.msk.f32.gmra.mrb[10].mxu1 %vm627_vm0, %v29615_v57  ;;  %v29635_v57 = vld [vmem:[#allocation2 + $0x92] sm:$0xff] }
 0x391   : > { %24772 = vmatprep.mubr.msk.f32.mxu1 %vm627_vm0, %v29619_v56  ;;  %34813 = vst [vmem:[#allocation57_spill] sm:$0xff] %v29635_v57  ;;  %v29639_v56 = vld [vmem:[#allocation2 + $0x9a] sm:$0xff] }
 0x392   : > { %34814 = vst [vmem:[#allocation58_spill] sm:$0xff] %v29639_v56 }
 0x394   : > { %24773 = vmatmul.mubr.msk.f32.gmra.mrb[12].mxu1 %vm627_vm0, %v29623_v33  ;;  %v29643_v33 = vld [vmem:[#allocation2 + $0xaa] sm:$0xff] }
 0x395   : > { %24775 = vmatprep.mubr.msk.f32.mxu1 %vm627_vm0, %v29627_v63  ;;  %34815 = vst [vmem:[#allocation59_spill] sm:$0xff] %v29643_v33  ;;  %v29647_v63 = vld [vmem:[#allocation2 + $0xb2] sm:$0xff] }
 0x396   : > { %34816 = vst [vmem:[#allocation60_spill] sm:$0xff] %v29647_v63 }
 0x398   : > { %24776 = vmatmul.mubr.msk.f32.gmra.mrb[14].mxu1 %vm627_vm0, %v29631_v5  ;;  %v29651_v5 = vld [vmem:[#allocation2 + $0xc2] sm:$0xff] }
 0x399   : > { %24778 = vmatprep.mubr.msk.f32.mxu1 %vm627_vm0, %v29635_v57  ;;  %34817 = vst [vmem:[#allocation61_spill] sm:$0xff] %v29651_v5  ;;  %v29655_v57 = vld [vmem:[#allocation2 + $0xca] sm:$0xff] }
 0x39a   : > { %34818 = vst [vmem:[#allocation62_spill] sm:$0xff] %v29655_v57 }
 0x39c   : > { %24779 = vmatmul.mubr.msk.f32.gmra.mrb[16].mxu1 %vm627_vm0, %v29639_v56  ;;  %v29659_v56 = vld [vmem:[#allocation2 + $0xda] sm:$0xff] }
 0x39d   : > { %24781 = vmatprep.mubr.msk.f32.mxu1 %vm627_vm0, %v29643_v33  ;;  %34819 = vst [vmem:[#allocation63_spill] sm:$0xff] %v29659_v56  ;;  %v29663_v33 = vld [vmem:[#allocation2 + $0xe2] sm:$0xff] }
 0x39e   : > { %34820 = vst [vmem:[#allocation64_spill] sm:$0xff] %v29663_v33 }
 0x3a0   : > { %24782 = vmatmul.mubr.msk.f32.gmra.mrb[18].mxu1 %vm627_vm0, %v29647_v63  ;;  %v29667_v63 = vld [vmem:[#allocation2 + $0xf2] sm:$0xff] }
 0x3a1   : > { %24784 = vmatprep.mubr.msk.f32.mxu1 %vm627_vm0, %v29651_v5  ;;  %34821 = vst [vmem:[#allocation65_spill] sm:$0xff] %v29667_v63  ;;  %v29671_v5 = vld [vmem:[#allocation2 + $0xfa] sm:$0xff] }
 0x3a2   : > { %34822 = vst [vmem:[#allocation66_spill] sm:$0xff] %v29671_v5 }
 0x3a4   : > { %24785 = vmatmul.mubr.msk.f32.gmra.mrb[20].mxu1 %vm627_vm0, %v29655_v57  ;;  %v29675_v57 = vld [vmem:[#allocation2 + $0x10a] sm:$0xff] }
 0x3a5   : > { %24787 = vmatprep.mubr.msk.f32.mxu1 %vm627_vm0, %v29659_v56  ;;  %34823 = vst [vmem:[#allocation67_spill] sm:$0xff] %v29675_v57  ;;  %v29679_v56 = vld [vmem:[#allocation2 + $0x112] sm:$0xff] }
 0x3a6   : > { %34824 = vst [vmem:[#allocation68_spill] sm:$0xff] %v29679_v56 }
 0x3a8   : > { %24788 = vmatmul.mubr.msk.f32.gmra.mrb[22].mxu1 %vm627_vm0, %v29663_v33  ;;  %v29683_v33 = vld [vmem:[#allocation2 + $0x122] sm:$0xff] }
 0x3a9   : > { %24790 = vmatprep.mubr.msk.f32.mxu1 %vm627_vm0, %v29667_v63  ;;  %34825 = vst [vmem:[#allocation69_spill] sm:$0xff] %v29683_v33  ;;  %v29687_v63 = vld [vmem:[#allocation2 + $0x12a] sm:$0xff] }
 0x3aa   : > { %34826 = vst [vmem:[#allocation70_spill] sm:$0xff] %v29687_v63 }
 0x3ac   : > { %24791 = vmatmul.mubr.msk.f32.gmra.mrb[24].mxu1 %vm627_vm0, %v29671_v5  ;;  %v29691_v5 = vld [vmem:[#allocation2 + $0x13a] sm:$0xff] }
 0x3ad   : > { %24793 = vmatprep.mubr.msk.f32.mxu1 %vm627_vm0, %v29675_v57  ;;  %34827 = vst [vmem:[#allocation71_spill] sm:$0xff] %v29691_v5  ;;  %v29695_v57 = vld [vmem:[#allocation2 + $0x142] sm:$0xff] }
 0x3b0   : > { %24794 = vmatmul.mubr.msk.f32.gmra.mrb[26].mxu1 %vm627_vm0, %v29679_v56  ;;  %v29699_v56 = vld [vmem:[#allocation2 + $0x152] sm:$0xff] }
 0x3b1   : > { %24796 = vmatprep.mubr.msk.f32.mxu1 %vm627_vm0, %v29683_v33  ;;  %34828 = vst [vmem:[#allocation72_spill] sm:$0xff] %v29699_v56  ;;  %v29703_v33 = vld [vmem:[#allocation2 + $0x15a] sm:$0xff] }
 0x3b4   : > { %24797 = vmatmul.mubr.msk.f32.gmra.mrb[28].mxu1 %vm627_vm0, %v29687_v63  ;;  %v29707_v63 = vld [vmem:[#allocation2 + $0x16a] sm:$0xff] }
 0x3b5   : > { %24799 = vmatprep.mubr.msk.f32.mxu1 %vm627_vm0, %v29691_v5  ;;  %34829 = vst [vmem:[#allocation73_spill] sm:$0xff] %v29707_v63  ;;  %v29711_v5 = vld [vmem:[#allocation2 + $0x172] sm:$0xff] }
 0x3b8   : > { %24800 = vmatmul.mubr.msk.f32.gmra.mrb[30].mxu1 %vm627_vm0, %v29695_v57 }
 0x3b9   : > { %24802 = vmatprep.mubr.msk.f32.mxu1 %vm627_vm0, %v29699_v56  ;;  %v21966_v56 = vld [vmem:[%s34767_s9 + $0x28] sm:$0xff] }
 0x3bc   : > { %24803 = vmatmul.mubr.msk.f32.gmra.mrb[32].mxu1 %vm627_vm0, %v29703_v33 }
 0x3bd   : > { %24805 = vmatprep.mubr.msk.f32.mxu1 %vm627_vm0, %v29707_v63 }
 0x3c0   : > { %24806 = vmatmul.mubr.msk.f32.gmra.mrb[34].mxu1 %vm627_vm0, %v29711_v5 }
 0x3c1   : > { %24810 = vmatprep.mubr.msk.f32.mxu1 %vm627_vm0, %v29464_v23  ;;  %v29783_v23 = vld [vmem:[#allocation2 + $0x188] sm:$0xff] }
 0x3c4   : > { %24811 = vmatmul.mubr.msk.f32.vlgmr.msra.gmra.mrb[4].mxu1 %vm627_vm0, %v29470_v53  ;;  %v21999_v53 = vld [vmem:[%s34767_s9 + $0x30] sm:$0xff] }
 0x3c5   : > { %24859 = vmatpush3.msra.mxu1 %v29590_v62  ;;  %24813 = vmatprep.mubr.msk.f32.mxu1 %vm627_vm0, %v29474_v15  ;;  %v29779_v62 = vld [vmem:[#allocation2 + $0x180] sm:$0xff] }
 0x3c6   : > { %24908 = vmatprep.subr.mxu1 %v21966_v56 }
 0x3c8   : > { %24814 = vmatmul.mubr.msk.f32.gmra.mrb[6].mxu1 %vm627_vm0, %v29478_v51 }
 0x3c9   : > { %24816 = vmatprep.mubr.msk.f32.mxu1 %vm627_vm0, %v29482_v55 }
 0x3cc   : > { %24817 = vmatmul.mubr.msk.f32.gmra.mrb[8].mxu1 %vm627_vm0, %v29486_v46 }
 0x3cd   : > { %24819 = vmatprep.mubr.msk.f32.mxu1 %vm627_vm0, %v29490_v54 }
 0x3d0   : > { %24820 = vmatmul.mubr.msk.f32.gmra.mrb[10].mxu1 %vm627_vm0, %v29494_v21 }
 0x3d1   : > { %24822 = vmatprep.mubr.msk.f32.mxu1 %vm627_vm0, %v29498_v2 }
 0x3d4   : > { %24823 = vmatmul.mubr.msk.f32.gmra.mrb[12].mxu1 %vm627_vm0, %v29502_v61 }
 0x3d5   : > { %24825 = vmatprep.mubr.msk.f32.mxu1 %vm627_vm0, %v29506_v60 }
 0x3d8   : > { %24826 = vmatmul.mubr.msk.f32.gmra.mrb[14].mxu1 %vm627_vm0, %v29510_v40 }
 0x3d9   : > { %24828 = vmatprep.mubr.msk.f32.mxu1 %vm627_vm0, %v29514_v39 }
 0x3dc   : > { %24829 = vmatmul.mubr.msk.f32.gmra.mrb[16].mxu1 %vm627_vm0, %v29518_v14 }
 0x3dd   : > { %24831 = vmatprep.mubr.msk.f32.mxu1 %vm627_vm0, %v29522_v13 }
 0x3e0   : > { %24832 = vmatmul.mubr.msk.f32.gmra.mrb[18].mxu1 %vm627_vm0, %v29526_v6 }
 0x3e1   : > { %24834 = vmatprep.mubr.msk.f32.mxu1 %vm627_vm0, %v29530_v35 }
 0x3e4   : > { %24835 = vmatmul.mubr.msk.f32.gmra.mrb[20].mxu1 %vm627_vm0, %v29534_v59 }
 0x3e5   : > { %24837 = vmatprep.mubr.msk.f32.mxu1 %vm627_vm0, %v29538_v58 }
 0x3e8   : > { %24838 = vmatmul.mubr.msk.f32.gmra.mrb[22].mxu1 %vm627_vm0, %v29542_v30 }
 0x3e9   : > { %24840 = vmatprep.mubr.msk.f32.mxu1 %vm627_vm0, %v29546_v45 }
 0x3ec   : > { %24841 = vmatmul.mubr.msk.f32.gmra.mrb[24].mxu1 %vm627_vm0, %v29550_v28 }
 0x3ed   : > { %24843 = vmatprep.mubr.msk.f32.mxu1 %vm627_vm0, %v29554_v27 }
 0x3f0   : > { %24844 = vmatmul.mubr.msk.f32.gmra.mrb[26].mxu1 %vm627_vm0, %v29558_v20 }
 0x3f1   : > { %24846 = vmatprep.mubr.msk.f32.mxu1 %vm627_vm0, %v29562_v19 }
 0x3f4   : > { %24847 = vmatmul.mubr.msk.f32.gmra.mrb[28].mxu1 %vm627_vm0, %v29566_v12 }
 0x3f5   : > { %24849 = vmatprep.mubr.msk.f32.mxu1 %vm627_vm0, %v29570_v11 }
 0x3f8   : > { %24850 = vmatmul.mubr.msk.f32.gmra.mrb[30].mxu1 %vm627_vm0, %v29574_v3 }
 0x3f9   : > { %24852 = vmatprep.mubr.msk.f32.mxu1 %vm627_vm0, %v29578_v34 }
 0x3fc   : > { %24853 = vmatmul.mubr.msk.f32.gmra.mrb[32].mxu1 %vm627_vm0, %v29582_v1 }
 0x3fd   : > { %24855 = vmatprep.mubr.msk.f32.mxu1 %vm627_vm0, %v29779_v62 }
 0x400   : > { %24856 = vmatmul.mubr.msk.f32.gmra.mrb[34].mxu1 %vm627_vm0, %v29783_v23 }
 0x401   : > { %24860 = vmatprep.mubr.msk.f32.mxu1 %vm627_vm0, %v29176_v8  ;;  %v34830_v8 = vld [vmem:[#allocation33_spill] sm:$0xff] }
 0x404   : > { %24861 = vmatmul.mubr.msk.f32.vlgmr.msra.gmra.mrb[4].mxu1 %vm627_vm0, %v29183_v10  ;;  %v34831_v10 = vld [vmem:[#allocation36_spill] sm:$0xff] }
 0x405   : > { %24909 = vmatpush3.msra.mxu1 %v21966_v56  ;;  %24863 = vmatprep.mubr.msk.f32.mxu1 %vm627_vm0, %v29196_v16  ;;  %v29850_v16 = vld [vmem:[#allocation2 + $0x181] sm:$0xff]  ;;  %v34841_v56 = vld [vmem:[#allocation56_spill] sm:$0xff] }
 0x406   : > { %24958 = vmatprep.subr.mxu1 %v21999_v53 }
 0x408   : > { %24864 = vmatmul.mubr.msk.f32.gmra.mrb[6].mxu1 %vm627_vm0, %v29203_v18  ;;  %v29854_v18 = vld [vmem:[#allocation2 + $0x189] sm:$0xff] }
 0x409   : > { %24866 = vmatprep.mubr.msk.f32.mxu1 %vm627_vm0, %v29216_v24  ;;  %v34832_v24 = vld [vmem:[#allocation39_spill] sm:$0xff] }
 0x40c   : > { %24867 = vmatmul.mubr.msk.f32.gmra.mrb[8].mxu1 %vm627_vm0, %v29223_v26  ;;  %v22032_v26 = vld [vmem:[%s34767_s9 + $0x38] sm:$0xff] }
 0x40d   : > { %24869 = vmatprep.mubr.msk.f32.mxu1 %vm627_vm0, %v29236_v42  ;;  %v34833_v42 = vld [vmem:[#allocation46_spill] sm:$0xff] }
 0x410   : > { %24870 = vmatmul.mubr.msk.f32.gmra.mrb[10].mxu1 %vm627_vm0, %v29243_v44  ;;  %v34834_v44 = vld [vmem:[#allocation49_spill] sm:$0xff] }
 0x411   : > { %24872 = vmatprep.mubr.msk.f32.mxu1 %vm627_vm0, %v29256_v49  ;;  %v34835_v49 = vld [vmem:[#allocation50_spill] sm:$0xff] }
 0x414   : > { %24873 = vmatmul.mubr.msk.f32.gmra.mrb[12].mxu1 %vm627_vm0, %v29263_v29  ;;  %v34836_v29 = vld [vmem:[#allocation51_spill] sm:$0xff] }
 0x415   : > { %24875 = vmatprep.mubr.msk.f32.mxu1 %vm627_vm0, %v29276_v31  ;;  %v34837_v31 = vld [vmem:[#allocation52_spill] sm:$0xff] }
 0x418   : > { %24876 = vmatmul.mubr.msk.f32.gmra.mrb[14].mxu1 %vm627_vm0, %v29283_v0  ;;  %v34838_v0 = vld [vmem:[#allocation53_spill] sm:$0xff] }
 0x419   : > { %24878 = vmatprep.mubr.msk.f32.mxu1 %vm627_vm0, %v29296_v37  ;;  %v34839_v37 = vld [vmem:[#allocation54_spill] sm:$0xff] }
 0x41c   : > { %24879 = vmatmul.mubr.msk.f32.gmra.mrb[16].mxu1 %vm627_vm0, %v29303_v9  ;;  %v34840_v9 = vld [vmem:[#allocation55_spill] sm:$0xff] }
 0x41d   : > { %24881 = vmatprep.mubr.msk.f32.mxu1 %vm627_vm0, %v29316_v22 }
 0x420   : > { %24882 = vmatmul.mubr.msk.f32.gmra.mrb[18].mxu1 %vm627_vm0, %v29323_v25 }
 0x421   : > { %24884 = vmatprep.mubr.msk.f32.mxu1 %vm627_vm0, %v29336_v47 }
 0x424   : > { %24885 = vmatmul.mubr.msk.f32.gmra.mrb[20].mxu1 %vm627_vm0, %v29343_v50 }
 0x425   : > { %24887 = vmatprep.mubr.msk.f32.mxu1 %vm627_vm0, %v29356_v4 }
 0x428   : > { %24888 = vmatmul.mubr.msk.f32.gmra.mrb[22].mxu1 %vm627_vm0, %v29363_v7 }
 0x429   : > { %24890 = vmatprep.mubr.msk.f32.mxu1 %vm627_vm0, %v29376_v43 }
 0x42c   : > { %24891 = vmatmul.mubr.msk.f32.gmra.mrb[24].mxu1 %vm627_vm0, %v29383_v48 }
 0x42d   : > { %24893 = vmatprep.mubr.msk.f32.mxu1 %vm627_vm0, %v29396_v41 }
 0x430   : > { %24894 = vmatmul.mubr.msk.f32.gmra.mrb[26].mxu1 %vm627_vm0, %v29403_v38 }
 0x431   : > { %24896 = vmatprep.mubr.msk.f32.mxu1 %vm627_vm0, %v29413_v52 }
 0x434   : > { %24897 = vmatmul.mubr.msk.f32.gmra.mrb[28].mxu1 %vm627_vm0, %v29421_v36 }
 0x435   : > { %24899 = vmatprep.mubr.msk.f32.mxu1 %vm627_vm0, %v29434_v17 }
 0x438   : > { %24900 = vmatmul.mubr.msk.f32.gmra.mrb[30].mxu1 %vm627_vm0, %v29441_v32 }
 0x439   : > { %24902 = vmatprep.mubr.msk.f32.mxu1 %vm627_vm0, %v34830_v8 }
 0x43c   : > { %24903 = vmatmul.mubr.msk.f32.gmra.mrb[32].mxu1 %vm627_vm0, %v34831_v10 }
 0x43d   : > { %24905 = vmatprep.mubr.msk.f32.mxu1 %vm627_vm0, %v29850_v16 }
 0x440   : > { %24906 = vmatmul.mubr.msk.f32.gmra.mrb[34].mxu1 %vm627_vm0, %v29854_v18 }
 0x441   : > { %24910 = vmatprep.mubr.msk.f32.mxu1 %vm627_vm0, %v34832_v24  ;;  %v34843_v24 = vld [vmem:[#allocation58_spill] sm:$0xff] }
 0x444   : > { %24911 = vmatmul.mubr.msk.f32.vlgmr.msra.gmra.mrb[4].mxu1 %vm627_vm0, %v34833_v42  ;;  %v34844_v42 = vld [vmem:[#allocation59_spill] sm:$0xff] }
 0x445   : > { %24959 = vmatpush3.msra.mxu1 %v21999_v53  ;;  %24913 = vmatprep.mubr.msk.f32.mxu1 %vm627_vm0, %v34834_v44  ;;  %v34842_v53 = vld [vmem:[#allocation57_spill] sm:$0xff] }
 0x446   : > { %25008 = vmatprep.subr.mxu1 %v22032_v26 }
 0x448   : > { %24914 = vmatmul.mubr.msk.f32.gmra.mrb[6].mxu1 %vm627_vm0, %v34835_v49 }
 0x449   : > { %24916 = vmatprep.mubr.msk.f32.mxu1 %vm627_vm0, %v34836_v29 }
 0x44c   : > { %24917 = vmatmul.mubr.msk.f32.gmra.mrb[8].mxu1 %vm627_vm0, %v34837_v31  ;;  %v34845_v31 = vld [vmem:[#allocation60_spill] sm:$0xff] }
 0x44d   : > { %24919 = vmatprep.mubr.msk.f32.mxu1 %vm627_vm0, %v34838_v0  ;;  %v34846_v0 = vld [vmem:[#allocation61_spill] sm:$0xff] }
 0x450   : > { %24920 = vmatmul.mubr.msk.f32.gmra.mrb[10].mxu1 %vm627_vm0, %v34839_v37  ;;  %v34847_v37 = vld [vmem:[#allocation62_spill] sm:$0xff] }
 0x451   : > { %24922 = vmatprep.mubr.msk.f32.mxu1 %vm627_vm0, %v34840_v9  ;;  %v34848_v9 = vld [vmem:[#allocation63_spill] sm:$0xff] }
 0x454   : > { %24923 = vmatmul.mubr.msk.f32.gmra.mrb[12].mxu1 %vm627_vm0, %v34841_v56  ;;  %v34849_v56 = vld [vmem:[#allocation64_spill] sm:$0xff] }
 0x455   : > { %24925 = vmatprep.mubr.msk.f32.mxu1 %vm627_vm0, %v34842_v53  ;;  %v34850_v53 = vld [vmem:[#allocation65_spill] sm:$0xff] }
 0x458   : > { %24926 = vmatmul.mubr.msk.f32.gmra.mrb[14].mxu1 %vm627_vm0, %v34843_v24  ;;  %v34851_v24 = vld [vmem:[#allocation66_spill] sm:$0xff] }
 0x459   : > { %24928 = vmatprep.mubr.msk.f32.mxu1 %vm627_vm0, %v34844_v42  ;;  %v34852_v42 = vld [vmem:[#allocation67_spill] sm:$0xff] }
 0x45c   : > { %24929 = vmatmul.mubr.msk.f32.gmra.mrb[16].mxu1 %vm627_vm0, %v34845_v31  ;;  %v34853_v31 = vld [vmem:[#allocation68_spill] sm:$0xff] }
 0x45d   : > { %24931 = vmatprep.mubr.msk.f32.mxu1 %vm627_vm0, %v34846_v0  ;;  %v34854_v0 = vld [vmem:[#allocation69_spill] sm:$0xff] }
 0x460   : > { %24932 = vmatmul.mubr.msk.f32.gmra.mrb[18].mxu1 %vm627_vm0, %v34847_v37  ;;  %v34855_v37 = vld [vmem:[#allocation70_spill] sm:$0xff] }
 0x461   : > { %24934 = vmatprep.mubr.msk.f32.mxu1 %vm627_vm0, %v34848_v9  ;;  %v34856_v9 = vld [vmem:[#allocation71_spill] sm:$0xff] }
 0x464   : > { %24935 = vmatmul.mubr.msk.f32.gmra.mrb[20].mxu1 %vm627_vm0, %v34849_v56 }
 0x465   : > { %24937 = vmatprep.mubr.msk.f32.mxu1 %vm627_vm0, %v34850_v53  ;;  %v34857_v53 = vld [vmem:[#allocation72_spill] sm:$0xff] }
 0x468   : > { %24938 = vmatmul.mubr.msk.f32.gmra.mrb[22].mxu1 %vm627_vm0, %v34851_v24 }
 0x469   : > { %24940 = vmatprep.mubr.msk.f32.mxu1 %vm627_vm0, %v34852_v42 }
 0x46c   : > { %24941 = vmatmul.mubr.msk.f32.gmra.mrb[24].mxu1 %vm627_vm0, %v34853_v31 }
 0x46d   : > { %24943 = vmatprep.mubr.msk.f32.mxu1 %vm627_vm0, %v34854_v0  ;;  %v29921_v0 = vld [vmem:[#allocation2 + $0x182] sm:$0xff] }
 0x470   : > { %24944 = vmatmul.mubr.msk.f32.gmra.mrb[26].mxu1 %vm627_vm0, %v34855_v37 }
 0x471   : > { %24946 = vmatprep.mubr.msk.f32.mxu1 %vm627_vm0, %v34856_v9  ;;  %v29925_v9 = vld [vmem:[#allocation2 + $0x18a] sm:$0xff] }
 0x474   : > { %24947 = vmatmul.mubr.msk.f32.gmra.mrb[28].mxu1 %vm627_vm0, %v29695_v57 }
 0x475   : > { %24949 = vmatprep.mubr.msk.f32.mxu1 %vm627_vm0, %v34857_v53 }
 0x478   : > { %24950 = vmatmul.mubr.msk.f32.gmra.mrb[30].mxu1 %vm627_vm0, %v29703_v33 }
 0x479   : > { %24952 = vmatprep.mubr.msk.f32.mxu1 %vm627_vm0, %v29707_v63  ;;  %v22065_v63 = vld [vmem:[%s34767_s9 + $0x40] sm:$0xff] }
 0x47c   : > { %24953 = vmatmul.mubr.msk.f32.gmra.mrb[32].mxu1 %vm627_vm0, %v29711_v5 }
 0x47d   : > { %24955 = vmatprep.mubr.msk.f32.mxu1 %vm627_vm0, %v29921_v0 }
 0x480   : > { %24956 = vmatmul.mubr.msk.f32.gmra.mrb[34].mxu1 %vm627_vm0, %v29925_v9 }
 0x481   : > { %24960 = vmatprep.mubr.msk.f32.mxu1 %vm627_vm0, %v29474_v15  ;;  %v30128_v15 = vld [vmem:[%s34359_s13 + $0x1] ss:$0 sm:$0xff] }
 0x484   : > { %24961 = vmatmul.mubr.msk.f32.vlgmr.msra.gmra.mrb[4].mxu1 %vm627_vm0, %v29478_v51 }
 0x485   : > { %25009 = vmatpush3.msra.mxu1 %v22032_v26  ;;  %24963 = vmatprep.mubr.msk.f32.mxu1 %vm627_vm0, %v29482_v55 }
 0x486   : > { %25058 = vmatprep.subr.mxu1 %v22065_v63 }
 0x488   : > { %24964 = vmatmul.mubr.msk.f32.gmra.mrb[6].mxu1 %vm627_vm0, %v29486_v46  ;;  %v22102_v46 = vld [vmem:[%s34767_s9 + $0x48] sm:$0xff] }
 0x489   : > { %24966 = vmatprep.mubr.msk.f32.mxu1 %vm627_vm0, %v29490_v54  ;;  %v7838_v54 = vld [vmem:[#allocation2 + $0x1] sm:$0xff] }
 0x48a   : > { %25110 = vmatprep.mubr.msk.f32.mxu0 %vm627_vm0, %v7838_v54 }
 0x48c   : > { %24967 = vmatmul.mubr.msk.f32.gmra.mrb[8].mxu1 %vm627_vm0, %v29494_v21  ;;  %v7308_v21 = vld [vmem:[#allocation2 + $0x19a] sm:$0xff] }
 0x48d   : > { %24969 = vmatprep.mubr.msk.f32.mxu1 %vm627_vm0, %v29498_v2  ;;  %v34871_v2 = vld [vmem:[#allocation69_spill] sm:$0xff] }
 0x490   : > { %24970 = vmatmul.mubr.msk.f32.gmra.mrb[10].mxu1 %vm627_vm0, %v29502_v61  ;;  %v34866_v61 = vld [vmem:[#allocation60_spill] sm:$0xff] }
 0x491   : > { %24972 = vmatprep.mubr.msk.f32.mxu1 %vm627_vm0, %v29506_v60  ;;  %v34865_v60 = vld [vmem:[#allocation59_spill] sm:$0xff] }
 0x494   : > { %24973 = vmatmul.mubr.msk.f32.gmra.mrb[12].mxu1 %vm627_vm0, %v29510_v40  ;;  %v34862_v40 = vld [vmem:[#allocation56_spill] sm:$0xff] }
 0x495   : > { %24975 = vmatprep.mubr.msk.f32.mxu1 %vm627_vm0, %v29514_v39  ;;  %v34861_v39 = vld [vmem:[#allocation55_spill] sm:$0xff] }
 0x498   : > { %24976 = vmatmul.mubr.msk.f32.gmra.mrb[14].mxu1 %vm627_vm0, %v29518_v14  ;;  %v34858_v14 = vld [vmem:[#allocation52_spill] sm:$0xff] }
 0x499   : > { %24978 = vmatprep.mubr.msk.f32.mxu1 %vm627_vm0, %v29522_v13  ;;  %v6922_v13 = vld [vmem:[#allocation2 + $0x1a1] sm:$0xff] }
 0x49c   : > { %24979 = vmatmul.mubr.msk.f32.gmra.mrb[16].mxu1 %vm627_vm0, %v29526_v6  ;;  %v6902_v6 = vld [vmem:[#allocation2 + $0xb1] sm:$0xff] }
 0x49d   : > { %24981 = vmatprep.mubr.msk.f32.mxu1 %vm627_vm0, %v29530_v35  ;;  %v6901_v35 = vld [vmem:[#allocation2 + $0xa9] sm:$0xff] }
 0x4a0   : > { %24982 = vmatmul.mubr.msk.f32.gmra.mrb[18].mxu1 %vm627_vm0, %v29534_v59  ;;  %v6900_v59 = vld [vmem:[#allocation2 + $0x99] sm:$0xff] }
 0x4a1   : > { %24984 = vmatprep.mubr.msk.f32.mxu1 %vm627_vm0, %v29538_v58  ;;  %v6899_v58 = vld [vmem:[#allocation2 + $0x91] sm:$0xff] }
 0x4a4   : > { %24985 = vmatmul.mubr.msk.f32.gmra.mrb[20].mxu1 %vm627_vm0, %v29542_v30  ;;  %v6898_v30 = vld [vmem:[#allocation2 + $0x81] sm:$0xff] }
 0x4a5   : > { %24987 = vmatprep.mubr.msk.f32.mxu1 %vm627_vm0, %v29546_v45  ;;  %v6897_v45 = vld [vmem:[#allocation2 + $0x79] sm:$0xff] }
 0x4a8   : > { %24988 = vmatmul.mubr.msk.f32.gmra.mrb[22].mxu1 %vm627_vm0, %v29550_v28  ;;  %v6896_v28 = vld [vmem:[#allocation2 + $0x69] sm:$0xff] }
 0x4a9   : > { %24990 = vmatprep.mubr.msk.f32.mxu1 %vm627_vm0, %v29554_v27  ;;  %v6895_v27 = vld [vmem:[#allocation2 + $0x61] sm:$0xff] }
 0x4ac   : > { %24991 = vmatmul.mubr.msk.f32.gmra.mrb[24].mxu1 %vm627_vm0, %v29558_v20  ;;  %v6534_v20 = vld [vmem:[#allocation2 + $0x198] sm:$0xff] }
 0x4ad   : > { %24993 = vmatprep.mubr.msk.f32.mxu1 %vm627_vm0, %v29562_v19  ;;  %v6894_v19 = vld [vmem:[#allocation2 + $0x51] sm:$0xff] }
 0x4b0   : > { %24994 = vmatmul.mubr.msk.f32.gmra.mrb[26].mxu1 %vm627_vm0, %v29566_v12  ;;  %v6535_v12 = vld [vmem:[#allocation2 + $0x1a0] sm:$0xff] }
 0x4b1   : > { %24996 = vmatprep.mubr.msk.f32.mxu1 %vm627_vm0, %v29570_v11  ;;  %v6891_v11 = vld [vmem:[#allocation2 + $0x31] sm:$0xff] }
 0x4b4   : > { %24997 = vmatmul.mubr.msk.f32.gmra.mrb[28].mxu1 %vm627_vm0, %v29574_v3  ;;  %v6893_v3 = vld [vmem:[#allocation2 + $0x49] sm:$0xff] }
 0x4b5   : > { %24999 = vmatprep.mubr.msk.f32.mxu1 %vm627_vm0, %v29578_v34  ;;  %v22103_v34 = vld [vmem:[%s34767_s9 + $0x50] sm:$0xff] }
 0x4b6   : > { %25108 = vmatprep.subr.mxu0 %v22103_v34 }
 0x4b7   : > { %25109 = vmatpush3.msra.mxu0 %v22103_v34 }
 0x4b8   : > { %25000 = vmatmul.mubr.msk.f32.gmra.mrb[30].mxu1 %vm627_vm0, %v29582_v1  ;;  %v6892_v1 = vld [vmem:[#allocation2 + $0x39] sm:$0xff]  ;;  %25158 = vmatprep.subr.mxu0 %v22102_v46 }
 0x4b9   : > { %25002 = vmatprep.mubr.msk.f32.mxu1 %vm627_vm0, %v29779_v62 }
 0x4bc   : > { %25003 = vmatmul.mubr.msk.f32.gmra.mrb[32].mxu1 %vm627_vm0, %v29783_v23 }
 0x4bd   : > { %25005 = vmatprep.mubr.msk.f32.mxu1 %vm627_vm0, %v6534_v20 }
 0x4c0   : > { %25006 = vmatmul.mubr.msk.f32.gmra.mrb[34].mxu1 %vm627_vm0, %v6535_v12 }
 0x4c1   : > { %25010 = vmatprep.mubr.msk.f32.mxu1 %vm627_vm0, %v6891_v11 }
 0x4c4   : > { %25011 = vmatmul.mubr.msk.f32.vlgmr.msra.gmra.mrb[4].mxu1 %vm627_vm0, %v6892_v1 }
 0x4c5   : > { %25059 = vmatpush3.msra.mxu1 %v22065_v63  ;;  %25013 = vmatprep.mubr.msk.f32.mxu1 %vm627_vm0, %v6893_v3 }
 0x4c8   : > { %25014 = vmatmul.mubr.msk.f32.gmra.mrb[6].mxu1 %vm627_vm0, %v6894_v19 }
 0x4c9   : > { %25016 = vmatprep.mubr.msk.f32.mxu1 %vm627_vm0, %v6895_v27 }
 0x4cc   : > { %25017 = vmatmul.mubr.msk.f32.gmra.mrb[8].mxu1 %vm627_vm0, %v6896_v28 }
 0x4cd   : > { %25019 = vmatprep.mubr.msk.f32.mxu1 %vm627_vm0, %v6897_v45 }
 0x4d0   : > { %25020 = vmatmul.mubr.msk.f32.gmra.mrb[10].mxu1 %vm627_vm0, %v6898_v30 }
 0x4d1   : > { %25022 = vmatprep.mubr.msk.f32.mxu1 %vm627_vm0, %v6899_v58 }
 0x4d4   : > { %25023 = vmatmul.mubr.msk.f32.gmra.mrb[12].mxu1 %vm627_vm0, %v6900_v59 }
 0x4d5   : > { %25025 = vmatprep.mubr.msk.f32.mxu1 %vm627_vm0, %v6901_v35 }
 0x4d8   : > { %25026 = vmatmul.mubr.msk.f32.gmra.mrb[14].mxu1 %vm627_vm0, %v6902_v6 }
 0x4d9   : > { %25028 = vmatprep.mubr.msk.f32.mxu1 %vm627_vm0, %v29316_v22  ;;  %v34859_v22 = vld [vmem:[#allocation53_spill] sm:$0xff] }
 0x4dc   : > { %25029 = vmatmul.mubr.msk.f32.gmra.mrb[16].mxu1 %vm627_vm0, %v29323_v25  ;;  %v34860_v25 = vld [vmem:[#allocation54_spill] sm:$0xff] }
 0x4dd   : > { %25031 = vmatprep.mubr.msk.f32.mxu1 %vm627_vm0, %v29336_v47  ;;  %v34863_v47 = vld [vmem:[#allocation57_spill] sm:$0xff] }
 0x4e0   : > { %25032 = vmatmul.mubr.msk.f32.gmra.mrb[18].mxu1 %vm627_vm0, %v29343_v50  ;;  %v34864_v50 = vld [vmem:[#allocation58_spill] sm:$0xff] }
 0x4e1   : > { %25034 = vmatprep.mubr.msk.f32.mxu1 %vm627_vm0, %v29356_v4  ;;  %v34867_v4 = vld [vmem:[#allocation61_spill] sm:$0xff] }
 0x4e4   : > { %25035 = vmatmul.mubr.msk.f32.gmra.mrb[20].mxu1 %vm627_vm0, %v29363_v7  ;;  %v34868_v7 = vld [vmem:[#allocation62_spill] sm:$0xff] }
 0x4e5   : > { %25037 = vmatprep.mubr.msk.f32.mxu1 %vm627_vm0, %v29376_v43  ;;  %v34869_v43 = vld [vmem:[#allocation63_spill] sm:$0xff] }
 0x4e8   : > { %25038 = vmatmul.mubr.msk.f32.gmra.mrb[22].mxu1 %vm627_vm0, %v29383_v48  ;;  %v34870_v48 = vld [vmem:[#allocation65_spill] sm:$0xff] }
 0x4e9   : > { %25040 = vmatprep.mubr.msk.f32.mxu1 %vm627_vm0, %v29396_v41  ;;  %v34872_v41 = vld [vmem:[#allocation71_spill] sm:$0xff] }
 0x4ec   : > { %25041 = vmatmul.mubr.msk.f32.gmra.mrb[24].mxu1 %vm627_vm0, %v29403_v38  ;;  %v6921_v38 = vld [vmem:[#allocation2 + $0x199] sm:$0xff] }
 0x4ed   : > { %25043 = vmatprep.mubr.msk.f32.mxu1 %vm627_vm0, %v29413_v52  ;;  %v34873_v52 = vld [vmem:[#allocation73_spill] sm:$0xff] }
 0x4f0   : > { %25044 = vmatmul.mubr.msk.f32.gmra.mrb[26].mxu1 %vm627_vm0, %v29421_v36  ;;  %v7309_v36 = vld [vmem:[#allocation2 + $0x1a2] sm:$0xff] }
 0x4f1   : > { %25046 = vmatprep.mubr.msk.f32.mxu1 %vm627_vm0, %v29434_v17  ;;  %v7839_v17 = vld [vmem:[#allocation2 + $0x9] sm:$0xff] }
 0x4f2   : > { %25111 = vmatmul.mubr.msk.f32.vlgmr.msra.gmra.mrb[32].mxu0 %vm627_vm0, %v7839_v17 }
 0x4f3   : > { %25159 = vmatpush3.msra.mxu0 %v22102_v46 }
 0x4f4   : > { %25047 = vmatmul.mubr.msk.f32.gmra.mrb[28].mxu1 %vm627_vm0, %v29441_v32  ;;  %v30117_v32 = vld [vmem:[%s34767_s9 + $0x58] sm:$0xff] }
 0x4f5   : > { %25049 = vmatprep.mubr.msk.f32.mxu1 %vm627_vm0, %v34830_v8  ;;  %25208 = vmatprep.subr.mxu0 %v30117_v32 }
 0x4f8   : > { %25050 = vmatmul.mubr.msk.f32.gmra.mrb[30].mxu1 %vm627_vm0, %v34831_v10 }
 0x4f9   : > { %25052 = vmatprep.mubr.msk.f32.mxu1 %vm627_vm0, %v29850_v16 }
 0x4fc   : > { %25053 = vmatmul.mubr.msk.f32.gmra.mrb[32].mxu1 %vm627_vm0, %v29854_v18 }
 0x4fd   : > { %25055 = vmatprep.mubr.msk.f32.mxu1 %vm627_vm0, %v6921_v38 }
 0x500   : > { %25056 = vmatmul.mubr.msk.f32.gmra.mrb[34].mxu1 %vm627_vm0, %v6922_v13 }
 0x501   : > { %25060 = vmatprep.mubr.msk.f32.mxu1 %vm627_vm0, %v34834_v44 }
 0x504   : > { %25061 = vmatmul.mubr.msk.f32.vlgmr.msra.gmra.mrb[4].mxu1 %vm627_vm0, %v34835_v49 }
 0x505   : > { %25063 = vmatprep.mubr.msk.f32.mxu1 %vm627_vm0, %v34836_v29 }
 0x508   : > { %25064 = vmatmul.mubr.msk.f32.gmra.mrb[6].mxu1 %vm627_vm0, %v34858_v14 }
 0x509   : > { %25066 = vmatprep.mubr.msk.f32.mxu1 %vm627_vm0, %v34859_v22 }
 0x50c   : > { %25067 = vmatmul.mubr.msk.f32.gmra.mrb[8].mxu1 %vm627_vm0, %v34860_v25 }
 0x50d   : > { %25069 = vmatprep.mubr.msk.f32.mxu1 %vm627_vm0, %v34861_v39 }
 0x510   : > { %25070 = vmatmul.mubr.msk.f32.gmra.mrb[10].mxu1 %vm627_vm0, %v34862_v40 }
 0x511   : > { %25072 = vmatprep.mubr.msk.f32.mxu1 %vm627_vm0, %v34863_v47 }
 0x514   : > { %25073 = vmatmul.mubr.msk.f32.gmra.mrb[12].mxu1 %vm627_vm0, %v34864_v50 }
 0x515   : > { %25075 = vmatprep.mubr.msk.f32.mxu1 %vm627_vm0, %v34865_v60 }
 0x518   : > { %25076 = vmatmul.mubr.msk.f32.gmra.mrb[14].mxu1 %vm627_vm0, %v34866_v61 }
 0x519   : > { %25078 = vmatprep.mubr.msk.f32.mxu1 %vm627_vm0, %v34867_v4 }
 0x51c   : > { %25079 = vmatmul.mubr.msk.f32.gmra.mrb[16].mxu1 %vm627_vm0, %v34868_v7 }
 0x51d   : > { %25081 = vmatprep.mubr.msk.f32.mxu1 %vm627_vm0, %v34869_v43 }
 0x520   : > { %25082 = vmatmul.mubr.msk.f32.gmra.mrb[18].mxu1 %vm627_vm0, %v34849_v56 }
 0x521   : > { %25084 = vmatprep.mubr.msk.f32.mxu1 %vm627_vm0, %v34870_v48 }
 0x524   : > { %25085 = vmatmul.mubr.msk.f32.gmra.mrb[20].mxu1 %vm627_vm0, %v34851_v24 }
 0x525   : > { %25087 = vmatprep.mubr.msk.f32.mxu1 %vm627_vm0, %v34852_v42 }
 0x528   : > { %25088 = vmatmul.mubr.msk.f32.gmra.mrb[22].mxu1 %vm627_vm0, %v34853_v31 }
 0x529   : > { %25090 = vmatprep.mubr.msk.f32.mxu1 %vm627_vm0, %v34871_v2 }
 0x52c   : > { %25091 = vmatmul.mubr.msk.f32.gmra.mrb[24].mxu1 %vm627_vm0, %v34855_v37 }
 0x52d   : > { %25093 = vmatprep.mubr.msk.f32.mxu1 %vm627_vm0, %v34872_v41 }
 0x530   : > { %25094 = vmatmul.mubr.msk.f32.gmra.mrb[26].mxu1 %vm627_vm0, %v29695_v57  ;;  %v30123_v57 = vld [vmem:[%s34359_s13] ss:$0 sm:$0xff] }
 0x531   : > { %25096 = vmatprep.mubr.msk.f32.mxu1 %vm627_vm0, %v34857_v53 }
 0x534   : > { %25097 = vmatmul.mubr.msk.f32.gmra.mrb[28].mxu1 %vm627_vm0, %v29703_v33 }
 0x535   : > { %25099 = vmatprep.mubr.msk.f32.mxu1 %vm627_vm0, %v34873_v52 }
 0x538   : > { %25100 = vmatmul.mubr.msk.f32.gmra.mrb[30].mxu1 %vm627_vm0, %v29711_v5 }
 0x539   : > { %25102 = vmatprep.mubr.msk.f32.mxu1 %vm627_vm0, %v29921_v0 }
 0x53c   : > { %25103 = vmatmul.mubr.msk.f32.gmra.mrb[32].mxu1 %vm627_vm0, %v29925_v9 }
 0x53d   : > { %25105 = vmatprep.mubr.msk.f32.mxu1 %vm627_vm0, %v7308_v21 }
 0x540   : > { %25106 = vmatmul.mubr.msk.f32.gmra.mrb[34].mxu1 %vm627_vm0, %v7309_v36 }
 0x5d7   : > { %v25062_v51 = vpop.f32.mrb[4].mxu1 }
 0x5d8   : > { %v7670_v55 = vmul.f32 %v25062_v51, %v30123_v57  ;;  %v7474_v33 = vpop.f32.mrb[5].mxu1 }
 0x5d9   : > { %v7669_v63 = vmul.f32 %v30123_v57, %v7474_v33 }
 0x5da   : > { %v7706_v5 = vadd.f32 %v30128_v15, %v7670_v55 }
 0x5db   : > { %v7705_v62 = vadd.f32 %v30128_v15, %v7669_v63  ;;  %v25065_v23 = vpop.f32.mrb[6].mxu1 }
 0x5dc   : > { %v7738_v8 = vmax.f32 %v7706_v5, 0.0  ;;  %v7672_v10 = vmul.f32 %v25065_v23, %v30123_v57  ;;  %v7484_v16 = vpop.f32.mrb[7].mxu1 }
 0x5dd   : > { %v7737_v18 = vmax.f32 %v7705_v62, 0.0  ;;  %v7671_v26 = vmul.f32 %v30123_v57, %v7484_v16 }
 0x5de   : > { %7770 = vst.msk [vmem:[#allocation2 + $0x21] sm:$0xff] %vm627_vm0, %v7738_v8  ;;  %v7708_v44 = vadd.f32 %v30128_v15, %v7672_v10 }
 0x5df   : > { %7769 = vst.msk [vmem:[#allocation2 + $0x19] sm:$0xff] %vm627_vm0, %v7737_v18  ;;  %v7707_v49 = vadd.f32 %v30128_v15, %v7671_v26  ;;  %v25068_v29 = vpop.f32.mrb[8].mxu1 }
 0x5e0   : > { %v7740_v31 = vmax.f32 %v7708_v44, 0.0  ;;  %v7674_v0 = vmul.f32 %v25068_v29, %v30123_v57  ;;  %v7494_v37 = vpop.f32.mrb[9].mxu1 }
 0x5e1   : > { %v7739_v9 = vmax.f32 %v7707_v49, 0.0  ;;  %v7673_v56 = vmul.f32 %v30123_v57, %v7494_v37 }
 0x5e2   : > { %7772 = vst.msk [vmem:[#allocation2 + $0x39] sm:$0xff] %vm627_vm0, %v7740_v31  ;;  %v7710_v53 = vadd.f32 %v30128_v15, %v7674_v0 }
 0x5e3   : > { %7771 = vst.msk [vmem:[#allocation2 + $0x31] sm:$0xff] %vm627_vm0, %v7739_v9  ;;  %v7709_v24 = vadd.f32 %v30128_v15, %v7673_v56  ;;  %v25071_v42 = vpop.f32.mrb[10].mxu1 }
 0x5e4   : > { %v7742_v20 = vmax.f32 %v7710_v53, 0.0  ;;  %v7676_v12 = vmul.f32 %v25071_v42, %v30123_v57  ;;  %v7504_v11 = vpop.f32.mrb[11].mxu1 }
 0x5e5   : > { %v7741_v34 = vmax.f32 %v7709_v24, 0.0  ;;  %v7675_v1 = vmul.f32 %v30123_v57, %v7504_v11  ;;  %v30156_v45 = vld [vmem:[#allocation2 + $0x21] sm:$0xff] }
 0x5e6   : > { %7774 = vst.msk [vmem:[#allocation2 + $0x51] sm:$0xff] %vm627_vm0, %v7742_v20  ;;  %v7712_v3 = vadd.f32 %v30128_v15, %v7676_v12  ;;  %v30150_v19 = vld [vmem:[#allocation2 + $0x19] sm:$0xff] }
 0x5e7   : > { %7773 = vst.msk [vmem:[#allocation2 + $0x49] sm:$0xff] %vm627_vm0, %v7741_v34  ;;  %v7711_v27 = vadd.f32 %v30128_v15, %v7675_v1  ;;  %v25074_v28 = vpop.f32.mrb[12].mxu1  ;;  %25113 = vmatprep.mubr.msk.f32.mxu0 %vm627_vm0, %v30150_v19 }
 0x5e8   : > { %v7744_v30 = vmax.f32 %v7712_v3, 0.0  ;;  %v7678_v58 = vmul.f32 %v25074_v28, %v30123_v57  ;;  %v7514_v59 = vpop.f32.mrb[13].mxu1  ;;  %25114 = vmatmul.mubr.msk.f32.gmra.mrb[34].mxu0 %vm627_vm0, %v30156_v45 }
 0x5e9   : > { %v7743_v35 = vmax.f32 %v7711_v27, 0.0  ;;  %v7677_v6 = vmul.f32 %v30123_v57, %v7514_v59  ;;  %v30170_v25 = vld [vmem:[#allocation2 + $0x39] sm:$0xff] }
 0x5ea   : > { %7776 = vst.msk [vmem:[#allocation2 + $0x69] sm:$0xff] %vm627_vm0, %v7744_v30  ;;  %v7714_v38 = vadd.f32 %v30128_v15, %v7678_v58  ;;  %v30164_v13 = vld [vmem:[#allocation2 + $0x31] sm:$0xff] }
 0x5eb   : > { %7775 = vst.msk [vmem:[#allocation2 + $0x61] sm:$0xff] %vm627_vm0, %v7743_v35  ;;  %v7713_v14 = vadd.f32 %v30128_v15, %v7677_v6  ;;  %v25077_v22 = vpop.f32.mrb[14].mxu1  ;;  %25116 = vmatprep.mubr.msk.f32.mxu0 %vm627_vm0, %v30164_v13 }
 0x5ec   : > { %v7746_v39 = vmax.f32 %v7714_v38, 0.0  ;;  %v7680_v40 = vmul.f32 %v25077_v22, %v30123_v57  ;;  %v7524_v47 = vpop.f32.mrb[15].mxu1  ;;  %25117 = vmatmul.mubr.msk.f32.gmra.mrb[36].mxu0 %vm627_vm0, %v30170_v25 }
 0x5ed   : > { %v7745_v50 = vmax.f32 %v7713_v14, 0.0  ;;  %v7679_v60 = vmul.f32 %v30123_v57, %v7524_v47  ;;  %v30184_v48 = vld [vmem:[#allocation2 + $0x51] sm:$0xff] }
 0x5ee   : > { %7778 = vst.msk [vmem:[#allocation2 + $0x81] sm:$0xff] %vm627_vm0, %v7746_v39  ;;  %v7716_v61 = vadd.f32 %v30128_v15, %v7680_v40  ;;  %v30178_v4 = vld [vmem:[#allocation2 + $0x49] sm:$0xff] }
 0x5ef   : > { %7777 = vst.msk [vmem:[#allocation2 + $0x79] sm:$0xff] %vm627_vm0, %v7745_v50  ;;  %v7715_v7 = vadd.f32 %v30128_v15, %v7679_v60  ;;  %v25080_v43 = vpop.f32.mrb[16].mxu1  ;;  %25119 = vmatprep.mubr.msk.f32.mxu0 %vm627_vm0, %v30178_v4 }
 0x5f0   : > { %v7748_v2 = vmax.f32 %v7716_v61, 0.0  ;;  %v7682_v41 = vmul.f32 %v25080_v43, %v30123_v57  ;;  %v7534_v52 = vpop.f32.mrb[17].mxu1  ;;  %25120 = vmatmul.mubr.msk.f32.gmra.mrb[38].mxu0 %vm627_vm0, %v30184_v48 }
 0x5f1   : > { %v7747_v21 = vmax.f32 %v7715_v7, 0.0  ;;  %v7681_v36 = vmul.f32 %v30123_v57, %v7534_v52  ;;  %v30198_v55 = vld [vmem:[#allocation2 + $0x69] sm:$0xff] }
 0x5f2   : > { %7780 = vst.msk [vmem:[#allocation2 + $0x99] sm:$0xff] %vm627_vm0, %v7748_v2  ;;  %v7718_v54 = vadd.f32 %v30128_v15, %v7682_v41  ;;  %v30192_v17 = vld [vmem:[#allocation2 + $0x61] sm:$0xff] }
 0x5f3   : > { %7779 = vst.msk [vmem:[#allocation2 + $0x91] sm:$0xff] %vm627_vm0, %v7747_v21  ;;  %v7717_v46 = vadd.f32 %v30128_v15, %v7681_v36  ;;  %v25083_v51 = vpop.f32.mrb[18].mxu1  ;;  %25122 = vmatprep.mubr.msk.f32.mxu0 %vm627_vm0, %v30192_v17 }
 0x5f4   : > { %v7750_v33 = vmax.f32 %v7718_v54, 0.0  ;;  %v7684_v63 = vmul.f32 %v25083_v51, %v30123_v57  ;;  %v7544_v5 = vpop.f32.mrb[19].mxu1  ;;  %25123 = vmatmul.mubr.msk.f32.gmra.mrb[40].mxu0 %vm627_vm0, %v30198_v55 }
 0x5f5   : > { %v7749_v62 = vmax.f32 %v7717_v46, 0.0  ;;  %v7683_v23 = vmul.f32 %v30123_v57, %v7544_v5  ;;  %v30212_v26 = vld [vmem:[#allocation2 + $0x81] sm:$0xff] }
 0x5f6   : > { %7782 = vst.msk [vmem:[#allocation2 + $0xb1] sm:$0xff] %vm627_vm0, %v7750_v33  ;;  %v7720_v8 = vadd.f32 %v30128_v15, %v7684_v63  ;;  %v30206_v10 = vld [vmem:[#allocation2 + $0x79] sm:$0xff] }
 0x5f7   : > { %7781 = vst.msk [vmem:[#allocation2 + $0xa9] sm:$0xff] %vm627_vm0, %v7749_v62  ;;  %v7719_v16 = vadd.f32 %v30128_v15, %v7683_v23  ;;  %v25086_v18 = vpop.f32.mrb[20].mxu1  ;;  %25125 = vmatprep.mubr.msk.f32.mxu0 %vm627_vm0, %v30206_v10 }
 0x5f8   : > { %v7752_v44 = vmax.f32 %v7720_v8, 0.0  ;;  %v7686_v49 = vmul.f32 %v25086_v18, %v30123_v57  ;;  %v7554_v29 = vpop.f32.mrb[21].mxu1  ;;  %25126 = vmatmul.mubr.msk.f32.gmra.mrb[42].mxu0 %vm627_vm0, %v30212_v26 }
 0x5f9   : > { %v7751_v31 = vmax.f32 %v7719_v16, 0.0  ;;  %v7685_v0 = vmul.f32 %v30123_v57, %v7554_v29  ;;  %v30226_v24 = vld [vmem:[#allocation2 + $0x99] sm:$0xff] }
 0x5fa   : > { %7784 = vst.msk [vmem:[#allocation2 + $0xc9] sm:$0xff] %vm627_vm0, %v7752_v44  ;;  %v7722_v37 = vadd.f32 %v30128_v15, %v7686_v49  ;;  %v30220_v9 = vld [vmem:[#allocation2 + $0x91] sm:$0xff] }
 0x5fb   : > { %7783 = vst.msk [vmem:[#allocation2 + $0xc1] sm:$0xff] %vm627_vm0, %v7751_v31  ;;  %v7721_v56 = vadd.f32 %v30128_v15, %v7685_v0  ;;  %v25089_v53 = vpop.f32.mrb[22].mxu1  ;;  %25128 = vmatprep.mubr.msk.f32.mxu0 %vm627_vm0, %v30220_v9 }
 0x5fc   : > { %v7754_v42 = vmax.f32 %v7722_v37, 0.0  ;;  %v7688_v20 = vmul.f32 %v25089_v53, %v30123_v57  ;;  %v7564_v12 = vpop.f32.mrb[23].mxu1  ;;  %25129 = vmatmul.mubr.msk.f32.gmra.mrb[44].mxu0 %vm627_vm0, %v30226_v24 }
 0x5fd   : > { %v7753_v11 = vmax.f32 %v7721_v56, 0.0  ;;  %v7687_v34 = vmul.f32 %v30123_v57, %v7564_v12  ;;  %v30240_v30 = vld [vmem:[#allocation2 + $0xb1] sm:$0xff] }
 0x5fe   : > { %7786 = vst.msk [vmem:[#allocation2 + $0xe1] sm:$0xff] %vm627_vm0, %v7754_v42  ;;  %v7724_v1 = vadd.f32 %v30128_v15, %v7688_v20  ;;  %v30234_v3 = vld [vmem:[#allocation2 + $0xa9] sm:$0xff] }
 0x5ff   : > { %7785 = vst.msk [vmem:[#allocation2 + $0xd9] sm:$0xff] %vm627_vm0, %v7753_v11  ;;  %v7723_v27 = vadd.f32 %v30128_v15, %v7687_v34  ;;  %v25092_v28 = vpop.f32.mrb[24].mxu1  ;;  %25131 = vmatprep.mubr.msk.f32.mxu0 %vm627_vm0, %v30234_v3 }
 0x600   : > { %v7756_v58 = vmax.f32 %v7724_v1, 0.0  ;;  %v7690_v59 = vmul.f32 %v25092_v28, %v30123_v57  ;;  %v7574_v35 = vpop.f32.mrb[25].mxu1  ;;  %25132 = vmatmul.mubr.msk.f32.gmra.mrb[46].mxu0 %vm627_vm0, %v30240_v30 }
 0x601   : > { %v7755_v6 = vmax.f32 %v7723_v27, 0.0  ;;  %v7689_v38 = vmul.f32 %v30123_v57, %v7574_v35  ;;  %v30254_v47 = vld [vmem:[#allocation2 + $0xc9] sm:$0xff] }
 0x602   : > { %7788 = vst.msk [vmem:[#allocation2 + $0xf9] sm:$0xff] %vm627_vm0, %v7756_v58  ;;  %v7726_v14 = vadd.f32 %v30128_v15, %v7690_v59  ;;  %v30248_v22 = vld [vmem:[#allocation2 + $0xc1] sm:$0xff] }
 0x603   : > { %7787 = vst.msk [vmem:[#allocation2 + $0xf1] sm:$0xff] %vm627_vm0, %v7755_v6  ;;  %v7725_v39 = vadd.f32 %v30128_v15, %v7689_v38  ;;  %v25095_v40 = vpop.f32.mrb[26].mxu1  ;;  %25134 = vmatprep.mubr.msk.f32.mxu0 %vm627_vm0, %v30248_v22 }
 0x604   : > { %v7758_v50 = vmax.f32 %v7726_v14, 0.0  ;;  %v7692_v60 = vmul.f32 %v25095_v40, %v30123_v57  ;;  %v7584_v61 = vpop.f32.mrb[27].mxu1  ;;  %25135 = vmatmul.mubr.msk.f32.gmra.mrb[48].mxu0 %vm627_vm0, %v30254_v47 }
 0x605   : > { %v7757_v7 = vmax.f32 %v7725_v39, 0.0  ;;  %v7691_v43 = vmul.f32 %v30123_v57, %v7584_v61  ;;  %v30268_v36 = vld [vmem:[#allocation2 + $0xe1] sm:$0xff] }
 0x606   : > { %7790 = vst.msk [vmem:[#allocation2 + $0x111] sm:$0xff] %vm627_vm0, %v7758_v50  ;;  %v7728_v2 = vadd.f32 %v30128_v15, %v7692_v60  ;;  %v30262_v41 = vld [vmem:[#allocation2 + $0xd9] sm:$0xff] }
 0x607   : > { %7789 = vst.msk [vmem:[#allocation2 + $0x109] sm:$0xff] %vm627_vm0, %v7757_v7  ;;  %v7727_v52 = vadd.f32 %v30128_v15, %v7691_v43  ;;  %v25098_v21 = vpop.f32.mrb[28].mxu1  ;;  %25137 = vmatprep.mubr.msk.f32.mxu0 %vm627_vm0, %v30262_v41 }
 0x608   : > { %v7760_v54 = vmax.f32 %v7728_v2, 0.0  ;;  %v7694_v46 = vmul.f32 %v25098_v21, %v30123_v57  ;;  %v7594_v51 = vpop.f32.mrb[29].mxu1  ;;  %25138 = vmatmul.mubr.msk.f32.gmra.mrb[50].mxu0 %vm627_vm0, %v30268_v36  ;;  %v7804_v21 = vld [vmem:[#allocation2] sm:$0xff] }
 0x609   : > { %v7759_v33 = vmax.f32 %v7727_v52, 0.0  ;;  %v7693_v63 = vmul.f32 %v30123_v57, %v7594_v51  ;;  %v30282_v16 = vld [vmem:[#allocation2 + $0xf9] sm:$0xff] }
 0x60a   : > { %7792 = vst.msk [vmem:[#allocation2 + $0x129] sm:$0xff] %vm627_vm0, %v7760_v54  ;;  %v7730_v5 = vadd.f32 %v30128_v15, %v7694_v46  ;;  %v30276_v62 = vld [vmem:[#allocation2 + $0xf1] sm:$0xff]  ;;  %v7805_v46 = vld [vmem:[#allocation2 + $0x8] sm:$0xff]  ;;  %v30350_v51 = vld [vmem:[%s34767_s9 + $0x60] sm:$0xff] }
 0x60b   : > { %7791 = vst.msk [vmem:[#allocation2 + $0x121] sm:$0xff] %vm627_vm0, %v7759_v33  ;;  %v7729_v23 = vadd.f32 %v30128_v15, %v7693_v63  ;;  %v25101_v8 = vpop.f32.mrb[30].mxu1  ;;  %25140 = vmatprep.mubr.msk.f32.mxu0 %vm627_vm0, %v30276_v62  ;;  %v30353_v33 = vld [vmem:[#allocation2 + $0x18] sm:$0xff]  ;;  %v30359_v63 = vld [vmem:[#allocation2 + $0x20] sm:$0xff] }
 0x60c   : > { %v7762_v18 = vmax.f32 %v7730_v5, 0.0  ;;  %v7696_v44 = vmul.f32 %v25101_v8, %v30123_v57  ;;  %v7604_v49 = vpop.f32.mrb[31].mxu1  ;;  %25141 = vmatmul.mubr.msk.f32.gmra.mrb[52].mxu0 %vm627_vm0, %v30282_v16  ;;  %v30363_v5 = vld [vmem:[#allocation2 + $0x30] sm:$0xff] }
 0x60d   : > { %v7761_v29 = vmax.f32 %v7729_v23, 0.0  ;;  %v7695_v31 = vmul.f32 %v30123_v57, %v7604_v49  ;;  %v30296_v42 = vld [vmem:[#allocation2 + $0x111] sm:$0xff] }
 0x60e   : > { %7794 = vst.msk [vmem:[#allocation2 + $0x141] sm:$0xff] %vm627_vm0, %v7762_v18  ;;  %v7732_v0 = vadd.f32 %v30128_v15, %v7696_v44  ;;  %v30290_v37 = vld [vmem:[#allocation2 + $0x109] sm:$0xff]  ;;  %v30367_v23 = vld [vmem:[#allocation2 + $0x38] sm:$0xff]  ;;  %v30379_v18 = vld [vmem:[#allocation2 + $0x60] sm:$0xff] }
 0x60f   : > { %7793 = vst.msk [vmem:[#allocation2 + $0x139] sm:$0xff] %vm627_vm0, %v7761_v29  ;;  %v7731_v56 = vadd.f32 %v30128_v15, %v7695_v31  ;;  %v25104_v53 = vpop.f32.mrb[32].mxu1  ;;  %25143 = vmatprep.mubr.msk.f32.mxu0 %vm627_vm0, %v30290_v37  ;;  %v30375_v8 = vld [vmem:[#allocation2 + $0x50] sm:$0xff]  ;;  %v30383_v44 = vld [vmem:[#allocation2 + $0x68] sm:$0xff]  ;;  %v30387_v49 = vld [vmem:[#allocation2 + $0x78] sm:$0xff] }
 0x610   : > { %v7764_v20 = vmax.f32 %v7732_v0, 0.0  ;;  %v7698_v12 = vmul.f32 %v25104_v53, %v30123_v57  ;;  %v7614_v11 = vpop.f32.mrb[33].mxu1  ;;  %25144 = vmatmul.mubr.msk.f32.gmra.mrb[54].mxu0 %vm627_vm0, %v30296_v42  ;;  %v30391_v29 = vld [vmem:[#allocation2 + $0x80] sm:$0xff]  ;;  %v30395_v31 = vld [vmem:[#allocation2 + $0x90] sm:$0xff]  ;;  %v30399_v0 = vld [vmem:[#allocation2 + $0x98] sm:$0xff] }
 0x611   : > { %v7763_v34 = vmax.f32 %v7731_v56, 0.0  ;;  %v7697_v1 = vmul.f32 %v30123_v57, %v7614_v11  ;;  %v30310_v35 = vld [vmem:[#allocation2 + $0x129] sm:$0xff]  ;;  %v30419_v11 = vld [vmem:[#allocation2 + $0xd8] sm:$0xff] }
 0x612   : > { %7796 = vst.msk [vmem:[#allocation2 + $0x159] sm:$0xff] %vm627_vm0, %v7764_v20  ;;  %v7734_v27 = vadd.f32 %v30128_v15, %v7698_v12  ;;  %v30304_v28 = vld [vmem:[#allocation2 + $0x121] sm:$0xff]  ;;  %v30407_v53 = vld [vmem:[#allocation2 + $0xb0] sm:$0xff] }
 0x613   : > { %7795 = vst.msk [vmem:[#allocation2 + $0x151] sm:$0xff] %vm627_vm0, %v7763_v34  ;;  %v7733_v58 = vadd.f32 %v30128_v15, %v7697_v1  ;;  %v25107_v59 = vpop.f32.mrb[34].mxu1  ;;  %25146 = vmatprep.mubr.msk.f32.mxu0 %vm627_vm0, %v30304_v28  ;;  %v30403_v56 = vld [vmem:[#allocation2 + $0xa8] sm:$0xff]  ;;  %v30411_v20 = vld [vmem:[#allocation2 + $0xc0] sm:$0xff]  ;;  %v30427_v1 = vld [vmem:[#allocation2 + $0xf0] sm:$0xff] }
 0x614   : > { %v7766_v6 = vmax.f32 %v7734_v27, 0.0  ;;  %v7700_v38 = vmul.f32 %v25107_v59, %v30123_v57  ;;  %v7624_v14 = vpop.f32.mrb[35].mxu1  ;;  %25147 = vmatmul.mubr.msk.f32.gmra.mrb[56].mxu0 %vm627_vm0, %v30310_v35  ;;  %v30415_v12 = vld [vmem:[#allocation2 + $0xc8] sm:$0xff]  ;;  %v30423_v34 = vld [vmem:[#allocation2 + $0xe0] sm:$0xff]  ;;  %v30431_v27 = vld [vmem:[#allocation2 + $0xf8] sm:$0xff] }
 0x615   : > { %v7765_v39 = vmax.f32 %v7733_v58, 0.0  ;;  %v7699_v40 = vmul.f32 %v30123_v57, %v7624_v14  ;;  %v30324_v7 = vld [vmem:[#allocation2 + $0x141] sm:$0xff]  ;;  %v30439_v59 = vld [vmem:[#allocation2 + $0x110] sm:$0xff] }
 0x616   : > { %7798 = vst.msk [vmem:[#allocation2 + $0x171] sm:$0xff] %vm627_vm0, %v7766_v6  ;;  %v7736_v50 = vadd.f32 %v30128_v15, %v7700_v38  ;;  %v30318_v60 = vld [vmem:[#allocation2 + $0x139] sm:$0xff]  ;;  %v30435_v58 = vld [vmem:[#allocation2 + $0x108] sm:$0xff] }
 0x617   : > { %7797 = vst.msk [vmem:[#allocation2 + $0x169] sm:$0xff] %vm627_vm0, %v7765_v39  ;;  %v7735_v61 = vadd.f32 %v30128_v15, %v7699_v40  ;;  %25149 = vmatprep.mubr.msk.f32.mxu0 %vm627_vm0, %v30318_v60  ;;  %v30443_v6 = vld [vmem:[#allocation2 + $0x120] sm:$0xff]  ;;  %v30447_v38 = vld [vmem:[#allocation2 + $0x128] sm:$0xff]  ;;  %v30451_v14 = vld [vmem:[#allocation2 + $0x138] sm:$0xff] }
 0x618   : > { %v7768_v43 = vmax.f32 %v7736_v50, 0.0  ;;  %25150 = vmatmul.mubr.msk.f32.gmra.mrb[58].mxu0 %vm627_vm0, %v30324_v7  ;;  %v30455_v39 = vld [vmem:[#allocation2 + $0x140] sm:$0xff] }
 0x619   : > { %v7767_v57 = vmax.f32 %v7735_v61, 0.0  ;;  %v30334_v15 = vld [vmem:[#allocation2 + $0x159] sm:$0xff] }
 0x61a   : > { %7800 = vst.msk [vmem:[#allocation2 + $0x189] sm:$0xff] %vm627_vm0, %v7768_v43  ;;  %v30329_v2 = vld [vmem:[#allocation2 + $0x151] sm:$0xff]  ;;  %v8514_v43 = vld [vmem:[#allocation2 + $0x2] sm:$0xff] }
 0x61b   : > { %7799 = vst.msk [vmem:[#allocation2 + $0x181] sm:$0xff] %vm627_vm0, %v7767_v57  ;;  %25152 = vmatprep.mubr.msk.f32.mxu0 %vm627_vm0, %v30329_v2  ;;  %v30459_v40 = vld [vmem:[#allocation2 + $0x150] sm:$0xff]  ;;  %v30463_v50 = vld [vmem:[#allocation2 + $0x158] sm:$0xff] }
 0x61c   : > { %25153 = vmatmul.mubr.msk.f32.gmra.mrb[60].mxu0 %vm627_vm0, %v30334_v15 }
 0x61d   : > { %v30342_v54 = vld [vmem:[#allocation2 + $0x171] sm:$0xff] }
 0x61e   : > { %v30338_v52 = vld [vmem:[#allocation2 + $0x169] sm:$0xff]  ;;  %34875 = vst [vmem:[#allocation36_spill] sm:$0xff] %v30342_v54 }
 0x61f   : > { %34874 = vst [vmem:[#allocation33_spill] sm:$0xff] %v30338_v52  ;;  %25155 = vmatprep.mubr.msk.f32.mxu0 %vm627_vm0, %v30338_v52  ;;  %v30467_v61 = vld [vmem:[#allocation2 + $0x168] sm:$0xff]  ;;  %v30471_v57 = vld [vmem:[#allocation2 + $0x170] sm:$0xff] }
 0x620   : > { %25156 = vmatmul.mubr.msk.f32.gmra.mrb[62].mxu0 %vm627_vm0, %v30342_v54  ;;  %v30482_v54 = vld [vmem:[#allocation2 + $0x1a] sm:$0xff]  ;;  %v30488_v52 = vld [vmem:[#allocation2 + $0x22] sm:$0xff] }
 0x621   : > { %25160 = vmatprep.mubr.msk.f32.mxu0 %vm627_vm0, %v7804_v21  ;;  %v8515_v21 = vld [vmem:[#allocation2 + $0xa] sm:$0xff]  ;;  %34876 = vst [vmem:[#allocation39_spill] sm:$0xff] %v30482_v54  ;;  %34877 = vst [vmem:[#allocation46_spill] sm:$0xff] %v30488_v52 }
 0x624   : > { %25161 = vmatmul.mubr.msk.f32.vlgmr.msra.gmra.mrb[32].mxu0 %vm627_vm0, %v7805_v46  ;;  %v30479_v46 = vld [vmem:[%s34767_s9 + $0x68] sm:$0xff] }
 0x625   : > { %25209 = vmatpush3.msra.mxu0 %v30117_v32  ;;  %25163 = vmatprep.mubr.msk.f32.mxu0 %vm627_vm0, %v30353_v33  ;;  %v30371_v32 = vld [vmem:[#allocation2 + $0x48] sm:$0xff] }
 0x626   : > { %25258 = vmatprep.subr.mxu0 %v30350_v51 }
 0x628   : > { %25164 = vmatmul.mubr.msk.f32.gmra.mrb[34].mxu0 %vm627_vm0, %v30359_v63 }
 0x629   : > { %25166 = vmatprep.mubr.msk.f32.mxu0 %vm627_vm0, %v30363_v5 }
 0x62c   : > { %25167 = vmatmul.mubr.msk.f32.gmra.mrb[36].mxu0 %vm627_vm0, %v30367_v23 }
 0x62d   : > { %25169 = vmatprep.mubr.msk.f32.mxu0 %vm627_vm0, %v30371_v32 }
 0x630   : > { %25170 = vmatmul.mubr.msk.f32.gmra.mrb[38].mxu0 %vm627_vm0, %v30375_v8 }
 0x631   : > { %25172 = vmatprep.mubr.msk.f32.mxu0 %vm627_vm0, %v30379_v18 }
 0x634   : > { %25173 = vmatmul.mubr.msk.f32.gmra.mrb[40].mxu0 %vm627_vm0, %v30383_v44 }
 0x635   : > { %25175 = vmatprep.mubr.msk.f32.mxu0 %vm627_vm0, %v30387_v49 }
 0x638   : > { %25176 = vmatmul.mubr.msk.f32.gmra.mrb[42].mxu0 %vm627_vm0, %v30391_v29 }
 0x639   : > { %25178 = vmatprep.mubr.msk.f32.mxu0 %vm627_vm0, %v30395_v31 }
 0x63c   : > { %25179 = vmatmul.mubr.msk.f32.gmra.mrb[44].mxu0 %vm627_vm0, %v30399_v0 }
 0x63d   : > { %25181 = vmatprep.mubr.msk.f32.mxu0 %vm627_vm0, %v30403_v56 }
 0x640   : > { %25182 = vmatmul.mubr.msk.f32.gmra.mrb[46].mxu0 %vm627_vm0, %v30407_v53 }
 0x641   : > { %25184 = vmatprep.mubr.msk.f32.mxu0 %vm627_vm0, %v30411_v20 }
 0x644   : > { %25185 = vmatmul.mubr.msk.f32.gmra.mrb[48].mxu0 %vm627_vm0, %v30415_v12 }
 0x645   : > { %25187 = vmatprep.mubr.msk.f32.mxu0 %vm627_vm0, %v30419_v11 }
 0x648   : > { %25188 = vmatmul.mubr.msk.f32.gmra.mrb[50].mxu0 %vm627_vm0, %v30423_v34 }
 0x649   : > { %25190 = vmatprep.mubr.msk.f32.mxu0 %vm627_vm0, %v30427_v1 }
 0x64c   : > { %25191 = vmatmul.mubr.msk.f32.gmra.mrb[52].mxu0 %vm627_vm0, %v30431_v27 }
 0x64d   : > { %25193 = vmatprep.mubr.msk.f32.mxu0 %vm627_vm0, %v30435_v58 }
 0x650   : > { %25194 = vmatmul.mubr.msk.f32.gmra.mrb[54].mxu0 %vm627_vm0, %v30439_v59 }
 0x651   : > { %25196 = vmatprep.mubr.msk.f32.mxu0 %vm627_vm0, %v30443_v6 }
 0x654   : > { %25197 = vmatmul.mubr.msk.f32.gmra.mrb[56].mxu0 %vm627_vm0, %v30447_v38 }
 0x655   : > { %25199 = vmatprep.mubr.msk.f32.mxu0 %vm627_vm0, %v30451_v14 }
 0x658   : > { %25200 = vmatmul.mubr.msk.f32.gmra.mrb[58].mxu0 %vm627_vm0, %v30455_v39 }
 0x659   : > { %25202 = vmatprep.mubr.msk.f32.mxu0 %vm627_vm0, %v30459_v40 }
 0x65c   : > { %25203 = vmatmul.mubr.msk.f32.gmra.mrb[60].mxu0 %vm627_vm0, %v30463_v50 }
 0x65d   : > { %25205 = vmatprep.mubr.msk.f32.mxu0 %vm627_vm0, %v30467_v61 }
 0x660   : > { %25206 = vmatmul.mubr.msk.f32.gmra.mrb[62].mxu0 %vm627_vm0, %v30471_v57 }
 0x661   : > { %25210 = vmatprep.mubr.msk.f32.mxu0 %vm627_vm0, %v8514_v43  ;;  %v30492_v43 = vld [vmem:[#allocation2 + $0x32] sm:$0xff] }
 0x662   : > { %34878 = vst [vmem:[#allocation49_spill] sm:$0xff] %v30492_v43 }
 0x664   : > { %25211 = vmatmul.mubr.msk.f32.vlgmr.msra.gmra.mrb[32].mxu0 %vm627_vm0, %v8515_v21  ;;  %v30496_v21 = vld [vmem:[#allocation2 + $0x3a] sm:$0xff] }
 0x665   : > { %25259 = vmatpush3.msra.mxu0 %v30350_v51  ;;  %25213 = vmatprep.mubr.msk.f32.mxu0 %vm627_vm0, %v30482_v54  ;;  %34879 = vst [vmem:[#allocation50_spill] sm:$0xff] %v30496_v21  ;;  %v30500_v51 = vld [vmem:[#allocation2 + $0x4a] sm:$0xff]  ;;  %v30504_v54 = vld [vmem:[#allocation2 + $0x52] sm:$0xff] }
 0x666   : > { %25308 = vmatprep.subr.mxu0 %v30479_v46  ;;  %34880 = vst [vmem:[#allocation51_spill] sm:$0xff] %v30500_v51  ;;  %34881 = vst [vmem:[#allocation64_spill] sm:$0xff] %v30504_v54 }
 0x668   : > { %25214 = vmatmul.mubr.msk.f32.gmra.mrb[34].mxu0 %vm627_vm0, %v30488_v52  ;;  %v30508_v52 = vld [vmem:[#allocation2 + $0x62] sm:$0xff] }
 0x669   : > { %25216 = vmatprep.mubr.msk.f32.mxu0 %vm627_vm0, %v30492_v43  ;;  %34882 = vst [vmem:[#allocation66_spill] sm:$0xff] %v30508_v52  ;;  %v30512_v43 = vld [vmem:[#allocation2 + $0x6a] sm:$0xff] }
 0x66a   : > { %34883 = vst [vmem:[#allocation67_spill] sm:$0xff] %v30512_v43 }
 0x66c   : > { %25217 = vmatmul.mubr.msk.f32.gmra.mrb[36].mxu0 %vm627_vm0, %v30496_v21  ;;  %v30516_v21 = vld [vmem:[#allocation2 + $0x7a] sm:$0xff] }
 0x66d   : > { %25219 = vmatprep.mubr.msk.f32.mxu0 %vm627_vm0, %v30500_v51  ;;  %34884 = vst [vmem:[#allocation68_spill] sm:$0xff] %v30516_v21  ;;  %v30520_v51 = vld [vmem:[#allocation2 + $0x82] sm:$0xff] }
 0x66e   : > { %34885 = vst [vmem:[#allocation70_spill] sm:$0xff] %v30520_v51 }
 0x670   : > { %25220 = vmatmul.mubr.msk.f32.gmra.mrb[38].mxu0 %vm627_vm0, %v30504_v54  ;;  %v30524_v54 = vld [vmem:[#allocation2 + $0x92] sm:$0xff] }
 0x671   : > { %25222 = vmatprep.mubr.msk.f32.mxu0 %vm627_vm0, %v30508_v52  ;;  %34886 = vst [vmem:[#allocation72_spill] sm:$0xff] %v30524_v54  ;;  %v30528_v52 = vld [vmem:[#allocation2 + $0x9a] sm:$0xff] }
 0x672   : > { %34887 = vst [vmem:[#allocation52_spill] sm:$0xff] %v30528_v52 }
 0x674   : > { %25223 = vmatmul.mubr.msk.f32.gmra.mrb[40].mxu0 %vm627_vm0, %v30512_v43  ;;  %v30532_v43 = vld [vmem:[#allocation2 + $0xaa] sm:$0xff] }
 0x675   : > { %25225 = vmatprep.mubr.msk.f32.mxu0 %vm627_vm0, %v30516_v21  ;;  %34888 = vst [vmem:[#allocation53_spill] sm:$0xff] %v30532_v43  ;;  %v30536_v21 = vld [vmem:[#allocation2 + $0xb2] sm:$0xff] }
 0x676   : > { %34889 = vst [vmem:[#allocation54_spill] sm:$0xff] %v30536_v21 }
 0x678   : > { %25226 = vmatmul.mubr.msk.f32.gmra.mrb[42].mxu0 %vm627_vm0, %v30520_v51  ;;  %v30540_v51 = vld [vmem:[#allocation2 + $0xc2] sm:$0xff] }
 0x679   : > { %25228 = vmatprep.mubr.msk.f32.mxu0 %vm627_vm0, %v30524_v54  ;;  %34890 = vst [vmem:[#allocation55_spill] sm:$0xff] %v30540_v51  ;;  %v30544_v54 = vld [vmem:[#allocation2 + $0xca] sm:$0xff] }
 0x67a   : > { %34891 = vst [vmem:[#allocation56_spill] sm:$0xff] %v30544_v54 }
 0x67c   : > { %25229 = vmatmul.mubr.msk.f32.gmra.mrb[44].mxu0 %vm627_vm0, %v30528_v52  ;;  %v30548_v52 = vld [vmem:[#allocation2 + $0xda] sm:$0xff] }
 0x67d   : > { %25231 = vmatprep.mubr.msk.f32.mxu0 %vm627_vm0, %v30532_v43  ;;  %34892 = vst [vmem:[#allocation57_spill] sm:$0xff] %v30548_v52  ;;  %v30552_v43 = vld [vmem:[#allocation2 + $0xe2] sm:$0xff] }
 0x67e   : > { %34893 = vst [vmem:[#allocation58_spill] sm:$0xff] %v30552_v43 }
 0x680   : > { %25232 = vmatmul.mubr.msk.f32.gmra.mrb[46].mxu0 %vm627_vm0, %v30536_v21  ;;  %v30556_v21 = vld [vmem:[#allocation2 + $0xf2] sm:$0xff] }
 0x681   : > { %25234 = vmatprep.mubr.msk.f32.mxu0 %vm627_vm0, %v30540_v51  ;;  %34894 = vst [vmem:[#allocation59_spill] sm:$0xff] %v30556_v21  ;;  %v30560_v51 = vld [vmem:[#allocation2 + $0xfa] sm:$0xff] }
 0x682   : > { %34895 = vst [vmem:[#allocation60_spill] sm:$0xff] %v30560_v51 }
 0x684   : > { %25235 = vmatmul.mubr.msk.f32.gmra.mrb[48].mxu0 %vm627_vm0, %v30544_v54  ;;  %v30564_v54 = vld [vmem:[#allocation2 + $0x10a] sm:$0xff] }
 0x685   : > { %25237 = vmatprep.mubr.msk.f32.mxu0 %vm627_vm0, %v30548_v52  ;;  %34896 = vst [vmem:[#allocation61_spill] sm:$0xff] %v30564_v54  ;;  %v30568_v52 = vld [vmem:[#allocation2 + $0x112] sm:$0xff] }
 0x686   : > { %34897 = vst [vmem:[#allocation62_spill] sm:$0xff] %v30568_v52 }
 0x688   : > { %25238 = vmatmul.mubr.msk.f32.gmra.mrb[50].mxu0 %vm627_vm0, %v30552_v43  ;;  %v30572_v43 = vld [vmem:[#allocation2 + $0x122] sm:$0xff] }
 0x689   : > { %25240 = vmatprep.mubr.msk.f32.mxu0 %vm627_vm0, %v30556_v21  ;;  %34898 = vst [vmem:[#allocation63_spill] sm:$0xff] %v30572_v43  ;;  %v30576_v21 = vld [vmem:[#allocation2 + $0x12a] sm:$0xff] }
 0x68a   : > { %34899 = vst [vmem:[#allocation65_spill] sm:$0xff] %v30576_v21 }
 0x68c   : > { %25241 = vmatmul.mubr.msk.f32.gmra.mrb[52].mxu0 %vm627_vm0, %v30560_v51  ;;  %v30580_v51 = vld [vmem:[#allocation2 + $0x13a] sm:$0xff] }
 0x68d   : > { %25243 = vmatprep.mubr.msk.f32.mxu0 %vm627_vm0, %v30564_v54  ;;  %34900 = vst [vmem:[#allocation69_spill] sm:$0xff] %v30580_v51  ;;  %v30584_v54 = vld [vmem:[#allocation2 + $0x142] sm:$0xff] }
 0x690   : > { %25244 = vmatmul.mubr.msk.f32.gmra.mrb[54].mxu0 %vm627_vm0, %v30568_v52  ;;  %v30588_v52 = vld [vmem:[#allocation2 + $0x152] sm:$0xff] }
 0x691   : > { %25246 = vmatprep.mubr.msk.f32.mxu0 %vm627_vm0, %v30572_v43  ;;  %34901 = vst [vmem:[#allocation71_spill] sm:$0xff] %v30588_v52  ;;  %v30592_v43 = vld [vmem:[#allocation2 + $0x15a] sm:$0xff] }
 0x694   : > { %25247 = vmatmul.mubr.msk.f32.gmra.mrb[56].mxu0 %vm627_vm0, %v30576_v21  ;;  %v30596_v21 = vld [vmem:[#allocation2 + $0x16a] sm:$0xff] }
 0x695   : > { %25249 = vmatprep.mubr.msk.f32.mxu0 %vm627_vm0, %v30580_v51  ;;  %34902 = vst [vmem:[#allocation73_spill] sm:$0xff] %v30596_v21  ;;  %v30600_v51 = vld [vmem:[#allocation2 + $0x172] sm:$0xff] }
 0x698   : > { %25250 = vmatmul.mubr.msk.f32.gmra.mrb[58].mxu0 %vm627_vm0, %v30584_v54 }
 0x699   : > { %25252 = vmatprep.mubr.msk.f32.mxu0 %vm627_vm0, %v30588_v52  ;;  %v22267_v52 = vld [vmem:[%s34767_s9 + $0x70] sm:$0xff] }
 0x69c   : > { %25253 = vmatmul.mubr.msk.f32.gmra.mrb[60].mxu0 %vm627_vm0, %v30592_v43 }
 0x69d   : > { %25255 = vmatprep.mubr.msk.f32.mxu0 %vm627_vm0, %v30596_v21 }
 0x6a0   : > { %25256 = vmatmul.mubr.msk.f32.gmra.mrb[62].mxu0 %vm627_vm0, %v30600_v51 }
 0x6a1   : > { %25260 = vmatprep.mubr.msk.f32.mxu0 %vm627_vm0, %v30353_v33  ;;  %v30668_v33 = vld [vmem:[#allocation2 + $0x180] sm:$0xff] }
 0x6a4   : > { %25261 = vmatmul.mubr.msk.f32.vlgmr.msra.gmra.mrb[32].mxu0 %vm627_vm0, %v30359_v63  ;;  %v30672_v63 = vld [vmem:[#allocation2 + $0x188] sm:$0xff] }
 0x6a5   : > { %25309 = vmatpush3.msra.mxu0 %v30479_v46  ;;  %25263 = vmatprep.mubr.msk.f32.mxu0 %vm627_vm0, %v30363_v5  ;;  %v22300_v46 = vld [vmem:[%s34767_s9 + $0x78] sm:$0xff] }
 0x6a6   : > { %25358 = vmatprep.subr.mxu0 %v22267_v52 }
 0x6a8   : > { %25264 = vmatmul.mubr.msk.f32.gmra.mrb[34].mxu0 %vm627_vm0, %v30367_v23 }
 0x6a9   : > { %25266 = vmatprep.mubr.msk.f32.mxu0 %vm627_vm0, %v30371_v32 }
 0x6ac   : > { %25267 = vmatmul.mubr.msk.f32.gmra.mrb[36].mxu0 %vm627_vm0, %v30375_v8 }
 0x6ad   : > { %25269 = vmatprep.mubr.msk.f32.mxu0 %vm627_vm0, %v30379_v18 }
 0x6b0   : > { %25270 = vmatmul.mubr.msk.f32.gmra.mrb[38].mxu0 %vm627_vm0, %v30383_v44 }
 0x6b1   : > { %25272 = vmatprep.mubr.msk.f32.mxu0 %vm627_vm0, %v30387_v49 }
 0x6b4   : > { %25273 = vmatmul.mubr.msk.f32.gmra.mrb[40].mxu0 %vm627_vm0, %v30391_v29 }
 0x6b5   : > { %25275 = vmatprep.mubr.msk.f32.mxu0 %vm627_vm0, %v30395_v31 }
 0x6b8   : > { %25276 = vmatmul.mubr.msk.f32.gmra.mrb[42].mxu0 %vm627_vm0, %v30399_v0 }
 0x6b9   : > { %25278 = vmatprep.mubr.msk.f32.mxu0 %vm627_vm0, %v30403_v56 }
 0x6bc   : > { %25279 = vmatmul.mubr.msk.f32.gmra.mrb[44].mxu0 %vm627_vm0, %v30407_v53 }
 0x6bd   : > { %25281 = vmatprep.mubr.msk.f32.mxu0 %vm627_vm0, %v30411_v20 }
 0x6c0   : > { %25282 = vmatmul.mubr.msk.f32.gmra.mrb[46].mxu0 %vm627_vm0, %v30415_v12 }
 0x6c1   : > { %25284 = vmatprep.mubr.msk.f32.mxu0 %vm627_vm0, %v30419_v11 }
 0x6c4   : > { %25285 = vmatmul.mubr.msk.f32.gmra.mrb[48].mxu0 %vm627_vm0, %v30423_v34 }
 0x6c5   : > { %25287 = vmatprep.mubr.msk.f32.mxu0 %vm627_vm0, %v30427_v1 }
 0x6c8   : > { %25288 = vmatmul.mubr.msk.f32.gmra.mrb[50].mxu0 %vm627_vm0, %v30431_v27 }
 0x6c9   : > { %25290 = vmatprep.mubr.msk.f32.mxu0 %vm627_vm0, %v30435_v58 }
 0x6cc   : > { %25291 = vmatmul.mubr.msk.f32.gmra.mrb[52].mxu0 %vm627_vm0, %v30439_v59 }
 0x6cd   : > { %25293 = vmatprep.mubr.msk.f32.mxu0 %vm627_vm0, %v30443_v6 }
 0x6d0   : > { %25294 = vmatmul.mubr.msk.f32.gmra.mrb[54].mxu0 %vm627_vm0, %v30447_v38 }
 0x6d1   : > { %25296 = vmatprep.mubr.msk.f32.mxu0 %vm627_vm0, %v30451_v14 }
 0x6d4   : > { %25297 = vmatmul.mubr.msk.f32.gmra.mrb[56].mxu0 %vm627_vm0, %v30455_v39 }
 0x6d5   : > { %25299 = vmatprep.mubr.msk.f32.mxu0 %vm627_vm0, %v30459_v40 }
 0x6d8   : > { %25300 = vmatmul.mubr.msk.f32.gmra.mrb[58].mxu0 %vm627_vm0, %v30463_v50 }
 0x6d9   : > { %25302 = vmatprep.mubr.msk.f32.mxu0 %vm627_vm0, %v30467_v61 }
 0x6dc   : > { %25303 = vmatmul.mubr.msk.f32.gmra.mrb[60].mxu0 %vm627_vm0, %v30471_v57 }
 0x6dd   : > { %25305 = vmatprep.mubr.msk.f32.mxu0 %vm627_vm0, %v30668_v33 }
 0x6e0   : > { %25306 = vmatmul.mubr.msk.f32.gmra.mrb[62].mxu0 %vm627_vm0, %v30672_v63 }
 0x6e1   : > { %25310 = vmatprep.mubr.msk.f32.mxu0 %vm627_vm0, %v30150_v19  ;;  %v34903_v19 = vld [vmem:[#allocation33_spill] sm:$0xff] }
 0x6e4   : > { %25311 = vmatmul.mubr.msk.f32.vlgmr.msra.gmra.mrb[32].mxu0 %vm627_vm0, %v30156_v45  ;;  %v34904_v45 = vld [vmem:[#allocation36_spill] sm:$0xff] }
 0x6e5   : > { %25359 = vmatpush3.msra.mxu0 %v22267_v52  ;;  %25313 = vmatprep.mubr.msk.f32.mxu0 %vm627_vm0, %v30164_v13  ;;  %v30739_v13 = vld [vmem:[#allocation2 + $0x181] sm:$0xff]  ;;  %v34913_v52 = vld [vmem:[#allocation68_spill] sm:$0xff] }
 0x6e6   : > { %25408 = vmatprep.subr.mxu0 %v22300_v46 }
 0x6e8   : > { %25314 = vmatmul.mubr.msk.f32.gmra.mrb[34].mxu0 %vm627_vm0, %v30170_v25  ;;  %v30743_v25 = vld [vmem:[#allocation2 + $0x189] sm:$0xff] }
 0x6e9   : > { %25316 = vmatprep.mubr.msk.f32.mxu0 %vm627_vm0, %v30178_v4  ;;  %v34905_v4 = vld [vmem:[#allocation39_spill] sm:$0xff] }
 0x6ec   : > { %25317 = vmatmul.mubr.msk.f32.gmra.mrb[36].mxu0 %vm627_vm0, %v30184_v48  ;;  %v22333_v48 = vld [vmem:[%s34767_s9 + $0x80] sm:$0xff] }
 0x6ed   : > { %25319 = vmatprep.mubr.msk.f32.mxu0 %vm627_vm0, %v30192_v17  ;;  %v34906_v17 = vld [vmem:[#allocation46_spill] sm:$0xff] }
 0x6f0   : > { %25320 = vmatmul.mubr.msk.f32.gmra.mrb[38].mxu0 %vm627_vm0, %v30198_v55  ;;  %v34907_v55 = vld [vmem:[#allocation49_spill] sm:$0xff] }
 0x6f1   : > { %25322 = vmatprep.mubr.msk.f32.mxu0 %vm627_vm0, %v30206_v10  ;;  %v34908_v10 = vld [vmem:[#allocation50_spill] sm:$0xff] }
 0x6f4   : > { %25323 = vmatmul.mubr.msk.f32.gmra.mrb[40].mxu0 %vm627_vm0, %v30212_v26  ;;  %v34909_v26 = vld [vmem:[#allocation51_spill] sm:$0xff] }
 0x6f5   : > { %25325 = vmatprep.mubr.msk.f32.mxu0 %vm627_vm0, %v30220_v9  ;;  %v34910_v9 = vld [vmem:[#allocation64_spill] sm:$0xff] }
 0x6f8   : > { %25326 = vmatmul.mubr.msk.f32.gmra.mrb[42].mxu0 %vm627_vm0, %v30226_v24  ;;  %v34911_v24 = vld [vmem:[#allocation66_spill] sm:$0xff] }
 0x6f9   : > { %25328 = vmatprep.mubr.msk.f32.mxu0 %vm627_vm0, %v30234_v3  ;;  %v34912_v3 = vld [vmem:[#allocation67_spill] sm:$0xff] }
 0x6fc   : > { %25329 = vmatmul.mubr.msk.f32.gmra.mrb[44].mxu0 %vm627_vm0, %v30240_v30 }
 0x6fd   : > { %25331 = vmatprep.mubr.msk.f32.mxu0 %vm627_vm0, %v30248_v22 }
 0x700   : > { %25332 = vmatmul.mubr.msk.f32.gmra.mrb[46].mxu0 %vm627_vm0, %v30254_v47 }
 0x701   : > { %25334 = vmatprep.mubr.msk.f32.mxu0 %vm627_vm0, %v30262_v41 }
 0x704   : > { %25335 = vmatmul.mubr.msk.f32.gmra.mrb[48].mxu0 %vm627_vm0, %v30268_v36 }
 0x705   : > { %25337 = vmatprep.mubr.msk.f32.mxu0 %vm627_vm0, %v30276_v62 }
 0x708   : > { %25338 = vmatmul.mubr.msk.f32.gmra.mrb[50].mxu0 %vm627_vm0, %v30282_v16 }
 0x709   : > { %25340 = vmatprep.mubr.msk.f32.mxu0 %vm627_vm0, %v30290_v37 }
 0x70c   : > { %25341 = vmatmul.mubr.msk.f32.gmra.mrb[52].mxu0 %vm627_vm0, %v30296_v42 }
 0x70d   : > { %25343 = vmatprep.mubr.msk.f32.mxu0 %vm627_vm0, %v30304_v28 }
 0x710   : > { %25344 = vmatmul.mubr.msk.f32.gmra.mrb[54].mxu0 %vm627_vm0, %v30310_v35 }
 0x711   : > { %25346 = vmatprep.mubr.msk.f32.mxu0 %vm627_vm0, %v30318_v60 }
 0x714   : > { %25347 = vmatmul.mubr.msk.f32.gmra.mrb[56].mxu0 %vm627_vm0, %v30324_v7 }
 0x715   : > { %25349 = vmatprep.mubr.msk.f32.mxu0 %vm627_vm0, %v30329_v2 }
 0x718   : > { %25350 = vmatmul.mubr.msk.f32.gmra.mrb[58].mxu0 %vm627_vm0, %v30334_v15 }
 0x719   : > { %25352 = vmatprep.mubr.msk.f32.mxu0 %vm627_vm0, %v34903_v19 }
 0x71c   : > { %25353 = vmatmul.mubr.msk.f32.gmra.mrb[60].mxu0 %vm627_vm0, %v34904_v45 }
 0x71d   : > { %25355 = vmatprep.mubr.msk.f32.mxu0 %vm627_vm0, %v30739_v13 }
 0x720   : > { %25356 = vmatmul.mubr.msk.f32.gmra.mrb[62].mxu0 %vm627_vm0, %v30743_v25 }
 0x721   : > { %25360 = vmatprep.mubr.msk.f32.mxu0 %vm627_vm0, %v34905_v4  ;;  %v34915_v4 = vld [vmem:[#allocation72_spill] sm:$0xff] }
 0x724   : > { %25361 = vmatmul.mubr.msk.f32.vlgmr.msra.gmra.mrb[32].mxu0 %vm627_vm0, %v34906_v17  ;;  %v34916_v17 = vld [vmem:[#allocation52_spill] sm:$0xff] }
 0x725   : > { %25409 = vmatpush3.msra.mxu0 %v22300_v46  ;;  %25363 = vmatprep.mubr.msk.f32.mxu0 %vm627_vm0, %v34907_v55  ;;  %v34914_v46 = vld [vmem:[#allocation70_spill] sm:$0xff] }
 0x726   : > { %25458 = vmatprep.subr.mxu0 %v22333_v48 }
 0x728   : > { %25364 = vmatmul.mubr.msk.f32.gmra.mrb[34].mxu0 %vm627_vm0, %v34908_v10 }
 0x729   : > { %25366 = vmatprep.mubr.msk.f32.mxu0 %vm627_vm0, %v34909_v26  ;;  %v34917_v26 = vld [vmem:[#allocation53_spill] sm:$0xff] }
 0x72c   : > { %25367 = vmatmul.mubr.msk.f32.gmra.mrb[36].mxu0 %vm627_vm0, %v34910_v9  ;;  %v34918_v9 = vld [vmem:[#allocation54_spill] sm:$0xff] }
 0x72d   : > { %25369 = vmatprep.mubr.msk.f32.mxu0 %vm627_vm0, %v34911_v24  ;;  %v34919_v24 = vld [vmem:[#allocation55_spill] sm:$0xff] }
 0x730   : > { %25370 = vmatmul.mubr.msk.f32.gmra.mrb[38].mxu0 %vm627_vm0, %v34912_v3  ;;  %v34920_v3 = vld [vmem:[#allocation56_spill] sm:$0xff] }
 0x731   : > { %25372 = vmatprep.mubr.msk.f32.mxu0 %vm627_vm0, %v34913_v52  ;;  %v34921_v52 = vld [vmem:[#allocation57_spill] sm:$0xff] }
 0x734   : > { %25373 = vmatmul.mubr.msk.f32.gmra.mrb[40].mxu0 %vm627_vm0, %v34914_v46  ;;  %v34922_v46 = vld [vmem:[#allocation58_spill] sm:$0xff] }
 0x735   : > { %25375 = vmatprep.mubr.msk.f32.mxu0 %vm627_vm0, %v34915_v4  ;;  %v34923_v4 = vld [vmem:[#allocation59_spill] sm:$0xff] }
 0x738   : > { %25376 = vmatmul.mubr.msk.f32.gmra.mrb[42].mxu0 %vm627_vm0, %v34916_v17  ;;  %v34924_v17 = vld [vmem:[#allocation60_spill] sm:$0xff] }
 0x739   : > { %25378 = vmatprep.mubr.msk.f32.mxu0 %vm627_vm0, %v34917_v26  ;;  %v34925_v26 = vld [vmem:[#allocation61_spill] sm:$0xff] }
 0x73c   : > { %25379 = vmatmul.mubr.msk.f32.gmra.mrb[44].mxu0 %vm627_vm0, %v34918_v9  ;;  %v34926_v9 = vld [vmem:[#allocation62_spill] sm:$0xff] }
 0x73d   : > { %25381 = vmatprep.mubr.msk.f32.mxu0 %vm627_vm0, %v34919_v24  ;;  %v34927_v24 = vld [vmem:[#allocation63_spill] sm:$0xff] }
 0x740   : > { %25382 = vmatmul.mubr.msk.f32.gmra.mrb[46].mxu0 %vm627_vm0, %v34920_v3  ;;  %v34928_v3 = vld [vmem:[#allocation65_spill] sm:$0xff] }
 0x741   : > { %25384 = vmatprep.mubr.msk.f32.mxu0 %vm627_vm0, %v34921_v52  ;;  %v34929_v52 = vld [vmem:[#allocation69_spill] sm:$0xff] }
 0x744   : > { %25385 = vmatmul.mubr.msk.f32.gmra.mrb[48].mxu0 %vm627_vm0, %v34922_v46 }
 0x745   : > { %25387 = vmatprep.mubr.msk.f32.mxu0 %vm627_vm0, %v34923_v4  ;;  %v34930_v4 = vld [vmem:[#allocation71_spill] sm:$0xff] }
 0x748   : > { %25388 = vmatmul.mubr.msk.f32.gmra.mrb[50].mxu0 %vm627_vm0, %v34924_v17 }
 0x749   : > { %25390 = vmatprep.mubr.msk.f32.mxu0 %vm627_vm0, %v34925_v26 }
 0x74c   : > { %25391 = vmatmul.mubr.msk.f32.gmra.mrb[52].mxu0 %vm627_vm0, %v34926_v9 }
 0x74d   : > { %25393 = vmatprep.mubr.msk.f32.mxu0 %vm627_vm0, %v34927_v24  ;;  %v30810_v24 = vld [vmem:[#allocation2 + $0x182] sm:$0xff] }
 0x750   : > { %25394 = vmatmul.mubr.msk.f32.gmra.mrb[54].mxu0 %vm627_vm0, %v34928_v3 }
 0x751   : > { %25396 = vmatprep.mubr.msk.f32.mxu0 %vm627_vm0, %v34929_v52  ;;  %v30814_v52 = vld [vmem:[#allocation2 + $0x18a] sm:$0xff] }
 0x754   : > { %25397 = vmatmul.mubr.msk.f32.gmra.mrb[56].mxu0 %vm627_vm0, %v30584_v54 }
 0x755   : > { %25399 = vmatprep.mubr.msk.f32.mxu0 %vm627_vm0, %v34930_v4 }
 0x758   : > { %25400 = vmatmul.mubr.msk.f32.gmra.mrb[58].mxu0 %vm627_vm0, %v30592_v43 }
 0x759   : > { %25402 = vmatprep.mubr.msk.f32.mxu0 %vm627_vm0, %v30596_v21  ;;  %v22366_v21 = vld [vmem:[%s34767_s9 + $0x88] sm:$0xff]  ;;  %s27873_s9 = sshll.u32 %s27937_s2, 4  ;;  %s27874_s9 = int_to_ptr.vmem [resolvable:$false] %s27873_s9 }
 0x75c   : > { %25403 = vmatmul.mubr.msk.f32.gmra.mrb[60].mxu0 %vm627_vm0, %v30600_v51 }
 0x75d   : > { %25405 = vmatprep.mubr.msk.f32.mxu0 %vm627_vm0, %v30810_v24 }
 0x760   : > { %25406 = vmatmul.mubr.msk.f32.gmra.mrb[62].mxu0 %vm627_vm0, %v30814_v52 }
 0x761   : > { %25410 = vmatprep.mubr.msk.f32.mxu0 %vm627_vm0, %v30363_v5  ;;  %v10092_v5 = vld [vmem:[#allocation2 + $0x198] sm:$0xff] }
 0x764   : > { %25411 = vmatmul.mubr.msk.f32.vlgmr.msra.gmra.mrb[32].mxu0 %vm627_vm0, %v30367_v23  ;;  %v10093_v23 = vld [vmem:[#allocation2 + $0x1a0] sm:$0xff] }
 0x765   : > { %25459 = vmatpush3.msra.mxu0 %v22333_v48  ;;  %25413 = vmatprep.mubr.msk.f32.mxu0 %vm627_vm0, %v30371_v32  ;;  %v10449_v32 = vld [vmem:[#allocation2 + $0x31] sm:$0xff] }
 0x766   : > { %25508 = vmatprep.subr.mxu0 %v22366_v21 }
 0x768   : > { %25414 = vmatmul.mubr.msk.f32.gmra.mrb[34].mxu0 %vm627_vm0, %v30375_v8  ;;  %v10450_v8 = vld [vmem:[#allocation2 + $0x39] sm:$0xff] }
 0x769   : > { %25416 = vmatprep.mubr.msk.f32.mxu0 %vm627_vm0, %v30379_v18  ;;  %v10451_v18 = vld [vmem:[#allocation2 + $0x49] sm:$0xff] }
 0x76c   : > { %25417 = vmatmul.mubr.msk.f32.gmra.mrb[36].mxu0 %vm627_vm0, %v30383_v44  ;;  %v10452_v44 = vld [vmem:[#allocation2 + $0x51] sm:$0xff] }
 0x76d   : > { %25419 = vmatprep.mubr.msk.f32.mxu0 %vm627_vm0, %v30387_v49  ;;  %v10453_v49 = vld [vmem:[#allocation2 + $0x61] sm:$0xff] }
 0x770   : > { %25420 = vmatmul.mubr.msk.f32.gmra.mrb[38].mxu0 %vm627_vm0, %v30391_v29  ;;  %v10454_v29 = vld [vmem:[#allocation2 + $0x69] sm:$0xff] }
 0x771   : > { %25422 = vmatprep.mubr.msk.f32.mxu0 %vm627_vm0, %v30395_v31  ;;  %v10455_v31 = vld [vmem:[#allocation2 + $0x79] sm:$0xff] }
 0x774   : > { %25423 = vmatmul.mubr.msk.f32.gmra.mrb[40].mxu0 %vm627_vm0, %v30399_v0  ;;  %v10456_v0 = vld [vmem:[#allocation2 + $0x81] sm:$0xff] }
 0x775   : > { %25425 = vmatprep.mubr.msk.f32.mxu0 %vm627_vm0, %v30403_v56  ;;  %v10457_v56 = vld [vmem:[#allocation2 + $0x91] sm:$0xff] }
 0x778   : > { %25426 = vmatmul.mubr.msk.f32.gmra.mrb[42].mxu0 %vm627_vm0, %v30407_v53  ;;  %v10458_v53 = vld [vmem:[#allocation2 + $0x99] sm:$0xff] }
 0x779   : > { %25428 = vmatprep.mubr.msk.f32.mxu0 %vm627_vm0, %v30411_v20  ;;  %v10459_v20 = vld [vmem:[#allocation2 + $0xa9] sm:$0xff] }
 0x77c   : > { %25429 = vmatmul.mubr.msk.f32.gmra.mrb[44].mxu0 %vm627_vm0, %v30415_v12  ;;  %v34944_v12 = vld [vmem:[#allocation59_spill] sm:$0xff] }
 0x77d   : > { %25431 = vmatprep.mubr.msk.f32.mxu0 %vm627_vm0, %v30419_v11  ;;  %v34945_v11 = vld [vmem:[#allocation63_spill] sm:$0xff] }
 0x780   : > { %25432 = vmatmul.mubr.msk.f32.gmra.mrb[46].mxu0 %vm627_vm0, %v30423_v34  ;;  %v34946_v34 = vld [vmem:[#allocation69_spill] sm:$0xff] }
 0x781   : > { %25434 = vmatprep.mubr.msk.f32.mxu0 %vm627_vm0, %v30427_v1  ;;  %v34947_v1 = vld [vmem:[#allocation73_spill] sm:$0xff] }
 0x784   : > { %25435 = vmatmul.mubr.msk.f32.gmra.mrb[48].mxu0 %vm627_vm0, %v30431_v27  ;;  %v10866_v27 = vld [vmem:[#allocation2 + $0x19a] sm:$0xff] }
 0x785   : > { %25437 = vmatprep.mubr.msk.f32.mxu0 %vm627_vm0, %v30435_v58  ;;  %v22401_v58 = vld [vmem:[%s34948_s3 + $0x8] sm:$0xff] }
 0x786   : > { %25558 = vmatprep.subr.mxu1 %v22401_v58 }
 0x787   : > { %25559 = vmatpush3.msra.mxu1 %v22401_v58 }
 0x788   : > { %25438 = vmatmul.mubr.msk.f32.gmra.mrb[50].mxu0 %vm627_vm0, %v30439_v59  ;;  %v27934_v59 = vmov 1983009808  }
 0x789   : > { %25440 = vmatprep.mubr.msk.f32.mxu0 %vm627_vm0, %v30443_v6  ;;  %v11393_v6 = vunpack.c.l.s4 %v27934_v59 }
 0x78c   : > { %25441 = vmatmul.mubr.msk.f32.gmra.mrb[52].mxu0 %vm627_vm0, %v30447_v38  ;;  %v11395_v38 = vlaneseq }
 0x78d   : > { %25443 = vmatprep.mubr.msk.f32.mxu0 %vm627_vm0, %v30451_v14  ;;  %v31002_v14 = vld [vmem:[%s34359_s13 + $0x2] ss:$0 sm:$0xff] }
 0x790   : > { %25444 = vmatmul.mubr.msk.f32.gmra.mrb[54].mxu0 %vm627_vm0, %v30455_v39  ;;  %v31007_v39 = vld [vmem:[%s34359_s13 + $0x3] ss:$0 sm:$0xff] }
 0x791   : > { %25446 = vmatprep.mubr.msk.f32.mxu0 %vm627_vm0, %v30459_v40 }
 0x794   : > { %25447 = vmatmul.mubr.msk.f32.gmra.mrb[56].mxu0 %vm627_vm0, %v30463_v50 }
 0x795   : > { %25449 = vmatprep.mubr.msk.f32.mxu0 %vm627_vm0, %v30467_v61  ;;  %v11394_v61 = vunpack.c.0.s8 %v11393_v6 }
 0x798   : > { %25450 = vmatmul.mubr.msk.f32.gmra.mrb[58].mxu0 %vm627_vm0, %v30471_v57  ;;  %v11396_v57 = vshrl.u32 %v11395_v38, 7 }
 0x799   : > { %25452 = vmatprep.mubr.msk.f32.mxu0 %vm627_vm0, %v30668_v33 }
 0x79c   : > { %25453 = vmatmul.mubr.msk.f32.gmra.mrb[60].mxu0 %vm627_vm0, %v30672_v63 }
 0x79d   : > { %25455 = vmatprep.mubr.msk.f32.mxu0 %vm627_vm0, %v10092_v5 }
 0x7a0   : > { %25456 = vmatmul.mubr.msk.f32.gmra.mrb[62].mxu0 %vm627_vm0, %v10093_v23 }
 0x7a1   : > { %25460 = vmatprep.mubr.msk.f32.mxu0 %vm627_vm0, %v10449_v32 }
 0x7a4   : > { %25461 = vmatmul.mubr.msk.f32.vlgmr.msra.gmra.mrb[32].mxu0 %vm627_vm0, %v10450_v8 }
 0x7a5   : > { %25509 = vmatpush3.msra.mxu0 %v22366_v21  ;;  %25463 = vmatprep.mubr.msk.f32.mxu0 %vm627_vm0, %v10451_v18 }
 0x7a8   : > { %25464 = vmatmul.mubr.msk.f32.gmra.mrb[34].mxu0 %vm627_vm0, %v10452_v44 }
 0x7a9   : > { %25466 = vmatprep.mubr.msk.f32.mxu0 %vm627_vm0, %v10453_v49 }
 0x7ac   : > { %25467 = vmatmul.mubr.msk.f32.gmra.mrb[36].mxu0 %vm627_vm0, %v10454_v29 }
 0x7ad   : > { %25469 = vmatprep.mubr.msk.f32.mxu0 %vm627_vm0, %v10455_v31 }
 0x7b0   : > { %25470 = vmatmul.mubr.msk.f32.gmra.mrb[38].mxu0 %vm627_vm0, %v10456_v0 }
 0x7b1   : > { %25472 = vmatprep.mubr.msk.f32.mxu0 %vm627_vm0, %v10457_v56 }
 0x7b4   : > { %25473 = vmatmul.mubr.msk.f32.gmra.mrb[40].mxu0 %vm627_vm0, %v10458_v53 }
 0x7b5   : > { %25475 = vmatprep.mubr.msk.f32.mxu0 %vm627_vm0, %v10459_v20 }
 0x7b8   : > { %25476 = vmatmul.mubr.msk.f32.gmra.mrb[42].mxu0 %vm627_vm0, %v30240_v30  ;;  %v10479_v30 = vld [vmem:[#allocation2 + $0x199] sm:$0xff] }
 0x7b9   : > { %25478 = vmatprep.mubr.msk.f32.mxu0 %vm627_vm0, %v30248_v22  ;;  %v10480_v22 = vld [vmem:[#allocation2 + $0x1a1] sm:$0xff] }
 0x7bc   : > { %25479 = vmatmul.mubr.msk.f32.gmra.mrb[44].mxu0 %vm627_vm0, %v30254_v47  ;;  %v34931_v47 = vld [vmem:[#allocation51_spill] sm:$0xff] }
 0x7bd   : > { %25481 = vmatprep.mubr.msk.f32.mxu0 %vm627_vm0, %v30262_v41  ;;  %v34932_v41 = vld [vmem:[#allocation64_spill] sm:$0xff] }
 0x7c0   : > { %25482 = vmatmul.mubr.msk.f32.gmra.mrb[46].mxu0 %vm627_vm0, %v30268_v36  ;;  %v34933_v36 = vld [vmem:[#allocation66_spill] sm:$0xff] }
 0x7c1   : > { %25484 = vmatprep.mubr.msk.f32.mxu0 %vm627_vm0, %v30276_v62  ;;  %v34934_v62 = vld [vmem:[#allocation67_spill] sm:$0xff] }
 0x7c4   : > { %25485 = vmatmul.mubr.msk.f32.gmra.mrb[48].mxu0 %vm627_vm0, %v30282_v16  ;;  %v34935_v16 = vld [vmem:[#allocation68_spill] sm:$0xff] }
 0x7c5   : > { %25487 = vmatprep.mubr.msk.f32.mxu0 %vm627_vm0, %v30290_v37  ;;  %v34936_v37 = vld [vmem:[#allocation70_spill] sm:$0xff] }
 0x7c8   : > { %25488 = vmatmul.mubr.msk.f32.gmra.mrb[50].mxu0 %vm627_vm0, %v30296_v42  ;;  %v34937_v42 = vld [vmem:[#allocation72_spill] sm:$0xff] }
 0x7c9   : > { %25490 = vmatprep.mubr.msk.f32.mxu0 %vm627_vm0, %v30304_v28  ;;  %v34938_v28 = vld [vmem:[#allocation52_spill] sm:$0xff] }
 0x7cc   : > { %25491 = vmatmul.mubr.msk.f32.gmra.mrb[52].mxu0 %vm627_vm0, %v30310_v35  ;;  %v34939_v35 = vld [vmem:[#allocation53_spill] sm:$0xff] }
 0x7cd   : > { %25493 = vmatprep.mubr.msk.f32.mxu0 %vm627_vm0, %v30318_v60  ;;  %v34940_v60 = vld [vmem:[#allocation54_spill] sm:$0xff] }
 0x7d0   : > { %25494 = vmatmul.mubr.msk.f32.gmra.mrb[54].mxu0 %vm627_vm0, %v30324_v7  ;;  %v34941_v7 = vld [vmem:[#allocation55_spill] sm:$0xff] }
 0x7d1   : > { %25496 = vmatprep.mubr.msk.f32.mxu0 %vm627_vm0, %v30329_v2  ;;  %v34942_v2 = vld [vmem:[#allocation56_spill] sm:$0xff] }
 0x7d4   : > { %25497 = vmatmul.mubr.msk.f32.gmra.mrb[56].mxu0 %vm627_vm0, %v30334_v15  ;;  %v34943_v15 = vld [vmem:[#allocation57_spill] sm:$0xff] }
 0x7d5   : > { %25499 = vmatprep.mubr.msk.f32.mxu0 %vm627_vm0, %v34903_v19 }
 0x7d8   : > { %25500 = vmatmul.mubr.msk.f32.gmra.mrb[58].mxu0 %vm627_vm0, %v34904_v45  ;;  %v31013_v45 = vsub.s32 %v11394_v61, %v11396_v57 }
 0x7d9   : > { %25502 = vmatprep.mubr.msk.f32.mxu0 %vm627_vm0, %v30739_v13 }
 0x7da   : > { %34949 = vst [vmem:[#allocation33_spill] sm:$0xff] %v31013_v45 }
 0x7dc   : > { %25503 = vmatmul.mubr.msk.f32.gmra.mrb[60].mxu0 %vm627_vm0, %v30743_v25 }
 0x7dd   : > { %25505 = vmatprep.mubr.msk.f32.mxu0 %vm627_vm0, %v10479_v30 }
 0x7e0   : > { %25506 = vmatmul.mubr.msk.f32.gmra.mrb[62].mxu0 %vm627_vm0, %v10480_v22 }
 0x7e1   : > { %25510 = vmatprep.mubr.msk.f32.mxu0 %vm627_vm0, %v34907_v55 }
 0x7e4   : > { %25511 = vmatmul.mubr.msk.f32.vlgmr.msra.gmra.mrb[32].mxu0 %vm627_vm0, %v34908_v10  ;;  %v34950_v10 = vld [vmem:[#allocation15_spill] sm:$0xff] }
 0x7e5   : > { %25513 = vmatprep.mubr.msk.f32.mxu0 %vm627_vm0, %v34931_v47 }
 0x7e8   : > { %25514 = vmatmul.mubr.msk.f32.gmra.mrb[34].mxu0 %vm627_vm0, %v34932_v41 }
 0x7e9   : > { %25516 = vmatprep.mubr.msk.f32.mxu0 %vm627_vm0, %v34933_v36  ;;  %v34952_v36 = vld [vmem:[#allocation34_spill] sm:$0xff] }
 0x7ec   : > { %25517 = vmatmul.mubr.msk.f32.gmra.mrb[36].mxu0 %vm627_vm0, %v34934_v62 }
 0x7ed   : > { %25519 = vmatprep.mubr.msk.f32.mxu0 %vm627_vm0, %v34935_v16  ;;  %v34953_v16 = vld [vmem:[#allocation35_spill] sm:$0xff] }
 0x7f0   : > { %25520 = vmatmul.mubr.msk.f32.gmra.mrb[38].mxu0 %vm627_vm0, %v34936_v37 }
 0x7f1   : > { %25522 = vmatprep.mubr.msk.f32.mxu0 %vm627_vm0, %v34937_v42 }
 0x7f4   : > { %25523 = vmatmul.mubr.msk.f32.gmra.mrb[40].mxu0 %vm627_vm0, %v34938_v28 }
 0x7f5   : > { %25525 = vmatprep.mubr.msk.f32.mxu0 %vm627_vm0, %v34939_v35 }
 0x7f8   : > { %25526 = vmatmul.mubr.msk.f32.gmra.mrb[42].mxu0 %vm627_vm0, %v34940_v60 }
 0x7f9   : > { %25528 = vmatprep.mubr.msk.f32.mxu0 %vm627_vm0, %v34941_v7 }
 0x7fc   : > { %25529 = vmatmul.mubr.msk.f32.gmra.mrb[44].mxu0 %vm627_vm0, %v34942_v2 }
 0x7fd   : > { %25531 = vmatprep.mubr.msk.f32.mxu0 %vm627_vm0, %v34943_v15  ;;  %v31059_v15 = vld [vmem:[%s34948_s3] sm:$0xff] }
 0x7fe   : > { %25572 = vmatprep.subr.mxu1 %v31059_v15 }
 0x800   : > { %25532 = vmatmul.mubr.msk.f32.gmra.mrb[46].mxu0 %vm627_vm0, %v34922_v46 }
 0x801   : > { %25534 = vmatprep.mubr.msk.f32.mxu0 %vm627_vm0, %v34944_v12 }
 0x804   : > { %25535 = vmatmul.mubr.msk.f32.gmra.mrb[48].mxu0 %vm627_vm0, %v34924_v17 }
 0x805   : > { %25537 = vmatprep.mubr.msk.f32.mxu0 %vm627_vm0, %v34925_v26 }
 0x808   : > { %25538 = vmatmul.mubr.msk.f32.gmra.mrb[50].mxu0 %vm627_vm0, %v34926_v9 }
 0x809   : > { %25540 = vmatprep.mubr.msk.f32.mxu0 %vm627_vm0, %v34945_v11 }
 0x80c   : > { %25541 = vmatmul.mubr.msk.f32.gmra.mrb[52].mxu0 %vm627_vm0, %v34928_v3  ;;  %v31021_v3 = vsub.s32 0, %v11396_v57 }
 0x80d   : > { %25543 = vmatprep.mubr.msk.f32.mxu0 %vm627_vm0, %v34946_v34 }
 0x810   : > { %25544 = vmatmul.mubr.msk.f32.gmra.mrb[54].mxu0 %vm627_vm0, %v30584_v54  ;;  %v10867_v54 = vld [vmem:[#allocation2 + $0x1a2] sm:$0xff] }
 0x811   : > { %25546 = vmatprep.mubr.msk.f32.mxu0 %vm627_vm0, %v34930_v4 }
 0x814   : > { %25547 = vmatmul.mubr.msk.f32.gmra.mrb[56].mxu0 %vm627_vm0, %v30592_v43 }
 0x815   : > { %25549 = vmatprep.mubr.msk.f32.mxu0 %vm627_vm0, %v34947_v1 }
 0x818   : > { %25550 = vmatmul.mubr.msk.f32.gmra.mrb[58].mxu0 %vm627_vm0, %v30600_v51 }
 0x819   : > { %25552 = vmatprep.mubr.msk.f32.mxu0 %vm627_vm0, %v30810_v24  ;;  %v31019_v24 = vsub.s32 1, %v11396_v57 }
 0x81c   : > { %25553 = vmatmul.mubr.msk.f32.gmra.mrb[60].mxu0 %vm627_vm0, %v30814_v52  ;;  %v34951_v52 = vld [vmem:[#allocation16_spill] sm:$0xff] }
 0x81d   : > { %25555 = vmatprep.mubr.msk.f32.mxu0 %vm627_vm0, %v10866_v27 }
 0x820   : > { %25556 = vmatmul.mubr.msk.f32.gmra.mrb[62].mxu0 %vm627_vm0, %v10867_v54 }
 0x8b7   : > { %v25512_v40 = vpop.f32.mrb[32].mxu0 }
 0x8b8   : > { %v11228_v50 = vmul.f32 %v25512_v40, %v31002_v14  ;;  %v11032_v43 = vpop.f32.mrb[33].mxu0 }
 0x8b9   : > { %v11227_v21 = vmul.f32 %v31002_v14, %v11032_v43 }
 0x8ba   : > { %v11264_v51 = vadd.f32 %v31007_v39, %v11228_v50 }
 0x8bb   : > { %v11263_v33 = vadd.f32 %v31007_v39, %v11227_v21  ;;  %v25515_v63 = vpop.f32.mrb[34].mxu0 }
 0x8bc   : > { %v11296_v19 = vmax.f32 %v11264_v51, 0.0  ;;  %v11230_v13 = vmul.f32 %v25515_v63, %v31002_v14  ;;  %v11042_v25 = vpop.f32.mrb[35].mxu0 }
 0x8bd   : > { %v11295_v48 = vmax.f32 %v11263_v33, 0.0  ;;  %v11229_v55 = vmul.f32 %v31002_v14, %v11042_v25 }
 0x8be   : > { %v11328_v26 = vadd.f32 %v11296_v19, %v34950_v10  ;;  %v11266_v9 = vadd.f32 %v31007_v39, %v11230_v13 }
 0x8bf   : > { %v11327_v46 = vadd.f32 %v11295_v48, %v34951_v52  ;;  %v11265_v4 = vadd.f32 %v31007_v39, %v11229_v55  ;;  %v25518_v17 = vpop.f32.mrb[36].mxu0 }
 0x8c0   : > { %v11408_v5 = vcombine.high %v11328_v26, %v11328_v26  ;;  %v31026_v23 = vrot.slane %v11328_v26, %v31013_v45  ;;  %v11298_v32 = vmax.f32 %v11266_v9, 0.0  ;;  %v11232_v8 = vmul.f32 %v25518_v17, %v31002_v14  ;;  %v11052_v18 = vpop.f32.mrb[37].mxu0 }
 0x8c1   : > { %v11391_v44 = vcombine.high %v11327_v46, %v11327_v46  ;;  %v11398_v49 = vrot.slane %v11327_v46, %v31013_v45  ;;  %v11297_v29 = vmax.f32 %v11265_v4, 0.0  ;;  %v11231_v31 = vmul.f32 %v31002_v14, %v11052_v18  ;;  %v34959_v4 = vld [vmem:[#allocation37_spill] sm:$0xff] }
 0x8c2   : > { %v31032_v0 = vrot.slane %v11408_v5, %v31013_v45  ;;  %v31036_v56 = vcombine.high %v31026_v23, %v31026_v23  ;;  %v11330_v62 = vadd.f32 %v11298_v32, %v34952_v36  ;;  %v11268_v42 = vadd.f32 %v31007_v39, %v11232_v8  ;;  %v34960_v5 = vld [vmem:[#allocation38_spill] sm:$0xff] }
 0x8c3   : > { %v31043_v30 = vrot.slane %v11391_v44, %v31013_v45  ;;  %v11406_v22 = vcombine.high %v11398_v49, %v11398_v49  ;;  %v25521_v47 = vpop.f32.mrb[38].mxu0  ;;  %v12381_v41 = vrot.slane %v11398_v49, %v31021_v3  ;;  %v11329_v37 = vadd.f32 %v11297_v29, %v34953_v16  ;;  %v34963_v29 = vld [vmem:[#allocation41_spill] sm:$0xff] }
 0x8c4   : > { %v11062_v28 = vpop.f32.mrb[39].mxu0  ;;  %v11267_v2 = vadd.f32 %v31007_v39, %v11231_v31  ;;  %v11941_v12 = vrot.slane %v11398_v49, %v31019_v24  ;;  %v11442_v11 = vcombine.high %v11330_v62, %v11330_v62  ;;  %v31063_v34 = vrot.slane %v11330_v62, %v31013_v45 }
 0x8c5   : > { %v31051_v35 = vcombine.high %v31043_v30, %v31043_v30  ;;  %v11945_v60 = vrot.slane %v11406_v22, %v31019_v24  ;;  %v12385_v7 = vrot.slane %v11406_v22, %v31021_v3  ;;  %v11425_v1 = vcombine.high %v11329_v37, %v11329_v37 }
 0x8c6   : > { %34954 = vst [vmem:[#allocation36_spill] sm:$0xff] %v31063_v34  ;;  %v11949_v27 = vrot.slane %v31043_v30, %v31019_v24  ;;  %v31081_v50 = vrot.slane %v11442_v11, %v31013_v45  ;;  %v31085_v61 = vcombine.high %v31063_v34, %v31063_v34  ;;  %v11432_v43 = vrot.slane %v11329_v37, %v31013_v45 }
 0x8c7   : > { %v31073_v59 = vsel %vm12194_vm2, %v12385_v7, %v12381_v41  ;;  %v25524_v6 = vpop.f32.mrb[40].mxu0  ;;  %v31076_v38 = vsel %vm12194_vm2, %v11945_v60, %v11941_v12  ;;  %v31089_v21 = vrot.slane %v11425_v1, %v31013_v45  ;;  %v11300_v51 = vmax.f32 %v11268_v42, 0.0 }
 0x8c8   : > { %34955 = vst [vmem:[#allocation39_spill] sm:$0xff] %v31081_v50  ;;  %34956 = vst [vmem:[#allocation46_spill] sm:$0xff] %v31085_v61  ;;  %v11072_v57 = vpop.f32.mrb[41].mxu0  ;;  %v11299_v33 = vmax.f32 %v11267_v2, 0.0  ;;  %v11234_v13 = vmul.f32 %v25521_v47, %v31002_v14  ;;  %v11233_v25 = vmul.f32 %v31002_v14, %v11062_v28  ;;  %v11440_v48 = vcombine.high %v11432_v43, %v11432_v43 }
 0x8c9   : > { %34957 = vst [vmem:[#allocation49_spill] sm:$0xff] %v31089_v21  ;;  %v31099_v55 = vcombine.high %v31089_v21, %v31089_v21  ;;  %v11236_v10 = vmul.f32 %v25524_v6, %v31002_v14  ;;  %v11235_v26 = vmul.f32 %v31002_v14, %v11072_v57  ;;  %v12816_v52 = vrot.slane %v11432_v43, %v31021_v3 }
 0x8ca   : > { %v11332_v17 = vadd.f32 %v11300_v51, %v34959_v4  ;;  %v11331_v32 = vadd.f32 %v11299_v33, %v34960_v5  ;;  %v12820_v18 = vrot.slane %v11440_v48, %v31021_v3  ;;  %v13259_v44 = vrot.slane %v11432_v43, %v31019_v24 }
 0x8cb   : > { %34958 = vst [vmem:[#allocation50_spill] sm:$0xff] %v31099_v55  ;;  %v25527_v9 = vpop.f32.mrb[42].mxu0  ;;  %v13263_v49 = vrot.slane %v11440_v48, %v31019_v24  ;;  %v11270_v7 = vadd.f32 %v31007_v39, %v11234_v13  ;;  %v11269_v2 = vadd.f32 %v31007_v39, %v11233_v25  ;;  %v11272_v19 = vadd.f32 %v31007_v39, %v11236_v10  ;;  %v34972_v25 = vld [vmem:[#allocation14_spill] sm:$0xff] }
 0x8cc   : > { %v31108_v8 = vpop.f32.mrb[43].mxu0  ;;  %v11476_v31 = vcombine.high %v11332_v17, %v11332_v17  ;;  %v31116_v22 = vrot.slane %v11332_v17, %v31013_v45  ;;  %v11459_v47 = vcombine.high %v11331_v32, %v11331_v32  ;;  %v11466_v41 = vrot.slane %v11331_v32, %v31013_v45 }
 0x8cd   : > { %v31122_v62 = vsel %vm12194_vm2, %v12820_v18, %v12816_v52  ;;  %v31127_v37 = vsel %vm12194_vm2, %v13263_v49, %v13259_v44  ;;  %v11302_v18 = vmax.f32 %v11270_v7, 0.0  ;;  %v11301_v44 = vmax.f32 %v11269_v2, 0.0  ;;  %v34964_v7 = vld [vmem:[#allocation43_spill] sm:$0xff] }
 0x8ce   : > { %34961 = vst [vmem:[#allocation58_spill] sm:$0xff] %v31122_v62  ;;  %34962 = vst [vmem:[#allocation60_spill] sm:$0xff] %v31127_v37  ;;  %v31132_v28 = vrot.slane %v11476_v31, %v31013_v45  ;;  %v31136_v60 = vcombine.high %v31116_v22, %v31116_v22  ;;  %v11473_v6 = vrot.slane %v11459_v47, %v31013_v45  ;;  %v11304_v46 = vmax.f32 %v11272_v19, 0.0 }
 0x8cf   : > { %v31129_v42 = vpop.f32.mrb[44].mxu0  ;;  %v11474_v57 = vcombine.high %v11466_v41, %v11466_v41  ;;  %v11973_v33 = vrot.slane %v11466_v41, %v31019_v24  ;;  %v12413_v13 = vrot.slane %v11466_v41, %v31021_v3  ;;  %v11334_v63 = vadd.f32 %v11302_v18, %v34963_v29 }
 0x8d0   : > { %v31140_v12 = vpop.f32.mrb[45].mxu0  ;;  %v31149_v43 = vcombine.high %v31132_v28, %v31132_v28  ;;  %v31159_v52 = vcombine.high %v11473_v6, %v11473_v6  ;;  %v12421_v32 = vrot.slane %v11473_v6, %v31021_v3  ;;  %v11981_v47 = vrot.slane %v11473_v6, %v31019_v24 }
 0x8d1   : > { %v11977_v4 = vrot.slane %v11474_v57, %v31019_v24  ;;  %v12417_v5 = vrot.slane %v11474_v57, %v31021_v3  ;;  %v11333_v2 = vadd.f32 %v11301_v44, %v34964_v7  ;;  %v11271_v31 = vadd.f32 %v31007_v39, %v11235_v26  ;;  %v34966_v26 = vld [vmem:[#allocation13_spill] sm:$0xff] }
 0x8d2   : > { %v11238_v6 = vmul.f32 %v25527_v9, %v31002_v14  ;;  %v11510_v1 = vcombine.high %v11334_v63, %v11334_v63  ;;  %v31186_v10 = vrot.slane %v11334_v63, %v31013_v45  ;;  %v11237_v44 = vmul.f32 %v31002_v14, %v31108_v8 }
 0x8d3   : > { %v31162_v17 = vpop.f32.mrb[46].mxu0  ;;  %v12208_v16 = vsel %vm12194_vm2, %v11977_v4, %v11973_v33  ;;  %v12641_v57 = vsel %vm12194_vm2, %v12417_v5, %v12413_v13  ;;  %v11493_v33 = vcombine.high %v11333_v2, %v11333_v2  ;;  %v11500_v13 = vrot.slane %v11333_v2, %v31013_v45 }
 0x8d4   : > { %v31166_v49 = vpop.f32.mrb[47].mxu0  ;;  %v31179_v36 = vsel %vm12196_vm3, %v12421_v32, %v12641_v57  ;;  %34965 = vst [vmem:[#allocation61_spill] sm:$0xff] %v31186_v10  ;;  %v31192_v4 = vsel %vm12196_vm3, %v11981_v47, %v12208_v16  ;;  %v11336_v5 = vadd.f32 %v11304_v46, %v34966_v26  ;;  %v11303_v9 = vmax.f32 %v11271_v31, 0.0 }
 0x8d5   : > { %v31198_v32 = vrot.slane %v11510_v1, %v31013_v45  ;;  %v31202_v63 = vcombine.high %v31186_v10, %v31186_v10  ;;  %v11274_v18 = vadd.f32 %v31007_v39, %v11238_v6  ;;  %v11507_v46 = vrot.slane %v11493_v33, %v31013_v45 }
 0x8d6   : > { %v11508_v31 = vcombine.high %v11500_v13, %v11500_v13  ;;  %v12848_v8 = vrot.slane %v11500_v13, %v31021_v3  ;;  %v13291_v2 = vrot.slane %v11500_v13, %v31019_v24  ;;  %v11544_v7 = vcombine.high %v11336_v5, %v11336_v5 }
 0x8d7   : > { %v31183_v48 = vpop.f32.mrb[48].mxu0  ;;  %34967 = vst [vmem:[#allocation62_spill] sm:$0xff] %v31198_v32  ;;  %34968 = vst [vmem:[#allocation65_spill] sm:$0xff] %v31202_v63  ;;  %v31216_v57 = vcombine.high %v31198_v32, %v31198_v32  ;;  %v31226_v33 = vcombine.high %v11507_v46, %v11507_v46  ;;  %v12856_v16 = vrot.slane %v11507_v46, %v31021_v3 }
 0x8d8   : > { %v31189_v29 = vpop.f32.mrb[49].mxu0  ;;  %v12852_v47 = vrot.slane %v11508_v31, %v31021_v3  ;;  %v13295_v20 = vrot.slane %v11508_v31, %v31019_v24  ;;  %v13299_v19 = vrot.slane %v11507_v46, %v31019_v24  ;;  %v31233_v40 = vrot.slane %v11336_v5, %v31013_v45 }
 0x8d9   : > { %34969 = vst [vmem:[#allocation71_spill] sm:$0xff] %v31216_v57  ;;  %34970 = vst [vmem:[#allocation51_spill] sm:$0xff] %v31226_v33  ;;  %v11335_v51 = vadd.f32 %v11303_v9, %v34972_v25  ;;  %v31257_v25 = vrot.slane %v11544_v7, %v31013_v45  ;;  %v11961_v26 = vrot.slane %v31036_v56, %v31019_v24 }
 0x8da   : > { %34971 = vst [vmem:[#allocation64_spill] sm:$0xff] %v31233_v40  ;;  %v13076_v58 = vsel %vm12194_vm2, %v12852_v47, %v12848_v8  ;;  %v13519_v13 = vsel %vm12194_vm2, %v13295_v20, %v13291_v2  ;;  %v31261_v9 = vcombine.high %v31233_v40, %v31233_v40  ;;  %v11306_v20 = vmax.f32 %v11274_v18, 0.0  ;;  %v34975_v18 = vld [vmem:[#allocation40_spill] sm:$0xff] }
 0x8db   : > { %v31212_v1 = vpop.f32.mrb[50].mxu0  ;;  %v31246_v31 = vsel %vm12196_vm3, %v12856_v16, %v13076_v58  ;;  %v31254_v47 = vsel %vm12196_vm3, %v13299_v19, %v13519_v13  ;;  %v11527_v8 = vcombine.high %v11335_v51, %v11335_v51  ;;  %v11534_v16 = vrot.slane %v11335_v51, %v31013_v45 }
 0x8dc   : > { %v31222_v6 = vpop.f32.mrb[51].mxu0  ;;  %34973 = vst [vmem:[#allocation66_spill] sm:$0xff] %v31246_v31  ;;  %34974 = vst [vmem:[#allocation67_spill] sm:$0xff] %v31254_v47  ;;  %v11273_v2 = vadd.f32 %v31007_v39, %v11237_v44  ;;  %v31274_v13 = vcombine.high %v31032_v0, %v31032_v0  ;;  %v11338_v46 = vadd.f32 %v11306_v20, %v34975_v18 }
 0x8dd   : > { %v31270_v7 = vrot.slane %v11527_v8, %v31013_v45  ;;  %v11542_v51 = vcombine.high %v11534_v16, %v11534_v16  ;;  %v11965_v44 = vrot.slane %v31032_v0, %v31019_v24  ;;  %v12197_v8 = vsel %vm12196_vm3, %v11949_v27, %v31076_v38 }
 0x8de   : > { %v12005_v53 = vrot.slane %v11534_v16, %v31019_v24  ;;  %v12445_v54 = vrot.slane %v11534_v16, %v31021_v3  ;;  %v11305_v20 = vmax.f32 %v11273_v2, 0.0  ;;  %v11578_v37 = vcombine.high %v11338_v46, %v11338_v46  ;;  %v34978_v2 = vld [vmem:[#allocation42_spill] sm:$0xff] }
 0x8df   : > { %v31241_v11 = vpop.f32.mrb[52].mxu0  ;;  %v31292_v58 = vcombine.high %v31270_v7, %v31270_v7  ;;  %v12009_v18 = vrot.slane %v11542_v51, %v31019_v24  ;;  %v12449_v47 = vrot.slane %v11542_v51, %v31021_v3  ;;  %v31299_v32 = vrot.slane %v11338_v46, %v31013_v45 }
 0x8e0   : > { %v31251_v41 = vpop.f32.mrb[53].mxu0  ;;  %v11337_v63 = vadd.f32 %v11305_v20, %v34978_v2  ;;  %v11969_v27 = vrot.slane %v31274_v13, %v31019_v24  ;;  %v31323_v16 = vrot.slane %v11578_v37, %v31013_v45  ;;  %v34982_v2 = vrot.slane %v31051_v35, %v31019_v24 }
 0x8e1   : > { %34976 = vst [vmem:[#allocation68_spill] sm:$0xff] %v31292_v58  ;;  %34977 = vst [vmem:[#allocation70_spill] sm:$0xff] %v31299_v32  ;;  %v31311_v51 = vsel %vm12194_vm2, %v12009_v18, %v12005_v53  ;;  %v31316_v10 = vsel %vm12194_vm2, %v12449_v47, %v12445_v54  ;;  %v31327_v20 = vcombine.high %v31299_v32, %v31299_v32 }
 0x8e2   : > { %34979 = vst [vmem:[#allocation72_spill] sm:$0xff] %v31316_v10  ;;  %34980 = vst [vmem:[#allocation52_spill] sm:$0xff] %v31323_v16  ;;  %v11561_v53 = vcombine.high %v11337_v63, %v11337_v63  ;;  %v11568_v18 = vrot.slane %v11337_v63, %v31013_v45  ;;  %v12199_v54 = vsel %vm12198_vm4, %v34982_v2, %v12197_v8 }
 0x8e3   : > { %v31278_v5 = vpop.f32.mrb[54].mxu0  ;;  %34981 = vst [vmem:[#allocation53_spill] sm:$0xff] %v31327_v20  ;;  %v11240_v47 = vmul.f32 %v31129_v42, %v31002_v14  ;;  %v11239_v46 = vmul.f32 %v31002_v14, %v31140_v12  ;;  %v11242_v37 = vmul.f32 %v31162_v17, %v31002_v14  ;;  %v34984_v42 = vrot.slane %v31026_v23, %v31019_v24 }
 0x8e4   : > { %v31288_v19 = vpop.f32.mrb[55].mxu0  ;;  %v31345_v16 = vrot.slane %v11561_v53, %v31013_v45  ;;  %v11576_v33 = vcombine.high %v11568_v18, %v11568_v18  ;;  %v12880_v63 = vrot.slane %v11568_v18, %v31021_v3  ;;  %v13323_v34 = vrot.slane %v11568_v18, %v31019_v24 }
 0x8e5   : > { %v12201_v12 = vsel %vm12200_vm5, %v34984_v42, %v12199_v54  ;;  %v11276_v2 = vadd.f32 %v31007_v39, %v11240_v47  ;;  %v11275_v17 = vadd.f32 %v31007_v39, %v11239_v46  ;;  %v11278_v20 = vadd.f32 %v31007_v39, %v11242_v37  ;;  %v34987_v54 = vld [vmem:[#allocation44_spill] sm:$0xff] }
 0x8e6   : > { %34983 = vst [vmem:[#allocation54_spill] sm:$0xff] %v31345_v16  ;;  %v31360_v53 = vcombine.high %v31345_v16, %v31345_v16  ;;  %v12884_v32 = vrot.slane %v11576_v33, %v31021_v3  ;;  %v12203_v47 = vsel %vm12202_vm6, %v11961_v26, %v12201_v12  ;;  %v13327_v21 = vrot.slane %v11576_v33, %v31019_v24  ;;  %v34988_v26 = vld [vmem:[#allocation45_spill] sm:$0xff] }
 0x8e7   : > { %v31308_v57 = vpop.f32.mrb[56].mxu0  ;;  %v11308_v46 = vmax.f32 %v11276_v2, 0.0  ;;  %v11307_v42 = vmax.f32 %v11275_v17, 0.0  ;;  %v12205_v18 = vsel %vm12204_vm7, %v11965_v44, %v12203_v47  ;;  %v11310_v2 = vmax.f32 %v11278_v20, 0.0 }
 0x8e8   : > { %v31320_v38 = vpop.f32.mrb[57].mxu0  ;;  %34985 = vst [vmem:[#allocation55_spill] sm:$0xff] %v31360_v53  ;;  %v31371_v55 = vsel %vm12194_vm2, %v12884_v32, %v12880_v63  ;;  %v12207_v63 = vsel %vm12206_vm8, %v11969_v27, %v12205_v18  ;;  %v11241_v33 = vmul.f32 %v31002_v14, %v31166_v49  ;;  %v34989_v62 = vrot.slane %v31159_v52, %v31019_v24  ;;  %v34998_v53 = vld [vmem:[#allocation48_spill] sm:$0xff] }
 0x8e9   : > { %34986 = vst [vmem:[#allocation56_spill] sm:$0xff] %v31371_v55  ;;  %v11340_v50 = vadd.f32 %v11308_v46, %v34987_v54  ;;  %v11339_v12 = vadd.f32 %v11307_v42, %v34988_v26  ;;  %25560 = vmatprep.mubr.msk.f32.mxu1 %vm627_vm0, %v12207_v63  ;;  %v31399_v27 = vsel %vm12194_vm2, %v13327_v21, %v13323_v34  ;;  %v34991_v42 = vld [vmem:[#allocation47_spill] sm:$0xff] }
 0x8ea   : > { %v12210_v44 = vsel %vm12198_vm4, %v34989_v62, %v31192_v4  ;;  %34990 = vst [vmem:[#allocation57_spill] sm:$0xff] %v31399_v27  ;;  %v11342_v49 = vadd.f32 %v11310_v2, %v34991_v42  ;;  %v11277_v18 = vadd.f32 %v31007_v39, %v11241_v33  ;;  %v34992_v26 = vrot.slane %v31116_v22, %v31019_v24 }
 0x8eb   : > { %v31347_v8 = vpop.f32.mrb[58].mxu0  ;;  %v11612_v54 = vcombine.high %v11340_v50, %v11340_v50  ;;  %v31395_v20 = vrot.slane %v11340_v50, %v31013_v45  ;;  %v11595_v47 = vcombine.high %v11339_v12, %v11339_v12  ;;  %v11602_v46 = vrot.slane %v11339_v12, %v31013_v45 }
 0x8ec   : > { %v31356_v31 = vpop.f32.mrb[59].mxu0  ;;  %v12211_v62 = vsel %vm12200_vm5, %v34992_v26, %v12210_v44  ;;  %v12001_v34 = vrot.slane %v31149_v43, %v31019_v24  ;;  %v11244_v21 = vmul.f32 %v31183_v48, %v31002_v14  ;;  %v11646_v42 = vcombine.high %v11342_v49, %v11342_v49 }
 0x8ed   : > { %v31410_v50 = vrot.slane %v11612_v54, %v31013_v45  ;;  %v31414_v12 = vcombine.high %v31395_v20, %v31395_v20  ;;  %v31427_v44 = vrot.slane %v11595_v47, %v31013_v45  ;;  %v11610_v54 = vcombine.high %v11602_v46, %v11602_v46 }
 0x8ee   : > { %v31430_v26 = vrot.slane %v11342_v49, %v31013_v45  ;;  %v11309_v32 = vmax.f32 %v11277_v18, 0.0  ;;  %v34995_v48 = vrot.slane %v31136_v60, %v31019_v24  ;;  %v12037_v33 = vrot.slane %v11602_v46, %v31019_v24 }
 0x8ef   : > { %v31376_v61 = vpop.f32.mrb[60].mxu0  ;;  %34993 = vst [vmem:[#allocation59_spill] sm:$0xff] %v31427_v44  ;;  %v31438_v63 = vcombine.high %v31427_v44, %v31427_v44  ;;  %v12041_v47 = vrot.slane %v11610_v54, %v31019_v24  ;;  %v12477_v27 = vrot.slane %v11602_v46, %v31021_v3  ;;  %v12481_v18 = vrot.slane %v11610_v54, %v31021_v3 }
 0x8f0   : > { %v31381_v17 = vpop.f32.mrb[61].mxu0  ;;  %34994 = vst [vmem:[#allocation63_spill] sm:$0xff] %v31430_v26  ;;  %v12212_v37 = vsel %vm12202_vm6, %v34995_v48, %v12211_v62  ;;  %v31449_v62 = vrot.slane %v11646_v42, %v31013_v45  ;;  %v31458_v46 = vcombine.high %v31430_v26, %v31430_v26  ;;  %v11341_v55 = vadd.f32 %v11309_v32, %v34998_v53  ;;  %v31480_v53 = vld [vmem:[%s34948_s3 + $0x10] sm:$0xff] }
 0x8f1   : > { %v31454_v16 = vsel %vm12194_vm2, %v12041_v47, %v12037_v33  ;;  %v34999_v42 = vrot.slane %v31132_v28, %v31019_v24  ;;  %v11280_v33 = vadd.f32 %v31007_v39, %v11244_v21  ;;  %v11246_v49 = vmul.f32 %v31212_v1, %v31002_v14  ;;  %35000 = vst [vmem:[#allocation15_spill] sm:$0xff] %v31480_v53 }
 0x8f2   : > { %34996 = vst [vmem:[#allocation69_spill] sm:$0xff] %v31449_v62  ;;  %34997 = vst [vmem:[#allocation73_spill] sm:$0xff] %v31458_v46  ;;  %v11243_v46 = vmul.f32 %v31002_v14, %v31189_v29  ;;  %v11245_v54 = vmul.f32 %v31002_v14, %v31222_v6  ;;  %v11629_v32 = vcombine.high %v11341_v55, %v11341_v55 }
 0x8f3   : > { %v31407_v4 = vpop.f32.mrb[62].mxu0  ;;  %v12213_v48 = vsel %vm12204_vm7, %v34999_v42, %v12212_v37  ;;  %v31483_v37 = vsel %vm12194_vm2, %v12481_v18, %v12477_v27  ;;  %v11312_v29 = vmax.f32 %v11280_v33, 0.0  ;;  %v11282_v6 = vadd.f32 %v31007_v39, %v11246_v49  ;;  %v35004_v49 = vld [vmem:[#allocation17_spill] sm:$0xff] }
 0x8f4   : > { %v31420_v2 = vpop.f32.mrb[63].mxu0  ;;  %v12214_v47 = vsel %vm12206_vm8, %v12001_v34, %v12213_v48  ;;  %35001 = vst [vmem:[#allocation16_spill] sm:$0xff] %v31483_v37  ;;  %v11636_v34 = vrot.slane %v11341_v55, %v31013_v45  ;;  %v11279_v21 = vadd.f32 %v31007_v39, %v11243_v46  ;;  %v11281_v48 = vadd.f32 %v31007_v39, %v11245_v54  ;;  %v35007_v37 = vld [vmem:[#allocation18_spill] sm:$0xff] }
 0x8f5   : > { %25561 = vmatmul.mubr.msk.f32.vlgmr.msra.gmra.mrb[36].mxu1 %vm627_vm0, %v12214_v47  ;;  %v31494_v27 = vrot.slane %v11629_v32, %v31013_v45  ;;  %v31498_v55 = vcombine.high %v31257_v25, %v31257_v25  ;;  %v11344_v33 = vadd.f32 %v11312_v29, %v35004_v49  ;;  %v11314_v47 = vmax.f32 %v11282_v6, 0.0 }
 0x8f6   : > { %25573 = vmatpush3.msra.mxu1 %v31059_v15  ;;  %v11644_v18 = vcombine.high %v11636_v34, %v11636_v34  ;;  %v12912_v46 = vrot.slane %v11636_v34, %v31021_v3  ;;  %v11311_v54 = vmax.f32 %v11279_v21, 0.0  ;;  %v11313_v26 = vmax.f32 %v11281_v48, 0.0  ;;  %v35011_v21 = vld [vmem:[#allocation20_spill] sm:$0xff] }
 0x8f7   : > { %35002 = vst [vmem:[#allocation34_spill] sm:$0xff] %v31494_v27  ;;  %35003 = vst [vmem:[#allocation35_spill] sm:$0xff] %v31498_v55  ;;  %25586 = vmatprep.subr.mxu1 %v31480_v53  ;;  %v31507_v15 = vcombine.high %v31494_v27, %v31494_v27  ;;  %v13355_v62 = vrot.slane %v11636_v34, %v31019_v24  ;;  %v11680_v42 = vcombine.high %v11344_v33, %v11344_v33 }
 0x8f8   : > { %v12916_v32 = vrot.slane %v11644_v18, %v31021_v3  ;;  %v13359_v1 = vrot.slane %v11644_v18, %v31019_v24  ;;  %v31513_v53 = vrot.slane %v11344_v33, %v31013_v45  ;;  %v11343_v10 = vadd.f32 %v11311_v54, %v35007_v37  ;;  %v35010_v54 = vld [vmem:[#allocation19_spill] sm:$0xff] }
 0x8f9   : > { %35005 = vst [vmem:[#allocation37_spill] sm:$0xff] %v31507_v15  ;;  %v31531_v37 = vrot.slane %v11680_v42, %v31013_v45  ;;  %v11345_v48 = vadd.f32 %v11313_v26, %v35011_v21  ;;  %v12033_v42 = vrot.slane %v31498_v55, %v31019_v24  ;;  %v35012_v26 = vrot.slane %v31270_v7, %v31019_v24 }
 0x8fa   : > { %35006 = vst [vmem:[#allocation38_spill] sm:$0xff] %v31513_v53  ;;  %v31521_v6 = vsel %vm12194_vm2, %v12916_v32, %v12912_v46  ;;  %v31528_v18 = vsel %vm12194_vm2, %v13359_v1, %v13355_v62  ;;  %v31535_v49 = vcombine.high %v31513_v53, %v31513_v53  ;;  %v11663_v33 = vcombine.high %v11343_v10, %v11343_v10 }
 0x8fb   : > { %35008 = vst [vmem:[#allocation41_spill] sm:$0xff] %v31521_v6  ;;  %35009 = vst [vmem:[#allocation43_spill] sm:$0xff] %v31528_v18  ;;  %v11670_v46 = vrot.slane %v11343_v10, %v31013_v45  ;;  %v11346_v32 = vadd.f32 %v11314_v47, %v35010_v54  ;;  %v12029_v1 = vrot.slane %v31257_v25, %v31019_v24 }
 0x8fc   : > { %v31549_v29 = vrot.slane %v11663_v33, %v31013_v45  ;;  %v12216_v47 = vsel %vm12196_vm3, %v35012_v26, %v31311_v51  ;;  %v11248_v21 = vmul.f32 %v31241_v11, %v31002_v14  ;;  %v11697_v34 = vcombine.high %v11345_v48, %v11345_v48 }
 0x8fd   : > { %v11678_v10 = vcombine.high %v11670_v46, %v11670_v46  ;;  %v11714_v54 = vcombine.high %v11346_v32, %v11346_v32  ;;  %v31559_v62 = vrot.slane %v11346_v32, %v31013_v45  ;;  %v11704_v18 = vrot.slane %v11345_v48, %v31013_v45 }
 0x8fe   : > { %v31564_v33 = vcombine.high %v31549_v29, %v31549_v29  ;;  %v12069_v15 = vrot.slane %v11670_v46, %v31019_v24  ;;  %v12509_v26 = vrot.slane %v11670_v46, %v31021_v3  ;;  %v11284_v11 = vadd.f32 %v31007_v39, %v11248_v21 }
 0x8ff   : > { %35013 = vst [vmem:[#allocation13_spill] sm:$0xff] %v31559_v62  ;;  %v12073_v27 = vrot.slane %v11678_v10, %v31019_v24  ;;  %v12513_v51 = vrot.slane %v11678_v10, %v31021_v3  ;;  %v31575_v48 = vrot.slane %v11714_v54, %v31013_v45  ;;  %v31584_v10 = vcombine.high %v31559_v62, %v31559_v62 }
 0x900   : > { %v31594_v54 = vrot.slane %v11697_v34, %v31013_v45  ;;  %v11712_v6 = vcombine.high %v11704_v18, %v11704_v18  ;;  %v11247_v46 = vmul.f32 %v31002_v14, %v31251_v41  ;;  %v12944_v34 = vrot.slane %v11704_v18, %v31021_v3 }
 0x901   : > { %35014 = vst [vmem:[#allocation14_spill] sm:$0xff] %v31575_v48  ;;  %v31580_v55 = vsel %vm12194_vm2, %v12073_v27, %v12069_v15  ;;  %35015 = vst [vmem:[#allocation40_spill] sm:$0xff] %v31584_v10  ;;  %v31591_v32 = vsel %vm12194_vm2, %v12513_v51, %v12509_v26  ;;  %v35018_v15 = vrot.slane %v31292_v58, %v31019_v24 }
 0x902   : > { %35016 = vst [vmem:[#allocation42_spill] sm:$0xff] %v31591_v32  ;;  %35017 = vst [vmem:[#allocation44_spill] sm:$0xff] %v31594_v54  ;;  %v31607_v51 = vcombine.high %v31594_v54, %v31594_v54  ;;  %v12948_v26 = vrot.slane %v11712_v6, %v31021_v3  ;;  %v13387_v27 = vrot.slane %v11704_v18, %v31019_v24 }
 0x903   : > { %v12217_v10 = vsel %vm12198_vm4, %v35018_v15, %v12216_v47  ;;  %v35020_v47 = vrot.slane %v31233_v40, %v31019_v24  ;;  %v11316_v15 = vmax.f32 %v11284_v11, 0.0  ;;  %v11283_v41 = vadd.f32 %v31007_v39, %v11247_v46 }
 0x904   : > { %35019 = vst [vmem:[#allocation45_spill] sm:$0xff] %v31607_v51  ;;  %v31622_v32 = vsel %vm12194_vm2, %v12948_v26, %v12944_v34  ;;  %v13391_v58 = vrot.slane %v11712_v6, %v31019_v24  ;;  %v35022_v62 = vrot.slane %v31261_v9, %v31019_v24  ;;  %v11250_v46 = vmul.f32 %v31278_v5, %v31002_v14  ;;  %v35029_v51 = vld [vmem:[#allocation23_spill] sm:$0xff] }
 0x905   : > { %v12218_v21 = vsel %vm12200_vm5, %v35020_v47, %v12217_v10  ;;  %35021 = vst [vmem:[#allocation47_spill] sm:$0xff] %v31622_v32  ;;  %v35023_v10 = vld [vmem:[#allocation21_spill] sm:$0xff]  ;;  %v11315_v47 = vmax.f32 %v11283_v41, 0.0  ;;  %v11249_v6 = vmul.f32 %v31002_v14, %v31288_v19  ;;  %v31641_v18 = vcombine.high %v31410_v50, %v31410_v50  ;;  %v35026_v41 = vld [vmem:[#allocation22_spill] sm:$0xff] }
 0x906   : > { %v12219_v40 = vsel %vm12202_vm6, %v35022_v62, %v12218_v21  ;;  %v11348_v11 = vadd.f32 %v11316_v15, %v35023_v10  ;;  %v31649_v10 = vsel %vm12194_vm2, %v13391_v58, %v13387_v27  ;;  %v12061_v58 = vrot.slane %v31410_v50, %v31019_v24 }
 0x907   : > { %v12220_v26 = vsel %vm12204_vm7, %v12029_v1, %v12219_v40  ;;  %35024 = vst [vmem:[#allocation48_spill] sm:$0xff] %v31641_v18  ;;  %v11347_v5 = vadd.f32 %v11315_v47, %v35026_v41  ;;  %35027 = vst [vmem:[#allocation18_spill] sm:$0xff] %v31649_v10  ;;  %v11286_v40 = vadd.f32 %v31007_v39, %v11250_v46 }
 0x908   : > { %v12221_v62 = vsel %vm12206_vm8, %v12033_v42, %v12220_v26  ;;  %v11748_v21 = vcombine.high %v11348_v11, %v11348_v11  ;;  %v31645_v15 = vrot.slane %v11348_v11, %v31013_v45  ;;  %v11285_v19 = vadd.f32 %v31007_v39, %v11249_v6 }
 0x909   : > { %25563 = vmatprep.mubr.msk.f32.mxu1 %vm627_vm0, %v12221_v62  ;;  %v12057_v1 = vrot.slane %v31414_v12, %v31019_v24  ;;  %v12065_v27 = vrot.slane %v31641_v18, %v31019_v24  ;;  %v11731_v47 = vcombine.high %v11347_v5, %v11347_v5  ;;  %v11738_v46 = vrot.slane %v11347_v5, %v31013_v45 }
 0x90a   : > { %35025 = vst [vmem:[#allocation17_spill] sm:$0xff] %v31645_v15  ;;  %v31657_v42 = vrot.slane %v11748_v21, %v31013_v45  ;;  %v31661_v11 = vcombine.high %v31645_v15, %v31645_v15  ;;  %v11318_v26 = vmax.f32 %v11286_v40, 0.0  ;;  %v11317_v6 = vmax.f32 %v11285_v19, 0.0 }
 0x90b   : > { %v35028_v41 = vrot.slane %v31427_v44, %v31019_v24  ;;  %v11252_v48 = vmul.f32 %v31308_v57, %v31002_v14  ;;  %v31680_v10 = vrot.slane %v11731_v47, %v31013_v45  ;;  %v11746_v5 = vcombine.high %v11738_v46, %v11738_v46 }
 0x90c   : > { %v11251_v40 = vmul.f32 %v31002_v14, %v31320_v38  ;;  %v11254_v19 = vmul.f32 %v31347_v8, %v31002_v14  ;;  %v12101_v21 = vrot.slane %v11738_v46, %v31019_v24  ;;  %v12541_v62 = vrot.slane %v11738_v46, %v31021_v3 }
 0x90d   : > { %v12223_v34 = vsel %vm12196_vm3, %v35028_v41, %v31454_v16  ;;  %v11350_v54 = vadd.f32 %v11318_v26, %v35029_v51  ;;  %v35030_v16 = vld [vmem:[#allocation24_spill] sm:$0xff]  ;;  %v31692_v57 = vcombine.high %v31680_v10, %v31680_v10  ;;  %v12105_v47 = vrot.slane %v11746_v5, %v31019_v24 }
 0x90e   : > { %v11349_v41 = vadd.f32 %v11317_v6, %v35030_v16  ;;  %v12545_v32 = vrot.slane %v11746_v5, %v31021_v3  ;;  %v11288_v38 = vadd.f32 %v31007_v39, %v11252_v48  ;;  %v35032_v51 = vrot.slane %v31438_v63, %v31019_v24 }
 0x90f   : > { %v11782_v18 = vcombine.high %v11350_v54, %v11350_v54  ;;  %v31698_v8 = vrot.slane %v11350_v54, %v31013_v45  ;;  %v31709_v5 = vsel %vm12194_vm2, %v12105_v47, %v12101_v21  ;;  %v35037_v47 = vrot.slane %v31395_v20, %v31019_v24 }
 0x910   : > { %v11765_v44 = vcombine.high %v11349_v41, %v11349_v41  ;;  %v12224_v46 = vsel %vm12198_vm4, %v35032_v51, %v12223_v34  ;;  %v31716_v16 = vsel %vm12194_vm2, %v12545_v32, %v12541_v62  ;;  %v11772_v6 = vrot.slane %v11349_v41, %v31013_v45 }
 0x911   : > { %35031 = vst [vmem:[#allocation19_spill] sm:$0xff] %v31698_v8  ;;  %35033 = vst [vmem:[#allocation20_spill] sm:$0xff] %v31716_v16  ;;  %v31719_v34 = vrot.slane %v11782_v18, %v31013_v45  ;;  %v31723_v51 = vcombine.high %v31698_v8, %v31698_v8  ;;  %v12225_v54 = vsel %vm12200_vm5, %v35037_v47, %v12224_v46  ;;  %v11320_v48 = vmax.f32 %v11288_v38, 0.0 }
 0x912   : > { %v31727_v21 = vrot.slane %v11765_v44, %v31013_v45  ;;  %v12226_v62 = vsel %vm12202_vm6, %v12057_v1, %v12225_v54  ;;  %v11287_v26 = vadd.f32 %v31007_v39, %v11251_v40  ;;  %v11780_v41 = vcombine.high %v11772_v6, %v11772_v6  ;;  %v35039_v1 = vld [vmem:[#allocation25_spill] sm:$0xff] }
 0x913   : > { %35034 = vst [vmem:[#allocation21_spill] sm:$0xff] %v31719_v34  ;;  %35035 = vst [vmem:[#allocation22_spill] sm:$0xff] %v31723_v51  ;;  %v11290_v51 = vadd.f32 %v31007_v39, %v11254_v19  ;;  %v11253_v38 = vmul.f32 %v31002_v14, %v31356_v31  ;;  %v12976_v46 = vrot.slane %v11772_v6, %v31021_v3 }
 0x914   : > { %35036 = vst [vmem:[#allocation23_spill] sm:$0xff] %v31727_v21  ;;  %v31741_v44 = vcombine.high %v31727_v21, %v31727_v21  ;;  %v12227_v18 = vsel %vm12204_vm7, %v12061_v58, %v12226_v62  ;;  %v11352_v54 = vadd.f32 %v11320_v48, %v35039_v1  ;;  %v12980_v40 = vrot.slane %v11780_v41, %v31021_v3  ;;  %v35044_v1 = vld [vmem:[#allocation26_spill] sm:$0xff]  ;;  %v35045_v48 = vld [vmem:[#allocation27_spill] sm:$0xff] }
 0x915   : > { %v13419_v32 = vrot.slane %v11772_v6, %v31019_v24  ;;  %v13423_v8 = vrot.slane %v11780_v41, %v31019_v24  ;;  %v12228_v31 = vsel %vm12206_vm8, %v12065_v27, %v12227_v18  ;;  %v11319_v47 = vmax.f32 %v11287_v26, 0.0 }
 0x916   : > { %35038 = vst [vmem:[#allocation24_spill] sm:$0xff] %v31741_v44  ;;  %v11816_v34 = vcombine.high %v11352_v54, %v11352_v54  ;;  %v31758_v16 = vrot.slane %v11352_v54, %v31013_v45  ;;  %25564 = vmatmul.mubr.msk.f32.gmra.mrb[38].mxu1 %vm627_vm0, %v12228_v31  ;;  %v11322_v6 = vmax.f32 %v11290_v51, 0.0  ;;  %v11289_v62 = vadd.f32 %v31007_v39, %v11253_v38 }
 0x917   : > { %v31767_v41 = vsel %vm12194_vm2, %v12980_v40, %v12976_v46  ;;  %v31770_v27 = vsel %vm12194_vm2, %v13423_v8, %v13419_v32  ;;  %v11351_v54 = vadd.f32 %v11319_v47, %v35044_v1  ;;  %v31783_v38 = vcombine.high %v31531_v37, %v31531_v37  ;;  %v35048_v1 = vld [vmem:[#allocation28_spill] sm:$0xff] }
 0x918   : > { %35040 = vst [vmem:[#allocation25_spill] sm:$0xff] %v31767_v41  ;;  %35041 = vst [vmem:[#allocation74_spill] sm:$0xff] %v31770_v27  ;;  %v31773_v18 = vrot.slane %v11816_v34, %v31013_v45  ;;  %v31777_v26 = vcombine.high %v31758_v16, %v31758_v16  ;;  %v11354_v31 = vadd.f32 %v11322_v6, %v35045_v48  ;;  %v11321_v51 = vmax.f32 %v11289_v62, 0.0 }
 0x919   : > { %v35046_v32 = vrot.slane %v31549_v29, %v31019_v24  ;;  %v11256_v47 = vmul.f32 %v31376_v61, %v31002_v14  ;;  %v11799_v40 = vcombine.high %v11351_v54, %v11351_v54  ;;  %v11806_v48 = vrot.slane %v11351_v54, %v31013_v45 }
 0x91a   : > { %35042 = vst [vmem:[#allocation75_spill] sm:$0xff] %v31773_v18  ;;  %35043 = vst [vmem:[#allocation76_spill] sm:$0xff] %v31777_v26  ;;  %v11850_v6 = vcombine.high %v11354_v31, %v11354_v31  ;;  %v31798_v62 = vrot.slane %v11354_v31, %v31013_v45  ;;  %v11353_v19 = vadd.f32 %v11321_v51, %v35048_v1 }
 0x91b   : > { %v12230_v46 = vsel %vm12196_vm3, %v35046_v32, %v31580_v55  ;;  %v12089_v58 = vrot.slane %v31535_v49, %v31019_v24  ;;  %v12093_v34 = vrot.slane %v31531_v37, %v31019_v24  ;;  %v12097_v55 = vrot.slane %v31783_v38, %v31019_v24 }
 0x91c   : > { %35047 = vst [vmem:[#allocation26_spill] sm:$0xff] %v31798_v62  ;;  %v31808_v14 = vrot.slane %v11799_v40, %v31013_v45  ;;  %v11814_v61 = vcombine.high %v11806_v48, %v11806_v48  ;;  %v35050_v54 = vrot.slane %v31564_v33, %v31019_v24  ;;  %v11292_v51 = vadd.f32 %v31007_v39, %v11256_v47 }
 0x91d   : > { %v12133_v32 = vrot.slane %v11806_v48, %v31019_v24  ;;  %v12573_v1 = vrot.slane %v11806_v48, %v31021_v3  ;;  %v31818_v8 = vrot.slane %v11850_v6, %v31013_v45  ;;  %v31822_v27 = vcombine.high %v31798_v62, %v31798_v62 }
 0x91e   : > { %35049 = vst [vmem:[#allocation27_spill] sm:$0xff] %v31808_v14  ;;  %v12231_v31 = vsel %vm12198_vm4, %v35050_v54, %v12230_v46  ;;  %v31826_v40 = vcombine.high %v31808_v14, %v31808_v14  ;;  %v12137_v44 = vrot.slane %v11814_v61, %v31019_v24  ;;  %v12577_v46 = vrot.slane %v11814_v61, %v31021_v3 }
 0x91f   : > { %35051 = vst [vmem:[#allocation28_spill] sm:$0xff] %v31818_v8  ;;  %35052 = vst [vmem:[#allocation77_spill] sm:$0xff] %v31822_v27  ;;  %v11833_v48 = vcombine.high %v11353_v19, %v11353_v19  ;;  %v11840_v6 = vrot.slane %v11353_v19, %v31013_v45  ;;  %v35053_v54 = vrot.slane %v31513_v53, %v31019_v24  ;;  %v11324_v61 = vmax.f32 %v11292_v51, 0.0 }
 0x920   : > { %v12141_v8 = vrot.slane %v31808_v14, %v31019_v24  ;;  %v12243_v21 = vsel %vm12194_vm2, %v12137_v44, %v12133_v32  ;;  %v31849_v19 = vsel %vm12194_vm2, %v12577_v46, %v12573_v1  ;;  %v27849_v44 = vld [vmem:[%s34359_s13 + $0x2] ss:$0 sm:$0xff]  ;;  %v31920_v53 = vcombine.high %v31773_v18, %v31773_v18 }
 0x921   : > { %v12232_v27 = vsel %vm12200_vm5, %v35053_v54, %v12231_v31  ;;  %35054 = vst [vmem:[#allocation78_spill] sm:$0xff] %v31849_v19  ;;  %v31852_v62 = vrot.slane %v11833_v48, %v31013_v45  ;;  %v11848_v31 = vcombine.high %v11840_v6, %v11840_v6  ;;  %v13008_v54 = vrot.slane %v11840_v6, %v31021_v3 }
 0x922   : > { %v12233_v41 = vsel %vm12202_vm6, %v12089_v58, %v12232_v27  ;;  %v11255_v32 = vmul.f32 %v27849_v44, %v31381_v17  ;;  %v11258_v48 = vmul.f32 %v27849_v44, %v31407_v4  ;;  %v13451_v39 = vrot.slane %v11840_v6, %v31019_v24  ;;  %v35057_v27 = vld [vmem:[#allocation29_spill] sm:$0xff]  ;;  %v27850_v17 = vld [vmem:[%s34359_s13 + $0x3] ss:$0 sm:$0xff] }
 0x923   : > { %35055 = vst [vmem:[#allocation79_spill] sm:$0xff] %v31852_v62  ;;  %v31862_v47 = vcombine.high %v31852_v62, %v31852_v62  ;;  %v13012_v1 = vrot.slane %v11848_v31, %v31021_v3  ;;  %v13455_v46 = vrot.slane %v11848_v31, %v31019_v24  ;;  %v12234_v58 = vsel %vm12204_vm7, %v12093_v34, %v12233_v41 }
 0x924   : > { %v11356_v51 = vadd.f32 %v11324_v61, %v35057_v27  ;;  %v11291_v14 = vadd.f32 %v27850_v17, %v11255_v32  ;;  %v12235_v41 = vsel %vm12206_vm8, %v12097_v55, %v12234_v58  ;;  %v35067_v62 = vrot.slane %v31645_v15, %v31019_v24 }
 0x925   : > { %35056 = vst [vmem:[#allocation80_spill] sm:$0xff] %v31862_v47  ;;  %v31878_v31 = vsel %vm12194_vm2, %v13012_v1, %v13008_v54  ;;  %v31889_v27 = vsel %vm12194_vm2, %v13455_v46, %v13451_v39  ;;  %25566 = vmatprep.mubr.msk.f32.mxu1 %vm627_vm0, %v12235_v41  ;;  %v11294_v54 = vadd.f32 %v27850_v17, %v11258_v48  ;;  %v35060_v48 = vld [vmem:[#allocation30_spill] sm:$0xff] }
 0x926   : > { %35058 = vst [vmem:[#allocation29_spill] sm:$0xff] %v31878_v31  ;;  %v11884_v34 = vcombine.high %v11356_v51, %v11356_v51  ;;  %v31884_v6 = vrot.slane %v11356_v51, %v31013_v45  ;;  %v11323_v61 = vmax.f32 %v11291_v14, 0.0  ;;  %35059 = vst [vmem:[#allocation81_spill] sm:$0xff] %v31889_v27  ;;  %v11257_v1 = vmul.f32 %v27849_v44, %v31420_v2 }
 0x927   : > { %v31902_v14 = vcombine.high %v31657_v42, %v31657_v42  ;;  %v12121_v39 = vrot.slane %v31661_v11, %v31019_v24  ;;  %v11326_v2 = vmax.f32 %v11294_v54, 0.0  ;;  %v12125_v41 = vrot.slane %v31657_v42, %v31019_v24  ;;  %35062 = vst [vmem:[#allocation30_spill] sm:$0xff] %v31920_v53 }
 0x928   : > { %v31894_v4 = vrot.slane %v11884_v34, %v31013_v45  ;;  %v31898_v55 = vcombine.high %v31884_v6, %v31884_v6  ;;  %v11355_v58 = vadd.f32 %v11323_v61, %v35060_v48  ;;  %v11293_v44 = vadd.f32 %v27850_v17, %v11257_v1  ;;  %v35063_v17 = vld [vmem:[#allocation31_spill] sm:$0xff] }
 0x929   : > { %v35061_v34 = vrot.slane %v31680_v10, %v31019_v24  ;;  %v11358_v54 = vadd.f32 %v11326_v2, %v35063_v17  ;;  %v12129_v48 = vrot.slane %v31902_v14, %v31019_v24  ;;  %v35064_v51 = vrot.slane %v31692_v57, %v31019_v24 }
 0x92a   : > { %v11867_v19 = vcombine.high %v11355_v58, %v11355_v58  ;;  %v11874_v61 = vrot.slane %v11355_v58, %v31013_v45  ;;  %v11325_v1 = vmax.f32 %v11293_v44, 0.0  ;;  %v12161_v2 = vrot.slane %v31920_v53, %v31019_v24 }
 0x92b   : > { %v12237_v32 = vsel %vm12196_vm3, %v35061_v34, %v31709_v5  ;;  %v12153_v5 = vrot.slane %v31777_v26, %v31019_v24  ;;  %v12157_v34 = vrot.slane %v31773_v18, %v31019_v24  ;;  %v12244_v44 = vsel %vm12196_vm3, %v12141_v8, %v12243_v21 }
 0x92c   : > { %v12238_v46 = vsel %vm12198_vm4, %v35064_v51, %v12237_v32  ;;  %v31935_v27 = vrot.slane %v11867_v19, %v31013_v45  ;;  %v11882_v58 = vcombine.high %v11874_v61, %v11874_v61  ;;  %v11918_v17 = vcombine.high %v11358_v54, %v11358_v54  ;;  %v35066_v32 = vld [vmem:[#allocation32_spill] sm:$0xff] }
 0x92d   : > { %v31941_v47 = vrot.slane %v11358_v54, %v31013_v45  ;;  %v11357_v51 = vadd.f32 %v11325_v1, %v35066_v32  ;;  %v12239_v31 = vsel %vm12200_vm5, %v35067_v62, %v12238_v46  ;;  %v12165_v18 = vrot.slane %v11874_v61, %v31019_v24 }
 0x92e   : > { %v31950_v19 = vcombine.high %v31935_v27, %v31935_v27  ;;  %v12169_v53 = vrot.slane %v11882_v58, %v31019_v24  ;;  %v12609_v21 = vrot.slane %v11882_v58, %v31021_v3  ;;  %v12173_v8 = vrot.slane %v31935_v27, %v31019_v24 }
 0x92f   : > { %35065 = vst [vmem:[#allocation31_spill] sm:$0xff] %v31941_v47  ;;  %v12605_v54 = vrot.slane %v11874_v61, %v31021_v3  ;;  %v31961_v62 = vrot.slane %v11918_v17, %v31013_v45  ;;  %v31968_v26 = vcombine.high %v31941_v47, %v31941_v47  ;;  %v11901_v15 = vcombine.high %v11357_v51, %v11357_v51 }
 0x930   : > { %v12177_v46 = vrot.slane %v31950_v19, %v31019_v24  ;;  %v12250_v32 = vsel %vm12194_vm2, %v12169_v53, %v12165_v18  ;;  %v11908_v1 = vrot.slane %v11357_v51, %v31013_v45  ;;  %v12240_v17 = vsel %vm12202_vm6, %v12121_v39, %v12239_v31 }
 0x931   : > { %35068 = vst [vmem:[#allocation32_spill] sm:$0xff] %v31961_v62  ;;  %35069 = vst [vmem:[#allocation82_spill] sm:$0xff] %v31968_v26  ;;  %v31977_v62 = vsel %vm12194_vm2, %v12609_v21, %v12605_v54  ;;  %v12241_v53 = vsel %vm12204_vm7, %v12125_v41, %v12240_v17  ;;  %v35070_v18 = vrot.slane %v31826_v40, %v31019_v24 }
 0x932   : > { %v31986_v58 = vcombine.high %v31894_v4, %v31894_v4  ;;  %v31991_v51 = vrot.slane %v11901_v15, %v31013_v45  ;;  %v11916_v31 = vcombine.high %v11908_v1, %v11908_v1  ;;  %v12185_v39 = vrot.slane %v31898_v55, %v31019_v24 }
 0x933   : > { %v12245_v26 = vsel %vm12198_vm4, %v35070_v18, %v12244_v44  ;;  %v13040_v41 = vrot.slane %v11908_v1, %v31021_v3  ;;  %v13483_v21 = vrot.slane %v11908_v1, %v31019_v24  ;;  %v12242_v44 = vsel %vm12206_vm8, %v12129_v48, %v12241_v53 }
 0x934   : > { %v35071_v54 = vrot.slane %v31758_v16, %v31019_v24  ;;  %v32004_v18 = vcombine.high %v31991_v51, %v31991_v51  ;;  %v13044_v15 = vrot.slane %v11916_v31, %v31021_v3  ;;  %v13487_v61 = vrot.slane %v11916_v31, %v31019_v24  ;;  %25567 = vmatmul.mubr.msk.f32.gmra.mrb[40].mxu1 %vm627_vm0, %v12242_v44 }
 0x935   : > { %v12189_v1 = vrot.slane %v31894_v4, %v31019_v24  ;;  %v13048_v48 = vrot.slane %v31991_v51, %v31021_v3  ;;  %v12401_v47 = vrot.slane %v31036_v56, %v31021_v3  ;;  %v12405_v56 = vrot.slane %v31032_v0, %v31021_v3 }
 0x936   : > { %v12246_v17 = vsel %vm12200_vm5, %v35071_v54, %v12245_v26  ;;  %v12193_v26 = vrot.slane %v31986_v58, %v31019_v24  ;;  %v12251_v54 = vsel %vm12196_vm3, %v12173_v8, %v12250_v32  ;;  %v32020_v31 = vsel %vm12194_vm2, %v13044_v15, %v13040_v41 }
 0x937   : > { %v12247_v53 = vsel %vm12202_vm6, %v12153_v5, %v12246_v17  ;;  %v32029_v17 = vsel %vm12194_vm2, %v13487_v61, %v13483_v21  ;;  %v12252_v32 = vsel %vm12198_vm4, %v12177_v46, %v12251_v54  ;;  %v35072_v41 = vrot.slane %v31884_v6, %v31019_v24 }
 0x938   : > { %v12248_v8 = vsel %vm12204_vm7, %v12157_v34, %v12247_v53  ;;  %v35073_v5 = vrot.slane %v31043_v30, %v31021_v3  ;;  %v35074_v46 = vrot.slane %v31051_v35, %v31021_v3  ;;  %v35075_v0 = vrot.slane %v31159_v52, %v31021_v3 }
 0x939   : > { %v12249_v45 = vsel %vm12206_vm8, %v12161_v2, %v12248_v8  ;;  %v12253_v15 = vsel %vm12200_vm5, %v35072_v41, %v12252_v32  ;;  %v12409_v2 = vrot.slane %v31274_v13, %v31021_v3  ;;  %v12441_v13 = vrot.slane %v31149_v43, %v31021_v3  ;;  %v35082_v32 = vld [vmem:[#allocation35_spill] sm:$0xff] }
 0x93a   : > { %v12635_v61 = vsel %vm12196_vm3, %v35073_v5, %v31073_v59  ;;  %25569 = vmatprep.mubr.msk.f32.mxu1 %vm627_vm0, %v12249_v45  ;;  %v12254_v34 = vsel %vm12202_vm6, %v12185_v39, %v12253_v15  ;;  %v12643_v30 = vsel %vm12198_vm4, %v35075_v0, %v31179_v36  ;;  %v35076_v45 = vrot.slane %v31026_v23, %v31021_v3  ;;  %v35083_v15 = vld [vmem:[#allocation68_spill] sm:$0xff]  ;;  %v35088_v0 = vld [vmem:[#allocation59_spill] sm:$0xff] }
 0x93b   : > { %v12636_v21 = vsel %vm12198_vm4, %v35074_v46, %v12635_v61  ;;  %v12255_v59 = vsel %vm12204_vm7, %v12189_v1, %v12254_v34  ;;  %v35077_v35 = vrot.slane %v31116_v22, %v31021_v3  ;;  %v35078_v36 = vrot.slane %v31136_v60, %v31021_v3 }
 0x93c   : > { %v12637_v39 = vsel %vm12200_vm5, %v35076_v45, %v12636_v21  ;;  %v12256_v54 = vsel %vm12206_vm8, %v12193_v26, %v12255_v59  ;;  %v12465_v23 = vrot.slane %v31261_v9, %v31021_v3  ;;  %v35079_v22 = vrot.slane %v31132_v28, %v31021_v3  ;;  %v35080_v26 = vld [vmem:[#allocation72_spill] sm:$0xff] }
 0x93d   : > { %v12644_v53 = vsel %vm12200_vm5, %v35077_v35, %v12643_v30  ;;  %v12638_v52 = vsel %vm12202_vm6, %v12401_v47, %v12637_v39  ;;  %25570 = vmatmul.mubr.msk.f32.gmra.mrb[42].mxu1 %vm627_vm0, %v12256_v54  ;;  %v12469_v47 = vrot.slane %v31257_v25, %v31021_v3  ;;  %v35081_v60 = vrot.slane %v31270_v7, %v31021_v3  ;;  %v35085_v7 = vld [vmem:[#allocation64_spill] sm:$0xff] }
 0x93e   : > { %v12645_v1 = vsel %vm12202_vm6, %v35078_v36, %v12644_v53  ;;  %v12639_v43 = vsel %vm12204_vm7, %v12405_v56, %v12638_v52  ;;  %v12473_v41 = vrot.slane %v35082_v32, %v31021_v3  ;;  %v35084_v56 = vrot.slane %v35083_v15, %v31021_v3  ;;  %v35087_v21 = vld [vmem:[#allocation16_spill] sm:$0xff] }
 0x93f   : > { %v12646_v5 = vsel %vm12204_vm7, %v35079_v22, %v12645_v1  ;;  %v12649_v8 = vsel %vm12196_vm3, %v35081_v60, %v35080_v26  ;;  %v12640_v9 = vsel %vm12206_vm8, %v12409_v2, %v12639_v43  ;;  %v12497_v61 = vrot.slane %v31414_v12, %v31021_v3  ;;  %v35090_v45 = vld [vmem:[#allocation48_spill] sm:$0xff]  ;;  %v35093_v1 = vld [vmem:[#allocation42_spill] sm:$0xff]  ;;  %v35095_v43 = vld [vmem:[#allocation15_spill] sm:$0xff] }
 0x940   : > { %v12650_v28 = vsel %vm12198_vm4, %v35084_v56, %v12649_v8  ;;  %25574 = vmatprep.mubr.msk.f32.mxu1 %vm627_vm0, %v12640_v9  ;;  %v12647_v25 = vsel %vm12206_vm8, %v12441_v13, %v12646_v5  ;;  %v35086_v34 = vrot.slane %v35085_v7, %v31021_v3  ;;  %v12501_v46 = vrot.slane %v31410_v50, %v31021_v3  ;;  %v35097_v26 = vld [vmem:[#allocation38_spill] sm:$0xff]  ;;  %v35099_v32 = vld [vmem:[#allocation20_spill] sm:$0xff] }
 0x941   : > { %v35089_v30 = vrot.slane %v35088_v0, %v31021_v3  ;;  %v12505_v39 = vrot.slane %v35090_v45, %v31021_v3  ;;  %v35091_v13 = vrot.slane %v31438_v63, %v31021_v3  ;;  %v12529_v53 = vrot.slane %v31535_v49, %v31021_v3  ;;  %25575 = vmatmul.mubr.msk.f32.vlgmr.msra.gmra.mrb[36].mxu1 %vm627_vm0, %v12647_v25  ;;  %v32137_v49 = vld [vmem:[%s34948_s3 + $0x18] sm:$0xff]  ;;  %s621_s3 = scalar_lea.vmem [#allocation6], %s620_s28 }
 0x942   : > { %v12651_v2 = vsel %vm12200_vm5, %v35086_v34, %v12650_v28  ;;  %v35092_v54 = vrot.slane %v31395_v20, %v31021_v3  ;;  %v12533_v36 = vrot.slane %v31531_v37, %v31021_v3  ;;  %v35094_v63 = vrot.slane %v31549_v29, %v31021_v3  ;;  %25587 = vmatpush3.msra.mxu1 %v35095_v43  ;;  %v35102_v25 = vld [vmem:[#allocation17_spill] sm:$0xff] }
 0x943   : > { %v12656_v59 = vsel %vm12196_vm3, %v35089_v30, %v35087_v21  ;;  %v12652_v12 = vsel %vm12202_vm6, %v12465_v23, %v12651_v2  ;;  %v12537_v37 = vrot.slane %v31783_v38, %v31021_v3  ;;  %v35096_v5 = vrot.slane %v31564_v33, %v31021_v3  ;;  %25600 = vmatprep.subr.mxu1 %v32137_v49  ;;  %v35105_v21 = vld [vmem:[#allocation75_spill] sm:$0xff]  ;;  %v35106_v30 = vld [vmem:[#allocation78_spill] sm:$0xff] }
 0x944   : > { %v12657_v35 = vsel %vm12198_vm4, %v35091_v13, %v12656_v59  ;;  %v12653_v50 = vsel %vm12204_vm7, %v12469_v47, %v12652_v12  ;;  %v12663_v23 = vsel %vm12196_vm3, %v35094_v63, %v35093_v1  ;;  %v35098_v60 = vrot.slane %v35097_v26, %v31021_v3  ;;  %v35107_v59 = vld [vmem:[#allocation27_spill] sm:$0xff] }
 0x945   : > { %v12658_v52 = vsel %vm12200_vm5, %v35092_v54, %v12657_v35  ;;  %v12654_v20 = vsel %vm12206_vm8, %v12473_v41, %v12653_v50  ;;  %v12664_v29 = vsel %vm12198_vm4, %v35096_v5, %v12663_v23  ;;  %v12561_v9 = vrot.slane %v31661_v11, %v31021_v3 }
 0x946   : > { %v12659_v22 = vsel %vm12202_vm6, %v12497_v61, %v12658_v52  ;;  %25577 = vmatprep.mubr.msk.f32.mxu1 %vm627_vm0, %v12654_v20  ;;  %v12665_v8 = vsel %vm12200_vm5, %v35098_v60, %v12664_v29  ;;  %v35100_v38 = vrot.slane %v31680_v10, %v31021_v3  ;;  %v12565_v56 = vrot.slane %v31657_v42, %v31021_v3  ;;  %v35104_v42 = vld [vmem:[#allocation76_spill] sm:$0xff]  ;;  %v35114_v20 = vld [vmem:[#allocation39_spill] sm:$0xff]  ;;  %v35118_v29 = vld [vmem:[#allocation49_spill] sm:$0xff] }
 0x947   : > { %v12660_v47 = vsel %vm12204_vm7, %v12501_v46, %v12659_v22  ;;  %v12666_v15 = vsel %vm12202_vm6, %v12529_v53, %v12665_v8  ;;  %v35101_v28 = vrot.slane %v31692_v57, %v31021_v3  ;;  %v12569_v11 = vrot.slane %v31902_v14, %v31021_v3 }
 0x948   : > { %v12670_v33 = vsel %vm12196_vm3, %v35100_v38, %v35099_v32  ;;  %v12661_v41 = vsel %vm12206_vm8, %v12505_v39, %v12660_v47  ;;  %v12667_v10 = vsel %vm12204_vm7, %v12533_v36, %v12666_v15  ;;  %v35103_v7 = vrot.slane %v35102_v25, %v31021_v3  ;;  %v35109_v39 = vld [vmem:[#allocation30_spill] sm:$0xff] }
 0x949   : > { %v12671_v61 = vsel %vm12198_vm4, %v35101_v28, %v12670_v33  ;;  %25578 = vmatmul.mubr.msk.f32.gmra.mrb[38].mxu1 %vm627_vm0, %v12661_v41  ;;  %v12593_v2 = vrot.slane %v35104_v42, %v31021_v3  ;;  %v12668_v57 = vsel %vm12206_vm8, %v12537_v37, %v12667_v10  ;;  %v12597_v0 = vrot.slane %v35105_v21, %v31021_v3  ;;  %v35116_v37 = vld [vmem:[#allocation46_spill] sm:$0xff]  ;;  %v35122_v33 = vld [vmem:[#allocation36_spill] sm:$0xff]  ;;  %v35125_v28 = vld [vmem:[#allocation51_spill] sm:$0xff] }
 0x94a   : > { %v12672_v34 = vsel %vm12200_vm5, %v35103_v7, %v12671_v61  ;;  %v35108_v12 = vrot.slane %v35107_v59, %v31021_v3  ;;  %25580 = vmatprep.mubr.msk.f32.mxu1 %vm627_vm0, %v12668_v57  ;;  %v12601_v13 = vrot.slane %v35109_v39, %v31021_v3  ;;  %v35110_v35 = vrot.slane %v31826_v40, %v31021_v3  ;;  %v35131_v59 = vld [vmem:[#allocation65_spill] sm:$0xff] }
 0x94b   : > { %v12673_v46 = vsel %vm12202_vm6, %v12561_v9, %v12672_v34  ;;  %v12625_v50 = vrot.slane %v31898_v55, %v31021_v3  ;;  %v35111_v52 = vrot.slane %v31758_v16, %v31021_v3  ;;  %v12629_v1 = vrot.slane %v31894_v4, %v31021_v3  ;;  %v35120_v9 = vld [vmem:[#allocation50_spill] sm:$0xff] }
 0x94c   : > { %v12677_v14 = vsel %vm12196_vm3, %v35108_v12, %v35106_v30  ;;  %v12674_v45 = vsel %vm12204_vm7, %v12565_v56, %v12673_v46  ;;  %v35112_v63 = vrot.slane %v31935_v27, %v31021_v3  ;;  %v12633_v23 = vrot.slane %v31986_v58, %v31021_v3  ;;  %v35117_v58 = vld [vmem:[#allocation58_spill] sm:$0xff] }
 0x94d   : > { %v12678_v53 = vsel %vm12198_vm4, %v35110_v35, %v12677_v14  ;;  %v12675_v54 = vsel %vm12206_vm8, %v12569_v11, %v12674_v45  ;;  %v35113_v16 = vrot.slane %v31950_v19, %v31021_v3  ;;  %v32221_v4 = vcombine.high %v35114_v20, %v35114_v20  ;;  %v35124_v56 = vld [vmem:[#allocation66_spill] sm:$0xff]  ;;  %v35127_v11 = vld [vmem:[#allocation52_spill] sm:$0xff]  ;;  %v35133_v45 = vld [vmem:[#allocation53_spill] sm:$0xff] }
 0x94e   : > { %v12679_v36 = vsel %vm12200_vm5, %v35111_v52, %v12678_v53  ;;  %v12684_v40 = vsel %vm12196_vm3, %v35112_v63, %v31977_v62  ;;  %25581 = vmatmul.mubr.msk.f32.gmra.mrb[40].mxu1 %vm627_vm0, %v12675_v54  ;;  %v35115_v62 = vrot.slane %v31884_v6, %v31021_v3  ;;  %v12836_v5 = vrot.slane %v35116_v37, %v31021_v3  ;;  %v35134_v35 = vld [vmem:[#allocation62_spill] sm:$0xff]  ;;  %v35136_v54 = vld [vmem:[#allocation56_spill] sm:$0xff]  ;;  %v35139_v63 = vld [vmem:[#allocation69_spill] sm:$0xff] }
 0x94f   : > { %v12680_v55 = vsel %vm12202_vm6, %v12593_v2, %v12679_v36  ;;  %v12685_v43 = vsel %vm12198_vm4, %v35113_v16, %v12684_v40  ;;  %v35119_v19 = vrot.slane %v35118_v29, %v31021_v3  ;;  %v12840_v8 = vrot.slane %v35114_v20, %v31021_v3  ;;  %v35128_v2 = vld [vmem:[#allocation61_spill] sm:$0xff]  ;;  %v35137_v52 = vld [vmem:[#allocation54_spill] sm:$0xff] }
 0x950   : > { %v12681_v27 = vsel %vm12204_vm7, %v12597_v0, %v12680_v55  ;;  %v12686_v22 = vsel %vm12200_vm5, %v35115_v62, %v12685_v43  ;;  %v35121_v6 = vrot.slane %v35120_v9, %v31021_v3  ;;  %v35123_v41 = vrot.slane %v35122_v33, %v31021_v3  ;;  %v35130_v0 = vld [vmem:[#allocation71_spill] sm:$0xff] }
 0x951   : > { %v13070_v47 = vsel %vm12196_vm3, %v35119_v19, %v35117_v58  ;;  %v12682_v26 = vsel %vm12206_vm8, %v12601_v13, %v12681_v27  ;;  %v12687_v60 = vsel %vm12202_vm6, %v12625_v50, %v12686_v22  ;;  %v35126_v61 = vrot.slane %v35125_v28, %v31021_v3  ;;  %v35140_v43 = vld [vmem:[#allocation55_spill] sm:$0xff]  ;;  %v35142_v22 = vld [vmem:[#allocation70_spill] sm:$0xff]  ;;  %v35144_v19 = vld [vmem:[#allocation73_spill] sm:$0xff] }
 0x952   : > { %v13071_v32 = vsel %vm12198_vm4, %v35121_v6, %v13070_v47  ;;  %25583 = vmatprep.mubr.msk.f32.mxu1 %vm627_vm0, %v12682_v26  ;;  %v12688_v38 = vsel %vm12204_vm7, %v12629_v1, %v12687_v60  ;;  %v32256_v25 = vcombine.high %v35127_v11, %v35127_v11  ;;  %v12844_v34 = vrot.slane %v32221_v4, %v31021_v3  ;;  %v35145_v26 = vld [vmem:[#allocation41_spill] sm:$0xff]  ;;  %v35146_v60 = vld [vmem:[#allocation34_spill] sm:$0xff] }
 0x953   : > { %v13072_v15 = vsel %vm12200_vm5, %v35123_v41, %v13071_v32  ;;  %v13078_v10 = vsel %vm12198_vm4, %v35126_v61, %v35124_v56  ;;  %v12689_v7 = vsel %vm12206_vm8, %v12633_v23, %v12688_v38  ;;  %v35129_v57 = vrot.slane %v35128_v2, %v31021_v3  ;;  %v35148_v32 = vld [vmem:[#allocation14_spill] sm:$0xff]  ;;  %v35149_v61 = vld [vmem:[#allocation37_spill] sm:$0xff] }
 0x954   : > { %v13073_v42 = vsel %vm12202_vm6, %v12836_v5, %v13072_v15  ;;  %25584 = vmatmul.mubr.msk.f32.gmra.mrb[42].mxu1 %vm627_vm0, %v12689_v7  ;;  %v12876_v30 = vrot.slane %v35130_v0, %v31021_v3  ;;  %v35132_v12 = vrot.slane %v35131_v59, %v31021_v3  ;;  %v12900_v39 = vrot.slane %v35133_v45, %v31021_v3 }
 0x955   : > { %v13079_v46 = vsel %vm12200_vm5, %v35129_v57, %v13078_v10  ;;  %v13074_v21 = vsel %vm12204_vm7, %v12840_v8, %v13073_v42  ;;  %v35135_v53 = vrot.slane %v35134_v35, %v31021_v3  ;;  %v35138_v36 = vrot.slane %v35137_v52, %v31021_v3  ;;  %v35151_v42 = vld [vmem:[#allocation63_spill] sm:$0xff] }
 0x956   : > { %v13080_v14 = vsel %vm12202_vm6, %v35132_v12, %v13079_v46  ;;  %v13075_v13 = vsel %vm12206_vm8, %v12844_v34, %v13074_v21  ;;  %v32288_v40 = vcombine.high %v35139_v63, %v35139_v63  ;;  %v12904_v23 = vrot.slane %v35127_v11, %v31021_v3  ;;  %v35153_v21 = vld [vmem:[#allocation40_spill] sm:$0xff]  ;;  %v35154_v12 = vld [vmem:[#allocation47_spill] sm:$0xff] }
 0x957   : > { %v13081_v50 = vsel %vm12204_vm7, %v35135_v53, %v13080_v14  ;;  %v13084_v1 = vsel %vm12196_vm3, %v35138_v36, %v35136_v54  ;;  %25588 = vmatprep.mubr.msk.f32.mxu1 %vm627_vm0, %v13075_v13  ;;  %v12908_v16 = vrot.slane %v32256_v25, %v31021_v3  ;;  %v35141_v27 = vrot.slane %v35140_v43, %v31021_v3  ;;  %v35155_v14 = vld [vmem:[#allocation44_spill] sm:$0xff] }
 0x958   : > { %v13082_v55 = vsel %vm12206_vm8, %v12876_v30, %v13081_v50  ;;  %v35143_v5 = vrot.slane %v35142_v22, %v31021_v3  ;;  %v12932_v47 = vrot.slane %v35144_v19, %v31021_v3  ;;  %v35147_v8 = vrot.slane %v35146_v60, %v31021_v3  ;;  %v35157_v50 = vld [vmem:[#allocation45_spill] sm:$0xff] }
 0x959   : > { %v13085_v62 = vsel %vm12198_vm4, %v35141_v27, %v13084_v1  ;;  %v32313_v38 = vcombine.high %v35148_v32, %v35148_v32  ;;  %25589 = vmatmul.mubr.msk.f32.vlgmr.msra.gmra.mrb[36].mxu1 %vm627_vm0, %v13082_v55  ;;  %v12936_v15 = vrot.slane %v35139_v63, %v31021_v3  ;;  %v12940_v56 = vrot.slane %v32288_v40, %v31021_v3  ;;  %v35159_v1 = vld [vmem:[#allocation21_spill] sm:$0xff] }
 0x95a   : > { %v13086_v58 = vsel %vm12200_vm5, %v35143_v5, %v13085_v62  ;;  %v13091_v6 = vsel %vm12196_vm3, %v35147_v8, %v35145_v26  ;;  %v35150_v10 = vrot.slane %v35149_v61, %v31021_v3  ;;  %25601 = vmatpush3.msra.mxu1 %v32137_v49  ;;  %v35152_v57 = vrot.slane %v35151_v42, %v31021_v3  ;;  %v35160_v62 = vld [vmem:[#allocation13_spill] sm:$0xff]  ;;  %v35162_v8 = vld [vmem:[#allocation22_spill] sm:$0xff] }
 0x95b   : > { %v13087_v41 = vsel %vm12202_vm6, %v12900_v39, %v13086_v58  ;;  %v12964_v30 = vrot.slane %v35153_v21, %v31021_v3  ;;  %v35156_v39 = vrot.slane %v35155_v14, %v31021_v3  ;;  %v35158_v54 = vrot.slane %v35157_v50, %v31021_v3 }
 0x95c   : > { %v13092_v7 = vsel %vm12198_vm4, %v35150_v10, %v13091_v6  ;;  %v13088_v34 = vsel %vm12204_vm7, %v12904_v23, %v13087_v41  ;;  %v32346_v55 = vcombine.high %v35159_v1, %v35159_v1  ;;  %v12968_v27 = vrot.slane %v35148_v32, %v31021_v3  ;;  %v35163_v41 = vld [vmem:[#allocation25_spill] sm:$0xff] }
 0x95d   : > { %v13093_v46 = vsel %vm12200_vm5, %v35152_v57, %v13092_v7  ;;  %v13098_v13 = vsel %vm12196_vm3, %v35156_v39, %v35154_v12  ;;  %v13089_v53 = vsel %vm12206_vm8, %v12908_v16, %v13088_v34  ;;  %v12972_v16 = vrot.slane %v32313_v38, %v31021_v3  ;;  %v35168_v12 = vld [vmem:[#allocation28_spill] sm:$0xff] }
 0x95e   : > { %v13094_v49 = vsel %vm12202_vm6, %v12932_v47, %v13093_v46  ;;  %v13099_v36 = vsel %vm12198_vm4, %v35158_v54, %v13098_v13  ;;  %25591 = vmatprep.mubr.msk.f32.mxu1 %vm627_vm0, %v13089_v53  ;;  %v35161_v5 = vrot.slane %v35160_v62, %v31021_v3  ;;  %v12996_v6 = vrot.slane %v35162_v8, %v31021_v3  ;;  %v35166_v46 = vld [vmem:[#allocation24_spill] sm:$0xff] }
 0x95f   : > { %v13095_v23 = vsel %vm12204_vm7, %v12936_v15, %v13094_v49  ;;  %v35164_v15 = vld [vmem:[#allocation23_spill] sm:$0xff]  ;;  %v13000_v57 = vrot.slane %v35159_v1, %v31021_v3  ;;  %v32377_v39 = vcombine.high %v35168_v12, %v35168_v12  ;;  %v13004_v53 = vrot.slane %v32346_v55, %v31021_v3 }
 0x960   : > { %v13100_v58 = vsel %vm12200_vm5, %v35161_v5, %v13099_v36  ;;  %v13096_v47 = vsel %vm12206_vm8, %v12940_v56, %v13095_v23  ;;  %v35165_v10 = vrot.slane %v35164_v15, %v31021_v3  ;;  %v35167_v56 = vrot.slane %v35166_v46, %v31021_v3  ;;  %v35169_v49 = vld [vmem:[#allocation19_spill] sm:$0xff]  ;;  %v35171_v23 = vld [vmem:[#allocation29_spill] sm:$0xff] }
 0x961   : > { %v13101_v26 = vsel %vm12202_vm6, %v12964_v30, %v13100_v58  ;;  %25592 = vmatmul.mubr.msk.f32.gmra.mrb[38].mxu1 %vm627_vm0, %v13096_v47  ;;  %v35170_v54 = vrot.slane %v35169_v49, %v31021_v3 }
 0x962   : > { %v13105_v7 = vsel %vm12196_vm3, %v35165_v10, %v35163_v41  ;;  %v13102_v34 = vsel %vm12204_vm7, %v12968_v27, %v13101_v26  ;;  %v35172_v27 = vld [vmem:[#allocation79_spill] sm:$0xff]  ;;  %v35175_v41 = vld [vmem:[#allocation80_spill] sm:$0xff] }
 0x963   : > { %v13106_v30 = vsel %vm12198_vm4, %v35167_v56, %v13105_v7  ;;  %v13103_v13 = vsel %vm12206_vm8, %v12972_v16, %v13102_v34  ;;  %v35173_v5 = vrot.slane %v35172_v27, %v31021_v3  ;;  %v35174_v16 = vld [vmem:[#allocation77_spill] sm:$0xff]  ;;  %v35176_v10 = vrot.slane %v35175_v41, %v31021_v3  ;;  %v35177_v34 = vld [vmem:[#allocation32_spill] sm:$0xff] }
 0x964   : > { %v13107_v36 = vsel %vm12200_vm5, %v35170_v54, %v13106_v30  ;;  %25594 = vmatprep.mubr.msk.f32.mxu1 %vm627_vm0, %v13103_v13  ;;  %v13028_v26 = vrot.slane %v35174_v16, %v31021_v3  ;;  %v32401_v56 = vcombine.high %v35177_v34, %v35177_v34  ;;  %v13032_v54 = vrot.slane %v35168_v12, %v31021_v3  ;;  %v35179_v13 = vld [vmem:[#allocation26_spill] sm:$0xff] }
 0x965   : > { %v13112_v58 = vsel %vm12196_vm3, %v35173_v5, %v35171_v23  ;;  %v13108_v47 = vsel %vm12202_vm6, %v12996_v6, %v13107_v36  ;;  %v13036_v6 = vrot.slane %v32377_v39, %v31021_v3  ;;  %v35180_v36 = vrot.slane %v35179_v13, %v31021_v3 }
 0x966   : > { %v13113_v7 = vsel %vm12198_vm4, %v35176_v10, %v13112_v58  ;;  %35178 = vst [vmem:[#allocation72_spill] sm:$0xff] %v32401_v56  ;;  %v13109_v30 = vsel %vm12204_vm7, %v13000_v57, %v13108_v47  ;;  %v35181_v10 = vld [vmem:[#allocation82_spill] sm:$0xff]  ;;  %v13119_v57 = vsel %vm12196_vm3, %v13048_v48, %v32020_v31 }
 0x967   : > { %v13114_v23 = vsel %vm12200_vm5, %v35180_v36, %v13113_v7  ;;  %v13110_v5 = vsel %vm12206_vm8, %v13004_v53, %v13109_v30  ;;  %v13060_v44 = vrot.slane %v35181_v10, %v31021_v3  ;;  %v13064_v7 = vrot.slane %v35177_v34, %v31021_v3 }
 0x968   : > { %v13115_v58 = vsel %vm12202_vm6, %v13028_v26, %v13114_v23  ;;  %25595 = vmatmul.mubr.msk.f32.gmra.mrb[40].mxu1 %vm627_vm0, %v13110_v5  ;;  %v13068_v53 = vrot.slane %v32401_v56, %v31021_v3  ;;  %v35182_v26 = vrot.slane %v32004_v18, %v31021_v3  ;;  %v35183_v23 = vld [vmem:[#allocation31_spill] sm:$0xff]  ;;  %v35185_v5 = vld [vmem:[#allocation60_spill] sm:$0xff] }
 0x969   : > { %v13116_v47 = vsel %vm12204_vm7, %v13032_v54, %v13115_v58  ;;  %v35184_v48 = vrot.slane %v35183_v23, %v31021_v3  ;;  %v13279_v54 = vrot.slane %v35116_v37, %v31019_v24  ;;  %v35186_v58 = vrot.slane %v35118_v29, %v31019_v24 }
 0x96a   : > { %v13120_v30 = vsel %vm12198_vm4, %v35182_v26, %v13119_v57  ;;  %v13117_v36 = vsel %vm12206_vm8, %v13036_v6, %v13116_v47  ;;  %v13283_v6 = vrot.slane %v35114_v20, %v31019_v24  ;;  %v35187_v47 = vrot.slane %v35120_v9, %v31019_v24 }
 0x96b   : > { %v13121_v31 = vsel %vm12200_vm5, %v35184_v48, %v13120_v30  ;;  %v13513_v56 = vsel %vm12196_vm3, %v35186_v58, %v35185_v5  ;;  %25597 = vmatprep.mubr.msk.f32.mxu1 %vm627_vm0, %v13117_v36  ;;  %v35188_v30 = vld [vmem:[#allocation67_spill] sm:$0xff]  ;;  %v35189_v37 = vrot.slane %v35125_v28, %v31019_v24  ;;  %v13287_v36 = vrot.slane %v32221_v4, %v31019_v24 }
 0x96c   : > { %v13122_v57 = vsel %vm12202_vm6, %v13060_v44, %v13121_v31  ;;  %v13514_v26 = vsel %vm12198_vm4, %v35187_v47, %v13513_v56  ;;  %v35190_v44 = vrot.slane %v35122_v33, %v31019_v24  ;;  %v35191_v9 = vrot.slane %v35128_v2, %v31019_v24 }
 0x96d   : > { %v13521_v29 = vsel %vm12198_vm4, %v35189_v37, %v35188_v30  ;;  %v13123_v48 = vsel %vm12204_vm7, %v13064_v7, %v13122_v57  ;;  %v13319_v7 = vrot.slane %v35130_v0, %v31019_v24  ;;  %v35192_v4 = vrot.slane %v35131_v59, %v31019_v24 }
 0x96e   : > { %v13515_v20 = vsel %vm12200_vm5, %v35190_v44, %v13514_v26  ;;  %v13522_v56 = vsel %vm12200_vm5, %v35191_v9, %v13521_v29  ;;  %v13124_v31 = vsel %vm12206_vm8, %v13068_v53, %v13123_v48  ;;  %v35193_v2 = vrot.slane %v35134_v35, %v31019_v24  ;;  %v35198_v29 = vld [vmem:[#allocation43_spill] sm:$0xff]  ;;  %v35202_v9 = vld [vmem:[#allocation18_spill] sm:$0xff] }
 0x96f   : > { %v13516_v28 = vsel %vm12202_vm6, %v13279_v54, %v13515_v20  ;;  %v13523_v5 = vsel %vm12202_vm6, %v35192_v4, %v13522_v56  ;;  %25598 = vmatmul.mubr.msk.f32.gmra.mrb[42].mxu1 %vm627_vm0, %v13124_v31  ;;  %v13343_v53 = vrot.slane %v35133_v45, %v31019_v24  ;;  %v35194_v54 = vld [vmem:[#allocation57_spill] sm:$0xff]  ;;  %v35195_v0 = vrot.slane %v35137_v52, %v31019_v24 }
 0x970   : > { %v13517_v33 = vsel %vm12204_vm7, %v13283_v6, %v13516_v28  ;;  %v13524_v58 = vsel %vm12204_vm7, %v35193_v2, %v13523_v5  ;;  %v13347_v6 = vrot.slane %v35127_v11, %v31019_v24  ;;  %v35196_v35 = vrot.slane %v35140_v43, %v31019_v24 }
 0x971   : > { %v13527_v59 = vsel %vm12196_vm3, %v35195_v0, %v35194_v54  ;;  %v13518_v57 = vsel %vm12206_vm8, %v13287_v36, %v13517_v33  ;;  %v13525_v47 = vsel %vm12206_vm8, %v13319_v7, %v13524_v58  ;;  %v13351_v45 = vrot.slane %v32256_v25, %v31019_v24  ;;  %v35206_v58 = vld [vmem:[#allocation74_spill] sm:$0xff] }
 0x972   : > { %v13528_v26 = vsel %vm12198_vm4, %v35196_v35, %v13527_v59  ;;  %25602 = vmatprep.mubr.msk.f32.mxu1 %vm627_vm0, %v13518_v57  ;;  %v35197_v52 = vrot.slane %v35142_v22, %v31019_v24  ;;  %v13375_v37 = vrot.slane %v35144_v19, %v31019_v24  ;;  %v35199_v11 = vrot.slane %v35146_v60, %v31019_v24  ;;  %v22439_v59 = vld [vmem:[%s34356_s10 + $0x18] sm:$0xff] }
 0x973   : > { %v13379_v36 = vrot.slane %v35139_v63, %v31019_v24  ;;  %v13383_v25 = vrot.slane %v32288_v40, %v31019_v24  ;;  %v35200_v22 = vrot.slane %v35149_v61, %v31019_v24  ;;  %25603 = vmatmul.mubr.msk.f32.vlgmr.msra.gmra.mrb[36].mxu1 %vm627_vm0, %v13525_v47  ;;  %v35201_v60 = vrot.slane %v35151_v42, %v31019_v24 }
 0x974   : > { %v13529_v30 = vsel %vm12200_vm5, %v35197_v52, %v13528_v26  ;;  %v13534_v43 = vsel %vm12196_vm3, %v35199_v11, %v35198_v29  ;;  %v13407_v63 = vrot.slane %v35153_v21, %v31019_v24  ;;  %v35203_v40 = vrot.slane %v35155_v14, %v31019_v24 }
 0x975   : > { %v13530_v48 = vsel %vm12202_vm6, %v13343_v53, %v13529_v30  ;;  %v13535_v44 = vsel %vm12198_vm4, %v35200_v22, %v13534_v43  ;;  %v13411_v28 = vrot.slane %v35148_v32, %v31019_v24  ;;  %v35204_v42 = vrot.slane %v35157_v50, %v31019_v24 }
 0x976   : > { %v13531_v19 = vsel %vm12204_vm7, %v13347_v6, %v13530_v48  ;;  %v13536_v20 = vsel %vm12200_vm5, %v35201_v60, %v13535_v44  ;;  %v13541_v61 = vsel %vm12196_vm3, %v35203_v40, %v35202_v9  ;;  %v13415_v14 = vrot.slane %v32313_v38, %v31019_v24  ;;  %v35210_v6 = vld [vmem:[#allocation81_spill] sm:$0xff]  ;;  %v22436_v40 = vld [vmem:[%s35219_s6] ss:$0 sm:$0xff] }
 0x977   : > { %v13532_v56 = vsel %vm12206_vm8, %v13351_v45, %v13531_v19  ;;  %v13537_v31 = vsel %vm12202_vm6, %v13375_v37, %v13536_v20  ;;  %v13542_v7 = vsel %vm12198_vm4, %v35204_v42, %v13541_v61  ;;  %v35205_v4 = vrot.slane %v35160_v62, %v31019_v24  ;;  %v13742_v20 = vld [vmem:[%s34356_s10] sm:$0xff] }
 0x978   : > { %25605 = vmatprep.mubr.msk.f32.mxu1 %vm627_vm0, %v13532_v56  ;;  %v13538_v21 = vsel %vm12204_vm7, %v13379_v36, %v13537_v31  ;;  %v13439_v32 = vrot.slane %v35162_v8, %v31019_v24  ;;  %v13443_v2 = vrot.slane %v35159_v1, %v31019_v24  ;;  %v35207_v53 = vrot.slane %v35164_v15, %v31019_v24  ;;  %v22438_v15 = vld [vmem:[%s34356_s10 + $0x10] sm:$0xff]  ;;  %v22437_v56 = vld [vmem:[%s35219_s6 + $0x1] ss:$0 sm:$0xff]  ;;  %s21240_s6 = scalar_lea.sflag [#allocation7], %s620_s28 }
 0x979   : > { %v13543_v5 = vsel %vm12200_vm5, %v35205_v4, %v13542_v7  ;;  %v13539_v33 = vsel %vm12206_vm8, %v13383_v25, %v13538_v21  ;;  %v13447_v8 = vrot.slane %v32346_v55, %v31019_v24  ;;  %v35208_v54 = vrot.slane %v35166_v46, %v31019_v24 }
 0x97a   : > { %v13544_v50 = vsel %vm12202_vm6, %v13407_v63, %v13543_v5  ;;  %v13548_v38 = vsel %vm12196_vm3, %v35207_v53, %v35206_v58  ;;  %25606 = vmatmul.mubr.msk.f32.gmra.mrb[38].mxu1 %vm627_vm0, %v13539_v33  ;;  %v13471_v1 = vrot.slane %v35174_v16, %v31019_v24  ;;  %v35209_v55 = vrot.slane %v35169_v49, %v31019_v24  ;;  %v13743_v63 = vld [vmem:[%s34356_s10 + $0x8] sm:$0xff]  ;;  %v22456_v58 = vld [vmem:[%s34356_s10 + $0x20] sm:$0xff] }
 0x97b   : > { %v13545_v62 = vsel %vm12204_vm7, %v13411_v28, %v13544_v50  ;;  %v13549_v0 = vsel %vm12198_vm4, %v35208_v54, %v13548_v38  ;;  %v13475_v47 = vrot.slane %v35168_v12, %v31019_v24  ;;  %v35211_v16 = vrot.slane %v35172_v27, %v31019_v24  ;;  %v22457_v53 = vld [vmem:[%s34356_s10 + $0x28] sm:$0xff] }
 0x97c   : > { %v13546_v57 = vsel %vm12206_vm8, %v13415_v14, %v13545_v62  ;;  %v13550_v46 = vsel %vm12200_vm5, %v35209_v55, %v13549_v0  ;;  %v13479_v45 = vrot.slane %v32377_v39, %v31019_v24  ;;  %v35212_v49 = vrot.slane %v35175_v41, %v31019_v24 }
 0x97d   : > { %v13555_v35 = vsel %vm12196_vm3, %v35211_v16, %v35210_v6  ;;  %25608 = vmatprep.mubr.msk.f32.mxu1 %vm627_vm0, %v13546_v57  ;;  %v13551_v26 = vsel %vm12202_vm6, %v13439_v32, %v13550_v46  ;;  %v13503_v12 = vrot.slane %v35181_v10, %v31019_v24  ;;  %v35213_v27 = vrot.slane %v35179_v13, %v31019_v24 }
 0x97e   : > { %v13556_v52 = vsel %vm12198_vm4, %v35212_v49, %v13555_v35  ;;  %v13552_v30 = vsel %vm12204_vm7, %v13443_v2, %v13551_v26  ;;  %v35214_v29 = vrot.slane %v31991_v51, %v31019_v24  ;;  %v26381_v11 = vpack.c.bf16 %v22439_v59, %v22438_v15 }
 0x97f   : > { %v13557_v37 = vsel %vm12200_vm5, %v35213_v27, %v13556_v52  ;;  %v13553_v41 = vsel %vm12206_vm8, %v13447_v8, %v13552_v30  ;;  %v35215_v10 = vrot.slane %v32004_v18, %v31019_v24  ;;  %v13507_v51 = vrot.slane %v35177_v34, %v31019_v24  ;;  %v35218_v34 = vld [vmem:[#allocation72_spill] sm:$0xff]  ;;  %v22467_v27 = vld [vmem:[%s34356_s10 + $0x38] sm:$0xff] }
 0x980   : > { %v13562_v39 = vsel %vm12196_vm3, %v35214_v29, %v32029_v17  ;;  %v13558_v43 = vsel %vm12202_vm6, %v13471_v1, %v13557_v37  ;;  %25609 = vmatmul.mubr.msk.f32.gmra.mrb[40].mxu1 %vm627_vm0, %v13553_v41  ;;  %v35216_v17 = vrot.slane %v35183_v23, %v31019_v24  ;;  %26382 = vmatprep.subr.bf16.mxu1 %v26381_v11  ;;  %v35217_v25 = vmov 0.0   ;;  %v22466_v30 = vld [vmem:[%s34356_s10 + $0x30] sm:$0xff] }
 0x981   : > { %v13563_v48 = vsel %vm12198_vm4, %v35215_v10, %v13562_v39  ;;  %v13559_v13 = vsel %vm12204_vm7, %v13475_v47, %v13558_v43  ;;  %689 = vst.msk [vmem:[#allocation3 + $0x20] sm:$0xff] %vm683_vm9, %v35217_v25  ;;  %684 = vst.msk [vmem:[#allocation3] sm:$0xff] %vm683_vm9, %v35217_v25  ;;  %v13511_v23 = vrot.slane %v35218_v34, %v31019_v24  ;;  %26384 = vmatpush3.bf16.msra.mxu1 %v26381_v11 }
 0x982   : > { %v13564_v36 = vsel %vm12200_vm5, %v35216_v17, %v13563_v48  ;;  %687 = vst.msk [vmem:[#allocation3 + $0x10] sm:$0xff] %vm683_vm9, %v35217_v25  ;;  %691 = vst.msk [vmem:[#allocation3 + $0x30] sm:$0xff] %vm683_vm9, %v35217_v25  ;;  %v13560_v18 = vsel %vm12206_vm8, %v13479_v45, %v13559_v13  ;;  %v26385_v9 = vpack.c.bf16 %v13743_v63, %v13742_v20  ;;  %v22477_v17 = vld [vmem:[%s34356_s10 + $0x48] sm:$0xff]  ;;  %v22486_v63 = vld [vmem:[%s34356_s10 + $0x50] sm:$0xff]  ;;  %26279 = vmatprep.mubr.msk.f32.mxu0 %vm27936_vm14, %v35217_v25 }
 0x983   : > { %693 = vst.msk [vmem:[#allocation3 + $0x40] sm:$0xff] %vm683_vm9, %v35217_v25  ;;  %695 = vst.msk [vmem:[#allocation3 + $0x50] sm:$0xff] %vm683_vm9, %v35217_v25  ;;  %v13565_v22 = vsel %vm12202_vm6, %v13503_v12, %v13564_v36  ;;  %25611 = vmatprep.mubr.msk.f32.mxu1 %vm627_vm0, %v13560_v18  ;;  %v26389_v0 = vpack.c.bf16 %v22457_v53, %v22456_v58  ;;  %v26393_v37 = vpack.c.bf16 %v22467_v27, %v22466_v30  ;;  %v22517_v58 = vld [vmem:[%s34356_s10 + $0x88] sm:$0xff] }
 0x984   : > { %697 = vst.msk [vmem:[#allocation3 + $0x60] sm:$0xff] %vm683_vm9, %v35217_v25  ;;  %699 = vst.msk [vmem:[#allocation3 + $0x70] sm:$0xff] %vm683_vm9, %v35217_v25  ;;  %v13566_v44 = vsel %vm12204_vm7, %v13507_v51, %v13565_v22  ;;  %26386 = vmatprep.subr.bf16.mxu1 %v26385_v9  ;;  %v22476_v51 = vld [vmem:[%s34356_s10 + $0x40] sm:$0xff] }
 0x985   : > { %701 = vst.msk [vmem:[#allocation3 + $0x80] sm:$0xff] %vm683_vm9, %v35217_v25  ;;  %703 = vst.msk [vmem:[#allocation3 + $0x90] sm:$0xff] %vm683_vm9, %v35217_v25  ;;  %v13567_v19 = vsel %vm12206_vm8, %v13511_v23, %v13566_v44  ;;  %v26397_v36 = vpack.c.bf16 %v22477_v17, %v22476_v51 }
 0x986   : > { %690 = vst.msk [vmem:[#allocation3 + $0x28] sm:$0x3] %vm685_vm10, %v35217_v25  ;;  %686 = vst.msk [vmem:[#allocation3 + $0x8] sm:$0x3] %vm685_vm10, %v35217_v25  ;;  %25612 = vmatmul.mubr.msk.f32.gmra.mrb[42].mxu1 %vm627_vm0, %v13567_v19  ;;  %vm21237_vm0 = vcmask 73728  }
 0x987   : > { %688 = vst.msk [vmem:[#allocation3 + $0x18] sm:$0x3] %vm685_vm10, %v35217_v25  ;;  %692 = vst.msk [vmem:[#allocation3 + $0x38] sm:$0x3] %vm685_vm10, %v35217_v25 }
 0x988   : > { %694 = vst.msk [vmem:[#allocation3 + $0x48] sm:$0x3] %vm685_vm10, %v35217_v25  ;;  %696 = vst.msk [vmem:[#allocation3 + $0x58] sm:$0x3] %vm685_vm10, %v35217_v25  ;;  %v32747_v52 = vld [vmem:[#allocation3] sm:$0xff] }
 0x989   : > { %698 = vst.msk [vmem:[#allocation3 + $0x68] sm:$0x3] %vm685_vm10, %v35217_v25  ;;  %700 = vst.msk [vmem:[#allocation3 + $0x78] sm:$0x3] %vm685_vm10, %v35217_v25 }
 0x98a   : > { %702 = vst.msk [vmem:[#allocation3 + $0x88] sm:$0x3] %vm685_vm10, %v35217_v25  ;;  %704 = vst.msk [vmem:[#allocation3 + $0x98] sm:$0x3] %vm685_vm10, %v35217_v25 }
 0x98b   : > { %708 = vst.msk [vmem:[#allocation4 + $0x10] sm:$0x3f] %vm705_vm11, %v35217_v25  ;;  %709 = vst.msk [vmem:[#allocation4 + $0x18] sm:$0x3f] %vm705_vm11, %v35217_v25 }
 0x98c   : > { %710 = vst.msk [vmem:[#allocation4 + $0x20] sm:$0x3f] %vm705_vm11, %v35217_v25  ;;  %706 = vst.msk [vmem:[#allocation4] sm:$0x3f] %vm705_vm11, %v35217_v25 }
 0x98d   : > { %v32669_v60 = vld [vmem:[#allocation3 + $0x1] sm:$0xff]  ;;  %707 = vst.msk [vmem:[#allocation4 + $0x8] sm:$0x3f] %vm705_vm11, %v35217_v25  ;;  %711 = vst.msk [vmem:[#allocation4 + $0x28] sm:$0x3f] %vm705_vm11, %v35217_v25 }
 0x98e   : > { %25618 = vmatprep.mubr.msk.f32.mxu1 %vm683_vm9, %v32669_v60  ;;  %v32782_v48 = vld [vmem:[#allocation3 + $0x2] sm:$0xff]  ;;  %713 = vst.msk [vmem:[#allocation5] sm:$0xf] %vm712_vm12, %v35217_v25  ;;  %714 = vst.msk [vmem:[#allocation5 + $0x4] sm:$0xf] %vm712_vm12, %v35217_v25 }
 0x98f   : > { %715 = vst.msk [vmem:[#allocation5 + $0x8] sm:$0xf] %vm712_vm12, %v35217_v25  ;;  %716 = vst.msk [vmem:[#allocation5 + $0xc] sm:$0xf] %vm712_vm12, %v35217_v25 }
 0xa46   : > { %v25604_v61 = vpop.f32.mrb[36].mxu1 }
 0xa47   : > { %v13703_v31 = vmul.f32 %v25604_v61, %v22436_v40  ;;  %v13650_v28 = vpop.f32.mrb[37].mxu1 }
 0xa48   : > { %v13702_v42 = vmul.f32 %v22436_v40, %v13650_v28 }
 0xa49   : > { %v32685_v7 = vadd.f32 %v22437_v56, %v13703_v31  ;;  %v22497_v31 = vld [vmem:[%s34356_s10 + $0x68] sm:$0xff] }
 0xa4a   : > { %v32687_v21 = vadd.f32 %v22437_v56, %v13702_v42 }
 0xa4b   : > { %13725 = vst.msk [vmem:[#allocation3 + $0x21] sm:$0xff] %vm683_vm9, %v32685_v7 }
 0xa4c   : > { %13724 = vst.msk [vmem:[#allocation3 + $0x11] sm:$0xff] %vm683_vm9, %v32687_v21 }
 0xa4d   : > { %v25607_v14 = vpop.f32.mrb[38].mxu1 }
 0xa4e   : > { %v13705_v4 = vmul.f32 %v25607_v14, %v22436_v40  ;;  %v13660_v5 = vpop.f32.mrb[39].mxu1  ;;  %v22506_v14 = vld [vmem:[%s34356_s10 + $0x70] sm:$0xff] }
 0xa4f   : > { %v13704_v32 = vmul.f32 %v22436_v40, %v13660_v5 }
 0xa50   : > { %v32693_v33 = vadd.f32 %v22437_v56, %v13705_v4  ;;  %v22507_v4 = vld [vmem:[%s34356_s10 + $0x78] sm:$0xff] }
 0xa51   : > { %v32695_v50 = vadd.f32 %v22437_v56, %v13704_v32  ;;  %v26409_v5 = vpack.c.bf16 %v22507_v4, %v22506_v14 }
 0xa52   : > { %13727 = vst.msk [vmem:[#allocation3 + $0x41] sm:$0xff] %vm683_vm9, %v32693_v33  ;;  %v32717_v46 = vld [vmem:[#allocation3 + $0x21] sm:$0xff] }
 0xa53   : > { %v25610_v2 = vpop.f32.mrb[40].mxu1  ;;  %13726 = vst.msk [vmem:[#allocation3 + $0x31] sm:$0xff] %vm683_vm9, %v32695_v50  ;;  %v32711_v59 = vld [vmem:[#allocation3 + $0x11] sm:$0xff]  ;;  %v32762_v39 = vld [vmem:[#allocation3 + $0x20] sm:$0xff] }
 0xa54   : > { %v13707_v38 = vmul.f32 %v25610_v2, %v22436_v40  ;;  %v13670_v62 = vpop.f32.mrb[41].mxu1  ;;  %25619 = vmatmul.mubr.msk.f32.vlgmr.msra.gmra.mrb[44].mxu1 %vm683_vm9, %v32711_v59  ;;  %v13735_v29 = vld [vmem:[#allocation3 + $0x10] sm:$0xff]  ;;  %v32797_v34 = vld [vmem:[#allocation3 + $0x22] sm:$0xff] }
 0xa55   : > { %v13706_v8 = vmul.f32 %v22436_v40, %v13670_v62  ;;  %26388 = vmatpush3.bf16.msra.mxu1 %v26385_v9  ;;  %25621 = vmatprep.mubr.msk.f32.mxu1 %vm683_vm9, %v32717_v46  ;;  %v14014_v18 = vld [vmem:[#allocation3 + $0x12] sm:$0xff]  ;;  %v22487_v9 = vld [vmem:[%s34356_s10 + $0x58] sm:$0xff] }
 0xa56   : > { %v32707_v54 = vadd.f32 %v22437_v56, %v13707_v38  ;;  %26390 = vmatprep.subr.bf16.mxu1 %v26389_v0  ;;  %v22516_v2 = vld [vmem:[%s34356_s10 + $0x80] sm:$0xff] }
 0xa57   : > { %v32709_v1 = vadd.f32 %v22437_v56, %v13706_v8  ;;  %v26413_v53 = vpack.c.bf16 %v22517_v58, %v22516_v2  ;;  %v32901_v38 = vld [vmem:[#allocation3 + $0x90] sm:$0xff]  ;;  %v22533_v8 = vld [vmem:[%s34356_s10 + $0xa8] sm:$0xff] }
 0xa58   : > { %13729 = vst.msk [vmem:[#allocation3 + $0x61] sm:$0xff] %vm683_vm9, %v32707_v54  ;;  %v22532_v62 = vld [vmem:[%s34356_s10 + $0xa0] sm:$0xff] }
 0xa59   : > { %v25613_v15 = vpop.f32.mrb[42].mxu1  ;;  %13728 = vst.msk [vmem:[#allocation3 + $0x51] sm:$0xff] %vm683_vm9, %v32709_v1  ;;  %v32733_v26 = vld [vmem:[#allocation3 + $0x41] sm:$0xff] }
 0xa5a   : > { %v13709_v57 = vmul.f32 %v25613_v15, %v22436_v40  ;;  %v13680_v55 = vpop.f32.mrb[43].mxu1  ;;  %v32727_v35 = vld [vmem:[#allocation3 + $0x31] sm:$0xff]  ;;  %v32770_v41 = vld [vmem:[#allocation3 + $0x40] sm:$0xff] }
 0xa5b   : > { %v13708_v47 = vmul.f32 %v22436_v40, %v13680_v55  ;;  %25622 = vmatmul.mubr.msk.f32.gmra.mrb[46].mxu1 %vm683_vm9, %v32727_v35  ;;  %v32766_v11 = vld [vmem:[#allocation3 + $0x30] sm:$0xff]  ;;  %v32805_v22 = vld [vmem:[#allocation3 + $0x42] sm:$0xff]  ;;  %v26401_v40 = vpack.c.bf16 %v22487_v9, %v22486_v63 }
 0xa5c   : > { %v32723_v6 = vadd.f32 %v22437_v56, %v13709_v57  ;;  %25624 = vmatprep.mubr.msk.f32.mxu1 %vm683_vm9, %v32733_v26  ;;  %v32801_v23 = vld [vmem:[#allocation3 + $0x32] sm:$0xff]  ;;  %v22530_v57 = vld [vmem:[%s34356_s10 + $0x90] sm:$0xff]  ;;  %v22531_v55 = vld [vmem:[%s34356_s10 + $0x98] sm:$0xff] }
 0xa5d   : > { %v32725_v16 = vadd.f32 %v22437_v56, %v13708_v47  ;;  %v22496_v56 = vld [vmem:[%s34356_s10 + $0x60] sm:$0xff] }
 0xa5e   : > { %13731 = vst.msk [vmem:[#allocation3 + $0x81] sm:$0xff] %vm683_vm9, %v32723_v6  ;;  %v26405_v28 = vpack.c.bf16 %v22497_v31, %v22496_v56  ;;  %v32924_v15 = vld [vmem:[#allocation3 + $0x91] sm:$0xff]  ;;  %v22526_v47 = vld [vmem:[%s34360_s14] ss:$0 sm:$0xff] }
 0xa5f   : > { %13730 = vst.msk [vmem:[#allocation3 + $0x71] sm:$0xff] %vm683_vm9, %v32725_v16  ;;  %v32743_v49 = vld [vmem:[#allocation3 + $0x61] sm:$0xff] }
 0xa60   : > { %v32739_v45 = vld [vmem:[#allocation3 + $0x51] sm:$0xff]  ;;  %v32778_v10 = vld [vmem:[#allocation3 + $0x60] sm:$0xff] }
 0xa61   : > { %25625 = vmatmul.mubr.msk.f32.gmra.mrb[48].mxu1 %vm683_vm9, %v32739_v45  ;;  %v32774_v43 = vld [vmem:[#allocation3 + $0x50] sm:$0xff]  ;;  %v32813_v19 = vld [vmem:[#allocation3 + $0x62] sm:$0xff] }
 0xa62   : > { %25627 = vmatprep.mubr.msk.f32.mxu1 %vm683_vm9, %v32743_v49  ;;  %v32809_v44 = vld [vmem:[#allocation3 + $0x52] sm:$0xff] }
 0xa65   : > { %v14168_v61 = vld [vmem:[#allocation3 + $0x80] sm:$0xff] }
 0xa66   : > { %v32749_v12 = vld [vmem:[#allocation3 + $0x71] sm:$0xff]  ;;  %v14316_v42 = vld [vmem:[#allocation3 + $0x81] sm:$0xff] }
 0xa67   : > { %25628 = vmatmul.mubr.msk.f32.gmra.mrb[50].mxu1 %vm683_vm9, %v32749_v12  ;;  %v32784_v13 = vld [vmem:[#allocation3 + $0x70] sm:$0xff]  ;;  %v14464_v32 = vld [vmem:[#allocation3 + $0x82] sm:$0xff] }
 0xa68   : > { %25634 = vmatprep.mubr.msk.f32.mxu1 %vm683_vm9, %v32747_v52  ;;  %v32817_v20 = vld [vmem:[#allocation3 + $0x72] sm:$0xff] }
 0xa6b   : > { %25635 = vmatmul.mubr.msk.f32.vlgmr.msra.gmra.mrb[44].mxu1 %vm683_vm9, %v13735_v29 }
 0xa6c   : > { %26392 = vmatpush3.bf16.msra.mxu1 %v26389_v0  ;;  %25637 = vmatprep.mubr.msk.f32.mxu1 %vm683_vm9, %v32762_v39  ;;  %v26417_v0 = vpack.c.bf16 %v22533_v8, %v22532_v62 }
 0xa6d   : > { %26394 = vmatprep.subr.bf16.mxu1 %v26393_v37 }
 0xa6f   : > { %25638 = vmatmul.mubr.msk.f32.gmra.mrb[46].mxu1 %vm683_vm9, %v32766_v11 }
 0xa70   : > { %25640 = vmatprep.mubr.msk.f32.mxu1 %vm683_vm9, %v32770_v41 }
 0xa73   : > { %25641 = vmatmul.mubr.msk.f32.gmra.mrb[48].mxu1 %vm683_vm9, %v32774_v43 }
 0xa74   : > { %25643 = vmatprep.mubr.msk.f32.mxu1 %vm683_vm9, %v32778_v10 }
 0xa77   : > { %25644 = vmatmul.mubr.msk.f32.gmra.mrb[50].mxu1 %vm683_vm9, %v32784_v13 }
 0xa78   : > { %25650 = vmatprep.mubr.msk.f32.mxu1 %vm683_vm9, %v32782_v48 }
 0xa7b   : > { %25651 = vmatmul.mubr.msk.f32.vlgmr.msra.gmra.mrb[44].mxu1 %vm683_vm9, %v14014_v18 }
 0xa7c   : > { %26396 = vmatpush3.bf16.msra.mxu1 %v26393_v37  ;;  %25653 = vmatprep.mubr.msk.f32.mxu1 %vm683_vm9, %v32797_v34 }
 0xa7d   : > { %26398 = vmatprep.subr.bf16.mxu1 %v26397_v36 }
 0xa7f   : > { %25654 = vmatmul.mubr.msk.f32.gmra.mrb[46].mxu1 %vm683_vm9, %v32801_v23 }
 0xa80   : > { %25656 = vmatprep.mubr.msk.f32.mxu1 %vm683_vm9, %v32805_v22 }
 0xa83   : > { %25657 = vmatmul.mubr.msk.f32.gmra.mrb[48].mxu1 %vm683_vm9, %v32809_v44 }
 0xa84   : > { %25659 = vmatprep.mubr.msk.f32.mxu1 %vm683_vm9, %v32813_v19 }
 0xa87   : > { %25660 = vmatmul.mubr.msk.f32.gmra.mrb[50].mxu1 %vm683_vm9, %v32817_v20 }
 0xa88   : > { %25666 = vmatprep.mubr.msk.f32.mxu1 %vm683_vm9, %v13735_v29 }
 0xa8b   : > { %25667 = vmatmul.mubr.msk.f32.vlgmr.msra.gmra.mrb[44].mxu1 %vm683_vm9, %v32762_v39 }
 0xa8c   : > { %26400 = vmatpush3.bf16.msra.mxu1 %v26397_v36  ;;  %25669 = vmatprep.mubr.msk.f32.mxu1 %vm683_vm9, %v32766_v11 }
 0xa8d   : > { %26402 = vmatprep.subr.bf16.mxu1 %v26401_v40 }
 0xa8f   : > { %25670 = vmatmul.mubr.msk.f32.gmra.mrb[46].mxu1 %vm683_vm9, %v32770_v41 }
 0xa90   : > { %25672 = vmatprep.mubr.msk.f32.mxu1 %vm683_vm9, %v32774_v43 }
 0xa93   : > { %25673 = vmatmul.mubr.msk.f32.gmra.mrb[48].mxu1 %vm683_vm9, %v32778_v10 }
 0xa94   : > { %25675 = vmatprep.mubr.msk.f32.mxu1 %vm683_vm9, %v32784_v13 }
 0xa97   : > { %25676 = vmatmul.mubr.msk.f32.gmra.mrb[50].mxu1 %vm683_vm9, %v14168_v61 }
 0xa98   : > { %25682 = vmatprep.mubr.msk.f32.mxu1 %vm683_vm9, %v32711_v59  ;;  %v32941_v59 = vld [vmem:[#allocation3 + $0x92] sm:$0xff] }
 0xa9b   : > { %25683 = vmatmul.mubr.msk.f32.vlgmr.msra.gmra.mrb[44].mxu1 %vm683_vm9, %v32717_v46 }
 0xa9c   : > { %26404 = vmatpush3.bf16.msra.mxu1 %v26401_v40  ;;  %25685 = vmatprep.mubr.msk.f32.mxu1 %vm683_vm9, %v32727_v35 }
 0xa9d   : > { %26406 = vmatprep.subr.bf16.mxu1 %v26405_v28 }
 0xa9f   : > { %25686 = vmatmul.mubr.msk.f32.gmra.mrb[46].mxu1 %vm683_vm9, %v32733_v26 }
 0xaa0   : > { %25688 = vmatprep.mubr.msk.f32.mxu1 %vm683_vm9, %v32739_v45 }
 0xaa3   : > { %25689 = vmatmul.mubr.msk.f32.gmra.mrb[48].mxu1 %vm683_vm9, %v32743_v49 }
 0xaa4   : > { %25691 = vmatprep.mubr.msk.f32.mxu1 %vm683_vm9, %v32749_v12 }
 0xaa7   : > { %25692 = vmatmul.mubr.msk.f32.gmra.mrb[50].mxu1 %vm683_vm9, %v14316_v42 }
 0xaa8   : > { %25698 = vmatprep.mubr.msk.f32.mxu1 %vm683_vm9, %v14014_v18 }
 0xaab   : > { %25699 = vmatmul.mubr.msk.f32.vlgmr.msra.gmra.mrb[44].mxu1 %vm683_vm9, %v32797_v34 }
 0xaac   : > { %26408 = vmatpush3.bf16.msra.mxu1 %v26405_v28  ;;  %25701 = vmatprep.mubr.msk.f32.mxu1 %vm683_vm9, %v32801_v23 }
 0xaad   : > { %26410 = vmatprep.subr.bf16.mxu1 %v26409_v5 }
 0xaaf   : > { %25702 = vmatmul.mubr.msk.f32.gmra.mrb[46].mxu1 %vm683_vm9, %v32805_v22 }
 0xab0   : > { %25704 = vmatprep.mubr.msk.f32.mxu1 %vm683_vm9, %v32809_v44 }
 0xab3   : > { %25705 = vmatmul.mubr.msk.f32.gmra.mrb[48].mxu1 %vm683_vm9, %v32813_v19 }
 0xab4   : > { %25707 = vmatprep.mubr.msk.f32.mxu1 %vm683_vm9, %v32817_v20 }
 0xab7   : > { %25708 = vmatmul.mubr.msk.f32.gmra.mrb[50].mxu1 %vm683_vm9, %v14464_v32 }
 0xab8   : > { %25714 = vmatprep.mubr.msk.f32.mxu1 %vm683_vm9, %v32762_v39 }
 0xabb   : > { %25715 = vmatmul.mubr.msk.f32.vlgmr.msra.gmra.mrb[44].mxu1 %vm683_vm9, %v32766_v11 }
 0xabc   : > { %26412 = vmatpush3.bf16.msra.mxu1 %v26409_v5  ;;  %25717 = vmatprep.mubr.msk.f32.mxu1 %vm683_vm9, %v32770_v41 }
 0xabd   : > { %26414 = vmatprep.subr.bf16.mxu1 %v26413_v53 }
 0xabf   : > { %25718 = vmatmul.mubr.msk.f32.gmra.mrb[46].mxu1 %vm683_vm9, %v32774_v43 }
 0xac0   : > { %25720 = vmatprep.mubr.msk.f32.mxu1 %vm683_vm9, %v32778_v10 }
 0xac3   : > { %25721 = vmatmul.mubr.msk.f32.gmra.mrb[48].mxu1 %vm683_vm9, %v32784_v13 }
 0xac4   : > { %25723 = vmatprep.mubr.msk.f32.mxu1 %vm683_vm9, %v14168_v61 }
 0xac7   : > { %25724 = vmatmul.mubr.msk.f32.gmra.mrb[50].mxu1 %vm683_vm9, %v32901_v38 }
 0xac8   : > { %25730 = vmatprep.mubr.msk.f32.mxu1 %vm683_vm9, %v32717_v46  ;;  %v26421_v46 = vpack.c.bf16 %v22531_v55, %v22530_v57  ;;  %v22561_v57 = vld [vmem:[%s34356_s10 + $0xc8] sm:$0xff] }
 0xacb   : > { %25731 = vmatmul.mubr.msk.f32.vlgmr.msra.gmra.mrb[44].mxu1 %vm683_vm9, %v32727_v35  ;;  %v22527_v35 = vld [vmem:[%s34360_s14 + $0x1] ss:$0 sm:$0xff] }
 0xacc   : > { %26416 = vmatpush3.bf16.msra.mxu1 %v26413_v53  ;;  %25733 = vmatprep.mubr.msk.f32.mxu1 %vm683_vm9, %v32733_v26 }
 0xacd   : > { %26418 = vmatprep.subr.bf16.mxu1 %v26417_v0 }
 0xacf   : > { %25734 = vmatmul.mubr.msk.f32.gmra.mrb[46].mxu1 %vm683_vm9, %v32739_v45 }
 0xad0   : > { %25736 = vmatprep.mubr.msk.f32.mxu1 %vm683_vm9, %v32743_v49 }
 0xad3   : > { %25737 = vmatmul.mubr.msk.f32.gmra.mrb[48].mxu1 %vm683_vm9, %v32749_v12 }
 0xad4   : > { %25739 = vmatprep.mubr.msk.f32.mxu1 %vm683_vm9, %v14316_v42 }
 0xad7   : > { %25740 = vmatmul.mubr.msk.f32.gmra.mrb[50].mxu1 %vm683_vm9, %v32924_v15 }
 0xad8   : > { %25746 = vmatprep.mubr.msk.f32.mxu1 %vm683_vm9, %v32797_v34 }
 0xadb   : > { %25747 = vmatmul.mubr.msk.f32.vlgmr.msra.gmra.mrb[44].mxu1 %vm683_vm9, %v32801_v23 }
 0xadc   : > { %25749 = vmatprep.mubr.msk.f32.mxu1 %vm683_vm9, %v32805_v22  ;;  %26420 = vmatpush3.bf16.msra.mxu1 %v26417_v0  ;;  %v22550_v22 = vld [vmem:[%s34356_s10 + $0xb0] sm:$0xff]  ;;  %v22560_v0 = vld [vmem:[%s34356_s10 + $0xc0] sm:$0xff] }
 0xadd   : > { %26422 = vmatprep.subr.bf16.mxu1 %v26421_v46  ;;  %v26429_v55 = vpack.c.bf16 %v22561_v57, %v22560_v0  ;;  %v22628_v0 = vld [vmem:[%s35220_s27 + $0x20] sm:$0xff]  ;;  %v22629_v57 = vld [vmem:[%s35220_s27 + $0x28] sm:$0xff] }
 0xadf   : > { %25750 = vmatmul.mubr.msk.f32.gmra.mrb[46].mxu1 %vm683_vm9, %v32809_v44  ;;  %v22551_v44 = vld [vmem:[%s34356_s10 + $0xb8] sm:$0xff] }
 0xae0   : > { %25752 = vmatprep.mubr.msk.f32.mxu1 %vm683_vm9, %v32813_v19  ;;  %v26425_v31 = vpack.c.bf16 %v22551_v44, %v22550_v22  ;;  %v22601_v22 = vld [vmem:[%s34356_s10 + $0x108] sm:$0xff] }
 0xae3   : > { %25753 = vmatmul.mubr.msk.f32.gmra.mrb[48].mxu1 %vm683_vm9, %v32817_v20 }
 0xae4   : > { %25755 = vmatprep.mubr.msk.f32.mxu1 %vm683_vm9, %v14464_v32 }
 0xae7   : > { %25756 = vmatmul.mubr.msk.f32.gmra.mrb[50].mxu1 %vm683_vm9, %v32941_v59 }
 0xae8   : > { %25762 = vmatprep.mubr.msk.f32.mxu1 %vm683_vm9, %v32669_v60 }
 0xbae   : > { %v25748_v26 = vpop.f32.mrb[44].mxu1 }
 0xbaf   : > { %v15055_v60 = vmul.f32 %v25748_v26, %v22526_v47  ;;  %v15003_v45 = vpop.f32.mrb[45].mxu1 }
 0xbb0   : > { %v15054_v49 = vmul.f32 %v22526_v47, %v15003_v45 }
 0xbb1   : > { %v15067_v12 = vadd.f32 %v22527_v35, %v15055_v60 }
 0xbb2   : > { %v15066_v30 = vadd.f32 %v22527_v35, %v15054_v49  ;;  %v25751_v27 = vpop.f32.mrb[46].mxu1  ;;  %v22570_v49 = vld [vmem:[%s34356_s10 + $0xd0] sm:$0xff] }
 0xbb3   : > { %v15075_v37 = vmax.f32 %v15067_v12, 0.0  ;;  %v15057_v29 = vmul.f32 %v25751_v27, %v22526_v47  ;;  %v15013_v39 = vpop.f32.mrb[47].mxu1  ;;  %v22571_v12 = vld [vmem:[%s34356_s10 + $0xd8] sm:$0xff] }
 0xbb4   : > { %v15074_v11 = vmax.f32 %v15066_v30, 0.0  ;;  %v15056_v41 = vmul.f32 %v22526_v47, %v15013_v39  ;;  %v26433_v30 = vpack.c.bf16 %v22571_v12, %v22570_v49  ;;  %v33240_v12 = vpack.c.bf16 %v22629_v57, %v22628_v0 }
 0xbb5   : > { %15083 = vst.msk [vmem:[#allocation3 + $0x21] sm:$0xff] %vm683_vm9, %v15075_v37  ;;  %v15069_v43 = vadd.f32 %v22527_v35, %v15057_v29 }
 0xbb6   : > { %15082 = vst.msk [vmem:[#allocation3 + $0x11] sm:$0xff] %vm683_vm9, %v15074_v11  ;;  %v15068_v10 = vadd.f32 %v22527_v35, %v15056_v41  ;;  %v25754_v13 = vpop.f32.mrb[48].mxu1 }
 0xbb7   : > { %v15077_v51 = vmax.f32 %v15069_v43, 0.0  ;;  %v15059_v17 = vmul.f32 %v25754_v13, %v22526_v47  ;;  %v15023_v36 = vpop.f32.mrb[49].mxu1  ;;  %v22580_v43 = vld [vmem:[%s34356_s10 + $0xe0] sm:$0xff] }
 0xbb8   : > { %v15076_v18 = vmax.f32 %v15068_v10, 0.0  ;;  %v15058_v34 = vmul.f32 %v22526_v47, %v15023_v36  ;;  %v22581_v10 = vld [vmem:[%s34356_s10 + $0xe8] sm:$0xff]  ;;  %v22591_v36 = vld [vmem:[%s34356_s10 + $0xf8] sm:$0xff] }
 0xbb9   : > { %15085 = vst.msk [vmem:[#allocation3 + $0x41] sm:$0xff] %vm683_vm9, %v15077_v51  ;;  %v15071_v23 = vadd.f32 %v22527_v35, %v15059_v17  ;;  %v26437_v13 = vpack.c.bf16 %v22581_v10, %v22580_v43  ;;  %v22590_v17 = vld [vmem:[%s34356_s10 + $0xf0] sm:$0xff] }
 0xbba   : > { %15084 = vst.msk [vmem:[#allocation3 + $0x31] sm:$0xff] %vm683_vm9, %v15076_v18  ;;  %v15070_v19 = vadd.f32 %v22527_v35, %v15058_v34  ;;  %v25757_v20 = vpop.f32.mrb[50].mxu1  ;;  %v26441_v18 = vpack.c.bf16 %v22591_v36, %v22590_v17 }
 0xbbb   : > { %v15079_v63 = vmax.f32 %v15071_v23, 0.0  ;;  %v15061_v9 = vmul.f32 %v25757_v20, %v22526_v47  ;;  %v15033_v40 = vpop.f32.mrb[51].mxu1  ;;  %v22600_v23 = vld [vmem:[%s34356_s10 + $0x100] sm:$0xff]  ;;  %v22610_v20 = vld [vmem:[%s34356_s10 + $0x110] sm:$0xff] }
 0xbbc   : > { %v15078_v61 = vmax.f32 %v15070_v19, 0.0  ;;  %v15060_v56 = vmul.f32 %v22526_v47, %v15033_v40  ;;  %v32975_v4 = vld [vmem:[#allocation3 + $0x21] sm:$0xff]  ;;  %v26445_v44 = vpack.c.bf16 %v22601_v22, %v22600_v23 }
 0xbbd   : > { %15087 = vst.msk [vmem:[#allocation3 + $0x61] sm:$0xff] %vm683_vm9, %v15079_v63  ;;  %v15073_v28 = vadd.f32 %v22527_v35, %v15061_v9  ;;  %v32970_v42 = vld [vmem:[#allocation3 + $0x11] sm:$0xff]  ;;  %v33010_v47 = vld [vmem:[#allocation3 + $0x20] sm:$0xff]  ;;  %v22611_v63 = vld [vmem:[%s34356_s10 + $0x118] sm:$0xff] }
 0xbbe   : > { %15086 = vst.msk [vmem:[#allocation3 + $0x51] sm:$0xff] %vm683_vm9, %v15078_v61  ;;  %v15072_v14 = vadd.f32 %v22527_v35, %v15060_v56  ;;  %25763 = vmatmul.mubr.msk.f32.vlgmr.msra.gmra.mrb[52].mxu1 %vm683_vm9, %v32970_v42  ;;  %v15374_v27 = vld [vmem:[#allocation3 + $0x12] sm:$0xff]  ;;  %v33043_v37 = vld [vmem:[#allocation3 + $0x22] sm:$0xff]  ;;  %v26449_v9 = vpack.c.bf16 %v22611_v63, %v22610_v20 }
 0xbbf   : > { %v15081_v5 = vmax.f32 %v15073_v28, 0.0  ;;  %26424 = vmatpush3.bf16.msra.mxu1 %v26421_v46  ;;  %25765 = vmatprep.mubr.msk.f32.mxu1 %vm683_vm9, %v32975_v4  ;;  %v15094_v46 = vld [vmem:[#allocation3 + $0x10] sm:$0xff]  ;;  %v16594_v56 = vld [vmem:[%s35220_s27 + $0x8] sm:$0xff] }
 0xbc0   : > { %v15080_v32 = vmax.f32 %v15072_v14, 0.0  ;;  %26426 = vmatprep.subr.bf16.mxu1 %v26425_v31  ;;  %v32985_v58 = vld [vmem:[#allocation3 + $0x41] sm:$0xff]  ;;  %v16593_v61 = vld [vmem:[%s35220_s27] sm:$0xff] }
 0xbc1   : > { %15089 = vst.msk [vmem:[#allocation3 + $0x81] sm:$0xff] %vm683_vm9, %v15081_v5  ;;  %v32980_v2 = vld [vmem:[#allocation3 + $0x31] sm:$0xff]  ;;  %v33018_v26 = vld [vmem:[#allocation3 + $0x40] sm:$0xff] }
 0xbc2   : > { %15088 = vst.msk [vmem:[#allocation3 + $0x71] sm:$0xff] %vm683_vm9, %v15080_v32  ;;  %25766 = vmatmul.mubr.msk.f32.gmra.mrb[54].mxu1 %vm683_vm9, %v32980_v2  ;;  %v33014_v35 = vld [vmem:[#allocation3 + $0x30] sm:$0xff]  ;;  %v33051_v39 = vld [vmem:[#allocation3 + $0x42] sm:$0xff] }
 0xbc3   : > { %25768 = vmatprep.mubr.msk.f32.mxu1 %vm683_vm9, %v32985_v58  ;;  %v33047_v29 = vld [vmem:[#allocation3 + $0x32] sm:$0xff] }
 0xbc4   : > { %v32993_v62 = vld [vmem:[#allocation3 + $0x61] sm:$0xff]  ;;  %v33216_v28 = vld [vmem:[%s34360_s14 + $0x3] ss:$0 sm:$0xff] }
 0xbc5   : > { %v32989_v53 = vld [vmem:[#allocation3 + $0x51] sm:$0xff]  ;;  %v33026_v60 = vld [vmem:[#allocation3 + $0x60] sm:$0xff] }
 0xbc6   : > { %25769 = vmatmul.mubr.msk.f32.gmra.mrb[56].mxu1 %vm683_vm9, %v32989_v53  ;;  %v33059_v11 = vld [vmem:[#allocation3 + $0x62] sm:$0xff] }
 0xbc7   : > { %25771 = vmatprep.mubr.msk.f32.mxu1 %vm683_vm9, %v32993_v62 }
 0xbc8   : > { %v15528_v51 = vld [vmem:[#allocation3 + $0x80] sm:$0xff] }
 0xbc9   : > { %v32997_v8 = vld [vmem:[#allocation3 + $0x71] sm:$0xff]  ;;  %v15676_v34 = vld [vmem:[#allocation3 + $0x81] sm:$0xff] }
 0xbca   : > { %25772 = vmatmul.mubr.msk.f32.gmra.mrb[58].mxu1 %vm683_vm9, %v32997_v8  ;;  %v33030_v45 = vld [vmem:[#allocation3 + $0x70] sm:$0xff]  ;;  %v15824_v19 = vld [vmem:[#allocation3 + $0x82] sm:$0xff] }
 0xbcb   : > { %25778 = vmatprep.mubr.msk.f32.mxu1 %vm683_vm9, %v32747_v52  ;;  %v33022_v52 = vld [vmem:[#allocation3 + $0x50] sm:$0xff] }
 0xbcc   : > { %v33063_v41 = vld [vmem:[#allocation3 + $0x72] sm:$0xff] }
 0xbce   : > { %25779 = vmatmul.mubr.msk.f32.vlgmr.msra.gmra.mrb[52].mxu1 %vm683_vm9, %v15094_v46 }
 0xbcf   : > { %26428 = vmatpush3.bf16.msra.mxu1 %v26425_v31  ;;  %25781 = vmatprep.mubr.msk.f32.mxu1 %vm683_vm9, %v33010_v47  ;;  %v33211_v31 = vld [vmem:[%s34360_s14 + $0x2] ss:$0 sm:$0xff] }
 0xbd0   : > { %26430 = vmatprep.subr.bf16.mxu1 %v26429_v55 }
 0xbd2   : > { %25782 = vmatmul.mubr.msk.f32.gmra.mrb[54].mxu1 %vm683_vm9, %v33014_v35 }
 0xbd3   : > { %25784 = vmatprep.mubr.msk.f32.mxu1 %vm683_vm9, %v33018_v26 }
 0xbd6   : > { %25785 = vmatmul.mubr.msk.f32.gmra.mrb[56].mxu1 %vm683_vm9, %v33022_v52 }
 0xbd7   : > { %25787 = vmatprep.mubr.msk.f32.mxu1 %vm683_vm9, %v33026_v60 }
 0xbda   : > { %25788 = vmatmul.mubr.msk.f32.gmra.mrb[58].mxu1 %vm683_vm9, %v33030_v45 }
 0xbdb   : > { %25794 = vmatprep.mubr.msk.f32.mxu1 %vm683_vm9, %v32782_v48  ;;  %v33055_v48 = vld [vmem:[#allocation3 + $0x52] sm:$0xff] }
 0xbde   : > { %25795 = vmatmul.mubr.msk.f32.vlgmr.msra.gmra.mrb[52].mxu1 %vm683_vm9, %v15374_v27 }
 0xbdf   : > { %26432 = vmatpush3.bf16.msra.mxu1 %v26429_v55  ;;  %25797 = vmatprep.mubr.msk.f32.mxu1 %vm683_vm9, %v33043_v37 }
 0xbe0   : > { %26434 = vmatprep.subr.bf16.mxu1 %v26433_v30 }
 0xbe2   : > { %25798 = vmatmul.mubr.msk.f32.gmra.mrb[54].mxu1 %vm683_vm9, %v33047_v29 }
 0xbe3   : > { %25800 = vmatprep.mubr.msk.f32.mxu1 %vm683_vm9, %v33051_v39 }
 0xbe6   : > { %25801 = vmatmul.mubr.msk.f32.gmra.mrb[56].mxu1 %vm683_vm9, %v33055_v48 }
 0xbe7   : > { %25803 = vmatprep.mubr.msk.f32.mxu1 %vm683_vm9, %v33059_v11 }
 0xbea   : > { %25804 = vmatmul.mubr.msk.f32.gmra.mrb[58].mxu1 %vm683_vm9, %v33063_v41 }
 0xbeb   : > { %25810 = vmatprep.mubr.msk.f32.mxu1 %vm683_vm9, %v15094_v46 }
 0xbee   : > { %25811 = vmatmul.mubr.msk.f32.vlgmr.msra.gmra.mrb[52].mxu1 %vm683_vm9, %v33010_v47 }
 0xbef   : > { %26436 = vmatpush3.bf16.msra.mxu1 %v26433_v30  ;;  %25813 = vmatprep.mubr.msk.f32.mxu1 %vm683_vm9, %v33014_v35 }
 0xbf0   : > { %26438 = vmatprep.subr.bf16.mxu1 %v26437_v13 }
 0xbf2   : > { %25814 = vmatmul.mubr.msk.f32.gmra.mrb[54].mxu1 %vm683_vm9, %v33018_v26 }
 0xbf3   : > { %25816 = vmatprep.mubr.msk.f32.mxu1 %vm683_vm9, %v33022_v52 }
 0xbf6   : > { %25817 = vmatmul.mubr.msk.f32.gmra.mrb[56].mxu1 %vm683_vm9, %v33026_v60 }
 0xbf7   : > { %25819 = vmatprep.mubr.msk.f32.mxu1 %vm683_vm9, %v33030_v45 }
 0xbfa   : > { %25820 = vmatmul.mubr.msk.f32.gmra.mrb[58].mxu1 %vm683_vm9, %v15528_v51 }
 0xbfb   : > { %25826 = vmatprep.mubr.msk.f32.mxu1 %vm683_vm9, %v32970_v42 }
 0xbfe   : > { %25827 = vmatmul.mubr.msk.f32.vlgmr.msra.gmra.mrb[52].mxu1 %vm683_vm9, %v32975_v4 }
 0xbff   : > { %26440 = vmatpush3.bf16.msra.mxu1 %v26437_v13  ;;  %25829 = vmatprep.mubr.msk.f32.mxu1 %vm683_vm9, %v32980_v2 }
 0xc00   : > { %26442 = vmatprep.subr.bf16.mxu1 %v26441_v18 }
 0xc02   : > { %25830 = vmatmul.mubr.msk.f32.gmra.mrb[54].mxu1 %vm683_vm9, %v32985_v58 }
 0xc03   : > { %25832 = vmatprep.mubr.msk.f32.mxu1 %vm683_vm9, %v32989_v53 }
 0xc06   : > { %25833 = vmatmul.mubr.msk.f32.gmra.mrb[56].mxu1 %vm683_vm9, %v32993_v62 }
 0xc07   : > { %25835 = vmatprep.mubr.msk.f32.mxu1 %vm683_vm9, %v32997_v8 }
 0xc0a   : > { %25836 = vmatmul.mubr.msk.f32.gmra.mrb[58].mxu1 %vm683_vm9, %v15676_v34 }
 0xc0b   : > { %25842 = vmatprep.mubr.msk.f32.mxu1 %vm683_vm9, %v15374_v27  ;;  %v35221_v27 = vld [vmem:[#allocation33_spill] sm:$0xff] }
 0xc0e   : > { %25843 = vmatmul.mubr.msk.f32.vlgmr.msra.gmra.mrb[52].mxu1 %vm683_vm9, %v33043_v37 }
 0xc0f   : > { %26444 = vmatpush3.bf16.msra.mxu1 %v26441_v18  ;;  %25845 = vmatprep.mubr.msk.f32.mxu1 %vm683_vm9, %v33047_v29 }
 0xc10   : > { %26446 = vmatprep.subr.bf16.mxu1 %v26445_v44 }
 0xc12   : > { %25846 = vmatmul.mubr.msk.f32.gmra.mrb[54].mxu1 %vm683_vm9, %v33051_v39 }
 0xc13   : > { %25848 = vmatprep.mubr.msk.f32.mxu1 %vm683_vm9, %v33055_v48 }
 0xc16   : > { %25849 = vmatmul.mubr.msk.f32.gmra.mrb[56].mxu1 %vm683_vm9, %v33059_v11 }
 0xc17   : > { %25851 = vmatprep.mubr.msk.f32.mxu1 %vm683_vm9, %v33063_v41 }
 0xc1a   : > { %25852 = vmatmul.mubr.msk.f32.gmra.mrb[58].mxu1 %vm683_vm9, %v15824_v19 }
 0xc1b   : > { %25858 = vmatprep.mubr.msk.f32.mxu1 %vm683_vm9, %v33010_v47  ;;  %v22632_v47 = vld [vmem:[%s35220_s27 + $0x30] sm:$0xff] }
 0xc1e   : > { %25859 = vmatmul.mubr.msk.f32.vlgmr.msra.gmra.mrb[52].mxu1 %vm683_vm9, %v33014_v35  ;;  %v22633_v35 = vld [vmem:[%s35220_s27 + $0x38] sm:$0xff] }
 0xc1f   : > { %26448 = vmatpush3.bf16.msra.mxu1 %v26445_v44  ;;  %25861 = vmatprep.mubr.msk.f32.mxu1 %vm683_vm9, %v33018_v26 }
 0xc20   : > { %26450 = vmatprep.subr.bf16.mxu1 %v26449_v9 }
 0xc22   : > { %25862 = vmatmul.mubr.msk.f32.gmra.mrb[54].mxu1 %vm683_vm9, %v33022_v52 }
 0xc23   : > { %25864 = vmatprep.mubr.msk.f32.mxu1 %vm683_vm9, %v33026_v60 }
 0xc26   : > { %25865 = vmatmul.mubr.msk.f32.gmra.mrb[56].mxu1 %vm683_vm9, %v33030_v45 }
 0xc27   : > { %25867 = vmatprep.mubr.msk.f32.mxu1 %vm683_vm9, %v15528_v51 }
 0xc2a   : > { %25868 = vmatmul.mubr.msk.f32.gmra.mrb[58].mxu1 %vm683_vm9, %v32901_v38  ;;  %v22622_v38 = vld [vmem:[%s35220_s27 + $0x10] sm:$0xff] }
 0xc2b   : > { %25874 = vmatprep.mubr.msk.f32.mxu1 %vm683_vm9, %v32975_v4 }
 0xc2e   : > { %25875 = vmatmul.mubr.msk.f32.vlgmr.msra.gmra.mrb[52].mxu1 %vm683_vm9, %v32980_v2 }
 0xc2f   : > { %26452 = vmatpush3.bf16.msra.mxu1 %v26449_v9  ;;  %25877 = vmatprep.mubr.msk.f32.mxu1 %vm683_vm9, %v32985_v58 }
 0xc32   : > { %25878 = vmatmul.mubr.msk.f32.gmra.mrb[54].mxu1 %vm683_vm9, %v32989_v53 }
 0xc33   : > { %25880 = vmatprep.mubr.msk.f32.mxu1 %vm683_vm9, %v32993_v62 }
 0xc36   : > { %25881 = vmatmul.mubr.msk.f32.gmra.mrb[56].mxu1 %vm683_vm9, %v32997_v8 }
 0xc37   : > { %25883 = vmatprep.mubr.msk.f32.mxu1 %vm683_vm9, %v15676_v34 }
 0xc3a   : > { %25884 = vmatmul.mubr.msk.f32.gmra.mrb[58].mxu1 %vm683_vm9, %v32924_v15  ;;  %v22623_v15 = vld [vmem:[%s35220_s27 + $0x18] sm:$0xff] }
 0xc3b   : > { %25890 = vmatprep.mubr.msk.f32.mxu1 %vm683_vm9, %v33043_v37  ;;  %v26453_v40 = vpack.c.bf16 %v22623_v15, %v22622_v38 }
 0xc3d   : > { %26454 = vmatprep.subr.bf16.mxu1 %v26453_v40 }
 0xc3e   : > { %25891 = vmatmul.mubr.msk.f32.vlgmr.msra.gmra.mrb[52].mxu1 %vm683_vm9, %v33047_v29 }
 0xc3f   : > { %25893 = vmatprep.mubr.msk.f32.mxu1 %vm683_vm9, %v33051_v39  ;;  %26456 = vmatpush3.bf16.msra.mxu1 %v26453_v40 }
 0xc42   : > { %25894 = vmatmul.mubr.msk.f32.gmra.mrb[54].mxu1 %vm683_vm9, %v33055_v48  ;;  %v33243_v48 = vpack.c.bf16 %v22633_v35, %v22632_v47 }
 0xc43   : > { %25896 = vmatprep.mubr.msk.f32.mxu1 %vm683_vm9, %v33059_v11 }
 0xc46   : > { %25897 = vmatmul.mubr.msk.f32.gmra.mrb[56].mxu1 %vm683_vm9, %v33063_v41 }
 0xc47   : > { %25899 = vmatprep.mubr.msk.f32.mxu1 %vm683_vm9, %v15824_v19 }
 0xc4a   : > { %25900 = vmatmul.mubr.msk.f32.gmra.mrb[58].mxu1 %vm683_vm9, %v32941_v59  ;;  %v33191_v59 = vpack.c.bf16 %v16594_v56, %v16593_v61 }
 0xc4c   : > { %26458 = vmatprep.subr.bf16.mxu1 %v33191_v59 }
 0xd11   : > { %v25892_v42 = vpop.f32.mrb[52].mxu1 }
 0xd12   : > { %v16414_v14 = vmul.f32 %v25892_v42, %v33211_v31  ;;  %v16362_v4 = vpop.f32.mrb[53].mxu1 }
 0xd13   : > { %v16413_v5 = vmul.f32 %v33211_v31, %v16362_v4 }
 0xd14   : > { %v16426_v32 = vadd.f32 %v33216_v28, %v16414_v14 }
 0xd15   : > { %v16425_v2 = vadd.f32 %v33216_v28, %v16413_v5  ;;  %v25895_v58 = vpop.f32.mrb[54].mxu1 }
 0xd16   : > { %v16434_v53 = vmax.f32 %v16426_v32, 0.0  ;;  %v16416_v62 = vmul.f32 %v25895_v58, %v33211_v31  ;;  %v16372_v8 = vpop.f32.mrb[55].mxu1 }
 0xd17   : > { %v16433_v55 = vmax.f32 %v16425_v2, 0.0  ;;  %v16415_v46 = vmul.f32 %v33211_v31, %v16372_v8 }
 0xd18   : > { %v16442_v26 = vadd.f32 %v16434_v53, %v32685_v7  ;;  %v16428_v52 = vadd.f32 %v33216_v28, %v16416_v62 }
 0xd19   : > { %v16441_v60 = vadd.f32 %v16433_v55, %v32687_v21  ;;  %v16427_v45 = vadd.f32 %v33216_v28, %v16415_v46  ;;  %v25898_v49 = vpop.f32.mrb[56].mxu1 }
 0xd1a   : > { %v16474_v30 = vcombine.high %v16442_v26, %v16442_v26  ;;  %v16481_v37 = vrot.slane %v16442_v26, %v35221_v27  ;;  %v16436_v29 = vmax.f32 %v16428_v52, 0.0  ;;  %v16382_v39 = vpop.f32.mrb[57].mxu1  ;;  %v16418_v43 = vmul.f32 %v25898_v49, %v33211_v31 }
 0xd1b   : > { %v16457_v11 = vcombine.high %v16441_v60, %v16441_v60  ;;  %v16464_v41 = vrot.slane %v16441_v60, %v35221_v27  ;;  %v16435_v7 = vmax.f32 %v16427_v45, 0.0  ;;  %v16417_v51 = vmul.f32 %v33211_v31, %v16382_v39 }
 0xd1c   : > { %v33248_v21 = vrot.slane %v16474_v30, %v35221_v27  ;;  %v16489_v10 = vcombine.high %v16481_v37, %v16481_v37  ;;  %v16918_v13 = vrot.slane %v16481_v37, %v31021_v3  ;;  %v17080_v17 = vrot.slane %v16481_v37, %v31019_v24 }
 0xd1d   : > { %v33254_v36 = vrot.slane %v16457_v11, %v35221_v27  ;;  %v16472_v18 = vcombine.high %v16464_v41, %v16464_v41  ;;  %v16601_v34 = vrot.slane %v16464_v41, %v31019_v24  ;;  %v25901_v23 = vpop.f32.mrb[58].mxu1  ;;  %v16758_v20 = vrot.slane %v16464_v41, %v31021_v3 }
 0xd1e   : > { %v33259_v22 = vcombine.high %v33248_v21, %v33248_v21  ;;  %v16922_v44 = vrot.slane %v16489_v10, %v31021_v3  ;;  %v17084_v19 = vrot.slane %v16489_v10, %v31019_v24  ;;  %v16392_v63 = vpop.f32.mrb[59].mxu1  ;;  %v16926_v9 = vrot.slane %v33248_v21, %v31021_v3 }
 0xd1f   : > { %v17088_v38 = vrot.slane %v33248_v21, %v31019_v24  ;;  %v33270_v15 = vcombine.high %v33254_v36, %v33254_v36  ;;  %v16605_v40 = vrot.slane %v16472_v18, %v31019_v24  ;;  %v16609_v14 = vrot.slane %v33254_v36, %v31019_v24 }
 0xd20   : > { %v16930_v61 = vrot.slane %v33259_v22, %v31021_v3  ;;  %v33276_v56 = vsel %vm12194_vm2, %v16922_v44, %v16918_v13  ;;  %v17092_v42 = vrot.slane %v33259_v22, %v31019_v24  ;;  %v33283_v4 = vsel %vm12194_vm2, %v17084_v19, %v17080_v17 }
 0xd21   : > { %v16613_v5 = vrot.slane %v33270_v15, %v31019_v24  ;;  %v16662_v32 = vsel %vm12194_vm2, %v16605_v40, %v16601_v34  ;;  %v16762_v2 = vrot.slane %v16472_v18, %v31021_v3  ;;  %v16766_v58 = vrot.slane %v33254_v36, %v31021_v3 }
 0xd22   : > { %v16444_v53 = vadd.f32 %v16436_v29, %v32693_v33  ;;  %v16443_v62 = vadd.f32 %v16435_v7, %v32695_v50  ;;  %v16430_v8 = vadd.f32 %v33216_v28, %v16418_v43  ;;  %v16770_v0 = vrot.slane %v33270_v15, %v31021_v3 }
 0xd23   : > { %v16429_v57 = vadd.f32 %v33216_v28, %v16417_v51  ;;  %v16420_v55 = vmul.f32 %v25901_v23, %v33211_v31  ;;  %v16419_v46 = vmul.f32 %v33211_v31, %v16392_v63  ;;  %v33308_v49 = vsel %vm12194_vm2, %v16762_v2, %v16758_v20 }
 0xd24   : > { %v16508_v47 = vcombine.high %v16444_v53, %v16444_v53  ;;  %v33300_v35 = vrot.slane %v16444_v53, %v35221_v27  ;;  %v16491_v26 = vcombine.high %v16443_v62, %v16443_v62  ;;  %v33303_v33 = vrot.slane %v16443_v62, %v35221_v27 }
 0xd25   : > { %v16438_v50 = vmax.f32 %v16430_v8, 0.0  ;;  %v16437_v52 = vmax.f32 %v16429_v57, 0.0  ;;  %v16432_v60 = vadd.f32 %v33216_v28, %v16420_v55  ;;  %v16431_v45 = vadd.f32 %v33216_v28, %v16419_v46 }
 0xd26   : > { %v33311_v30 = vrot.slane %v16508_v47, %v35221_v27  ;;  %v33315_v31 = vcombine.high %v33300_v35, %v33300_v35  ;;  %v16934_v37 = vrot.slane %v33300_v35, %v31021_v3  ;;  %v17096_v29 = vrot.slane %v33300_v35, %v31019_v24 }
 0xd27   : > { %v33322_v39 = vrot.slane %v16491_v26, %v35221_v27  ;;  %v33326_v28 = vcombine.high %v33303_v33, %v33303_v33  ;;  %v16617_v11 = vrot.slane %v33303_v33, %v31019_v24  ;;  %v16446_v41 = vadd.f32 %v16438_v50, %v32707_v54 }
 0xd28   : > { %v16445_v7 = vadd.f32 %v16437_v52, %v32709_v1  ;;  %v16440_v43 = vmax.f32 %v16432_v60, 0.0  ;;  %v16439_v10 = vmax.f32 %v16431_v45, 0.0  ;;  %v16774_v13 = vrot.slane %v33303_v33, %v31021_v3 }
 0xd29   : > { %v33336_v51 = vcombine.high %v33322_v39, %v33322_v39  ;;  %v16621_v17 = vrot.slane %v33326_v28, %v31019_v24  ;;  %v16663_v18 = vsel %vm12196_vm3, %v16609_v14, %v16662_v32  ;;  %v16542_v34 = vcombine.high %v16446_v41, %v16446_v41 }
 0xd2a   : > { %v16549_v23 = vrot.slane %v16446_v41, %v35221_v27  ;;  %v16525_v54 = vcombine.high %v16445_v7, %v16445_v7  ;;  %v16532_v1 = vrot.slane %v16445_v7, %v35221_v27  ;;  %v16448_v44 = vadd.f32 %v16440_v43, %v32723_v6 }
 0xd2b   : > { %v16447_v19 = vadd.f32 %v16439_v10, %v32725_v16  ;;  %v16625_v20 = vrot.slane %v33322_v39, %v31019_v24  ;;  %v16629_v63 = vrot.slane %v33336_v51, %v31019_v24  ;;  %v33350_v40 = vrot.slane %v16542_v34, %v35221_v27 }
 0xd2c   : > { %v16557_v14 = vcombine.high %v16549_v23, %v16549_v23  ;;  %v16950_v32 = vrot.slane %v16549_v23, %v31021_v3  ;;  %v16664_v2 = vsel %vm12198_vm4, %v16613_v5, %v16663_v18  ;;  %v17112_v53 = vrot.slane %v16549_v23, %v31019_v24 }
 0xd2d   : > { %v16539_v6 = vrot.slane %v16525_v54, %v35221_v27  ;;  %v16540_v62 = vcombine.high %v16532_v1, %v16532_v1  ;;  %v16633_v16 = vrot.slane %v16532_v1, %v31019_v24  ;;  %v33359_v8 = vcombine.high %v33350_v40, %v33350_v40 }
 0xd2e   : > { %v16954_v57 = vrot.slane %v16557_v14, %v31021_v3  ;;  %v17116_v55 = vrot.slane %v16557_v14, %v31019_v24  ;;  %v16790_v46 = vrot.slane %v16532_v1, %v31021_v3  ;;  %v16958_v5 = vrot.slane %v33350_v40, %v31021_v3 }
 0xd2f   : > { %v16541_v47 = vcombine.high %v16539_v6, %v16539_v6  ;;  %v16637_v26 = vrot.slane %v16540_v62, %v31019_v24  ;;  %v16641_v50 = vrot.slane %v16539_v6, %v31019_v24  ;;  %v16962_v52 = vrot.slane %v33359_v8, %v31021_v3 }
 0xd30   : > { %v33371_v60 = vsel %vm12194_vm2, %v16954_v57, %v16950_v32  ;;  %v33378_v7 = vsel %vm12194_vm2, %v17116_v55, %v17112_v53  ;;  %v16794_v18 = vrot.slane %v16540_v62, %v31021_v3  ;;  %v16798_v23 = vrot.slane %v16539_v6, %v31021_v3 }
 0xd31   : > { %v16645_v43 = vrot.slane %v16541_v47, %v31019_v24  ;;  %v16669_v10 = vsel %vm12194_vm2, %v16637_v26, %v16633_v16  ;;  %v16576_v54 = vcombine.high %v16448_v44, %v16448_v44  ;;  %v33386_v1 = vrot.slane %v16448_v44, %v35221_v27 }
 0xd32   : > { %v16670_v34 = vsel %vm12196_vm3, %v16641_v50, %v16669_v10  ;;  %v16802_v14 = vrot.slane %v16541_v47, %v31021_v3  ;;  %v16559_v32 = vcombine.high %v16447_v19, %v16447_v19  ;;  %v16566_v53 = vrot.slane %v16447_v19, %v35221_v27 }
 0xd33   : > { %v16665_v57 = vsel %vm12200_vm5, %v16617_v11, %v16664_v2  ;;  %v16826_v55 = vsel %vm12194_vm2, %v16794_v18, %v16790_v46  ;;  %v33393_v16 = vrot.slane %v16576_v54, %v35221_v27  ;;  %v33397_v62 = vcombine.high %v33386_v1, %v33386_v1 }
 0xd34   : > { %v16966_v44 = vrot.slane %v33386_v1, %v31021_v3  ;;  %v16573_v47 = vrot.slane %v16559_v32, %v35221_v27  ;;  %v16574_v19 = vcombine.high %v16566_v53, %v16566_v53  ;;  %v16649_v11 = vrot.slane %v16566_v53, %v31019_v24 }
 0xd35   : > { %v16970_v2 = vrot.slane %v33397_v62, %v31021_v3  ;;  %v16806_v46 = vrot.slane %v16566_v53, %v31021_v3  ;;  %v16666_v26 = vsel %vm12202_vm6, %v16621_v17, %v16665_v57  ;;  %v16671_v50 = vsel %vm12198_vm4, %v16645_v43, %v16670_v34 }
 0xd36   : > { %v16575_v10 = vcombine.high %v16573_v47, %v16573_v47  ;;  %v16653_v18 = vrot.slane %v16574_v19, %v31019_v24  ;;  %v16657_v54 = vrot.slane %v16573_v47, %v31019_v24  ;;  %v16810_v6 = vrot.slane %v16574_v19, %v31021_v3 }
 0xd37   : > { %v16667_v32 = vsel %vm12204_vm7, %v16625_v20, %v16666_v26  ;;  %v16672_v41 = vsel %vm12200_vm5, %v16649_v11, %v16671_v50  ;;  %v16778_v45 = vrot.slane %v33326_v28, %v31021_v3  ;;  %v16782_v53 = vrot.slane %v33322_v39, %v31021_v3 }
 0xd38   : > { %v16668_v17 = vsel %vm12206_vm8, %v16629_v63, %v16667_v32  ;;  %v16661_v43 = vrot.slane %v16575_v10, %v31019_v24  ;;  %v16673_v34 = vsel %vm12202_vm6, %v16653_v18, %v16672_v41  ;;  %v16786_v57 = vrot.slane %v33336_v51, %v31021_v3 }
 0xd39   : > { %25906 = vmatprep.mubr.msk.f32.mxu1 %vm683_vm9, %v16668_v17  ;;  %v16674_v20 = vsel %vm12204_vm7, %v16657_v54, %v16673_v34  ;;  %v16820_v28 = vsel %vm12196_vm3, %v16766_v58, %v33308_v49  ;;  %v16814_v39 = vrot.slane %v16573_v47, %v31021_v3  ;;  %v16818_v63 = vrot.slane %v16575_v10, %v31021_v3 }
 0xd3a   : > { %v16675_v19 = vsel %vm12206_vm8, %v16661_v43, %v16674_v20  ;;  %v16821_v51 = vsel %vm12198_vm4, %v16770_v0, %v16820_v28  ;;  %v16827_v41 = vsel %vm12196_vm3, %v16798_v23, %v16826_v55  ;;  %v16524_v11 = vcombine.high %v33311_v30, %v33311_v30 }
 0xd3b   : > { %25907 = vmatmul.mubr.msk.f32.vlgmr.msra.gmra.mrb[60].mxu1 %vm683_vm9, %v16675_v19  ;;  %v16822_v36 = vsel %vm12200_vm5, %v16774_v13, %v16821_v51  ;;  %v16828_v58 = vsel %vm12198_vm4, %v16802_v14, %v16827_v41  ;;  %v16938_v49 = vrot.slane %v33315_v31, %v31021_v3  ;;  %v16942_v15 = vrot.slane %v33311_v30, %v31021_v3  ;;  %v22636_v51 = vld [vmem:[%s35225_s7] ss:$0 sm:$0xff] }
 0xd3c   : > { %26460 = vmatpush3.bf16.msra.mxu1 %v33191_v59  ;;  %v16823_v0 = vsel %vm12202_vm6, %v16778_v45, %v16822_v36  ;;  %v16829_v23 = vsel %vm12200_vm5, %v16806_v46, %v16828_v58  ;;  %v16946_v55 = vrot.slane %v16524_v11, %v31021_v3  ;;  %v16980_v33 = vsel %vm12196_vm3, %v16926_v9, %v33276_v56 }
 0xd3d   : > { %v16824_v13 = vsel %vm12204_vm7, %v16782_v53, %v16823_v0  ;;  %26462 = vmatprep.subr.bf16.mxu1 %v33240_v12  ;;  %v16830_v14 = vsel %vm12202_vm6, %v16810_v6, %v16829_v23  ;;  %v16981_v59 = vsel %vm12198_vm4, %v16930_v61, %v16980_v33  ;;  %v16592_v45 = vcombine.high %v33393_v16, %v33393_v16  ;;  %v17269_v33 = vld [vmem:[%s34357_s11 + $0x10] sm:$0xff] }
 0xd3e   : > { %v17132_v47 = vrot.slane %v33397_v62, %v31019_v24  ;;  %v16825_v46 = vsel %vm12206_vm8, %v16786_v57, %v16824_v13  ;;  %v16831_v9 = vsel %vm12204_vm7, %v16814_v39, %v16830_v14  ;;  %v16982_v56 = vsel %vm12200_vm5, %v16934_v37, %v16981_v59  ;;  %v22640_v57 = vld [vmem:[%s34357_s11 + $0x30] sm:$0xff]  ;;  %v17267_v39 = vld [vmem:[%s34357_s11] sm:$0xff]  ;;  %v17270_v13 = vld [vmem:[%s34357_s11 + $0x18] sm:$0xff] }
 0xd3f   : > { %25913 = vmatprep.mubr.msk.f32.mxu1 %vm683_vm9, %v16825_v46  ;;  %v16832_v6 = vsel %vm12206_vm8, %v16818_v63, %v16831_v9  ;;  %v16983_v61 = vsel %vm12202_vm6, %v16938_v49, %v16982_v56  ;;  %v16974_v26 = vrot.slane %v33393_v16, %v31021_v3  ;;  %v16987_v62 = vsel %vm12196_vm3, %v16958_v5, %v33371_v60  ;;  %v17268_v63 = vld [vmem:[%s34357_s11 + $0x8] sm:$0xff]  ;;  %v22646_v59 = vld [vmem:[%s34357_s11 + $0x40] sm:$0xff] }
 0xd40   : > { %v16984_v50 = vsel %vm12204_vm7, %v16942_v15, %v16983_v61  ;;  %v16978_v10 = vrot.slane %v16592_v45, %v31021_v3  ;;  %v16988_v37 = vsel %vm12198_vm4, %v16962_v52, %v16987_v62  ;;  %v17100_v18 = vrot.slane %v33315_v31, %v31019_v24  ;;  %v22647_v9 = vld [vmem:[%s34357_s11 + $0x48] sm:$0xff]  ;;  %v22649_v61 = vld [vmem:[%s34357_s11 + $0x58] sm:$0xff] }
 0xd41   : > { %v16985_v54 = vsel %vm12206_vm8, %v16946_v55, %v16984_v50  ;;  %v16989_v32 = vsel %vm12200_vm5, %v16966_v44, %v16988_v37  ;;  %v17104_v53 = vrot.slane %v33311_v30, %v31019_v24  ;;  %v17142_v5 = vsel %vm12196_vm3, %v17088_v38, %v33283_v4  ;;  %v22653_v62 = vld [vmem:[%s34357_s11 + $0x68] sm:$0xff] }
 0xd42   : > { %v16990_v60 = vsel %vm12202_vm6, %v16970_v2, %v16989_v32  ;;  %v17108_v52 = vrot.slane %v16524_v11, %v31019_v24  ;;  %v17143_v31 = vsel %vm12198_vm4, %v17092_v42, %v17142_v5  ;;  %v17136_v44 = vrot.slane %v33393_v16, %v31019_v24  ;;  %v22637_v11 = vld [vmem:[%s35225_s7 + $0x1] ss:$0 sm:$0xff]  ;;  %v22655_v32 = vld [vmem:[%s34357_s11 + $0x78] sm:$0xff]  ;;  %s27875_s7 = scalar_lea.vmem %s27874_s9, 32 }
 0xd43   : > { %25914 = vmatmul.mubr.msk.f32.vlgmr.msra.gmra.mrb[60].mxu1 %vm683_vm9, %v16832_v6  ;;  %v16991_v30 = vsel %vm12204_vm7, %v16974_v26, %v16990_v60  ;;  %v17144_v21 = vsel %vm12200_vm5, %v17096_v29, %v17143_v31  ;;  %v17140_v38 = vrot.slane %v16592_v45, %v31019_v24  ;;  %v35222_v22 = vrot.slane %v33350_v40, %v31019_v24  ;;  %v22648_v6 = vld [vmem:[%s34357_s11 + $0x50] sm:$0xff]  ;;  %v22652_v26 = vld [vmem:[%s34357_s11 + $0x60] sm:$0xff]  ;;  %v22659_v31 = vld [vmem:[%s34357_s11 + $0x88] sm:$0xff] }
 0xd44   : > { %26464 = vmatpush3.bf16.msra.mxu1 %v33240_v12  ;;  %25920 = vmatprep.mubr.msk.f32.mxu1 %vm683_vm9, %v16985_v54  ;;  %v16992_v4 = vsel %vm12206_vm8, %v16978_v10, %v16991_v30  ;;  %v17145_v16 = vsel %vm12202_vm6, %v17100_v18, %v17144_v21  ;;  %v35223_v35 = vrot.slane %v33359_v8, %v31019_v24  ;;  %v22638_v8 = vld [vmem:[%s34357_s11 + $0x20] sm:$0xff]  ;;  %v22654_v54 = vld [vmem:[%s34357_s11 + $0x70] sm:$0xff]  ;;  %v22661_v21 = vld [vmem:[%s34357_s11 + $0x98] sm:$0xff] }
 0xd45   : > { %v17149_v42 = vsel %vm12196_vm3, %v35222_v22, %v33378_v7  ;;  %26466 = vmatprep.subr.bf16.mxu1 %v33243_v48  ;;  %v17146_v2 = vsel %vm12204_vm7, %v17104_v53, %v17145_v16  ;;  %v35224_v40 = vrot.slane %v33386_v1, %v31019_v24  ;;  %v22639_v1 = vld [vmem:[%s34357_s11 + $0x28] sm:$0xff]  ;;  %v26477_v19 = vpack.c.bf16 %v17268_v63, %v17267_v39  ;;  %v22660_v30 = vld [vmem:[%s34357_s11 + $0x90] sm:$0xff] }
 0xd46   : > { %v17150_v29 = vsel %vm12198_vm4, %v35223_v35, %v17149_v42  ;;  %v17147_v7 = vsel %vm12206_vm8, %v17108_v52, %v17146_v2  ;;  %v26469_v20 = vpack.c.bf16 %v22639_v1, %v22638_v8  ;;  %v26485_v56 = vpack.c.bf16 %v22647_v9, %v22646_v59  ;;  %v22658_v52 = vld [vmem:[%s34357_s11 + $0x80] sm:$0xff]  ;;  %v22665_v16 = vld [vmem:[%s34357_s11 + $0xa8] sm:$0xff]  ;;  %v22667_v2 = vld [vmem:[%s34357_s11 + $0xb8] sm:$0xff] }
 0xd47   : > { %v17151_v12 = vsel %vm12200_vm5, %v35224_v40, %v17150_v29  ;;  %v26489_v10 = vpack.c.bf16 %v22649_v61, %v22648_v6  ;;  %v26493_v18 = vpack.c.bf16 %v22653_v62, %v22652_v26  ;;  %v26497_v5 = vpack.c.bf16 %v22655_v32, %v22654_v54  ;;  %v22666_v29 = vld [vmem:[%s34357_s11 + $0xb0] sm:$0xff]  ;;  %v22673_v1 = vld [vmem:[%s34357_s11 + $0xd8] sm:$0xff]  ;;  %v22677_v39 = vld [vmem:[%s34357_s11 + $0xe8] sm:$0xff] }
 0xd48   : > { %v17152_v17 = vsel %vm12202_vm6, %v17132_v47, %v17151_v12  ;;  %v26481_v47 = vpack.c.bf16 %v17270_v13, %v17269_v33  ;;  %v26505_v22 = vpack.c.bf16 %v22661_v21, %v22660_v30  ;;  %v26513_v12 = vpack.c.bf16 %v22667_v2, %v22666_v29  ;;  %v22672_v8 = vld [vmem:[%s34357_s11 + $0xd0] sm:$0xff]  ;;  %v22685_v33 = vld [vmem:[%s34357_s11 + $0x118] sm:$0xff]  ;;  %v22692_v26 = vld [vmem:[%s34357_s11 + $0x120] sm:$0xff] }
 0xd49   : > { %v17153_v43 = vsel %vm12204_vm7, %v17136_v44, %v17152_v17  ;;  %v26501_v44 = vpack.c.bf16 %v22659_v31, %v22658_v52  ;;  %v22670_v17 = vld [vmem:[%s34357_s11 + $0xc0] sm:$0xff]  ;;  %v22698_v9 = vld [vmem:[%s34357_s11 + $0x150] sm:$0xff]  ;;  %v22699_v6 = vld [vmem:[%s34357_s11 + $0x158] sm:$0xff] }
 0xd4a   : > { %v17154_v34 = vsel %vm12206_vm8, %v17140_v38, %v17153_v43  ;;  %v22671_v43 = vld [vmem:[%s34357_s11 + $0xc8] sm:$0xff]  ;;  %v26545_v61 = vpack.c.bf16 %v22699_v6, %v22698_v9  ;;  %v22694_v21 = vld [vmem:[%s34357_s11 + $0x130] sm:$0xff] }
 0xd4b   : > { %25921 = vmatmul.mubr.msk.f32.vlgmr.msra.gmra.mrb[60].mxu1 %vm683_vm9, %v16992_v4  ;;  %v22664_v4 = vld [vmem:[%s34357_s11 + $0xa0] sm:$0xff]  ;;  %v22693_v62 = vld [vmem:[%s34357_s11 + $0x128] sm:$0xff]  ;;  %v22730_v6 = vld [vmem:[%s34357_s11 + $0x1f0] sm:$0xff] }
 0xd4c   : > { %26468 = vmatpush3.bf16.msra.mxu1 %v33243_v48  ;;  %25927 = vmatprep.mubr.msk.f32.mxu1 %vm683_vm9, %v17147_v7  ;;  %v22641_v48 = vld [vmem:[%s34357_s11 + $0x38] sm:$0xff]  ;;  %v26509_v35 = vpack.c.bf16 %v22665_v16, %v22664_v4  ;;  %v22705_v29 = vld [vmem:[%s34357_s11 + $0x168] sm:$0xff] }
 0xd4d   : > { %v26473_v28 = vpack.c.bf16 %v22641_v48, %v22640_v57  ;;  %26470 = vmatprep.subr.bf16.mxu1 %v26469_v20  ;;  %v22729_v9 = vld [vmem:[%s34357_s11 + $0x1e8] sm:$0xff] }
 0xd53   : > { %25928 = vmatmul.mubr.msk.f32.vlgmr.msra.gmra.mrb[60].mxu1 %vm683_vm9, %v17154_v34  ;;  %v26517_v34 = vpack.c.bf16 %v22671_v43, %v22670_v17  ;;  %v22711_v17 = vld [vmem:[%s34357_s11 + $0x188] sm:$0xff] }
 0xd54   : > { %26472 = vmatpush3.bf16.msra.mxu1 %v26469_v20  ;;  %v26521_v20 = vpack.c.bf16 %v22673_v1, %v22672_v8 }
 0xd55   : > { %26474 = vmatprep.subr.bf16.mxu1 %v26473_v28 }
 0xd58   : > { %26476 = vmatpush3.bf16.msra.mxu1 %v26473_v28  ;;  %v22676_v28 = vld [vmem:[%s34357_s11 + $0xe0] sm:$0xff] }
 0xd59   : > { %26478 = vmatprep.subr.bf16.mxu1 %v26477_v19  ;;  %v26525_v63 = vpack.c.bf16 %v22677_v39, %v22676_v28 }
 0xe26   : > { %v25929_v41 = vpop.f32.mrb[60].mxu1 }
 0xe27   : > { %v17242_v36 = vmul.f32 %v25929_v41, %v22636_v51  ;;  %v17225_v58 = vpop.f32.mrb[61].mxu1 }
 0xe28   : > { %v17241_v49 = vmul.f32 %v22636_v51, %v17225_v58  ;;  %v22679_v51 = vld [vmem:[%s34357_s11 + $0xf8] sm:$0xff]  ;;  %v22682_v58 = vld [vmem:[%s34357_s11 + $0x100] sm:$0xff] }
 0xe29   : > { %v33570_v15 = vadd.f32 %v22637_v11, %v17242_v36 }
 0xe2a   : > { %v33572_v0 = vadd.f32 %v22637_v11, %v17241_v49  ;;  %v22683_v49 = vld [vmem:[%s34357_s11 + $0x108] sm:$0xff] }
 0xe2b   : > { %v17253_v23 = vcombine.high %v33570_v15, %v33570_v15  ;;  %17259 = vst.msk [vmem:[#allocation4 + $0x19] sm:$0xf] %vm712_vm12, %v33570_v15 }
 0xe2c   : > { %v17252_v55 = vcombine.high %v33572_v0, %v33572_v0  ;;  %17257 = vst.msk [vmem:[#allocation4 + $0x9] sm:$0xf] %vm712_vm12, %v33572_v0 }
 0xe2d   : > { %17260 = vst.msk [vmem:[#allocation4 + $0x21] sm:$0xf] %vm712_vm12, %v17253_v23  ;;  %v26533_v23 = vpack.c.bf16 %v22683_v49, %v22682_v58 }
 0xe2e   : > { %17258 = vst.msk [vmem:[#allocation4 + $0x11] sm:$0xf] %vm712_vm12, %v17252_v55  ;;  %v22684_v55 = vld [vmem:[%s34357_s11 + $0x110] sm:$0xff] }
 0xe33   : > { %v27793_v14 = vld [vmem:[#allocation4 + $0x1] ss:$8 sps:$4 sm:$0xff]  }
 0xe34   : > { %25938 = vmatprep.mubr.msk.f32.mxu1 %vm17286_vm13, %v27793_v14  ;;  %v27795_v46 = vld [vmem:[#allocation4] ss:$8 sps:$4 sm:$0xff]   ;;  %v26537_v14 = vpack.c.bf16 %v22685_v33, %v22684_v55  ;;  %v22723_v55 = vld [vmem:[%s34357_s11 + $0x1c8] sm:$0xff] }
 0xe35   : > { %v27794_v45 = vld [vmem:[#allocation4 + $0x11] ss:$8 sps:$4 sm:$0xff]   ;;  %v27797_v37 = vld [vmem:[#allocation4 + $0x2] ss:$8 sps:$4 sm:$0xff]  }
 0xe36   : > { %25939 = vmatmul.mubr.msk.f32.vlgmr.msra.gmra.mrb[62].mxu1 %vm17286_vm13, %v27794_v45  ;;  %v27796_v50 = vld [vmem:[#allocation4 + $0x10] ss:$8 sps:$4 sm:$0xff]   ;;  %v27806_v41 = vld [vmem:[#allocation4 + $0x20] ss:$8 sps:$4 sm:$0xff]  }
 0xe37   : > { %26480 = vmatpush3.bf16.msra.mxu1 %v26477_v19  ;;  %25949 = vmatprep.mubr.msk.f32.mxu1 %vm17286_vm13, %v27795_v46  ;;  %v27798_v53 = vld [vmem:[#allocation4 + $0x12] ss:$8 sps:$4 sm:$0xff]   ;;  %v22678_v19 = vld [vmem:[%s34357_s11 + $0xf0] sm:$0xff] }
 0xe38   : > { %26482 = vmatprep.subr.bf16.mxu1 %v26481_v47  ;;  %v27799_v60 = vld [vmem:[#allocation4 + $0x8] ss:$8 sps:$4 sm:$0xff]   ;;  %v27800_v38 = vld [vmem:[#allocation4 + $0x18] ss:$8 sps:$4 sm:$0xff]   ;;  %v26529_v11 = vpack.c.bf16 %v22679_v51, %v22678_v19 }
 0xe39   : > { %v27801_v42 = vld [vmem:[#allocation4 + $0x9] ss:$8 sps:$4 sm:$0xff]   ;;  %v27802_v40 = vld [vmem:[#allocation4 + $0x19] ss:$8 sps:$4 sm:$0xff]  }
 0xe3a   : > { %v27803_v7 = vld [vmem:[#allocation4 + $0xa] ss:$8 sps:$4 sm:$0xff]   ;;  %v27804_v57 = vld [vmem:[#allocation4 + $0x1a] ss:$8 sps:$4 sm:$0xff]  }
 0xe3b   : > { %26484 = vmatpush3.bf16.msra.mxu1 %v26481_v47  ;;  %v27805_v48 = vld [vmem:[#allocation4 + $0x10] ss:$8 sps:$4 sm:$0xff]   ;;  %v27808_v13 = vld [vmem:[#allocation4 + $0x21] ss:$8 sps:$4 sm:$0xff]  }
 0xe3c   : > { %26486 = vmatprep.subr.bf16.mxu1 %v26485_v56  ;;  %v27807_v36 = vld [vmem:[#allocation4 + $0x11] ss:$8 sps:$4 sm:$0xff]   ;;  %v27810_v45 = vld [vmem:[#allocation4 + $0x22] ss:$8 sps:$4 sm:$0xff]  }
 0xe3d   : > { %v27809_v59 = vld [vmem:[#allocation4 + $0x12] ss:$8 sps:$4 sm:$0xff]  }
 0xe3e   : > { %25950 = vmatmul.mubr.msk.f32.vlgmr.msra.gmra.mrb[62].mxu1 %vm17286_vm13, %v27796_v50  ;;  %v22696_v47 = vld [vmem:[%s34357_s11 + $0x140] sm:$0xff]  ;;  %v22697_v46 = vld [vmem:[%s34357_s11 + $0x148] sm:$0xff]  ;;  %v26549_v50 = vpack.c.bf16 %v22693_v62, %v22692_v26 }
 0xe3f   : > { %26488 = vmatpush3.bf16.msra.mxu1 %v26485_v56  ;;  %25960 = vmatprep.mubr.msk.f32.mxu1 %vm17286_vm13, %v27797_v37  ;;  %v26541_v56 = vpack.c.bf16 %v22697_v46, %v22696_v47  ;;  %v22689_v37 = vld [vmem:[%s34361_s15 + $0x1] ss:$0 sm:$0xff]  ;;  %v22717_v19 = vld [vmem:[%s34357_s11 + $0x1a8] sm:$0xff] }
 0xe40   : > { %26490 = vmatprep.subr.bf16.mxu1 %v26489_v10  ;;  %v22728_v46 = vld [vmem:[%s34357_s11 + $0x1e0] sm:$0xff] }
 0xe43   : > { %26492 = vmatpush3.bf16.msra.mxu1 %v26489_v10  ;;  %v22688_v10 = vld [vmem:[%s34361_s15] ss:$0 sm:$0xff] }
 0xe44   : > { %26494 = vmatprep.subr.bf16.mxu1 %v26493_v18 }
 0xe46   : > { %25961 = vmatmul.mubr.msk.f32.vlgmr.msra.gmra.mrb[62].mxu1 %vm17286_vm13, %v27798_v53 }
 0xe47   : > { %26496 = vmatpush3.bf16.msra.mxu1 %v26493_v18  ;;  %25971 = vmatprep.mubr.msk.f32.mxu1 %vm17286_vm13, %v27799_v60 }
 0xe48   : > { %26498 = vmatprep.subr.bf16.mxu1 %v26497_v5 }
 0xe4b   : > { %26500 = vmatpush3.bf16.msra.mxu1 %v26497_v5 }
 0xe4c   : > { %26502 = vmatprep.subr.bf16.mxu1 %v26501_v44 }
 0xe4e   : > { %25972 = vmatmul.mubr.msk.f32.vlgmr.msra.gmra.mrb[62].mxu1 %vm17286_vm13, %v27800_v38  ;;  %v22695_v38 = vld [vmem:[%s34357_s11 + $0x138] sm:$0xff] }
 0xe4f   : > { %26504 = vmatpush3.bf16.msra.mxu1 %v26501_v44  ;;  %25982 = vmatprep.mubr.msk.f32.mxu1 %vm17286_vm13, %v27801_v42  ;;  %v22704_v42 = vld [vmem:[%s34357_s11 + $0x160] sm:$0xff]  ;;  %v26553_v16 = vpack.c.bf16 %v22695_v38, %v22694_v21  ;;  %v22743_v21 = vld [vmem:[%s34357_s11 + $0x238] sm:$0xff] }
 0xe50   : > { %26506 = vmatprep.subr.bf16.mxu1 %v26505_v22  ;;  %v26557_v2 = vpack.c.bf16 %v22705_v29, %v22704_v42  ;;  %v22750_v29 = vld [vmem:[%s35226_s5 + $0x30] sm:$0xff] }
 0xe53   : > { %26508 = vmatpush3.bf16.msra.mxu1 %v26505_v22 }
 0xe54   : > { %26510 = vmatprep.subr.bf16.mxu1 %v26509_v35 }
 0xe56   : > { %25983 = vmatmul.mubr.msk.f32.vlgmr.msra.gmra.mrb[62].mxu1 %vm17286_vm13, %v27802_v40  ;;  %v22706_v40 = vld [vmem:[%s34357_s11 + $0x170] sm:$0xff] }
 0xe57   : > { %26512 = vmatpush3.bf16.msra.mxu1 %v26509_v35  ;;  %25993 = vmatprep.mubr.msk.f32.mxu1 %vm17286_vm13, %v27803_v7  ;;  %v22710_v7 = vld [vmem:[%s34357_s11 + $0x180] sm:$0xff] }
 0xe58   : > { %26514 = vmatprep.subr.bf16.mxu1 %v26513_v12  ;;  %v26565_v1 = vpack.c.bf16 %v22711_v17, %v22710_v7  ;;  %v22746_v17 = vld [vmem:[%s34361_s15 + $0x2] ss:$0 sm:$0xff] }
 0xe5b   : > { %26516 = vmatpush3.bf16.msra.mxu1 %v26513_v12  ;;  %v22707_v12 = vld [vmem:[%s34357_s11 + $0x178] sm:$0xff] }
 0xe5c   : > { %26518 = vmatprep.subr.bf16.mxu1 %v26517_v34 }
 0xe5e   : > { %25994 = vmatmul.mubr.msk.f32.vlgmr.msra.gmra.mrb[62].mxu1 %vm17286_vm13, %v27804_v57  ;;  %v22712_v57 = vld [vmem:[%s34357_s11 + $0x190] sm:$0xff] }
 0xe5f   : > { %26520 = vmatpush3.bf16.msra.mxu1 %v26517_v34  ;;  %26004 = vmatprep.mubr.msk.f32.mxu1 %vm17286_vm13, %v27805_v48  ;;  %v26561_v34 = vpack.c.bf16 %v22707_v12, %v22706_v40  ;;  %v22751_v12 = vld [vmem:[%s35226_s5 + $0x38] sm:$0xff] }
 0xe60   : > { %26522 = vmatprep.subr.bf16.mxu1 %v26521_v20  ;;  %v26617_v7 = vpack.c.bf16 %v22751_v12, %v22750_v29  ;;  %v22755_v29 = vld [vmem:[%s35226_s5 + $0x48] sm:$0xff]  ;;  %v22756_v12 = vld [vmem:[%s35226_s5 + $0x50] sm:$0xff] }
 0xe63   : > { %26524 = vmatpush3.bf16.msra.mxu1 %v26521_v20  ;;  %v22713_v20 = vld [vmem:[%s34357_s11 + $0x198] sm:$0xff] }
 0xe64   : > { %26526 = vmatprep.subr.bf16.mxu1 %v26525_v63  ;;  %v26569_v28 = vpack.c.bf16 %v22713_v20, %v22712_v57 }
 0xe66   : > { %26005 = vmatmul.mubr.msk.f32.vlgmr.msra.gmra.mrb[62].mxu1 %vm17286_vm13, %v27806_v41  ;;  %v22718_v41 = vld [vmem:[%s34357_s11 + $0x1b0] sm:$0xff] }
 0xe67   : > { %26528 = vmatpush3.bf16.msra.mxu1 %v26525_v63  ;;  %26015 = vmatprep.mubr.msk.f32.mxu1 %vm17286_vm13, %v27807_v36  ;;  %v22716_v63 = vld [vmem:[%s34357_s11 + $0x1a0] sm:$0xff] }
 0xe68   : > { %26530 = vmatprep.subr.bf16.mxu1 %v26529_v11  ;;  %v26573_v51 = vpack.c.bf16 %v22717_v19, %v22716_v63 }
 0xe6b   : > { %26532 = vmatpush3.bf16.msra.mxu1 %v26529_v11  ;;  %v22719_v11 = vld [vmem:[%s34357_s11 + $0x1b8] sm:$0xff] }
 0xe6c   : > { %26534 = vmatprep.subr.bf16.mxu1 %v26533_v23  ;;  %v26577_v58 = vpack.c.bf16 %v22719_v11, %v22718_v41  ;;  %v19064_v41 = vld [vmem:[%s35226_s5 + $0x8] sm:$0xff] }
 0xe6e   : > { %26016 = vmatmul.mubr.msk.f32.vlgmr.msra.gmra.mrb[62].mxu1 %vm17286_vm13, %v27808_v13  ;;  %v22724_v13 = vld [vmem:[%s34357_s11 + $0x1d0] sm:$0xff] }
 0xe6f   : > { %26536 = vmatpush3.bf16.msra.mxu1 %v26533_v23  ;;  %26026 = vmatprep.mubr.msk.f32.mxu1 %vm17286_vm13, %v27809_v59  ;;  %v22722_v23 = vld [vmem:[%s34357_s11 + $0x1c0] sm:$0xff] }
 0xe70   : > { %26538 = vmatprep.subr.bf16.mxu1 %v26537_v14  ;;  %v26581_v33 = vpack.c.bf16 %v22723_v55, %v22722_v23 }
 0xe73   : > { %26540 = vmatpush3.bf16.msra.mxu1 %v26537_v14  ;;  %v22725_v14 = vld [vmem:[%s34357_s11 + $0x1d8] sm:$0xff] }
 0xe74   : > { %26542 = vmatprep.subr.bf16.mxu1 %v26541_v56 }
 0xe76   : > { %26027 = vmatmul.mubr.msk.f32.vlgmr.msra.gmra.mrb[62].mxu1 %vm17286_vm13, %v27810_v45  ;;  %v26585_v45 = vpack.c.bf16 %v22725_v14, %v22724_v13 }
 0xe77   : > { %26544 = vmatpush3.bf16.msra.mxu1 %v26541_v56  ;;  %v26589_v56 = vpack.c.bf16 %v22729_v9, %v22728_v46 }
 0xe78   : > { %26546 = vmatprep.subr.bf16.mxu1 %v26545_v61 }
 0xe7b   : > { %26548 = vmatpush3.bf16.msra.mxu1 %v26545_v61  ;;  %v22731_v61 = vld [vmem:[%s34357_s11 + $0x1f8] sm:$0xff] }
 0xe7c   : > { %26550 = vmatprep.subr.bf16.mxu1 %v26549_v50  ;;  %v26593_v62 = vpack.c.bf16 %v22731_v61, %v22730_v6 }
 0xf49   : > { %v26028_v18 = vpop.f32.mrb[62].mxu1 }
 0xf4a   : > { %v18129_v54 = vmul.f32 %v26028_v18, %v22688_v10  ;;  %v18113_v32 = vpop.f32.mrb[63].mxu1 }
 0xf4b   : > { %v18128_v53 = vmul.f32 %v22688_v10, %v18113_v32  ;;  %v22734_v10 = vld [vmem:[%s34357_s11 + $0x200] sm:$0xff]  ;;  %v22737_v32 = vld [vmem:[%s34357_s11 + $0x218] sm:$0xff] }
 0xf4c   : > { %v18135_v5 = vadd.f32 %v22689_v37, %v18129_v54  ;;  %v22736_v54 = vld [vmem:[%s34357_s11 + $0x210] sm:$0xff] }
 0xf4d   : > { %v18134_v60 = vadd.f32 %v22689_v37, %v18128_v53  ;;  %v22735_v37 = vld [vmem:[%s34357_s11 + $0x208] sm:$0xff] }
 0xf4e   : > { %v18137_v52 = vmax.f32 %v18135_v5, 0.0  ;;  %v26597_v18 = vpack.c.bf16 %v22735_v37, %v22734_v10  ;;  %v26601_v5 = vpack.c.bf16 %v22737_v32, %v22736_v54 }
 0xf4f   : > { %v18136_v31 = vmax.f32 %v18134_v60, 0.0 }
 0xf50   : > { %v18141_v44 = vcombine.high %v18137_v52, %v18137_v52  ;;  %18146 = vst.msk [vmem:[#allocation4 + $0x19] sm:$0xf] %vm712_vm12, %v18137_v52  ;;  %v22740_v52 = vld [vmem:[%s34357_s11 + $0x220] sm:$0xff] }
 0xf51   : > { %v18140_v30 = vcombine.high %v18136_v31, %v18136_v31  ;;  %18144 = vst.msk [vmem:[#allocation4 + $0x9] sm:$0xf] %vm712_vm12, %v18136_v31  ;;  %v22741_v31 = vld [vmem:[%s34357_s11 + $0x228] sm:$0xff] }
 0xf52   : > { %18147 = vst.msk [vmem:[#allocation4 + $0x21] sm:$0xf] %vm712_vm12, %v18141_v44  ;;  %v26605_v44 = vpack.c.bf16 %v22741_v31, %v22740_v52 }
 0xf53   : > { %18145 = vst.msk [vmem:[#allocation4 + $0x11] sm:$0xf] %vm712_vm12, %v18140_v30  ;;  %v22742_v30 = vld [vmem:[%s34357_s11 + $0x230] sm:$0xff] }
 0xf58   : > { %v27811_v22 = vld [vmem:[#allocation4 + $0x1] ss:$8 sps:$4 sm:$0xff]  }
 0xf59   : > { %26037 = vmatprep.mubr.msk.f32.mxu1 %vm17286_vm13, %v27811_v22  ;;  %v27813_v35 = vld [vmem:[#allocation4] ss:$8 sps:$4 sm:$0xff]   ;;  %v26609_v22 = vpack.c.bf16 %v22743_v21, %v22742_v30 }
 0xf5a   : > { %v27812_v4 = vld [vmem:[#allocation4 + $0x11] ss:$8 sps:$4 sm:$0xff]   ;;  %v27815_v8 = vld [vmem:[#allocation4 + $0x2] ss:$8 sps:$4 sm:$0xff]  }
 0xf5b   : > { %26038 = vmatmul.mubr.msk.f32.vlgmr.msra.gmra.mrb[64].mxu1 %vm17286_vm13, %v27812_v4  ;;  %v27814_v43 = vld [vmem:[#allocation4 + $0x10] ss:$8 sps:$4 sm:$0xff]   ;;  %v27824_v53 = vld [vmem:[#allocation4 + $0x20] ss:$8 sps:$4 sm:$0xff]  }
 0xf5c   : > { %26552 = vmatpush3.bf16.msra.mxu1 %v26549_v50  ;;  %26048 = vmatprep.mubr.msk.f32.mxu1 %vm17286_vm13, %v27813_v35  ;;  %v27816_v48 = vld [vmem:[#allocation4 + $0x12] ss:$8 sps:$4 sm:$0xff]   ;;  %v27826_v38 = vld [vmem:[#allocation4 + $0x21] ss:$8 sps:$4 sm:$0xff]  }
 0xf5d   : > { %26554 = vmatprep.subr.bf16.mxu1 %v26553_v16  ;;  %v27817_v39 = vld [vmem:[#allocation4 + $0x8] ss:$8 sps:$4 sm:$0xff]   ;;  %v27818_v36 = vld [vmem:[#allocation4 + $0x18] ss:$8 sps:$4 sm:$0xff]  }
 0xf5e   : > { %v27819_v49 = vld [vmem:[#allocation4 + $0x9] ss:$8 sps:$4 sm:$0xff]   ;;  %v27820_v59 = vld [vmem:[#allocation4 + $0x19] ss:$8 sps:$4 sm:$0xff]  }
 0xf5f   : > { %v27821_v47 = vld [vmem:[#allocation4 + $0xa] ss:$8 sps:$4 sm:$0xff]   ;;  %v27822_v26 = vld [vmem:[#allocation4 + $0x1a] ss:$8 sps:$4 sm:$0xff]  }
 0xf60   : > { %26556 = vmatpush3.bf16.msra.mxu1 %v26553_v16  ;;  %v27823_v50 = vld [vmem:[#allocation4 + $0x10] ss:$8 sps:$4 sm:$0xff]   ;;  %v27828_v4 = vld [vmem:[#allocation4 + $0x22] ss:$8 sps:$4 sm:$0xff]  }
 0xf61   : > { %26558 = vmatprep.subr.bf16.mxu1 %v26557_v2  ;;  %v27825_v60 = vld [vmem:[#allocation4 + $0x11] ss:$8 sps:$4 sm:$0xff]  }
 0xf62   : > { %v27827_v42 = vld [vmem:[#allocation4 + $0x12] ss:$8 sps:$4 sm:$0xff]  }
 0xf63   : > { %26049 = vmatmul.mubr.msk.f32.vlgmr.msra.gmra.mrb[64].mxu1 %vm17286_vm13, %v27814_v43  ;;  %v22748_v16 = vld [vmem:[%s35226_s5 + $0x20] sm:$0xff]  ;;  %v22749_v35 = vld [vmem:[%s35226_s5 + $0x28] sm:$0xff] }
 0xf64   : > { %26560 = vmatpush3.bf16.msra.mxu1 %v26557_v2  ;;  %26059 = vmatprep.mubr.msk.f32.mxu1 %vm17286_vm13, %v27815_v8  ;;  %v27935_v2 = vmov 0.0|0.0   ;;  %v26614_v40 = vpack.c.bf16 %v22749_v35, %v22748_v16  ;;  %v22747_v43 = vld [vmem:[%s34361_s15 + $0x3] ss:$0 sm:$0xff] }
 0xf65   : > { %26562 = vmatprep.subr.bf16.mxu1 %v26561_v34  ;;  %26691 = vmatprep.subr.bf16.mxu0 %v27935_v2  ;;  %v22754_v35 = vld [vmem:[%s35226_s5 + $0x40] sm:$0xff] }
 0xf68   : > { %26564 = vmatpush3.bf16.msra.mxu1 %v26561_v34 }
 0xf69   : > { %26566 = vmatprep.subr.bf16.mxu1 %v26565_v1 }
 0xf6b   : > { %26060 = vmatmul.mubr.msk.f32.vlgmr.msra.gmra.mrb[64].mxu1 %vm17286_vm13, %v27816_v48 }
 0xf6c   : > { %26568 = vmatpush3.bf16.msra.mxu1 %v26565_v1  ;;  %26070 = vmatprep.mubr.msk.f32.mxu1 %vm17286_vm13, %v27817_v39 }
 0xf6d   : > { %26570 = vmatprep.subr.bf16.mxu1 %v26569_v28 }
 0xf70   : > { %26572 = vmatpush3.bf16.msra.mxu1 %v26569_v28 }
 0xf71   : > { %26574 = vmatprep.subr.bf16.mxu1 %v26573_v51 }
 0xf73   : > { %26071 = vmatmul.mubr.msk.f32.vlgmr.msra.gmra.mrb[64].mxu1 %vm17286_vm13, %v27818_v36 }
 0xf74   : > { %26576 = vmatpush3.bf16.msra.mxu1 %v26573_v51  ;;  %26081 = vmatprep.mubr.msk.f32.mxu1 %vm17286_vm13, %v27819_v49  ;;  %v19063_v51 = vld [vmem:[%s35226_s5] sm:$0xff] }
 0xf75   : > { %26578 = vmatprep.subr.bf16.mxu1 %v26577_v58 }
 0xf78   : > { %26580 = vmatpush3.bf16.msra.mxu1 %v26577_v58 }
 0xf79   : > { %26582 = vmatprep.subr.bf16.mxu1 %v26581_v33 }
 0xf7b   : > { %26082 = vmatmul.mubr.msk.f32.vlgmr.msra.gmra.mrb[64].mxu1 %vm17286_vm13, %v27820_v59 }
 0xf7c   : > { %26584 = vmatpush3.bf16.msra.mxu1 %v26581_v33  ;;  %26092 = vmatprep.mubr.msk.f32.mxu1 %vm17286_vm13, %v27821_v47 }
 0xf7d   : > { %26586 = vmatprep.subr.bf16.mxu1 %v26585_v45 }
 0xf80   : > { %26588 = vmatpush3.bf16.msra.mxu1 %v26585_v45 }
 0xf81   : > { %26590 = vmatprep.subr.bf16.mxu1 %v26589_v56 }
 0xf83   : > { %26093 = vmatmul.mubr.msk.f32.vlgmr.msra.gmra.mrb[64].mxu1 %vm17286_vm13, %v27822_v26 }
 0xf84   : > { %26592 = vmatpush3.bf16.msra.mxu1 %v26589_v56  ;;  %26103 = vmatprep.mubr.msk.f32.mxu1 %vm17286_vm13, %v27823_v50 }
 0xf85   : > { %26594 = vmatprep.subr.bf16.mxu1 %v26593_v62 }
 0xf88   : > { %26596 = vmatpush3.bf16.msra.mxu1 %v26593_v62 }
 0xf89   : > { %26598 = vmatprep.subr.bf16.mxu1 %v26597_v18 }
 0xf8b   : > { %26104 = vmatmul.mubr.msk.f32.vlgmr.msra.gmra.mrb[64].mxu1 %vm17286_vm13, %v27824_v53 }
 0xf8c   : > { %26600 = vmatpush3.bf16.msra.mxu1 %v26597_v18  ;;  %26114 = vmatprep.mubr.msk.f32.mxu1 %vm17286_vm13, %v27825_v60  ;;  %v19066_v60 = vld [vmem:[%s35226_s5 + $0x18] sm:$0xff] }
 0xf8d   : > { %26602 = vmatprep.subr.bf16.mxu1 %v26601_v5 }
 0xf90   : > { %26604 = vmatpush3.bf16.msra.mxu1 %v26601_v5  ;;  %v19065_v5 = vld [vmem:[%s35226_s5 + $0x10] sm:$0xff] }
 0xf91   : > { %26606 = vmatprep.subr.bf16.mxu1 %v26605_v44 }
 0xf93   : > { %26115 = vmatmul.mubr.msk.f32.vlgmr.msra.gmra.mrb[64].mxu1 %vm17286_vm13, %v27826_v38 }
 0xf94   : > { %26608 = vmatpush3.bf16.msra.mxu1 %v26605_v44  ;;  %26125 = vmatprep.mubr.msk.f32.mxu1 %vm17286_vm13, %v27827_v42 }
 0xf95   : > { %26610 = vmatprep.subr.bf16.mxu1 %v26609_v22 }
 0xf98   : > { %26612 = vmatpush3.bf16.msra.mxu1 %v26609_v22 }
 0xf99   : > { %26613 = vmatprep.subr.bf16.mxu1 %v27935_v2 }
 0xf9b   : > { %26126 = vmatmul.mubr.msk.f32.vlgmr.msra.gmra.mrb[64].mxu1 %vm17286_vm13, %v27828_v4  ;;  %v26623_v4 = vpack.c.bf16 %v19066_v60, %v19065_v5  ;;  %v22777_v5 = vld [vmem:[%s34358_s12 + $0x60] sm:$0xff]  ;;  %v22778_v60 = vld [vmem:[%s34358_s12 + $0x68] sm:$0xff] }
 0xf9c   : > { %26136 = vmatprep.mubr.msk.f32.mxu1 %vm27936_vm14, %v35217_v25  ;;  %26615 = vmatpush3.bf16.msra.mxu1 %v26614_v40  ;;  %v26626_v40 = vpack.c.bf16 %v22755_v29, %v22754_v35  ;;  %v22787_v35 = vld [vmem:[%s34358_s12 + $0xa0] sm:$0xff]  ;;  %v22788_v29 = vld [vmem:[%s34358_s12 + $0xa8] sm:$0xff] }
 0xf9d   : > { %26616 = vmatprep.subr.bf16.mxu1 %v27935_v2 }
 0xfa0   : > { %26618 = vmatpush3.bf16.msra.mxu1 %v26617_v7  ;;  %v22757_v7 = vld [vmem:[%s35226_s5 + $0x58] sm:$0xff] }
 0xfa1   : > { %26619 = vmatprep.subr.bf16.mxu1 %v27935_v2 }
0x106e   : > { %v26127_v34 = vpop.f32.mrb[64].mxu1 }
0x106f   : > { %v19016_v8 = vmul.f32 %v26127_v34, %v22746_v17  ;;  %v19000_v1 = vpop.f32.mrb[65].mxu1  ;;  %v22760_v34 = vld [vmem:[%s35226_s5 + $0x68] sm:$0xff] }
0x1070   : > { %v19015_v57 = vmul.f32 %v22746_v17, %v19000_v1  ;;  %v26629_v17 = vpack.c.bf16 %v22757_v7, %v22756_v12  ;;  %v22761_v1 = vld [vmem:[%s35226_s5 + $0x70] sm:$0xff]  ;;  %v22790_v7 = vld [vmem:[%s34358_s12 + $0xb8] sm:$0xff] }
0x1071   : > { %v19022_v20 = vadd.f32 %v22747_v43, %v19016_v8  ;;  %v22789_v12 = vld [vmem:[%s34358_s12 + $0xb0] sm:$0xff] }
0x1072   : > { %v19021_v48 = vadd.f32 %v22747_v43, %v19015_v57  ;;  %v22759_v43 = vld [vmem:[%s35226_s5 + $0x60] sm:$0xff]  ;;  %v22762_v57 = vld [vmem:[%s35226_s5 + $0x78] sm:$0xff]  ;;  %s21252_s5 = sshll.u32 %s621_s3, 4  ;;  %s34306_s5 = int_to_ptr.vmem [resolvable:$true] %s21252_s5 }
0x1073   : > { %v19024_v28 = vmax.f32 %v19022_v20, 0.0  ;;  %v26632_v8 = vpack.c.bf16 %v22760_v34, %v22759_v43  ;;  %v26635_v20 = vpack.c.bf16 %v22762_v57, %v22761_v1  ;;  %v22792_v34 = vld [vmem:[%s34358_s12 + $0xc0] sm:$0xff]  ;;  %v22794_v57 = vld [vmem:[%s34358_s12 + $0xd0] sm:$0xff]  ;;  %s27869_s26 = scalar_lea.vmem %s34306_s5, 16  ;;  %p27876_p0 = scmp.lt.s32.totalorder %s34306_s5, %s27874_s9 }
0x1074   : > { %v19023_v39 = vmax.f32 %v19021_v48, 0.0  ;;  %v22766_v48 = vld [vmem:[%s34358_s12 + $0x20] sm:$0xff]  ;;  %p27870_p11 = scmp.ne.s32.totalorder %s34306_s5, %s27869_s26  ;;  %p27877_p1 = scmp.lt.s32.totalorder %s27875_s7, %s27869_s26 }
0x1075   : > { %v19026_v63 = vadd.f32 %v19024_v28, %v33570_v15  ;;  %v26620_v15 = vpack.c.bf16 %v19064_v41, %v19063_v51  ;;  %v22767_v28 = vld [vmem:[%s34358_s12 + $0x28] sm:$0xff]  ;;  %v22815_v41 = vld [vmem:[%s34358_s12 + $0x140] sm:$0xff] }
0x1076   : > { %v19025_v19 = vadd.f32 %v19023_v39, %v33572_v0  ;;  %v22768_v39 = vld [vmem:[%s34358_s12 + $0x30] sm:$0xff]  ;;  %p27871_p12 = pnand %p27870_p11, %p28081_p5  ;;  %p27878_p2 = por %p27877_p1, %p27876_p0 }
0x1077   : > { %v19046_v11 = vcombine.high %v19026_v63, %v19026_v63  ;;  %v19053_v36 = vrot.slane %v19026_v63, %v35221_v27  ;;  %v26638_v63 = vpack.c.bf16 %v22767_v28, %v22766_v48 }
0x1078   : > { %v19029_v58 = vcombine.high %v19025_v19, %v19025_v19  ;;  %v19036_v49 = vrot.slane %v19025_v19, %v35221_v27  ;;  %v22769_v19 = vld [vmem:[%s34358_s12 + $0x38] sm:$0xff]  ;;  %p27872_p13 = pneg %p27871_p12 }
0x1079   : > { %v19060_v23 = vrot.slane %v19046_v11, %v35221_v27  ;;  %v19061_v55 = vcombine.high %v19053_v36, %v19053_v36  ;;  %v19083_v0 = vrot.slane %v19053_v36, %v31019_v24  ;;  %v19174_v33 = vrot.slane %v19053_v36, %v31021_v3  ;;  %v22816_v11 = vld [vmem:[%s34358_s12 + $0x148] sm:$0xff]  ;;  %v22817_v36 = vld [vmem:[%s34358_s12 + $0x150] sm:$0xff] }
0x107a   : > { %v19043_v13 = vrot.slane %v19029_v58, %v35221_v27  ;;  %v19044_v14 = vcombine.high %v19036_v49, %v19036_v49  ;;  %v19075_v59 = vrot.slane %v19036_v49, %v31019_v24  ;;  %v19166_v45 = vrot.slane %v19036_v49, %v31021_v3  ;;  %v22818_v49 = vld [vmem:[%s34358_s12 + $0x158] sm:$0xff]  ;;  %p27879_p3 = pnand %p27878_p2, %p27872_p13 }
0x107b   : > { %v19087_v47 = vrot.slane %v19061_v55, %v31019_v24  ;;  %v19062_v46 = vcombine.high %v19060_v23, %v19060_v23  ;;  %v19178_v61 = vrot.slane %v19061_v55, %v31021_v3  ;;  %v19270_v50 = vrot.slane %v19060_v23, %v31021_v3  ;;  %v22764_v55 = vld [vmem:[%s34354_s8] ss:$0 sm:$0xff] }
0x107c   : > { %v19045_v9 = vcombine.high %v19043_v13, %v19043_v13  ;;  %v19079_v56 = vrot.slane %v19044_v14, %v31019_v24  ;;  %v19170_v6 = vrot.slane %v19044_v14, %v31021_v3  ;;  %v19262_v26 = vrot.slane %v19043_v13, %v31021_v3 }
0x107d   : > { %v19359_v62 = vrot.slane %v19043_v13, %v31019_v24  ;;  %v19274_v10 = vrot.slane %v19062_v46, %v31021_v3  ;;  %v19367_v31 = vrot.slane %v19060_v23, %v31019_v24  ;;  %v19371_v44 = vrot.slane %v19062_v46, %v31019_v24  ;;  %v19480_v46 = vld [vmem:[%s34358_s12 + $0x8] sm:$0xff] }
0x107e   : > { %v19088_v37 = vsel %vm12194_vm2, %v19079_v56, %v19075_v59  ;;  %v19179_v18 = vsel %vm12194_vm2, %v19170_v6, %v19166_v45  ;;  %v19266_v54 = vrot.slane %v19045_v9, %v31021_v3  ;;  %v19363_v32 = vrot.slane %v19045_v9, %v31019_v24  ;;  %v19481_v6 = vld [vmem:[%s34358_s12 + $0x10] sm:$0xff] }
0x107f   : > { %v19089_v53 = vsel %vm12196_vm3, %v19083_v0, %v19088_v37  ;;  %v19180_v52 = vsel %vm12196_vm3, %v19174_v33, %v19179_v18  ;;  %v26641_v51 = vpack.c.bf16 %v22769_v19, %v22768_v39  ;;  %v26692_v58 = vpack.c.bf16 %v22816_v11, %v22815_v41  ;;  %v22765_v0 = vld [vmem:[%s34354_s8 + $0x1] ss:$0 sm:$0xff]  ;;  %v22774_v18 = vld [vmem:[%s34358_s12 + $0x50] sm:$0xff]  ;;  %v22800_v41 = vld [vmem:[%s34358_s12 + $0xf8] sm:$0xff] }
0x1080   : > { %v19090_v3 = vsel %vm12198_vm4, %v19087_v47, %v19089_v53  ;;  %v19181_v30 = vsel %vm12198_vm4, %v19178_v61, %v19180_v52  ;;  %v19275_v21 = vsel %vm12194_vm2, %v19266_v54, %v19262_v26  ;;  %v19372_v38 = vsel %vm12194_vm2, %v19363_v32, %v19359_v62  ;;  %v19479_v47 = vld [vmem:[%s34358_s12] sm:$0xff]  ;;  %v19482_v61 = vld [vmem:[%s34358_s12 + $0x18] sm:$0xff] }
0x1081   : > { %26137 = vmatmul.mubr.msk.f32.vlgmr.msra.gmra.mrb[66].mxu1 %vm17286_vm13, %v19090_v3  ;;  %v19276_v22 = vsel %vm12196_vm3, %v19270_v50, %v19275_v21  ;;  %v19373_v42 = vsel %vm12196_vm3, %v19367_v31, %v19372_v38  ;;  %26693 = vmatpush3.bf16.msra.mxu0 %v26692_v58  ;;  %v26695_v23 = vpack.c.bf16 %v22818_v49, %v22817_v36  ;;  %v22772_v62 = vld [vmem:[%s34358_s12 + $0x40] sm:$0xff]  ;;  %v22775_v54 = vld [vmem:[%s34358_s12 + $0x58] sm:$0xff]  ;;  %v22779_v31 = vld [vmem:[%s34358_s12 + $0x70] sm:$0xff] }
0x1082   : > { %26621 = vmatpush3.bf16.msra.mxu1 %v26620_v15  ;;  %26147 = vmatprep.mubr.msk.f32.mxu1 %vm27936_vm14, %v35217_v25  ;;  %v19277_v24 = vsel %vm12198_vm4, %v19274_v10, %v19276_v22  ;;  %v19374_v16 = vsel %vm12198_vm4, %v19371_v44, %v19373_v42  ;;  %v26644_v56 = vpack.c.bf16 %v19480_v46, %v19479_v47  ;;  %v22773_v10 = vld [vmem:[%s34358_s12 + $0x48] sm:$0xff]  ;;  %v22780_v44 = vld [vmem:[%s34358_s12 + $0x78] sm:$0xff]  ;;  %v22782_v21 = vld [vmem:[%s34358_s12 + $0x80] sm:$0xff] }
0x1083   : > { %26622 = vmatprep.subr.bf16.mxu1 %v27935_v2  ;;  %26694 = vmatprep.subr.bf16.mxu0 %v27935_v2  ;;  %v26647_v26 = vpack.c.bf16 %v19482_v61, %v19481_v6  ;;  %v26650_v37 = vpack.c.bf16 %v22773_v10, %v22772_v62  ;;  %v26653_v32 = vpack.c.bf16 %v22775_v54, %v22774_v18  ;;  %v22783_v38 = vld [vmem:[%s34358_s12 + $0x88] sm:$0xff]  ;;  %v22784_v42 = vld [vmem:[%s34358_s12 + $0x90] sm:$0xff]  ;;  %v22797_v39 = vld [vmem:[%s34358_s12 + $0xe0] sm:$0xff] }
0x1084   : > { %v26656_v52 = vpack.c.bf16 %v22778_v60, %v22777_v5  ;;  %v26659_v3 = vpack.c.bf16 %v22780_v44, %v22779_v31  ;;  %v26662_v22 = vpack.c.bf16 %v22783_v38, %v22782_v21  ;;  %v22802_v58 = vld [vmem:[%s34358_s12 + $0x100] sm:$0xff]  ;;  %v22803_v49 = vld [vmem:[%s34358_s12 + $0x108] sm:$0xff]  ;;  %v22823_v60 = vld [vmem:[%s34358_s12 + $0x170] sm:$0xff] }
0x1085   : > { %26696 = vmatpush3.bf16.msra.mxu0 %v26695_v23  ;;  %v26686_v23 = vpack.c.bf16 %v22803_v49, %v22802_v58  ;;  %v22812_v62 = vld [vmem:[%s34358_s12 + $0x128] sm:$0xff]  ;;  %v22821_v54 = vld [vmem:[%s34358_s12 + $0x160] sm:$0xff]  ;;  %v22828_v38 = vld [vmem:[%s34358_s12 + $0x190] sm:$0xff] }
0x1086   : > { %26624 = vmatpush3.bf16.msra.mxu1 %v26623_v4  ;;  %26697 = vmatprep.subr.bf16.mxu0 %v27935_v2  ;;  %v22785_v4 = vld [vmem:[%s34358_s12 + $0x98] sm:$0xff]  ;;  %v22848_v49 = vld [vmem:[%s34358_s12 + $0x210] sm:$0xff] }
0x1087   : > { %26625 = vmatprep.subr.bf16.mxu1 %v27935_v2 }
0x1089   : > { %26148 = vmatmul.mubr.msk.f32.vlgmr.msra.gmra.mrb[66].mxu1 %vm17286_vm13, %v19181_v30 }
0x108a   : > { %26627 = vmatpush3.bf16.msra.mxu1 %v26626_v40  ;;  %26158 = vmatprep.mubr.msk.f32.mxu1 %vm27936_vm14, %v35217_v25  ;;  %v26668_v40 = vpack.c.bf16 %v22788_v29, %v22787_v35  ;;  %v22833_v29 = vld [vmem:[%s34358_s12 + $0x1b0] sm:$0xff] }
0x108b   : > { %26628 = vmatprep.subr.bf16.mxu1 %v27935_v2 }
0x108e   : > { %26630 = vmatpush3.bf16.msra.mxu1 %v26629_v17  ;;  %v26671_v17 = vpack.c.bf16 %v22790_v7, %v22789_v12 }
0x108f   : > { %26631 = vmatprep.subr.bf16.mxu1 %v27935_v2 }
0x1091   : > { %26159 = vmatmul.mubr.msk.f32.vlgmr.msra.gmra.mrb[66].mxu1 %vm17286_vm13, %v19277_v24  ;;  %v26665_v24 = vpack.c.bf16 %v22785_v4, %v22784_v42 }
0x1092   : > { %26633 = vmatpush3.bf16.msra.mxu1 %v26632_v8  ;;  %26169 = vmatprep.mubr.msk.f32.mxu1 %vm27936_vm14, %v35217_v25  ;;  %v22793_v8 = vld [vmem:[%s34358_s12 + $0xc8] sm:$0xff] }
0x1093   : > { %26634 = vmatprep.subr.bf16.mxu1 %v27935_v2  ;;  %v26674_v1 = vpack.c.bf16 %v22793_v8, %v22792_v34  ;;  %v22838_v8 = vld [vmem:[%s34358_s12 + $0x1d0] sm:$0xff] }
0x1096   : > { %26636 = vmatpush3.bf16.msra.mxu1 %v26635_v20  ;;  %v22795_v20 = vld [vmem:[%s34358_s12 + $0xd8] sm:$0xff] }
0x1097   : > { %26637 = vmatprep.subr.bf16.mxu1 %v27935_v2  ;;  %v26677_v48 = vpack.c.bf16 %v22795_v20, %v22794_v57 }
0x1099   : > { %26170 = vmatmul.mubr.msk.f32.vlgmr.msra.gmra.mrb[66].mxu1 %vm17286_vm13, %v19374_v16 }
0x109a   : > { %26180 = vmatprep.mubr.msk.f32.mxu1 %vm27936_vm14, %v35217_v25  ;;  %26639 = vmatpush3.bf16.msra.mxu1 %v26638_v63  ;;  %v22798_v63 = vld [vmem:[%s34358_s12 + $0xe8] sm:$0xff] }
0x109b   : > { %26640 = vmatprep.subr.bf16.mxu1 %v27935_v2  ;;  %v26680_v19 = vpack.c.bf16 %v22798_v63, %v22797_v39  ;;  %v22843_v63 = vld [vmem:[%s34358_s12 + $0x1f0] sm:$0xff] }
0x109e   : > { %26642 = vmatpush3.bf16.msra.mxu1 %v26641_v51  ;;  %v22799_v51 = vld [vmem:[%s34358_s12 + $0xf0] sm:$0xff] }
0x109f   : > { %26643 = vmatprep.subr.bf16.mxu1 %v27935_v2  ;;  %v26683_v11 = vpack.c.bf16 %v22800_v41, %v22799_v51 }
0x116c   : > { %v19443_v15 = vpop.f32.mrb[66].mxu1 }
0x116d   : > { %v19453_v33 = vmul.f32 %v22764_v55, %v19443_v15  ;;  %v26171_v13 = vpop.f32.mrb[67].mxu1  ;;  %v22804_v55 = vld [vmem:[%s34358_s12 + $0x110] sm:$0xff]  ;;  %v22805_v15 = vld [vmem:[%s34358_s12 + $0x118] sm:$0xff] }
0x116e   : > { %v22807_v13 = vld [vmem:[%s34362_s16] ss:$0 sm:$0xff] }
0x116f   : > { %v33976_v14 = vadd.f32 %v22765_v0, %v19453_v33  ;;  %v26689_v0 = vpack.c.bf16 %v22805_v15, %v22804_v55 }
0x1171   : > { %v19467_v59 = vrot.slane %v33976_v14, %v35221_v27 }
0x1173   : > { %v19468_v45 = vcombine.high %v19467_v59, %v19467_v59  ;;  %19473 = vst.msk [vmem:[#allocation5 + $0x5] sm:$0x3] %vm19472_vm15, %v19467_v59  ;;  %v22808_v59 = vld [vmem:[%s34362_s16 + $0x1] ss:$0 sm:$0xff] }
0x1175   : > { %19474 = vst.msk [vmem:[#allocation5 + $0x9] sm:$0x3] %vm19472_vm15, %v19468_v45 }
0x117a   : > { %v27851_v9 = vld.sshfl [vmem:[#allocation5 + $0x1] sm:$0xf pattern:$0x76325410] }
0x117b   : > { %26181 = vmatmul.mubr.msk.f32.vlgmr.msra.gmra.mrb[68].mxu1 %vm17286_vm13, %v27851_v9  ;;  %v27852_v50 = vld.sshfl [vmem:[#allocation5] sm:$0xf pattern:$0x76325410] }
0x117c   : > { %26645 = vmatpush3.bf16.msra.mxu1 %v26644_v56  ;;  %26191 = vmatprep.mubr.msk.f32.mxu1 %vm27936_vm14, %v35217_v25  ;;  %v27853_v53 = vld.sshfl [vmem:[#allocation5 + $0x2] sm:$0xf pattern:$0x76325410] }
0x117d   : > { %26646 = vmatprep.subr.bf16.mxu1 %v27935_v2  ;;  %v27854_v30 = vld.sshfl [vmem:[#allocation5 + $0x4] sm:$0xf pattern:$0x76325410] }
0x117e   : > { %v27855_v16 = vld.sshfl [vmem:[#allocation5 + $0x5] sm:$0xf pattern:$0x76325410] }
0x117f   : > { %v27856_v43 = vld.sshfl [vmem:[#allocation5 + $0x6] sm:$0xf pattern:$0x76325410] }
0x1180   : > { %26648 = vmatpush3.bf16.msra.mxu1 %v26647_v26  ;;  %v27857_v28 = vld.sshfl [vmem:[#allocation5 + $0x8] sm:$0xf pattern:$0x76325410]  ;;  %v22811_v26 = vld [vmem:[%s34358_s12 + $0x120] sm:$0xff] }
0x1181   : > { %26649 = vmatprep.subr.bf16.mxu1 %v27935_v2  ;;  %v27858_v36 = vld.sshfl [vmem:[#allocation5 + $0x9] sm:$0xf pattern:$0x76325410]  ;;  %v26698_v10 = vpack.c.bf16 %v22812_v62, %v22811_v26 }
0x1182   : > { %v27859_v33 = vld.sshfl [vmem:[#allocation5 + $0xa] sm:$0xf pattern:$0x76325410] }
0x1183   : > { %26192 = vmatmul.mubr.msk.f32.vlgmr.msra.gmra.mrb[68].mxu1 %vm17286_vm13, %v27852_v50 }
0x1184   : > { %26651 = vmatpush3.bf16.msra.mxu1 %v26650_v37  ;;  %26202 = vmatprep.mubr.msk.f32.mxu1 %vm27936_vm14, %v35217_v25  ;;  %v22813_v37 = vld [vmem:[%s34358_s12 + $0x130] sm:$0xff] }
0x1185   : > { %26652 = vmatprep.subr.bf16.mxu1 %v27935_v2 }
0x1188   : > { %26654 = vmatpush3.bf16.msra.mxu1 %v26653_v32 }
0x1189   : > { %26655 = vmatprep.subr.bf16.mxu1 %v27935_v2 }
0x118b   : > { %26203 = vmatmul.mubr.msk.f32.vlgmr.msra.gmra.mrb[68].mxu1 %vm17286_vm13, %v27853_v53  ;;  %v22822_v53 = vld [vmem:[%s34358_s12 + $0x168] sm:$0xff] }
0x118c   : > { %26657 = vmatpush3.bf16.msra.mxu1 %v26656_v52  ;;  %26213 = vmatprep.mubr.msk.f32.mxu1 %vm27936_vm14, %v35217_v25  ;;  %v26704_v5 = vpack.c.bf16 %v22822_v53, %v22821_v54  ;;  %v22824_v52 = vld [vmem:[%s34358_s12 + $0x178] sm:$0xff] }
0x118d   : > { %26658 = vmatprep.subr.bf16.mxu1 %v27935_v2  ;;  %v26707_v31 = vpack.c.bf16 %v22824_v52, %v22823_v60 }
0x1190   : > { %26660 = vmatpush3.bf16.msra.mxu1 %v26659_v3  ;;  %v22826_v3 = vld [vmem:[%s34358_s12 + $0x180] sm:$0xff] }
0x1191   : > { %26661 = vmatprep.subr.bf16.mxu1 %v27935_v2 }
0x1193   : > { %26214 = vmatmul.mubr.msk.f32.vlgmr.msra.gmra.mrb[68].mxu1 %vm17286_vm13, %v27854_v30  ;;  %v22827_v30 = vld [vmem:[%s34358_s12 + $0x188] sm:$0xff] }
0x1194   : > { %26663 = vmatpush3.bf16.msra.mxu1 %v26662_v22  ;;  %26224 = vmatprep.mubr.msk.f32.mxu1 %vm27936_vm14, %v35217_v25  ;;  %v26710_v21 = vpack.c.bf16 %v22827_v30, %v22826_v3  ;;  %v22829_v22 = vld [vmem:[%s34358_s12 + $0x198] sm:$0xff] }
0x1195   : > { %26664 = vmatprep.subr.bf16.mxu1 %v27935_v2  ;;  %v26713_v42 = vpack.c.bf16 %v22829_v22, %v22828_v38  ;;  %v21161_v38 = vld [vmem:[%s34364_s18 + $0x10] sm:$0xff] }
0x1198   : > { %26666 = vmatpush3.bf16.msra.mxu1 %v26665_v24  ;;  %v22831_v24 = vld [vmem:[%s34358_s12 + $0x1a0] sm:$0xff] }
0x1199   : > { %26667 = vmatprep.subr.bf16.mxu1 %v27935_v2 }
0x119b   : > { %26225 = vmatmul.mubr.msk.f32.vlgmr.msra.gmra.mrb[68].mxu1 %vm17286_vm13, %v27855_v16  ;;  %v22832_v16 = vld [vmem:[%s34358_s12 + $0x1a8] sm:$0xff] }
0x119c   : > { %26669 = vmatpush3.bf16.msra.mxu1 %v26668_v40  ;;  %26235 = vmatprep.mubr.msk.f32.mxu1 %vm27936_vm14, %v35217_v25  ;;  %v26716_v35 = vpack.c.bf16 %v22832_v16, %v22831_v24  ;;  %v22834_v40 = vld [vmem:[%s34358_s12 + $0x1b8] sm:$0xff] }
0x119d   : > { %26670 = vmatprep.subr.bf16.mxu1 %v27935_v2  ;;  %v26719_v12 = vpack.c.bf16 %v22834_v40, %v22833_v29  ;;  %v21155_v40 = vld [vmem:[%s34363_s17] sm:$0x1] }
0x11a0   : > { %26672 = vmatpush3.bf16.msra.mxu1 %v26671_v17  ;;  %v22836_v17 = vld [vmem:[%s34358_s12 + $0x1c0] sm:$0xff] }
0x11a1   : > { %26673 = vmatprep.subr.bf16.mxu1 %v27935_v2 }
0x11a3   : > { %26236 = vmatmul.mubr.msk.f32.vlgmr.msra.gmra.mrb[68].mxu1 %vm17286_vm13, %v27856_v43  ;;  %v22837_v43 = vld [vmem:[%s34358_s12 + $0x1c8] sm:$0xff] }
0x11a4   : > { %26675 = vmatpush3.bf16.msra.mxu1 %v26674_v1  ;;  %26246 = vmatprep.mubr.msk.f32.mxu1 %vm27936_vm14, %v35217_v25  ;;  %v26722_v34 = vpack.c.bf16 %v22837_v43, %v22836_v17  ;;  %v22839_v1 = vld [vmem:[%s34358_s12 + $0x1d8] sm:$0xff] }
0x11a5   : > { %26676 = vmatprep.subr.bf16.mxu1 %v27935_v2  ;;  %v26725_v57 = vpack.c.bf16 %v22839_v1, %v22838_v8 }
0x11a8   : > { %26678 = vmatpush3.bf16.msra.mxu1 %v26677_v48  ;;  %v22841_v48 = vld [vmem:[%s34358_s12 + $0x1e0] sm:$0xff] }
0x11a9   : > { %26679 = vmatprep.subr.bf16.mxu1 %v27935_v2 }
0x11ab   : > { %26247 = vmatmul.mubr.msk.f32.vlgmr.msra.gmra.mrb[68].mxu1 %vm17286_vm13, %v27857_v28  ;;  %v22842_v28 = vld [vmem:[%s34358_s12 + $0x1e8] sm:$0xff] }
0x11ac   : > { %26681 = vmatpush3.bf16.msra.mxu1 %v26680_v19  ;;  %26257 = vmatprep.mubr.msk.f32.mxu1 %vm27936_vm14, %v35217_v25  ;;  %v26728_v39 = vpack.c.bf16 %v22842_v28, %v22841_v48  ;;  %v22844_v19 = vld [vmem:[%s34358_s12 + $0x1f8] sm:$0xff] }
0x11ad   : > { %26682 = vmatprep.subr.bf16.mxu1 %v27935_v2  ;;  %v26731_v51 = vpack.c.bf16 %v22844_v19, %v22843_v63 }
0x11b0   : > { %26684 = vmatpush3.bf16.msra.mxu1 %v26683_v11  ;;  %v22846_v11 = vld [vmem:[%s34358_s12 + $0x200] sm:$0xff] }
0x11b1   : > { %26685 = vmatprep.subr.bf16.mxu1 %v27935_v2 }
0x11b3   : > { %26258 = vmatmul.mubr.msk.f32.vlgmr.msra.gmra.mrb[68].mxu1 %vm17286_vm13, %v27858_v36  ;;  %v22847_v36 = vld [vmem:[%s34358_s12 + $0x208] sm:$0xff] }
0x11b4   : > { %26687 = vmatpush3.bf16.msra.mxu1 %v26686_v23  ;;  %26268 = vmatprep.mubr.msk.f32.mxu1 %vm27936_vm14, %v35217_v25  ;;  %v26734_v58 = vpack.c.bf16 %v22847_v36, %v22846_v11  ;;  %v22849_v23 = vld [vmem:[%s34358_s12 + $0x218] sm:$0xff] }
0x11b5   : > { %26688 = vmatprep.subr.bf16.mxu1 %v27935_v2  ;;  %v26737_v55 = vpack.c.bf16 %v22849_v23, %v22848_v49 }
0x11b8   : > { %26690 = vmatpush3.bf16.msra.mxu1 %v26689_v0  ;;  %v22851_v0 = vld [vmem:[%s34358_s12 + $0x220] sm:$0xff] }
0x11b9   : > { %26745 = vmatprep.subr.bf16.mxu1 %v27935_v2 }
0x11bb   : > { %26269 = vmatmul.mubr.msk.f32.vlgmr.msra.gmra.mrb[68].mxu1 %vm17286_vm13, %v27859_v33  ;;  %v22852_v33 = vld [vmem:[%s34358_s12 + $0x228] sm:$0xff] }
0x11bc   : > { %26378 = vmatprep.mubr.msk.f32.mxu1 %vm27936_vm14, %v35217_v25 }
0x128e   : > { %v20280_v45 = vpop.f32.mrb[68].mxu1 }
0x128f   : > { %v20289_v47 = vmul.f32 %v22807_v13, %v20280_v45  ;;  %v26270_v46 = vpop.f32.mrb[69].mxu1  ;;  %v26740_v13 = vpack.c.bf16 %v22852_v33, %v22851_v0  ;;  %v22854_v45 = vld [vmem:[%s34358_s12 + $0x238] sm:$0xff] }
0x1291   : > { %v20294_v9 = vadd.f32 %v22808_v59, %v20289_v47  ;;  %v22853_v59 = vld [vmem:[%s34358_s12 + $0x230] sm:$0xff] }
0x1292   : > { %v26743_v47 = vpack.c.bf16 %v22854_v45, %v22853_v59 }
0x1293   : > { %v20295_v56 = vmax.f32 %v20294_v9, 0.0  ;;  %v22856_v9 = vld [vmem:[%s34362_s16 + $0x2] ss:$0 sm:$0xff] }
0x1295   : > { %v20303_v6 = vrot.slane %v20295_v56, %v35221_v27  ;;  %v22814_v27 = vld [vmem:[%s34358_s12 + $0x138] sm:$0xff]  ;;  %v22857_v56 = vld [vmem:[%s34362_s16 + $0x3] ss:$0 sm:$0xff] }
0x1296   : > { %v26701_v18 = vpack.c.bf16 %v22814_v27, %v22813_v37 }
0x1297   : > { %v20304_v61 = vcombine.high %v20303_v6, %v20303_v6  ;;  %20307 = vst.msk [vmem:[#allocation5 + $0x5] sm:$0x3] %vm19472_vm15, %v20303_v6 }
0x1299   : > { %20308 = vst.msk [vmem:[#allocation5 + $0x9] sm:$0x3] %vm19472_vm15, %v20304_v61 }
0x129e   : > { %v27860_v50 = vld.sshfl [vmem:[#allocation5 + $0x1] sm:$0xf pattern:$0x76325410] }
0x129f   : > { %26280 = vmatmul.mubr.msk.f32.vlgmr.msra.gmra.mrb[64].mxu0 %vm17286_vm13, %v27860_v50  ;;  %v27861_v32 = vld.sshfl [vmem:[#allocation5] sm:$0xf pattern:$0x76325410] }
0x12a0   : > { %26699 = vmatpush3.bf16.msra.mxu0 %v26698_v10  ;;  %26290 = vmatprep.mubr.msk.f32.mxu0 %vm27936_vm14, %v35217_v25  ;;  %v27862_v44 = vld.sshfl [vmem:[#allocation5 + $0x2] sm:$0xf pattern:$0x76325410] }
0x12a1   : > { %26700 = vmatprep.subr.bf16.mxu0 %v27935_v2  ;;  %v27863_v4 = vld.sshfl [vmem:[#allocation5 + $0x4] sm:$0xf pattern:$0x76325410] }
0x12a2   : > { %v27864_v7 = vld.sshfl [vmem:[#allocation5 + $0x5] sm:$0xf pattern:$0x76325410] }
0x12a3   : > { %v27865_v20 = vld.sshfl [vmem:[#allocation5 + $0x6] sm:$0xf pattern:$0x76325410] }
0x12a4   : > { %26702 = vmatpush3.bf16.msra.mxu0 %v26701_v18  ;;  %v27866_v41 = vld.sshfl [vmem:[#allocation5 + $0x8] sm:$0xf pattern:$0x76325410] }
0x12a5   : > { %26703 = vmatprep.subr.bf16.mxu0 %v27935_v2  ;;  %v27867_v15 = vld.sshfl [vmem:[#allocation5 + $0x9] sm:$0xf pattern:$0x76325410] }
0x12a6   : > { %v27868_v46 = vld.sshfl [vmem:[#allocation5 + $0xa] sm:$0xf pattern:$0x76325410] }
0x12a7   : > { %26291 = vmatmul.mubr.msk.f32.vlgmr.msra.gmra.mrb[64].mxu0 %vm17286_vm13, %v27861_v32 }
0x12a8   : > { %26705 = vmatpush3.bf16.msra.mxu0 %v26704_v5  ;;  %26301 = vmatprep.mubr.msk.f32.mxu0 %vm27936_vm14, %v35217_v25 }
0x12a9   : > { %26706 = vmatprep.subr.bf16.mxu0 %v27935_v2 }
0x12ac   : > { %26708 = vmatpush3.bf16.msra.mxu0 %v26707_v31 }
0x12ad   : > { %26709 = vmatprep.subr.bf16.mxu0 %v27935_v2 }
0x12af   : > { %26302 = vmatmul.mubr.msk.f32.vlgmr.msra.gmra.mrb[64].mxu0 %vm17286_vm13, %v27862_v44 }
0x12b0   : > { %26711 = vmatpush3.bf16.msra.mxu0 %v26710_v21  ;;  %26312 = vmatprep.mubr.msk.f32.mxu0 %vm27936_vm14, %v35217_v25  ;;  %v21160_v21 = vld [vmem:[%s34364_s18 + $0x8] sm:$0xff] }
0x12b1   : > { %26712 = vmatprep.subr.bf16.mxu0 %v27935_v2 }
0x12b4   : > { %26714 = vmatpush3.bf16.msra.mxu0 %v26713_v42  ;;  %v21162_v42 = vld [vmem:[%s34364_s18 + $0x18] sm:$0xff] }
0x12b5   : > { %26715 = vmatprep.subr.bf16.mxu0 %v27935_v2 }
0x12b7   : > { %26313 = vmatmul.mubr.msk.f32.vlgmr.msra.gmra.mrb[64].mxu0 %vm17286_vm13, %v27863_v4  ;;  %v26749_v4 = vpack.c.bf16 %v21162_v42, %v21161_v38 }
0x12b8   : > { %26717 = vmatpush3.bf16.msra.mxu0 %v26716_v35  ;;  %26323 = vmatprep.mubr.msk.f32.mxu0 %vm27936_vm14, %v35217_v25 }
0x12b9   : > { %26718 = vmatprep.subr.bf16.mxu0 %v27935_v2 }
0x12bc   : > { %26720 = vmatpush3.bf16.msra.mxu0 %v26719_v12 }
0x12bd   : > { %26721 = vmatprep.subr.bf16.mxu0 %v27935_v2 }
0x12bf   : > { %26324 = vmatmul.mubr.msk.f32.vlgmr.msra.gmra.mrb[64].mxu0 %vm17286_vm13, %v27864_v7  ;;  %v21157_v7 = vld [vmem:[%s34363_s17 + $0x1] sm:$0x1] }
0x12c0   : > { %26723 = vmatpush3.bf16.msra.mxu0 %v26722_v34  ;;  %26334 = vmatprep.mubr.msk.f32.mxu0 %vm27936_vm14, %v35217_v25 }
0x12c1   : > { %26724 = vmatprep.subr.bf16.mxu0 %v27935_v2 }
0x12c4   : > { %26726 = vmatpush3.bf16.msra.mxu0 %v26725_v57 }
0x12c5   : > { %26727 = vmatprep.subr.bf16.mxu0 %v27935_v2 }
0x12c7   : > { %26335 = vmatmul.mubr.msk.f32.vlgmr.msra.gmra.mrb[64].mxu0 %vm17286_vm13, %v27865_v20 }
0x12c8   : > { %26729 = vmatpush3.bf16.msra.mxu0 %v26728_v39  ;;  %26345 = vmatprep.mubr.msk.f32.mxu0 %vm27936_vm14, %v35217_v25 }
0x12c9   : > { %26730 = vmatprep.subr.bf16.mxu0 %v27935_v2 }
0x12cc   : > { %26732 = vmatpush3.bf16.msra.mxu0 %v26731_v51 }
0x12cd   : > { %26733 = vmatprep.subr.bf16.mxu0 %v27935_v2 }
0x12cf   : > { %26346 = vmatmul.mubr.msk.f32.vlgmr.msra.gmra.mrb[64].mxu0 %vm17286_vm13, %v27866_v41 }
0x12d0   : > { %26735 = vmatpush3.bf16.msra.mxu0 %v26734_v58  ;;  %26356 = vmatprep.mubr.msk.f32.mxu0 %vm27936_vm14, %v35217_v25 }
0x12d1   : > { %26736 = vmatprep.subr.bf16.mxu0 %v27935_v2 }
0x12d4   : > { %26738 = vmatpush3.bf16.msra.mxu0 %v26737_v55 }
0x12d5   : > { %26739 = vmatprep.subr.bf16.mxu0 %v27935_v2 }
0x12d7   : > { %26357 = vmatmul.mubr.msk.f32.vlgmr.msra.gmra.mrb[64].mxu0 %vm17286_vm13, %v27867_v15 }
0x12d8   : > { %26741 = vmatpush3.bf16.msra.mxu0 %v26740_v13  ;;  %26367 = vmatprep.mubr.msk.f32.mxu0 %vm27936_vm14, %v35217_v25 }
0x12d9   : > { %26742 = vmatprep.subr.bf16.mxu0 %v27935_v2 }
0x12dc   : > { %26744 = vmatpush3.bf16.msra.mxu0 %v26743_v47 }
0x12df   : > { %26368 = vmatmul.mubr.msk.f32.vlgmr.msra.gmra.mrb[64].mxu0 %vm17286_vm13, %v27868_v46 }
0x13b2   : > { %v21115_v6 = vpop.f32.mrb[64].mxu0 }
0x13b3   : > { %v21124_v61 = vmul.f32 %v22856_v9, %v21115_v6  ;;  %v26369_v26 = vpop.f32.mrb[65].mxu0 }
0x13b5   : > { %v21129_v62 = vadd.f32 %v22857_v56, %v21124_v61 }
0x13b7   : > { %v21130_v50 = vmax.f32 %v21129_v62, 0.0 }
0x13b9   : > { %v21131_v25 = vadd.f32 %v21130_v50, %v33976_v14  ;;  %v21159_v14 = vld [vmem:[%s34364_s18] sm:$0xff] }
0x13ba   : > { %v26746_v22 = vpack.c.bf16 %v21160_v21, %v21159_v14 }
0x13bb   : > { %v21132_v10 = vsel %vm712_vm12, %v21131_v25, 0.0 }
0x13bc   : > { %v21133_v37 = vrot.slane %v21132_v10, 4  ;;  %26747 = vmatpush3.bf16.msra.mxu1 %v26746_v22 }
0x13bd   : > { %26748 = vmatprep.subr.bf16.mxu1 %v27935_v2  ;;  %v21163_v2 = vld [vmem:[%s34365_s19] sm:$0x1] }
0x13be   : > { %v21134_v27 = vadd.f32 %v21133_v37, %v21132_v10 }
0x13c0   : > { %v21135_v18 = vrot.slane %v21134_v27, 2  ;;  %26750 = vmatpush3.bf16.msra.mxu1 %v26749_v4 }
0x13c2   : > { %v21136_v54 = vadd.f32 %v21135_v18, %v21134_v27 }
0x13c4   : > { %v21137_v32 = vrot.slane %v21136_v54, 1 }
0x13c6   : > { %v21138_v53 = vadd.f32 %v21137_v32, %v21136_v54 }
0x13c8   : > { %v21140_v5 = vmul.f32 0.25, %v21138_v53 }
0x13ca   : > { %v21141_v60 = vsel %vm17286_vm13, %v21140_v5, 0.0 }
0x13cb   : > { %21142 = vadd.xlane.f32.xlu0 %v21141_v60 }
0x1458   : > { %v21143_v52 = vpop.xlane.xlu0 %21142 }
0x1459   : > { %v21145_v31 = vmul.f32 0.03125, %v21143_v52 }
0x145b   : > { %v21146_v44 = vsub.f32 %v21140_v5, %v21145_v31 }
0x145d   : > { %v21147_v3 = vmul.f32 %v21146_v44, %v21146_v44 }
0x145f   : > { %v21148_v30 = vsel %vm17286_vm13, %v21147_v3, 0.0 }
0x1460   : > { %21149 = vadd.xlane.f32.xlu0 %v21148_v30 }
0x14ed   : > { %v21150_v24 = vpop.xlane.xlu0 %21149 }
0x14ee   : > { %v21151_v16 = vmul.f32 0.03125, %v21150_v24 }
0x14f0   : > { %v21152_v35 = vadd.f32 1e-05, %v21151_v16 }
0x14f2   : > { %27847 = vrsqrt.f32 %v21152_v35 }
0x14fc   : > { %v27848_v29 = vpop.eup %27847 }
0x14fd   : > { %v21154_v12 = vmul.f32 %v27848_v29, %v21146_v44 }
0x14ff   : > { %v21156_v17 = vmul.f32 %v21155_v40, %v21154_v12 }
0x1501   : > { %v21158_v43 = vadd.f32 %v21157_v7, %v21156_v17 }
0x1503   : > { %26379 = vmatmul.mubr.msk.f32.vlgmr.msra.gmra.mrb[70].mxu1 %vm17286_vm13, %v21158_v43 }
0x15d6   : > { %v21233_v34 = vpop.f32.mrb[70].mxu1 }
0x15d7   : > { %v21234_v8 = vadd.f32 %v21233_v34, %v21163_v2  ;;  %v26380_v1 = vpop.f32.mrb[71].mxu1 }
0x15d9   : > { %21238 = vst.msk [vmem:[%s621_s3] sm:$0x1] %vm21237_vm0, %v21234_v8 }
0x15da   : > { %27882 = shalt.err (!%p27879_p3)
}
0x15db   : > { %s27883_s28 = scalar_lea.hbm %s34304_s23, 16  ;;  %s27887_s25 = scalar_lea.hbm %s34366_s20, 32 }
0x15dc   : > { %p27884_p4 = scmp.ne.s32.totalorder %s34304_s23, %s27883_s28  ;;  %p27888_p9 = scmp.lt.u32.totalorder %s34304_s23, %s34366_s20 }
0x15dd   : > { %p27889_p10 = scmp.lt.u32.totalorder %s27887_s25, %s27883_s28  ;;  %p27891_p12 = scmp.lt.u32.totalorder %s27883_s28, %s34304_s23 }
0x15de   : > { %p27885_p7 = pnand %p27884_p4, %p28081_p5 }
0x15df   : > { %p27890_p11 = por %p27889_p10, %p27888_p9 }
0x15e0   : > { %p27886_p8 = pneg %p27885_p7 }
0x15e1   : > { %p27892_p13 = por %p27891_p12, %p27890_p11 }
0x15e3   : > { %p27893_p0 = pnand %p27892_p13, %p27886_p8 }
0x15e5   : > { %27896 = shalt.err (!%p27893_p0)
}
0x15e6   : > { %27750 = dma.vmem_to_hbm [thread:$0]  (%p28081_p5), %s34306_s5, 16, %s34304_s23, %s21240_s6  }
0x15e7 PF: > { %p27756_p1 = scmp.ge.s32.totalorder %s27931_s24, 2  ;;  %s21264_s26 = sand.u32 1, %s27919_s1  }
0x15e8   : > { %s21265_s9 = scalar_lea.sflag [#allocation7], %s21264_s26 }
0x15e9   : > { %p27753_p2 = pnand %p27756_p1, %p28085_p6 }
0x15eb   : > { %27914 = dma.done.wait (!%p27753_p2), %s21265_s9, 16  }
0x15ec   : > { %27916 = vsyncadd (!%p27753_p2), %s21265_s9, 4294967280  ;;  %s35228_s24 = sld [smem:[#allocation10_spill]]  ;;  %s35229_s28 = sld [smem:[#allocation9_spill]] }
0x15ed   : > { %s35230_s23 = sld [smem:[#allocation11_spill]]  ;;  %s35231_s1 = smov %s27923_s22 }
0x15f2   : > { %p30_p3 = scmp.ge.s32.totalorder %s35228_s24, 4   ;;  %s35232_s22 = smov %s35229_s28 }
0x15f4   :  { %32 = sbr.rel (!%p30_p3) target bundleno = 13 (0xd), region = 234 }
0x15fb   :  { %21269 = vsyncpa [#allocation7], 1 }
0x15fc   :  { %21271 = vsyncpa [#allocation7 + $0x1], 1 }

</bundles_post_ra>
